<compile_context>
chip_gen: v7x
topology: tpu7x:2x2x1
jax: 0.10.0
libtpu: 0.0.40
codegen_flags: <defaults>
</compile_context>

<pallas_src>
import numpy as np
import jax
import jax.numpy as jnp
from jax.experimental import pallas as pl
from jax.experimental.pallas import tpu as pltpu

BN_EPS = 1e-3  # YOLOX BaseConv uses nn.BatchNorm2d(..., eps=1e-3)


# --------------------------- small config helpers ----------------------------
_VMEM_LIMIT = None


def _vmem_limit():
    """Generation-aware VMEM limit: leave headroom on v7x, go higher on v5e/v6e."""
    global _VMEM_LIMIT
    if _VMEM_LIMIT is None:
        limit = 64 << 20
        try:
            cap = getattr(pltpu.get_tpu_info(), "vmem_capacity_bytes", None)
            if cap:
                limit = int(max(32 << 20, min(cap - (16 << 20), 100 << 20)))
        except Exception:
            pass
        _VMEM_LIMIT = limit
    return _VMEM_LIMIT


_BUFFERED_OK = None


def _probe_buffered_specs():
    """Check whether this jax build supports pipeline_mode=pl.Buffered(1) on a
    pallas_call BlockSpec (used to single-buffer constant weight operands)."""
    if not hasattr(pl, "Buffered"):
        return False
    try:
        def k(x_ref, o_ref):
            o_ref[...] = x_ref[...] + 1.0

        f = pl.pallas_call(
            k,
            out_shape=jax.ShapeDtypeStruct((8, 128), jnp.float32),
            grid=(2,),
            in_specs=[pl.BlockSpec((8, 128), lambda i: (0, 0),
                                   pipeline_mode=pl.Buffered(1))],
            out_specs=pl.BlockSpec((8, 128), lambda i: (0, 0)),
        )
        y = jax.block_until_ready(f(jnp.zeros((8, 128), jnp.float32)))
        return bool(jnp.all(y == 1.0))
    except Exception:
        return False


def _const_spec(shape, index_map):
    """BlockSpec for grid-invariant operands; single-buffered when supported."""
    global _BUFFERED_OK
    if _BUFFERED_OK is None:
        _BUFFERED_OK = _probe_buffered_specs()
    if _BUFFERED_OK:
        return pl.BlockSpec(shape, index_map, pipeline_mode=pl.Buffered(1))
    return pl.BlockSpec(shape, index_map)


def _pick_tile_h(H, W):
    # 8-16 rows per tile; keep TH*W a multiple of 16 (v5e bf16 sublane packing).
    for th in (8, 16):
        if H % th == 0 and (th * W) % 16 == 0:
            return th
    return H


# --------------------------- Pallas kernels ----------------------------------
def _stage1_kernel(xc_ref, xt_ref, xb_ref, w_ref, b_ref, o_ref, xp_ref):
    """Fused first BaseConv of the cls AND reg branches for one H-tile.

    xc_ref : (1, TH, W, Cin)   center rows of the input tile (bf16)
    xt_ref : (1, 1, W, Cin)    halo row above the tile (clamped at border)
    xb_ref : (1, 1, W, Cin)    halo row below the tile (clamped at border)
    w_ref  : (9, Cin, 2*Cin)   BN-folded weights per 3x3 tap (tap = kh*3+kw)
    b_ref  : (1, 2*Cin)        BN-folded bias (f32)
    o_ref  : (1, TH, W, 2*Cin) SiLU output, bf16, channels = [cls | reg]
    xp_ref : (TH+2, W+2, Cin)  VMEM scratch, padded input tile
    """
    _, TH, W, Cin = xc_ref.shape
    Cout = o_ref.shape[-1]
    h = pl.program_id(1)
    nh = pl.num_programs(1)

    # Zero only the 1-px left/right border columns (not the whole scratch).
    zcol = jnp.zeros((TH + 2, 1, Cin), xp_ref.dtype)
    xp_ref[:, 0:1, :] = zcol
    xp_ref[:, W + 1:W + 2, :] = zcol
    xp_ref[1:TH + 1, 1:W + 1, :] = xc_ref[0]

    @pl.when(h > 0)
    def _():
        xp_ref[0, 1:W + 1, :] = xt_ref[0, 0]

    @pl.when(h == 0)
    def _():
        xp_ref[0, 1:W + 1, :] = jnp.zeros((W, Cin), xp_ref.dtype)

    @pl.when(h < nh - 1)
    def _():
        xp_ref[TH + 1, 1:W + 1, :] = xb_ref[0, 0]

    @pl.when(h == nh - 1)
    def _():
        xp_ref[TH + 1, 1:W + 1, :] = jnp.zeros((W, Cin), xp_ref.dtype)

    # 9 accumulate matmuls, K = Cin (no materialized im2col patch; each
    # per-tap window is consumed immediately to keep live ranges short).
    acc = jnp.zeros((TH * W, Cout), jnp.float32)
    for kh in range(3):
        for kw in range(3):
            win = xp_ref[kh:kh + TH, kw:kw + W, :].reshape(TH * W, Cin)
            acc = acc + jnp.dot(win, w_ref[kh * 3 + kw],
                                preferred_element_type=jnp.float32)

    y = acc + b_ref[...]
    y = y * jax.nn.sigmoid(y)                      # SiLU in f32
    o_ref[0] = y.reshape(TH, W, Cout).astype(o_ref.dtype)


def _stage2_head_kernel(fc_ref, ft_ref, fb_ref, wc_ref, bc_ref, wr_ref, br_ref,
                        wh_ref, bh_ref, o_ref, pc_ref, pr_ref):
    """Second BaseConv of both branches + fused 1x1 prediction heads (one tile).

    fc_ref : (1, TH, W, 2C)  stage-1 output tile, channels = [cls | reg], bf16
    ft_ref : (1, 1, W, 2C)   halo row above
    fb_ref : (1, 1, W, 2C)   halo row below
    wc_ref : (9, C, C)       cls conv-2 weights per tap (BN folded)
    bc_ref : (1, C)          cls conv-2 bias (f32)
    wr_ref : (9, C, C)       reg conv-2 weights per tap
    br_ref : (1, C)          reg conv-2 bias (f32)
    wh_ref : (5+nc, 2C)      fused 1x1 head weights, block-zero layout
                             (rows = [reg(4), obj(1), cls(nc)], cols = [cls|reg])
    bh_ref : (5+nc, 1)       fused head bias (f32)
    o_ref  : (1, 5+nc, TH*W) channel-major output tile (lane axis = TH*W), f32
    pc_ref : (TH+2, W+2, C)  VMEM scratch, padded cls-branch features
    pr_ref : (TH+2, W+2, C)  VMEM scratch, padded reg-branch features
    """
    _, TH, W, C2 = fc_ref.shape
    C = C2 // 2
    h = pl.program_id(1)
    nh = pl.num_programs(1)

    zcol = jnp.zeros((TH + 2, 1, C), pc_ref.dtype)
    pc_ref[:, 0:1, :] = zcol
    pc_ref[:, W + 1:W + 2, :] = zcol
    pr_ref[:, 0:1, :] = zcol
    pr_ref[:, W + 1:W + 2, :] = zcol

    center = fc_ref[0]                              # (TH, W, 2C)
    pc_ref[1:TH + 1, 1:W + 1, :] = center[:, :, :C]
    pr_ref[1:TH + 1, 1:W + 1, :] = center[:, :, C:]

    @pl.when(h > 0)
    def _():
        top = ft_ref[0, 0]
        pc_ref[0, 1:W + 1, :] = top[:, :C]
        pr_ref[0, 1:W + 1, :] = top[:, C:]

    @pl.when(h == 0)
    def _():
        z = jnp.zeros((W, C), pc_ref.dtype)
        pc_ref[0, 1:W + 1, :] = z
        pr_ref[0, 1:W + 1, :] = z

    @pl.when(h < nh - 1)
    def _():
        bot = fb_ref[0, 0]
        pc_ref[TH + 1, 1:W + 1, :] = bot[:, :C]
        pr_ref[TH + 1, 1:W + 1, :] = bot[:, C:]

    @pl.when(h == nh - 1)
    def _():
        z = jnp.zeros((W, C), pc_ref.dtype)
        pc_ref[TH + 1, 1:W + 1, :] = z
        pr_ref[TH + 1, 1:W + 1, :] = z

    acc_c = jnp.zeros((TH * W, C), jnp.float32)
    acc_r = jnp.zeros((TH * W, C), jnp.float32)
    for kh in range(3):
        for kw in range(3):
            t = kh * 3 + kw
            win_c = pc_ref[kh:kh + TH, kw:kw + W, :].reshape(TH * W, C)
            acc_c = acc_c + jnp.dot(win_c, wc_ref[t],
                                    preferred_element_type=jnp.float32)
            win_r = pr_ref[kh:kh + TH, kw:kw + W, :].reshape(TH * W, C)
            acc_r = acc_r + jnp.dot(win_r, wr_ref[t],
                                    preferred_element_type=jnp.float32)

    yc = acc_c + bc_ref[...]
    yc = yc * jax.nn.sigmoid(yc)                    # cls_feat (TH*W, C), f32
    yr = acc_r + br_ref[...]
    yr = yr * jax.nn.sigmoid(yr)                    # reg_feat (TH*W, C), f32

    # Fused 1x1 heads: one matmul against the block-zero (5+nc, 2C) weight and
    # one aligned full-block, lane-dense store (last dim = TH*W).
    feat = jnp.concatenate([yc, yr], axis=-1).astype(fc_ref.dtype)   # (TH*W, 2C)
    dn = (((1,), (1,)), ((), ()))
    out = jax.lax.dot_general(wh_ref[...], feat, dn,
                              preferred_element_type=jnp.float32) + bh_ref[...]
    o_ref[0] = out.astype(o_ref.dtype)


# --------------------------- pallas_call wrappers ----------------------------
def stage1(x, w1, b1, th):
    B, H, W, Cin = x.shape
    Cout = w1.shape[-1]
    nh = H // th

    center_map = lambda b, h: (b, h, 0, 0)
    top_map = lambda b, h: (b, jnp.maximum(h * th - 1, 0), 0, 0)
    bot_map = lambda b, h: (b, jnp.minimum((h + 1) * th, H - 1), 0, 0)

    return pl.pallas_call(
        _stage1_kernel,
        out_shape=jax.ShapeDtypeStruct((B, H, W, Cout), x.dtype),
        grid_spec=pltpu.PrefetchScalarGridSpec(
            num_scalar_prefetch=0,
            grid=(B, nh),
            in_specs=[
                pl.BlockSpec((1, th, W, Cin), center_map),
                pl.BlockSpec((1, 1, W, Cin), top_map),
                pl.BlockSpec((1, 1, W, Cin), bot_map),
                _const_spec((9, Cin, Cout), lambda b, h: (0, 0, 0)),
                _const_spec((1, Cout), lambda b, h: (0, 0)),
            ],
            out_specs=pl.BlockSpec((1, th, W, Cout), center_map),
            scratch_shapes=[pltpu.VMEM((th + 2, W + 2, Cin), x.dtype)],
        ),
        compiler_params=pltpu.CompilerParams(
            dimension_semantics=("parallel", "parallel"),
            vmem_limit_bytes=_vmem_limit()),
    )(x, x, x, w1, b1)


def stage2_head(feat, wc2, bc2, wr2, br2, w_head, b_head, th):
    B, H, W, C2 = feat.shape
    C = C2 // 2
    n_out = w_head.shape[0]
    nh = H // th

    center_map = lambda b, h: (b, h, 0, 0)
    top_map = lambda b, h: (b, jnp.maximum(h * th - 1, 0), 0, 0)
    bot_map = lambda b, h: (b, jnp.minimum((h + 1) * th, H - 1), 0, 0)

    return pl.pallas_call(
        _stage2_head_kernel,
        out_shape=jax.ShapeDtypeStruct((B, n_out, H * W), jnp.float32),
        grid_spec=pltpu.PrefetchScalarGridSpec(
            num_scalar_prefetch=0,
            grid=(B, nh),
            in_specs=[
                pl.BlockSpec((1, th, W, C2), center_map),
                pl.BlockSpec((1, 1, W, C2), top_map),
                pl.BlockSpec((1, 1, W, C2), bot_map),
                _const_spec((9, C, C), lambda b, h: (0, 0, 0)),
                _const_spec((1, C), lambda b, h: (0, 0)),
                _const_spec((9, C, C), lambda b, h: (0, 0, 0)),
                _const_spec((1, C), lambda b, h: (0, 0)),
                _const_spec((n_out, C2), lambda b, h: (0, 0)),
                _const_spec((n_out, 1), lambda b, h: (0, 0)),
            ],
            out_specs=pl.BlockSpec((1, n_out, th * W), lambda b, h: (b, 0, h)),
            scratch_shapes=[pltpu.VMEM((th + 2, W + 2, C), feat.dtype),
                            pltpu.VMEM((th + 2, W + 2, C), feat.dtype)],
        ),
        compiler_params=pltpu.CompilerParams(
            dimension_semantics=("parallel", "parallel"),
            vmem_limit_bytes=_vmem_limit()),
    )(feat, feat, feat, wc2, bc2, wr2, br2, w_head, b_head)


# --------------------------- Parameter setup (glue) --------------------------
def init_params(key, in_ch, num_classes):
    ks = iter(jax.random.split(key, 20))
    C = in_ch

    def conv3_w(k):
        fan_in = 9 * C
        return jax.random.normal(k, (3, 3, C, C), jnp.float32) / np.sqrt(fan_in)

    def bn(k):
        k1, k2, k3, k4 = jax.random.split(k, 4)
        gamma = 1.0 + 0.1 * jax.random.normal(k1, (C,), jnp.float32)
        beta = 0.1 * jax.random.normal(k2, (C,), jnp.float32)
        mean = 0.05 * jax.random.normal(k3, (C,), jnp.float32)
        var = 1.0 + 0.1 * jax.random.uniform(k4, (C,), jnp.float32)
        return gamma, beta, mean, var

    def fold(w, stats):  # BatchNorm eval-mode folding into conv weight/bias
        gamma, beta, mean, var = stats
        scale = gamma / jnp.sqrt(var + BN_EPS)
        return w * scale, beta - mean * scale

    def conv1(k, cout):
        k1, k2 = jax.random.split(k)
        w = jax.random.normal(k1, (C, cout), jnp.float32) / np.sqrt(C)
        b = 0.1 * jax.random.normal(k2, (cout,), jnp.float32)
        return w, b

    cls_w1, cls_b1 = fold(conv3_w(next(ks)), bn(next(ks)))
    cls_w2, cls_b2 = fold(conv3_w(next(ks)), bn(next(ks)))
    reg_w1, reg_b1 = fold(conv3_w(next(ks)), bn(next(ks)))
    reg_w2, reg_b2 = fold(conv3_w(next(ks)), bn(next(ks)))
    w_cls, b_cls = conv1(next(ks), num_classes)
    w_reg, b_reg = conv1(next(ks), 4)
    w_obj, b_obj = conv1(next(ks), 1)

    bf = lambda a: a.astype(jnp.bfloat16)
    p = {}
    # Stage 1: both branches fused along Cout ([cls | reg]); per-tap layout.
    p["w1"] = bf(jnp.concatenate([cls_w1, reg_w1], axis=-1).reshape(9, C, 2 * C))
    p["b1"] = jnp.concatenate([cls_b1, reg_b1]).reshape(1, 2 * C)
    # Stage 2 convs, per-tap layout (tap = kh*3 + kw).
    p["wc2"] = bf(cls_w2.reshape(9, C, C))
    p["bc2"] = cls_b2.reshape(1, C)
    p["wr2"] = bf(reg_w2.reshape(9, C, C))
    p["br2"] = reg_b2.reshape(1, C)
    # Fused 1x1 heads: rows = [reg(4), obj(1), cls(nc)], cols = [cls_feat | reg_feat].
    n_out = 5 + num_classes
    w_head = jnp.zeros((n_out, 2 * C), jnp.float32)
    w_head = w_head.at[0:4, C:].set(w_reg.T)
    w_head = w_head.at[4:5, C:].set(w_obj.T)
    w_head = w_head.at[5:, :C].set(w_cls.T)
    p["w_head"] = bf(w_head)                                       # (5+nc, 2C)
    p["b_head"] = jnp.concatenate([b_reg, b_obj, b_cls]).reshape(-1, 1)  # (5+nc, 1)
    return p


# --------------------------- Forward ----------------------------------------
@jax.jit
def dna_head_forward(params, x_nchw):
    B, _, H, W = x_nchw.shape
    # TODO(synk): accept NHWC/bf16 input upstream (or use allow_input_fusion)
    # to avoid this extra HBM pass over the input.
    x = jnp.transpose(x_nchw, (0, 2, 3, 1)).astype(jnp.bfloat16)   # NCHW -> NHWC
    th = _pick_tile_h(H, W)
    feat1 = stage1(x, params["w1"], params["b1"], th)              # (B, H, W, 2C)
    out = stage2_head(feat1, params["wc2"], params["bc2"],
                      params["wr2"], params["br2"],
                      params["w_head"], params["b_head"], th)      # (B, 5+nc, H*W)
    return out.reshape(B, -1, H, W)                                # channel-major


def dna_head_apply(params, x_nchw):
    # Mirrors torch: returns a list with one (B, 4+1+num_classes, H, W) tensor.
    return [dna_head_forward(params, x_nchw)]


# --------------------------- Pure-JAX reference ------------------------------
def ref_forward(params, x_nchw):
    f32 = lambda a: a.astype(jnp.float32)
    C = x_nchw.shape[1]

    def conv_silu(h, w_hwio, b):
        y = jax.lax.conv_general_dilated(
            h, w_hwio, (1, 1), "SAME",
            dimension_numbers=("NHWC", "HWIO", "NHWC"),
            precision=jax.lax.Precision.HIGHEST)
        y = y + b
        return y * jax.nn.sigmoid(y)

    # Mirror the kernel's bf16 I/O (inputs / HBM intermediates rounded to bf16,
    # math in f32).
    x = f32(jnp.transpose(x_nchw, (0, 2, 3, 1)).astype(jnp.bfloat16))
    w1 = f32(params["w1"]).reshape(3, 3, C, 2 * C)
    f1 = f32(conv_silu(x, w1, f32(params["b1"])).astype(jnp.bfloat16))
    cls_in, reg_in = f1[..., :C], f1[..., C:]
    wc2 = f32(params["wc2"]).reshape(3, 3, C, C)
    wr2 = f32(params["wr2"]).reshape(3, 3, C, C)
    cls_feat = conv_silu(cls_in, wc2, f32(params["bc2"]))
    reg_feat = conv_silu(reg_in, wr2, f32(params["br2"]))
    feat = jnp.concatenate([cls_feat, reg_feat], axis=-1).astype(jnp.bfloat16)
    out = jnp.einsum("bhwc,oc->bohw", f32(feat), f32(params["w_head"]),
                     precision=jax.lax.Precision.HIGHEST) \
        + f32(params["b_head"]).reshape(1, -1, 1, 1)
    return out


if __name__ == "__main__":
    B, C, H, W = 2, 32, 16, 16       # small stand-in for in_channels=256, 80x80
    num_classes = 8
    key = jax.random.PRNGKey(0)
    kx, kp = jax.random.split(key)
    x = jax.random.normal(kx, (B, C, H, W), jnp.float32)
    params = init_params(kp, C, num_classes)

    outputs = dna_head_apply(params, x)
    out = jax.block_until_ready(outputs[0])
    assert out.shape == (B, 4 + 1 + num_classes, H, W)

    ref = ref_forward(params, x)
    np.testing.assert_allclose(np.asarray(out, dtype=np.float32),
                               np.asarray(ref, dtype=np.float32),
                               rtol=2e-2, atol=2e-2)
    print("KERNEL_OK")
</pallas_src>

<mosaic_0001>
module attributes {stable_mosaic.version = 11 : i64} {
  func.func @_stage1_kernel(%arg0: i32, %arg1: i32, %arg2: memref<1x8x16x32xbf16, #tpu.memory_space<vmem>>, %arg3: memref<1x1x16x32xbf16, #tpu.memory_space<vmem>>, %arg4: memref<1x1x16x32xbf16, #tpu.memory_space<vmem>>, %arg5: memref<9x32x64xbf16, #tpu.memory_space<vmem>>, %arg6: memref<1x64xf32, #tpu.memory_space<vmem>>, %arg7: memref<1x8x16x64xbf16, #tpu.memory_space<vmem>>, %arg8: memref<10x18x32xbf16, #tpu.memory_space<vmem>>) attributes {dimension_semantics = [#tpu.dimension_semantics<parallel>, #tpu.dimension_semantics<parallel>], iteration_bounds = array<i64: 2, 2>, scalar_prefetch = 0 : i64, scratch_operands = 1 : i64, tpu.core_type = #tpu.core_type<tc>, window_params = [{transform_indices = @transform_0, window_bounds = array<i64: 1, 8, 16, 32>}, {transform_indices = @transform_1, window_bounds = array<i64: 1, 1, 16, 32>}, {transform_indices = @transform_2, window_bounds = array<i64: 1, 1, 16, 32>}, {pipeline_mode = #tpu.pipeline_mode<synchronous>, transform_indices = @transform_3, window_bounds = array<i64: 9, 32, 64>}, {pipeline_mode = #tpu.pipeline_mode<synchronous>, transform_indices = @transform_4, window_bounds = array<i64: 1, 64>}, {transform_indices = @transform_5, window_bounds = array<i64: 1, 8, 16, 64>}]} {
    %cst = arith.constant 0.000000e+00 : bf16
    %0 = vector.broadcast %cst : bf16 to vector<10x1x32xbf16>
    %c0 = arith.constant 0 : index
    %c0_0 = arith.constant 0 : index
    %c0_1 = arith.constant 0 : index
    %1 = vector.load %arg8[%c0, %c0_0, %c0_1] : memref<10x18x32xbf16, #tpu.memory_space<vmem>>, vector<10x1x32xbf16>
    tpu.vector_store %arg8[%c0, %c0_0, %c0_1], %0 {strides = array<i32>} : memref<10x18x32xbf16, #tpu.memory_space<vmem>>, vector<10x1x32xbf16>,
    %c0_2 = arith.constant 0 : index
    %c17 = arith.constant 17 : index
    %c0_3 = arith.constant 0 : index
    %2 = vector.load %arg8[%c0_2, %c17, %c0_3] : memref<10x18x32xbf16, #tpu.memory_space<vmem>>, vector<10x1x32xbf16>
    tpu.vector_store %arg8[%c0_2, %c17, %c0_3], %0 {strides = array<i32>} : memref<10x18x32xbf16, #tpu.memory_space<vmem>>, vector<10x1x32xbf16>,
    %c0_4 = arith.constant 0 : index
    %c0_5 = arith.constant 0 : index
    %c0_6 = arith.constant 0 : index
    %c0_7 = arith.constant 0 : index
    %3 = vector.load %arg2[%c0_4, %c0_5, %c0_6, %c0_7] : memref<1x8x16x32xbf16, #tpu.memory_space<vmem>>, vector<1x8x16x32xbf16>
    %4 = vector.shape_cast %3 : vector<1x8x16x32xbf16> to vector<8x16x32xbf16>
    %c1 = arith.constant 1 : index
    %c1_8 = arith.constant 1 : index
    %c0_9 = arith.constant 0 : index
    %5 = vector.load %arg8[%c1, %c1_8, %c0_9] : memref<10x18x32xbf16, #tpu.memory_space<vmem>>, vector<8x16x32xbf16>
    tpu.vector_store %arg8[%c1, %c1_8, %c0_9], %4 {strides = array<i32>} : memref<10x18x32xbf16, #tpu.memory_space<vmem>>, vector<8x16x32xbf16>,
    %c0_i32 = arith.constant 0 : i32
    %6 = arith.cmpi sgt, %arg1, %c0_i32 : i32
    %7 = arith.extui %6 : i1 to i32
    %c0_i32_10 = arith.constant 0 : i32
    %8 = arith.cmpi ne, %7, %c0_i32_10 : i32
    scf.if %8 {
      %c0_80 = arith.constant 0 : index
      %c0_81 = arith.constant 0 : index
      %c0_82 = arith.constant 0 : index
      %c0_83 = arith.constant 0 : index
      %87 = vector.load %arg3[%c0_80, %c0_81, %c0_82, %c0_83] : memref<1x1x16x32xbf16, #tpu.memory_space<vmem>>, vector<1x1x16x32xbf16>
      %88 = vector.shape_cast %87 : vector<1x1x16x32xbf16> to vector<16x32xbf16>
      %c0_84 = arith.constant 0 : index
      %c1_85 = arith.constant 1 : index
      %c0_86 = arith.constant 0 : index
      %89 = vector.load %arg8[%c0_84, %c1_85, %c0_86] : memref<10x18x32xbf16, #tpu.memory_space<vmem>>, vector<1x16x32xbf16>
      %90 = vector.shape_cast %89 : vector<1x16x32xbf16> to vector<16x32xbf16>
      %91 = vector.shape_cast %88 : vector<16x32xbf16> to vector<1x16x32xbf16>
      tpu.vector_store %arg8[%c0_84, %c1_85, %c0_86], %91 {strides = array<i32>} : memref<10x18x32xbf16, #tpu.memory_space<vmem>>, vector<1x16x32xbf16>,
    } else {
    }
    %c0_i32_11 = arith.constant 0 : i32
    %9 = arith.cmpi eq, %arg1, %c0_i32_11 : i32
    %10 = arith.extui %9 : i1 to i32
    %c0_i32_12 = arith.constant 0 : i32
    %11 = arith.cmpi ne, %10, %c0_i32_12 : i32
    scf.if %11 {
      %cst_80 = arith.constant 0.000000e+00 : bf16
      %87 = vector.broadcast %cst_80 : bf16 to vector<16x32xbf16>
      %c0_81 = arith.constant 0 : index
      %c1_82 = arith.constant 1 : index
      %c0_83 = arith.constant 0 : index
      %88 = vector.load %arg8[%c0_81, %c1_82, %c0_83] : memref<10x18x32xbf16, #tpu.memory_space<vmem>>, vector<1x16x32xbf16>
      %89 = vector.shape_cast %88 : vector<1x16x32xbf16> to vector<16x32xbf16>
      %90 = vector.shape_cast %87 : vector<16x32xbf16> to vector<1x16x32xbf16>
      tpu.vector_store %arg8[%c0_81, %c1_82, %c0_83], %90 {strides = array<i32>} : memref<10x18x32xbf16, #tpu.memory_space<vmem>>, vector<1x16x32xbf16>,
    } else {
    }
    %c1_i32 = arith.constant 1 : i32
    %12 = arith.cmpi slt, %arg1, %c1_i32 : i32
    %13 = arith.extui %12 : i1 to i32
    %c0_i32_13 = arith.constant 0 : i32
    %14 = arith.cmpi ne, %13, %c0_i32_13 : i32
    scf.if %14 {
      %c0_80 = arith.constant 0 : index
      %c0_81 = arith.constant 0 : index
      %c0_82 = arith.constant 0 : index
      %c0_83 = arith.constant 0 : index
      %87 = vector.load %arg4[%c0_80, %c0_81, %c0_82, %c0_83] : memref<1x1x16x32xbf16, #tpu.memory_space<vmem>>, vector<1x1x16x32xbf16>
      %88 = vector.shape_cast %87 : vector<1x1x16x32xbf16> to vector<16x32xbf16>
      %c9 = arith.constant 9 : index
      %c1_84 = arith.constant 1 : index
      %c0_85 = arith.constant 0 : index
      %89 = vector.load %arg8[%c9, %c1_84, %c0_85] : memref<10x18x32xbf16, #tpu.memory_space<vmem>>, vector<1x16x32xbf16>
      %90 = vector.shape_cast %89 : vector<1x16x32xbf16> to vector<16x32xbf16>
      %91 = vector.shape_cast %88 : vector<16x32xbf16> to vector<1x16x32xbf16>
      tpu.vector_store %arg8[%c9, %c1_84, %c0_85], %91 {strides = array<i32>} : memref<10x18x32xbf16, #tpu.memory_space<vmem>>, vector<1x16x32xbf16>,
    } else {
    }
    %c1_i32_14 = arith.constant 1 : i32
    %15 = arith.cmpi eq, %arg1, %c1_i32_14 : i32
    %16 = arith.extui %15 : i1 to i32
    %c0_i32_15 = arith.constant 0 : i32
    %17 = arith.cmpi ne, %16, %c0_i32_15 : i32
    scf.if %17 {
      %cst_80 = arith.constant 0.000000e+00 : bf16
      %87 = vector.broadcast %cst_80 : bf16 to vector<16x32xbf16>
      %c9 = arith.constant 9 : index
      %c1_81 = arith.constant 1 : index
      %c0_82 = arith.constant 0 : index
      %88 = vector.load %arg8[%c9, %c1_81, %c0_82] : memref<10x18x32xbf16, #tpu.memory_space<vmem>>, vector<1x16x32xbf16>
      %89 = vector.shape_cast %88 : vector<1x16x32xbf16> to vector<16x32xbf16>
      %90 = vector.shape_cast %87 : vector<16x32xbf16> to vector<1x16x32xbf16>
      tpu.vector_store %arg8[%c9, %c1_81, %c0_82], %90 {strides = array<i32>} : memref<10x18x32xbf16, #tpu.memory_space<vmem>>, vector<1x16x32xbf16>,
    } else {
    }
    %cst_16 = arith.constant 0.000000e+00 : f32
    %18 = vector.broadcast %cst_16 : f32 to vector<128x64xf32>
    %c0_17 = arith.constant 0 : index
    %c0_18 = arith.constant 0 : index
    %c0_19 = arith.constant 0 : index
    %19 = vector.load %arg8[%c0_17, %c0_18, %c0_19] : memref<10x18x32xbf16, #tpu.memory_space<vmem>>, vector<8x16x32xbf16>
    %20 = vector.shape_cast %19 : vector<8x16x32xbf16> to vector<128x32xbf16>
    %c0_20 = arith.constant 0 : index
    %c0_21 = arith.constant 0 : index
    %c0_22 = arith.constant 0 : index
    %21 = vector.load %arg5[%c0_20, %c0_21, %c0_22] : memref<9x32x64xbf16, #tpu.memory_space<vmem>>, vector<1x32x64xbf16>
    %22 = vector.shape_cast %21 : vector<1x32x64xbf16> to vector<32x64xbf16>
    %cst_23 = arith.constant dense<0.000000e+00> : vector<128x64xf32>
    %23 = tpu.matmul %20, %22, %cst_23 {dimension_numbers = #tpu.dot_dimension_numbers<[1], [0], [0], [1], [0, 0, 1, 1], [], []>} : vector<128x32xbf16>, vector<32x64xbf16>, vector<128x64xf32> -> vector<128x64xf32>
    %24 = arith.addf %18, %23 : vector<128x64xf32>
    %c0_24 = arith.constant 0 : index
    %c1_25 = arith.constant 1 : index
    %c0_26 = arith.constant 0 : index
    %25 = vector.load %arg8[%c0_24, %c1_25, %c0_26] : memref<10x18x32xbf16, #tpu.memory_space<vmem>>, vector<8x16x32xbf16>
    %26 = vector.shape_cast %25 : vector<8x16x32xbf16> to vector<128x32xbf16>
    %c1_27 = arith.constant 1 : index
    %c0_28 = arith.constant 0 : index
    %c0_29 = arith.constant 0 : index
    %27 = vector.load %arg5[%c1_27, %c0_28, %c0_29] : memref<9x32x64xbf16, #tpu.memory_space<vmem>>, vector<1x32x64xbf16>
    %28 = vector.shape_cast %27 : vector<1x32x64xbf16> to vector<32x64xbf16>
    %cst_30 = arith.constant dense<0.000000e+00> : vector<128x64xf32>
    %29 = tpu.matmul %26, %28, %cst_30 {dimension_numbers = #tpu.dot_dimension_numbers<[1], [0], [0], [1], [0, 0, 1, 1], [], []>} : vector<128x32xbf16>, vector<32x64xbf16>, vector<128x64xf32> -> vector<128x64xf32>
    %30 = arith.addf %24, %29 : vector<128x64xf32>
    %c0_31 = arith.constant 0 : index
    %c2 = arith.constant 2 : index
    %c0_32 = arith.constant 0 : index
    %31 = vector.load %arg8[%c0_31, %c2, %c0_32] : memref<10x18x32xbf16, #tpu.memory_space<vmem>>, vector<8x16x32xbf16>
    %32 = vector.shape_cast %31 : vector<8x16x32xbf16> to vector<128x32xbf16>
    %c2_33 = arith.constant 2 : index
    %c0_34 = arith.constant 0 : index
    %c0_35 = arith.constant 0 : index
    %33 = vector.load %arg5[%c2_33, %c0_34, %c0_35] : memref<9x32x64xbf16, #tpu.memory_space<vmem>>, vector<1x32x64xbf16>
    %34 = vector.shape_cast %33 : vector<1x32x64xbf16> to vector<32x64xbf16>
    %cst_36 = arith.constant dense<0.000000e+00> : vector<128x64xf32>
    %35 = tpu.matmul %32, %34, %cst_36 {dimension_numbers = #tpu.dot_dimension_numbers<[1], [0], [0], [1], [0, 0, 1, 1], [], []>} : vector<128x32xbf16>, vector<32x64xbf16>, vector<128x64xf32> -> vector<128x64xf32>
    %36 = arith.addf %30, %35 : vector<128x64xf32>
    %c1_37 = arith.constant 1 : index
    %c0_38 = arith.constant 0 : index
    %c0_39 = arith.constant 0 : index
    %37 = vector.load %arg8[%c1_37, %c0_38, %c0_39] : memref<10x18x32xbf16, #tpu.memory_space<vmem>>, vector<8x16x32xbf16>
    %38 = vector.shape_cast %37 : vector<8x16x32xbf16> to vector<128x32xbf16>
    %c3 = arith.constant 3 : index
    %c0_40 = arith.constant 0 : index
    %c0_41 = arith.constant 0 : index
    %39 = vector.load %arg5[%c3, %c0_40, %c0_41] : memref<9x32x64xbf16, #tpu.memory_space<vmem>>, vector<1x32x64xbf16>
    %40 = vector.shape_cast %39 : vector<1x32x64xbf16> to vector<32x64xbf16>
    %cst_42 = arith.constant dense<0.000000e+00> : vector<128x64xf32>
    %41 = tpu.matmul %38, %40, %cst_42 {dimension_numbers = #tpu.dot_dimension_numbers<[1], [0], [0], [1], [0, 0, 1, 1], [], []>} : vector<128x32xbf16>, vector<32x64xbf16>, vector<128x64xf32> -> vector<128x64xf32>
    %42 = arith.addf %36, %41 : vector<128x64xf32>
    %c1_43 = arith.constant 1 : index
    %c1_44 = arith.constant 1 : index
    %c0_45 = arith.constant 0 : index
    %43 = vector.load %arg8[%c1_43, %c1_44, %c0_45] : memref<10x18x32xbf16, #tpu.memory_space<vmem>>, vector<8x16x32xbf16>
    %44 = vector.shape_cast %43 : vector<8x16x32xbf16> to vector<128x32xbf16>
    %c4 = arith.constant 4 : index
    %c0_46 = arith.constant 0 : index
    %c0_47 = arith.constant 0 : index
    %45 = vector.load %arg5[%c4, %c0_46, %c0_47] : memref<9x32x64xbf16, #tpu.memory_space<vmem>>, vector<1x32x64xbf16>
    %46 = vector.shape_cast %45 : vector<1x32x64xbf16> to vector<32x64xbf16>
    %cst_48 = arith.constant dense<0.000000e+00> : vector<128x64xf32>
    %47 = tpu.matmul %44, %46, %cst_48 {dimension_numbers = #tpu.dot_dimension_numbers<[1], [0], [0], [1], [0, 0, 1, 1], [], []>} : vector<128x32xbf16>, vector<32x64xbf16>, vector<128x64xf32> -> vector<128x64xf32>
    %48 = arith.addf %42, %47 : vector<128x64xf32>
    %c1_49 = arith.constant 1 : index
    %c2_50 = arith.constant 2 : index
    %c0_51 = arith.constant 0 : index
    %49 = vector.load %arg8[%c1_49, %c2_50, %c0_51] : memref<10x18x32xbf16, #tpu.memory_space<vmem>>, vector<8x16x32xbf16>
    %50 = vector.shape_cast %49 : vector<8x16x32xbf16> to vector<128x32xbf16>
    %c5 = arith.constant 5 : index
    %c0_52 = arith.constant 0 : index
    %c0_53 = arith.constant 0 : index
    %51 = vector.load %arg5[%c5, %c0_52, %c0_53] : memref<9x32x64xbf16, #tpu.memory_space<vmem>>, vector<1x32x64xbf16>
    %52 = vector.shape_cast %51 : vector<1x32x64xbf16> to vector<32x64xbf16>
    %cst_54 = arith.constant dense<0.000000e+00> : vector<128x64xf32>
    %53 = tpu.matmul %50, %52, %cst_54 {dimension_numbers = #tpu.dot_dimension_numbers<[1], [0], [0], [1], [0, 0, 1, 1], [], []>} : vector<128x32xbf16>, vector<32x64xbf16>, vector<128x64xf32> -> vector<128x64xf32>
    %54 = arith.addf %48, %53 : vector<128x64xf32>
    %c2_55 = arith.constant 2 : index
    %c0_56 = arith.constant 0 : index
    %c0_57 = arith.constant 0 : index
    %55 = vector.load %arg8[%c2_55, %c0_56, %c0_57] : memref<10x18x32xbf16, #tpu.memory_space<vmem>>, vector<8x16x32xbf16>
    %56 = vector.shape_cast %55 : vector<8x16x32xbf16> to vector<128x32xbf16>
    %c6 = arith.constant 6 : index
    %c0_58 = arith.constant 0 : index
    %c0_59 = arith.constant 0 : index
    %57 = vector.load %arg5[%c6, %c0_58, %c0_59] : memref<9x32x64xbf16, #tpu.memory_space<vmem>>, vector<1x32x64xbf16>
    %58 = vector.shape_cast %57 : vector<1x32x64xbf16> to vector<32x64xbf16>
    %cst_60 = arith.constant dense<0.000000e+00> : vector<128x64xf32>
    %59 = tpu.matmul %56, %58, %cst_60 {dimension_numbers = #tpu.dot_dimension_numbers<[1], [0], [0], [1], [0, 0, 1, 1], [], []>} : vector<128x32xbf16>, vector<32x64xbf16>, vector<128x64xf32> -> vector<128x64xf32>
    %60 = arith.addf %54, %59 : vector<128x64xf32>
    %c2_61 = arith.constant 2 : index
    %c1_62 = arith.constant 1 : index
    %c0_63 = arith.constant 0 : index
    %61 = vector.load %arg8[%c2_61, %c1_62, %c0_63] : memref<10x18x32xbf16, #tpu.memory_space<vmem>>, vector<8x16x32xbf16>
    %62 = vector.shape_cast %61 : vector<8x16x32xbf16> to vector<128x32xbf16>
    %c7 = arith.constant 7 : index
    %c0_64 = arith.constant 0 : index
    %c0_65 = arith.constant 0 : index
    %63 = vector.load %arg5[%c7, %c0_64, %c0_65] : memref<9x32x64xbf16, #tpu.memory_space<vmem>>, vector<1x32x64xbf16>
    %64 = vector.shape_cast %63 : vector<1x32x64xbf16> to vector<32x64xbf16>
    %cst_66 = arith.constant dense<0.000000e+00> : vector<128x64xf32>
    %65 = tpu.matmul %62, %64, %cst_66 {dimension_numbers = #tpu.dot_dimension_numbers<[1], [0], [0], [1], [0, 0, 1, 1], [], []>} : vector<128x32xbf16>, vector<32x64xbf16>, vector<128x64xf32> -> vector<128x64xf32>
    %66 = arith.addf %60, %65 : vector<128x64xf32>
    %c2_67 = arith.constant 2 : index
    %c2_68 = arith.constant 2 : index
    %c0_69 = arith.constant 0 : index
    %67 = vector.load %arg8[%c2_67, %c2_68, %c0_69] : memref<10x18x32xbf16, #tpu.memory_space<vmem>>, vector<8x16x32xbf16>
    %68 = vector.shape_cast %67 : vector<8x16x32xbf16> to vector<128x32xbf16>
    %c8 = arith.constant 8 : index
    %c0_70 = arith.constant 0 : index
    %c0_71 = arith.constant 0 : index
    %69 = vector.load %arg5[%c8, %c0_70, %c0_71] : memref<9x32x64xbf16, #tpu.memory_space<vmem>>, vector<1x32x64xbf16>
    %70 = vector.shape_cast %69 : vector<1x32x64xbf16> to vector<32x64xbf16>
    %cst_72 = arith.constant dense<0.000000e+00> : vector<128x64xf32>
    %71 = tpu.matmul %68, %70, %cst_72 {dimension_numbers = #tpu.dot_dimension_numbers<[1], [0], [0], [1], [0, 0, 1, 1], [], []>} : vector<128x32xbf16>, vector<32x64xbf16>, vector<128x64xf32> -> vector<128x64xf32>
    %72 = arith.addf %66, %71 : vector<128x64xf32>
    %c0_73 = arith.constant 0 : index
    %c0_74 = arith.constant 0 : index
    %73 = vector.load %arg6[%c0_73, %c0_74] : memref<1x64xf32, #tpu.memory_space<vmem>>, vector<1x64xf32>
    %74 = vector.broadcast %73 : vector<1x64xf32> to vector<128x64xf32>
    %75 = arith.addf %72, %74 : vector<128x64xf32>
    %76 = arith.negf %75 : vector<128x64xf32>
    %77 = math.exp %76 : vector<128x64xf32>
    %cst_75 = arith.constant 1.000000e+00 : f32
    %78 = vector.broadcast %cst_75 : f32 to vector<128x64xf32>
    %79 = arith.addf %78, %77 : vector<128x64xf32>
    %80 = arith.divf %78, %79 : vector<128x64xf32>
    %81 = arith.mulf %75, %80 : vector<128x64xf32>
    %82 = vector.shape_cast %81 : vector<128x64xf32> to vector<8x16x64xf32>
    %83 = arith.truncf %82 : vector<8x16x64xf32> to vector<8x16x64xbf16>
    %c0_76 = arith.constant 0 : index
    %c0_77 = arith.constant 0 : index
    %c0_78 = arith.constant 0 : index
    %c0_79 = arith.constant 0 : index
    %84 = vector.load %arg7[%c0_76, %c0_77, %c0_78, %c0_79] : memref<1x8x16x64xbf16, #tpu.memory_space<vmem>>, vector<1x8x16x64xbf16>
    %85 = vector.shape_cast %84 : vector<1x8x16x64xbf16> to vector<8x16x64xbf16>
    %86 = vector.shape_cast %83 : vector<8x16x64xbf16> to vector<1x8x16x64xbf16>
    tpu.vector_store %arg7[%c0_76, %c0_77, %c0_78, %c0_79], %86 {strides = array<i32>} : memref<1x8x16x64xbf16, #tpu.memory_space<vmem>>, vector<1x8x16x64xbf16>,
    return
  }
  func.func @transform_0(%arg0: i32, %arg1: i32) -> (i32, i32, i32, i32) {
    %c0_i32 = arith.constant 0 : i32
    %c0_i32_0 = arith.constant 0 : i32
    %c0_i32_1 = arith.constant 0 : i32
    return %arg0, %arg1, %c0_i32, %c0_i32_0 : i32, i32, i32, i32
  }
  func.func @transform_1(%arg0: i32, %arg1: i32) -> (i32, i32, i32, i32) {
    %c8_i32 = arith.constant 8 : i32
    %0 = arith.muli %arg1, %c8_i32 : i32
    %c1_i32 = arith.constant 1 : i32
    %1 = arith.subi %0, %c1_i32 : i32
    %c0_i32 = arith.constant 0 : i32
    %2 = arith.maxsi %1, %c0_i32 : i32
    %c0_i32_0 = arith.constant 0 : i32
    %c0_i32_1 = arith.constant 0 : i32
    %c0_i32_2 = arith.constant 0 : i32
    return %arg0, %2, %c0_i32_0, %c0_i32_1 : i32, i32, i32, i32
  }
  func.func @transform_2(%arg0: i32, %arg1: i32) -> (i32, i32, i32, i32) {
    %c1_i32 = arith.constant 1 : i32
    %0 = arith.addi %arg1, %c1_i32 : i32
    %c8_i32 = arith.constant 8 : i32
    %1 = arith.muli %0, %c8_i32 : i32
    %c15_i32 = arith.constant 15 : i32
    %2 = arith.minsi %1, %c15_i32 : i32
    %c0_i32 = arith.constant 0 : i32
    %c0_i32_0 = arith.constant 0 : i32
    %c0_i32_1 = arith.constant 0 : i32
    return %arg0, %2, %c0_i32, %c0_i32_0 : i32, i32, i32, i32
  }
  func.func @transform_3(%arg0: i32, %arg1: i32) -> (i32, i32, i32) {
    %c0_i32 = arith.constant 0 : i32
    %c0_i32_0 = arith.constant 0 : i32
    %c0_i32_1 = arith.constant 0 : i32
    %c0_i32_2 = arith.constant 0 : i32
    return %c0_i32, %c0_i32_0, %c0_i32_1 : i32, i32, i32
  }
  func.func @transform_4(%arg0: i32, %arg1: i32) -> (i32, i32) {
    %c0_i32 = arith.constant 0 : i32
    %c0_i32_0 = arith.constant 0 : i32
    %c0_i32_1 = arith.constant 0 : i32
    return %c0_i32, %c0_i32_0 : i32, i32
  }
  func.func @transform_5(%arg0: i32, %arg1: i32) -> (i32, i32, i32, i32) {
    %c0_i32 = arith.constant 0 : i32
    %c0_i32_0 = arith.constant 0 : i32
    %c0_i32_1 = arith.constant 0 : i32
    return %arg0, %arg1, %c0_i32, %c0_i32_0 : i32, i32, i32, i32
  }
}

module attributes {stable_mosaic.version = 11 : i64} {
  func.func @_stage2_head_kernel(%arg0: i32, %arg1: i32, %arg2: memref<1x8x16x64xbf16, #tpu.memory_space<vmem>>, %arg3: memref<1x1x16x64xbf16, #tpu.memory_space<vmem>>, %arg4: memref<1x1x16x64xbf16, #tpu.memory_space<vmem>>, %arg5: memref<9x32x32xbf16, #tpu.memory_space<vmem>>, %arg6: memref<1x32xf32, #tpu.memory_space<vmem>>, %arg7: memref<9x32x32xbf16, #tpu.memory_space<vmem>>, %arg8: memref<1x32xf32, #tpu.memory_space<vmem>>, %arg9: memref<13x64xbf16, #tpu.memory_space<vmem>>, %arg10: memref<13x1xf32, #tpu.memory_space<vmem>>, %arg11: memref<1x13x128xf32, #tpu.memory_space<vmem>>, %arg12: memref<10x18x32xbf16, #tpu.memory_space<vmem>>, %arg13: memref<10x18x32xbf16, #tpu.memory_space<vmem>>) attributes {dimension_semantics = [#tpu.dimension_semantics<parallel>, #tpu.dimension_semantics<parallel>], iteration_bounds = array<i64: 2, 2>, scalar_prefetch = 0 : i64, scratch_operands = 2 : i64, tpu.core_type = #tpu.core_type<tc>, window_params = [{transform_indices = @transform_0, window_bounds = array<i64: 1, 8, 16, 64>}, {transform_indices = @transform_1, window_bounds = array<i64: 1, 1, 16, 64>}, {transform_indices = @transform_2, window_bounds = array<i64: 1, 1, 16, 64>}, {pipeline_mode = #tpu.pipeline_mode<synchronous>, transform_indices = @transform_3, window_bounds = array<i64: 9, 32, 32>}, {pipeline_mode = #tpu.pipeline_mode<synchronous>, transform_indices = @transform_4, window_bounds = array<i64: 1, 32>}, {pipeline_mode = #tpu.pipeline_mode<synchronous>, transform_indices = @transform_5, window_bounds = array<i64: 9, 32, 32>}, {pipeline_mode = #tpu.pipeline_mode<synchronous>, transform_indices = @transform_6, window_bounds = array<i64: 1, 32>}, {pipeline_mode = #tpu.pipeline_mode<synchronous>, transform_indices = @transform_7, window_bounds = array<i64: 13, 64>}, {pipeline_mode = #tpu.pipeline_mode<synchronous>, transform_indices = @transform_8, window_bounds = array<i64: 13, 1>}, {transform_indices = @transform_9, window_bounds = array<i64: 1, 13, 128>}]} {
    %cst = arith.constant 0.000000e+00 : bf16
    %0 = vector.broadcast %cst : bf16 to vector<10x1x32xbf16>
    %c0 = arith.constant 0 : index
    %c0_0 = arith.constant 0 : index
    %c0_1 = arith.constant 0 : index
    %1 = vector.load %arg12[%c0, %c0_0, %c0_1] : memref<10x18x32xbf16, #tpu.memory_space<vmem>>, vector<10x1x32xbf16>
    tpu.vector_store %arg12[%c0, %c0_0, %c0_1], %0 {strides = array<i32>} : memref<10x18x32xbf16, #tpu.memory_space<vmem>>, vector<10x1x32xbf16>,
    %c0_2 = arith.constant 0 : index
    %c17 = arith.constant 17 : index
    %c0_3 = arith.constant 0 : index
    %2 = vector.load %arg12[%c0_2, %c17, %c0_3] : memref<10x18x32xbf16, #tpu.memory_space<vmem>>, vector<10x1x32xbf16>
    tpu.vector_store %arg12[%c0_2, %c17, %c0_3], %0 {strides = array<i32>} : memref<10x18x32xbf16, #tpu.memory_space<vmem>>, vector<10x1x32xbf16>,
    %c0_4 = arith.constant 0 : index
    %c0_5 = arith.constant 0 : index
    %c0_6 = arith.constant 0 : index
    %3 = vector.load %arg13[%c0_4, %c0_5, %c0_6] : memref<10x18x32xbf16, #tpu.memory_space<vmem>>, vector<10x1x32xbf16>
    tpu.vector_store %arg13[%c0_4, %c0_5, %c0_6], %0 {strides = array<i32>} : memref<10x18x32xbf16, #tpu.memory_space<vmem>>, vector<10x1x32xbf16>,
    %c0_7 = arith.constant 0 : index
    %c17_8 = arith.constant 17 : index
    %c0_9 = arith.constant 0 : index
    %4 = vector.load %arg13[%c0_7, %c17_8, %c0_9] : memref<10x18x32xbf16, #tpu.memory_space<vmem>>, vector<10x1x32xbf16>
    tpu.vector_store %arg13[%c0_7, %c17_8, %c0_9], %0 {strides = array<i32>} : memref<10x18x32xbf16, #tpu.memory_space<vmem>>, vector<10x1x32xbf16>,
    %c0_10 = arith.constant 0 : index
    %c0_11 = arith.constant 0 : index
    %c0_12 = arith.constant 0 : index
    %c0_13 = arith.constant 0 : index
    %5 = vector.load %arg2[%c0_10, %c0_11, %c0_12, %c0_13] : memref<1x8x16x64xbf16, #tpu.memory_space<vmem>>, vector<1x8x16x64xbf16>
    %6 = vector.shape_cast %5 : vector<1x8x16x64xbf16> to vector<8x16x64xbf16>
    %7 = vector.extract_strided_slice %6 {offsets = [0, 0, 0], sizes = [8, 16, 32], strides = [1, 1, 1]} : vector<8x16x64xbf16> to vector<8x16x32xbf16>
    %c1 = arith.constant 1 : index
    %c1_14 = arith.constant 1 : index
    %c0_15 = arith.constant 0 : index
    %8 = vector.load %arg12[%c1, %c1_14, %c0_15] : memref<10x18x32xbf16, #tpu.memory_space<vmem>>, vector<8x16x32xbf16>
    tpu.vector_store %arg12[%c1, %c1_14, %c0_15], %7 {strides = array<i32>} : memref<10x18x32xbf16, #tpu.memory_space<vmem>>, vector<8x16x32xbf16>,
    %9 = vector.extract_strided_slice %6 {offsets = [0, 0, 32], sizes = [8, 16, 32], strides = [1, 1, 1]} : vector<8x16x64xbf16> to vector<8x16x32xbf16>
    %c1_16 = arith.constant 1 : index
    %c1_17 = arith.constant 1 : index
    %c0_18 = arith.constant 0 : index
    %10 = vector.load %arg13[%c1_16, %c1_17, %c0_18] : memref<10x18x32xbf16, #tpu.memory_space<vmem>>, vector<8x16x32xbf16>
    tpu.vector_store %arg13[%c1_16, %c1_17, %c0_18], %9 {strides = array<i32>} : memref<10x18x32xbf16, #tpu.memory_space<vmem>>, vector<8x16x32xbf16>,
    %c0_i32 = arith.constant 0 : i32
    %11 = arith.cmpi sgt, %arg1, %c0_i32 : i32
    %12 = arith.extui %11 : i1 to i32
    %c0_i32_19 = arith.constant 0 : i32
    %13 = arith.cmpi ne, %12, %c0_i32_19 : i32
    scf.if %13 {
      %c0_160 = arith.constant 0 : index
      %c0_161 = arith.constant 0 : index
      %c0_162 = arith.constant 0 : index
      %c0_163 = arith.constant 0 : index
      %161 = vector.load %arg3[%c0_160, %c0_161, %c0_162, %c0_163] : memref<1x1x16x64xbf16, #tpu.memory_space<vmem>>, vector<1x1x16x64xbf16>
      %162 = vector.shape_cast %161 : vector<1x1x16x64xbf16> to vector<16x64xbf16>
      %163 = vector.extract_strided_slice %162 {offsets = [0, 0], sizes = [16, 32], strides = [1, 1]} : vector<16x64xbf16> to vector<16x32xbf16>
      %c0_164 = arith.constant 0 : index
      %c1_165 = arith.constant 1 : index
      %c0_166 = arith.constant 0 : index
      %164 = vector.load %arg12[%c0_164, %c1_165, %c0_166] : memref<10x18x32xbf16, #tpu.memory_space<vmem>>, vector<1x16x32xbf16>
      %165 = vector.shape_cast %164 : vector<1x16x32xbf16> to vector<16x32xbf16>
      %166 = vector.shape_cast %163 : vector<16x32xbf16> to vector<1x16x32xbf16>
      tpu.vector_store %arg12[%c0_164, %c1_165, %c0_166], %166 {strides = array<i32>} : memref<10x18x32xbf16, #tpu.memory_space<vmem>>, vector<1x16x32xbf16>,
      %167 = vector.extract_strided_slice %162 {offsets = [0, 32], sizes = [16, 32], strides = [1, 1]} : vector<16x64xbf16> to vector<16x32xbf16>
      %c0_167 = arith.constant 0 : index
      %c1_168 = arith.constant 1 : index
      %c0_169 = arith.constant 0 : index
      %168 = vector.load %arg13[%c0_167, %c1_168, %c0_169] : memref<10x18x32xbf16, #tpu.memory_space<vmem>>, vector<1x16x32xbf16>
      %169 = vector.shape_cast %168 : vector<1x16x32xbf16> to vector<16x32xbf16>
      %170 = vector.shape_cast %167 : vector<16x32xbf16> to vector<1x16x32xbf16>
      tpu.vector_store %arg13[%c0_167, %c1_168, %c0_169], %170 {strides = array<i32>} : memref<10x18x32xbf16, #tpu.memory_space<vmem>>, vector<1x16x32xbf16>,
    } else {
    }
    %c0_i32_20 = arith.constant 0 : i32
    %14 = arith.cmpi eq, %arg1, %c0_i32_20 : i32
    %15 = arith.extui %14 : i1 to i32
    %c0_i32_21 = arith.constant 0 : i32
    %16 = arith.cmpi ne, %15, %c0_i32_21 : i32
    scf.if %16 {
      %cst_160 = arith.constant 0.000000e+00 : bf16
      %161 = vector.broadcast %cst_160 : bf16 to vector<16x32xbf16>
      %c0_161 = arith.constant 0 : index
      %c1_162 = arith.constant 1 : index
      %c0_163 = arith.constant 0 : index
      %162 = vector.load %arg12[%c0_161, %c1_162, %c0_163] : memref<10x18x32xbf16, #tpu.memory_space<vmem>>, vector<1x16x32xbf16>
      %163 = vector.shape_cast %162 : vector<1x16x32xbf16> to vector<16x32xbf16>
      %164 = vector.shape_cast %161 : vector<16x32xbf16> to vector<1x16x32xbf16>
      tpu.vector_store %arg12[%c0_161, %c1_162, %c0_163], %164 {strides = array<i32>} : memref<10x18x32xbf16, #tpu.memory_space<vmem>>, vector<1x16x32xbf16>,
      %c0_164 = arith.constant 0 : index
      %c1_165 = arith.constant 1 : index
      %c0_166 = arith.constant 0 : index
      %165 = vector.load %arg13[%c0_164, %c1_165, %c0_166] : memref<10x18x32xbf16, #tpu.memory_space<vmem>>, vector<1x16x32xbf16>
      %166 = vector.shape_cast %165 : vector<1x16x32xbf16> to vector<16x32xbf16>
      %167 = vector.shape_cast %161 : vector<16x32xbf16> to vector<1x16x32xbf16>
      tpu.vector_store %arg13[%c0_164, %c1_165, %c0_166], %167 {strides = array<i32>} : memref<10x18x32xbf16, #tpu.memory_space<vmem>>, vector<1x16x32xbf16>,
    } else {
    }
    %c1_i32 = arith.constant 1 : i32
    %17 = arith.cmpi slt, %arg1, %c1_i32 : i32
    %18 = arith.extui %17 : i1 to i32
    %c0_i32_22 = arith.constant 0 : i32
    %19 = arith.cmpi ne, %18, %c0_i32_22 : i32
    scf.if %19 {
      %c0_160 = arith.constant 0 : index
      %c0_161 = arith.constant 0 : index
      %c0_162 = arith.constant 0 : index
      %c0_163 = arith.constant 0 : index
      %161 = vector.load %arg4[%c0_160, %c0_161, %c0_162, %c0_163] : memref<1x1x16x64xbf16, #tpu.memory_space<vmem>>, vector<1x1x16x64xbf16>
      %162 = vector.shape_cast %161 : vector<1x1x16x64xbf16> to vector<16x64xbf16>
      %163 = vector.extract_strided_slice %162 {offsets = [0, 0], sizes = [16, 32], strides = [1, 1]} : vector<16x64xbf16> to vector<16x32xbf16>
      %c9 = arith.constant 9 : index
      %c1_164 = arith.constant 1 : index
      %c0_165 = arith.constant 0 : index
      %164 = vector.load %arg12[%c9, %c1_164, %c0_165] : memref<10x18x32xbf16, #tpu.memory_space<vmem>>, vector<1x16x32xbf16>
      %165 = vector.shape_cast %164 : vector<1x16x32xbf16> to vector<16x32xbf16>
      %166 = vector.shape_cast %163 : vector<16x32xbf16> to vector<1x16x32xbf16>
      tpu.vector_store %arg12[%c9, %c1_164, %c0_165], %166 {strides = array<i32>} : memref<10x18x32xbf16, #tpu.memory_space<vmem>>, vector<1x16x32xbf16>,
      %167 = vector.extract_strided_slice %162 {offsets = [0, 32], sizes = [16, 32], strides = [1, 1]} : vector<16x64xbf16> to vector<16x32xbf16>
      %c9_166 = arith.constant 9 : index
      %c1_167 = arith.constant 1 : index
      %c0_168 = arith.constant 0 : index
      %168 = vector.load %arg13[%c9_166, %c1_167, %c0_168] : memref<10x18x32xbf16, #tpu.memory_space<vmem>>, vector<1x16x32xbf16>
      %169 = vector.shape_cast %168 : vector<1x16x32xbf16> to vector<16x32xbf16>
      %170 = vector.shape_cast %167 : vector<16x32xbf16> to vector<1x16x32xbf16>
      tpu.vector_store %arg13[%c9_166, %c1_167, %c0_168], %170 {strides = array<i32>} : memref<10x18x32xbf16, #tpu.memory_space<vmem>>, vector<1x16x32xbf16>,
    } else {
    }
    %c1_i32_23 = arith.constant 1 : i32
    %20 = arith.cmpi eq, %arg1, %c1_i32_23 : i32
    %21 = arith.extui %20 : i1 to i32
    %c0_i32_24 = arith.constant 0 : i32
    %22 = arith.cmpi ne, %21, %c0_i32_24 : i32
    scf.if %22 {
      %cst_160 = arith.constant 0.000000e+00 : bf16
      %161 = vector.broadcast %cst_160 : bf16 to vector<16x32xbf16>
      %c9 = arith.constant 9 : index
      %c1_161 = arith.constant 1 : index
      %c0_162 = arith.constant 0 : index
      %162 = vector.load %arg12[%c9, %c1_161, %c0_162] : memref<10x18x32xbf16, #tpu.memory_space<vmem>>, vector<1x16x32xbf16>
      %163 = vector.shape_cast %162 : vector<1x16x32xbf16> to vector<16x32xbf16>
      %164 = vector.shape_cast %161 : vector<16x32xbf16> to vector<1x16x32xbf16>
      tpu.vector_store %arg12[%c9, %c1_161, %c0_162], %164 {strides = array<i32>} : memref<10x18x32xbf16, #tpu.memory_space<vmem>>, vector<1x16x32xbf16>,
      %c9_163 = arith.constant 9 : index
      %c1_164 = arith.constant 1 : index
      %c0_165 = arith.constant 0 : index
      %165 = vector.load %arg13[%c9_163, %c1_164, %c0_165] : memref<10x18x32xbf16, #tpu.memory_space<vmem>>, vector<1x16x32xbf16>
      %166 = vector.shape_cast %165 : vector<1x16x32xbf16> to vector<16x32xbf16>
      %167 = vector.shape_cast %161 : vector<16x32xbf16> to vector<1x16x32xbf16>
      tpu.vector_store %arg13[%c9_163, %c1_164, %c0_165], %167 {strides = array<i32>} : memref<10x18x32xbf16, #tpu.memory_space<vmem>>, vector<1x16x32xbf16>,
    } else {
    }
    %cst_25 = arith.constant 0.000000e+00 : f32
    %23 = vector.broadcast %cst_25 : f32 to vector<128x32xf32>
    %cst_26 = arith.constant 0.000000e+00 : f32
    %24 = vector.broadcast %cst_26 : f32 to vector<128x32xf32>
    %c0_27 = arith.constant 0 : index
    %c0_28 = arith.constant 0 : index
    %c0_29 = arith.constant 0 : index
    %25 = vector.load %arg12[%c0_27, %c0_28, %c0_29] : memref<10x18x32xbf16, #tpu.memory_space<vmem>>, vector<8x16x32xbf16>
    %26 = vector.shape_cast %25 : vector<8x16x32xbf16> to vector<128x32xbf16>
    %c0_30 = arith.constant 0 : index
    %c0_31 = arith.constant 0 : index
    %c0_32 = arith.constant 0 : index
    %27 = vector.load %arg5[%c0_30, %c0_31, %c0_32] : memref<9x32x32xbf16, #tpu.memory_space<vmem>>, vector<1x32x32xbf16>
    %28 = vector.shape_cast %27 : vector<1x32x32xbf16> to vector<32x32xbf16>
    %cst_33 = arith.constant dense<0.000000e+00> : vector<128x32xf32>
    %29 = tpu.matmul %26, %28, %cst_33 {dimension_numbers = #tpu.dot_dimension_numbers<[1], [0], [0], [1], [0, 0, 1, 1], [], []>} : vector<128x32xbf16>, vector<32x32xbf16>, vector<128x32xf32> -> vector<128x32xf32>
    %30 = arith.addf %23, %29 : vector<128x32xf32>
    %c0_34 = arith.constant 0 : index
    %c0_35 = arith.constant 0 : index
    %c0_36 = arith.constant 0 : index
    %31 = vector.load %arg13[%c0_34, %c0_35, %c0_36] : memref<10x18x32xbf16, #tpu.memory_space<vmem>>, vector<8x16x32xbf16>
    %32 = vector.shape_cast %31 : vector<8x16x32xbf16> to vector<128x32xbf16>
    %c0_37 = arith.constant 0 : index
    %c0_38 = arith.constant 0 : index
    %c0_39 = arith.constant 0 : index
    %33 = vector.load %arg7[%c0_37, %c0_38, %c0_39] : memref<9x32x32xbf16, #tpu.memory_space<vmem>>, vector<1x32x32xbf16>
    %34 = vector.shape_cast %33 : vector<1x32x32xbf16> to vector<32x32xbf16>
    %cst_40 = arith.constant dense<0.000000e+00> : vector<128x32xf32>
    %35 = tpu.matmul %32, %34, %cst_40 {dimension_numbers = #tpu.dot_dimension_numbers<[1], [0], [0], [1], [0, 0, 1, 1], [], []>} : vector<128x32xbf16>, vector<32x32xbf16>, vector<128x32xf32> -> vector<128x32xf32>
    %36 = arith.addf %24, %35 : vector<128x32xf32>
    %c0_41 = arith.constant 0 : index
    %c1_42 = arith.constant 1 : index
    %c0_43 = arith.constant 0 : index
    %37 = vector.load %arg12[%c0_41, %c1_42, %c0_43] : memref<10x18x32xbf16, #tpu.memory_space<vmem>>, vector<8x16x32xbf16>
    %38 = vector.shape_cast %37 : vector<8x16x32xbf16> to vector<128x32xbf16>
    %c1_44 = arith.constant 1 : index
    %c0_45 = arith.constant 0 : index
    %c0_46 = arith.constant 0 : index
    %39 = vector.load %arg5[%c1_44, %c0_45, %c0_46] : memref<9x32x32xbf16, #tpu.memory_space<vmem>>, vector<1x32x32xbf16>
    %40 = vector.shape_cast %39 : vector<1x32x32xbf16> to vector<32x32xbf16>
    %cst_47 = arith.constant dense<0.000000e+00> : vector<128x32xf32>
    %41 = tpu.matmul %38, %40, %cst_47 {dimension_numbers = #tpu.dot_dimension_numbers<[1], [0], [0], [1], [0, 0, 1, 1], [], []>} : vector<128x32xbf16>, vector<32x32xbf16>, vector<128x32xf32> -> vector<128x32xf32>
    %42 = arith.addf %30, %41 : vector<128x32xf32>
    %c0_48 = arith.constant 0 : index
    %c1_49 = arith.constant 1 : index
    %c0_50 = arith.constant 0 : index
    %43 = vector.load %arg13[%c0_48, %c1_49, %c0_50] : memref<10x18x32xbf16, #tpu.memory_space<vmem>>, vector<8x16x32xbf16>
    %44 = vector.shape_cast %43 : vector<8x16x32xbf16> to vector<128x32xbf16>
    %c1_51 = arith.constant 1 : index
    %c0_52 = arith.constant 0 : index
    %c0_53 = arith.constant 0 : index
    %45 = vector.load %arg7[%c1_51, %c0_52, %c0_53] : memref<9x32x32xbf16, #tpu.memory_space<vmem>>, vector<1x32x32xbf16>
    %46 = vector.shape_cast %45 : vector<1x32x32xbf16> to vector<32x32xbf16>
    %cst_54 = arith.constant dense<0.000000e+00> : vector<128x32xf32>
    %47 = tpu.matmul %44, %46, %cst_54 {dimension_numbers = #tpu.dot_dimension_numbers<[1], [0], [0], [1], [0, 0, 1, 1], [], []>} : vector<128x32xbf16>, vector<32x32xbf16>, vector<128x32xf32> -> vector<128x32xf32>
    %48 = arith.addf %36, %47 : vector<128x32xf32>
    %c0_55 = arith.constant 0 : index
    %c2 = arith.constant 2 : index
    %c0_56 = arith.constant 0 : index
    %49 = vector.load %arg12[%c0_55, %c2, %c0_56] : memref<10x18x32xbf16, #tpu.memory_space<vmem>>, vector<8x16x32xbf16>
    %50 = vector.shape_cast %49 : vector<8x16x32xbf16> to vector<128x32xbf16>
    %c2_57 = arith.constant 2 : index
    %c0_58 = arith.constant 0 : index
    %c0_59 = arith.constant 0 : index
    %51 = vector.load %arg5[%c2_57, %c0_58, %c0_59] : memref<9x32x32xbf16, #tpu.memory_space<vmem>>, vector<1x32x32xbf16>
    %52 = vector.shape_cast %51 : vector<1x32x32xbf16> to vector<32x32xbf16>
    %cst_60 = arith.constant dense<0.000000e+00> : vector<128x32xf32>
    %53 = tpu.matmul %50, %52, %cst_60 {dimension_numbers = #tpu.dot_dimension_numbers<[1], [0], [0], [1], [0, 0, 1, 1], [], []>} : vector<128x32xbf16>, vector<32x32xbf16>, vector<128x32xf32> -> vector<128x32xf32>
    %54 = arith.addf %42, %53 : vector<128x32xf32>
    %c0_61 = arith.constant 0 : index
    %c2_62 = arith.constant 2 : index
    %c0_63 = arith.constant 0 : index
    %55 = vector.load %arg13[%c0_61, %c2_62, %c0_63] : memref<10x18x32xbf16, #tpu.memory_space<vmem>>, vector<8x16x32xbf16>
    %56 = vector.shape_cast %55 : vector<8x16x32xbf16> to vector<128x32xbf16>
    %c2_64 = arith.constant 2 : index
    %c0_65 = arith.constant 0 : index
    %c0_66 = arith.constant 0 : index
    %57 = vector.load %arg7[%c2_64, %c0_65, %c0_66] : memref<9x32x32xbf16, #tpu.memory_space<vmem>>, vector<1x32x32xbf16>
    %58 = vector.shape_cast %57 : vector<1x32x32xbf16> to vector<32x32xbf16>
    %cst_67 = arith.constant dense<0.000000e+00> : vector<128x32xf32>
    %59 = tpu.matmul %56, %58, %cst_67 {dimension_numbers = #tpu.dot_dimension_numbers<[1], [0], [0], [1], [0, 0, 1, 1], [], []>} : vector<128x32xbf16>, vector<32x32xbf16>, vector<128x32xf32> -> vector<128x32xf32>
    %60 = arith.addf %48, %59 : vector<128x32xf32>
    %c1_68 = arith.constant 1 : index
    %c0_69 = arith.constant 0 : index
    %c0_70 = arith.constant 0 : index
    %61 = vector.load %arg12[%c1_68, %c0_69, %c0_70] : memref<10x18x32xbf16, #tpu.memory_space<vmem>>, vector<8x16x32xbf16>
    %62 = vector.shape_cast %61 : vector<8x16x32xbf16> to vector<128x32xbf16>
    %c3 = arith.constant 3 : index
    %c0_71 = arith.constant 0 : index
    %c0_72 = arith.constant 0 : index
    %63 = vector.load %arg5[%c3, %c0_71, %c0_72] : memref<9x32x32xbf16, #tpu.memory_space<vmem>>, vector<1x32x32xbf16>
    %64 = vector.shape_cast %63 : vector<1x32x32xbf16> to vector<32x32xbf16>
    %cst_73 = arith.constant dense<0.000000e+00> : vector<128x32xf32>
    %65 = tpu.matmul %62, %64, %cst_73 {dimension_numbers = #tpu.dot_dimension_numbers<[1], [0], [0], [1], [0, 0, 1, 1], [], []>} : vector<128x32xbf16>, vector<32x32xbf16>, vector<128x32xf32> -> vector<128x32xf32>
    %66 = arith.addf %54, %65 : vector<128x32xf32>
    %c1_74 = arith.constant 1 : index
    %c0_75 = arith.constant 0 : index
    %c0_76 = arith.constant 0 : index
    %67 = vector.load %arg13[%c1_74, %c0_75, %c0_76] : memref<10x18x32xbf16, #tpu.memory_space<vmem>>, vector<8x16x32xbf16>
    %68 = vector.shape_cast %67 : vector<8x16x32xbf16> to vector<128x32xbf16>
    %c3_77 = arith.constant 3 : index
    %c0_78 = arith.constant 0 : index
    %c0_79 = arith.constant 0 : index
    %69 = vector.load %arg7[%c3_77, %c0_78, %c0_79] : memref<9x32x32xbf16, #tpu.memory_space<vmem>>, vector<1x32x32xbf16>
    %70 = vector.shape_cast %69 : vector<1x32x32xbf16> to vector<32x32xbf16>
    %cst_80 = arith.constant dense<0.000000e+00> : vector<128x32xf32>
    %71 = tpu.matmul %68, %70, %cst_80 {dimension_numbers = #tpu.dot_dimension_numbers<[1], [0], [0], [1], [0, 0, 1, 1], [], []>} : vector<128x32xbf16>, vector<32x32xbf16>, vector<128x32xf32> -> vector<128x32xf32>
    %72 = arith.addf %60, %71 : vector<128x32xf32>
    %c1_81 = arith.constant 1 : index
    %c1_82 = arith.constant 1 : index
    %c0_83 = arith.constant 0 : index
    %73 = vector.load %arg12[%c1_81, %c1_82, %c0_83] : memref<10x18x32xbf16, #tpu.memory_space<vmem>>, vector<8x16x32xbf16>
    %74 = vector.shape_cast %73 : vector<8x16x32xbf16> to vector<128x32xbf16>
    %c4 = arith.constant 4 : index
    %c0_84 = arith.constant 0 : index
    %c0_85 = arith.constant 0 : index
    %75 = vector.load %arg5[%c4, %c0_84, %c0_85] : memref<9x32x32xbf16, #tpu.memory_space<vmem>>, vector<1x32x32xbf16>
    %76 = vector.shape_cast %75 : vector<1x32x32xbf16> to vector<32x32xbf16>
    %cst_86 = arith.constant dense<0.000000e+00> : vector<128x32xf32>
    %77 = tpu.matmul %74, %76, %cst_86 {dimension_numbers = #tpu.dot_dimension_numbers<[1], [0], [0], [1], [0, 0, 1, 1], [], []>} : vector<128x32xbf16>, vector<32x32xbf16>, vector<128x32xf32> -> vector<128x32xf32>
    %78 = arith.addf %66, %77 : vector<128x32xf32>
    %c1_87 = arith.constant 1 : index
    %c1_88 = arith.constant 1 : index
    %c0_89 = arith.constant 0 : index
    %79 = vector.load %arg13[%c1_87, %c1_88, %c0_89] : memref<10x18x32xbf16, #tpu.memory_space<vmem>>, vector<8x16x32xbf16>
    %80 = vector.shape_cast %79 : vector<8x16x32xbf16> to vector<128x32xbf16>
    %c4_90 = arith.constant 4 : index
    %c0_91 = arith.constant 0 : index
    %c0_92 = arith.constant 0 : index
    %81 = vector.load %arg7[%c4_90, %c0_91, %c0_92] : memref<9x32x32xbf16, #tpu.memory_space<vmem>>, vector<1x32x32xbf16>
    %82 = vector.shape_cast %81 : vector<1x32x32xbf16> to vector<32x32xbf16>
    %cst_93 = arith.constant dense<0.000000e+00> : vector<128x32xf32>
    %83 = tpu.matmul %80, %82, %cst_93 {dimension_numbers = #tpu.dot_dimension_numbers<[1], [0], [0], [1], [0, 0, 1, 1], [], []>} : vector<128x32xbf16>, vector<32x32xbf16>, vector<128x32xf32> -> vector<128x32xf32>
    %84 = arith.addf %72, %83 : vector<128x32xf32>
    %c1_94 = arith.constant 1 : index
    %c2_95 = arith.constant 2 : index
    %c0_96 = arith.constant 0 : index
    %85 = vector.load %arg12[%c1_94, %c2_95, %c0_96] : memref<10x18x32xbf16, #tpu.memory_space<vmem>>, vector<8x16x32xbf16>
    %86 = vector.shape_cast %85 : vector<8x16x32xbf16> to vector<128x32xbf16>
    %c5 = arith.constant 5 : index
    %c0_97 = arith.constant 0 : index
    %c0_98 = arith.constant 0 : index
    %87 = vector.load %arg5[%c5, %c0_97, %c0_98] : memref<9x32x32xbf16, #tpu.memory_space<vmem>>, vector<1x32x32xbf16>
    %88 = vector.shape_cast %87 : vector<1x32x32xbf16> to vector<32x32xbf16>
    %cst_99 = arith.constant dense<0.000000e+00> : vector<128x32xf32>
    %89 = tpu.matmul %86, %88, %cst_99 {dimension_numbers = #tpu.dot_dimension_numbers<[1], [0], [0], [1], [0, 0, 1, 1], [], []>} : vector<128x32xbf16>, vector<32x32xbf16>, vector<128x32xf32> -> vector<128x32xf32>
    %90 = arith.addf %78, %89 : vector<128x32xf32>
    %c1_100 = arith.constant 1 : index
    %c2_101 = arith.constant 2 : index
    %c0_102 = arith.constant 0 : index
    %91 = vector.load %arg13[%c1_100, %c2_101, %c0_102] : memref<10x18x32xbf16, #tpu.memory_space<vmem>>, vector<8x16x32xbf16>
    %92 = vector.shape_cast %91 : vector<8x16x32xbf16> to vector<128x32xbf16>
    %c5_103 = arith.constant 5 : index
    %c0_104 = arith.constant 0 : index
    %c0_105 = arith.constant 0 : index
    %93 = vector.load %arg7[%c5_103, %c0_104, %c0_105] : memref<9x32x32xbf16, #tpu.memory_space<vmem>>, vector<1x32x32xbf16>
    %94 = vector.shape_cast %93 : vector<1x32x32xbf16> to vector<32x32xbf16>
    %cst_106 = arith.constant dense<0.000000e+00> : vector<128x32xf32>
    %95 = tpu.matmul %92, %94, %cst_106 {dimension_numbers = #tpu.dot_dimension_numbers<[1], [0], [0], [1], [0, 0, 1, 1], [], []>} : vector<128x32xbf16>, vector<32x32xbf16>, vector<128x32xf32> -> vector<128x32xf32>
    %96 = arith.addf %84, %95 : vector<128x32xf32>
    %c2_107 = arith.constant 2 : index
    %c0_108 = arith.constant 0 : index
    %c0_109 = arith.constant 0 : index
    %97 = vector.load %arg12[%c2_107, %c0_108, %c0_109] : memref<10x18x32xbf16, #tpu.memory_space<vmem>>, vector<8x16x32xbf16>
    %98 = vector.shape_cast %97 : vector<8x16x32xbf16> to vector<128x32xbf16>
    %c6 = arith.constant 6 : index
    %c0_110 = arith.constant 0 : index
    %c0_111 = arith.constant 0 : index
    %99 = vector.load %arg5[%c6, %c0_110, %c0_111] : memref<9x32x32xbf16, #tpu.memory_space<vmem>>, vector<1x32x32xbf16>
    %100 = vector.shape_cast %99 : vector<1x32x32xbf16> to vector<32x32xbf16>
    %cst_112 = arith.constant dense<0.000000e+00> : vector<128x32xf32>
    %101 = tpu.matmul %98, %100, %cst_112 {dimension_numbers = #tpu.dot_dimension_numbers<[1], [0], [0], [1], [0, 0, 1, 1], [], []>} : vector<128x32xbf16>, vector<32x32xbf16>, vector<128x32xf32> -> vector<128x32xf32>
    %102 = arith.addf %90, %101 : vector<128x32xf32>
    %c2_113 = arith.constant 2 : index
    %c0_114 = arith.constant 0 : index
    %c0_115 = arith.constant 0 : index
    %103 = vector.load %arg13[%c2_113, %c0_114, %c0_115] : memref<10x18x32xbf16, #tpu.memory_space<vmem>>, vector<8x16x32xbf16>
    %104 = vector.shape_cast %103 : vector<8x16x32xbf16> to vector<128x32xbf16>
    %c6_116 = arith.constant 6 : index
    %c0_117 = arith.constant 0 : index
    %c0_118 = arith.constant 0 : index
    %105 = vector.load %arg7[%c6_116, %c0_117, %c0_118] : memref<9x32x32xbf16, #tpu.memory_space<vmem>>, vector<1x32x32xbf16>
    %106 = vector.shape_cast %105 : vector<1x32x32xbf16> to vector<32x32xbf16>
    %cst_119 = arith.constant dense<0.000000e+00> : vector<128x32xf32>
    %107 = tpu.matmul %104, %106, %cst_119 {dimension_numbers = #tpu.dot_dimension_numbers<[1], [0], [0], [1], [0, 0, 1, 1], [], []>} : vector<128x32xbf16>, vector<32x32xbf16>, vector<128x32xf32> -> vector<128x32xf32>
    %108 = arith.addf %96, %107 : vector<128x32xf32>
    %c2_120 = arith.constant 2 : index
    %c1_121 = arith.constant 1 : index
    %c0_122 = arith.constant 0 : index
    %109 = vector.load %arg12[%c2_120, %c1_121, %c0_122] : memref<10x18x32xbf16, #tpu.memory_space<vmem>>, vector<8x16x32xbf16>
    %110 = vector.shape_cast %109 : vector<8x16x32xbf16> to vector<128x32xbf16>
    %c7 = arith.constant 7 : index
    %c0_123 = arith.constant 0 : index
    %c0_124 = arith.constant 0 : index
    %111 = vector.load %arg5[%c7, %c0_123, %c0_124] : memref<9x32x32xbf16, #tpu.memory_space<vmem>>, vector<1x32x32xbf16>
    %112 = vector.shape_cast %111 : vector<1x32x32xbf16> to vector<32x32xbf16>
    %cst_125 = arith.constant dense<0.000000e+00> : vector<128x32xf32>
    %113 = tpu.matmul %110, %112, %cst_125 {dimension_numbers = #tpu.dot_dimension_numbers<[1], [0], [0], [1], [0, 0, 1, 1], [], []>} : vector<128x32xbf16>, vector<32x32xbf16>, vector<128x32xf32> -> vector<128x32xf32>
    %114 = arith.addf %102, %113 : vector<128x32xf32>
    %c2_126 = arith.constant 2 : index
    %c1_127 = arith.constant 1 : index
    %c0_128 = arith.constant 0 : index
    %115 = vector.load %arg13[%c2_126, %c1_127, %c0_128] : memref<10x18x32xbf16, #tpu.memory_space<vmem>>, vector<8x16x32xbf16>
    %116 = vector.shape_cast %115 : vector<8x16x32xbf16> to vector<128x32xbf16>
    %c7_129 = arith.constant 7 : index
    %c0_130 = arith.constant 0 : index
    %c0_131 = arith.constant 0 : index
    %117 = vector.load %arg7[%c7_129, %c0_130, %c0_131] : memref<9x32x32xbf16, #tpu.memory_space<vmem>>, vector<1x32x32xbf16>
    %118 = vector.shape_cast %117 : vector<1x32x32xbf16> to vector<32x32xbf16>
    %cst_132 = arith.constant dense<0.000000e+00> : vector<128x32xf32>
    %119 = tpu.matmul %116, %118, %cst_132 {dimension_numbers = #tpu.dot_dimension_numbers<[1], [0], [0], [1], [0, 0, 1, 1], [], []>} : vector<128x32xbf16>, vector<32x32xbf16>, vector<128x32xf32> -> vector<128x32xf32>
    %120 = arith.addf %108, %119 : vector<128x32xf32>
    %c2_133 = arith.constant 2 : index
    %c2_134 = arith.constant 2 : index
    %c0_135 = arith.constant 0 : index
    %121 = vector.load %arg12[%c2_133, %c2_134, %c0_135] : memref<10x18x32xbf16, #tpu.memory_space<vmem>>, vector<8x16x32xbf16>
    %122 = vector.shape_cast %121 : vector<8x16x32xbf16> to vector<128x32xbf16>
    %c8 = arith.constant 8 : index
    %c0_136 = arith.constant 0 : index
    %c0_137 = arith.constant 0 : index
    %123 = vector.load %arg5[%c8, %c0_136, %c0_137] : memref<9x32x32xbf16, #tpu.memory_space<vmem>>, vector<1x32x32xbf16>
    %124 = vector.shape_cast %123 : vector<1x32x32xbf16> to vector<32x32xbf16>
    %cst_138 = arith.constant dense<0.000000e+00> : vector<128x32xf32>
    %125 = tpu.matmul %122, %124, %cst_138 {dimension_numbers = #tpu.dot_dimension_numbers<[1], [0], [0], [1], [0, 0, 1, 1], [], []>} : vector<128x32xbf16>, vector<32x32xbf16>, vector<128x32xf32> -> vector<128x32xf32>
    %126 = arith.addf %114, %125 : vector<128x32xf32>
    %c2_139 = arith.constant 2 : index
    %c2_140 = arith.constant 2 : index
    %c0_141 = arith.constant 0 : index
    %127 = vector.load %arg13[%c2_139, %c2_140, %c0_141] : memref<10x18x32xbf16, #tpu.memory_space<vmem>>, vector<8x16x32xbf16>
    %128 = vector.shape_cast %127 : vector<8x16x32xbf16> to vector<128x32xbf16>
    %c8_142 = arith.constant 8 : index
    %c0_143 = arith.constant 0 : index
    %c0_144 = arith.constant 0 : index
    %129 = vector.load %arg7[%c8_142, %c0_143, %c0_144] : memref<9x32x32xbf16, #tpu.memory_space<vmem>>, vector<1x32x32xbf16>
    %130 = vector.shape_cast %129 : vector<1x32x32xbf16> to vector<32x32xbf16>
    %cst_145 = arith.constant dense<0.000000e+00> : vector<128x32xf32>
    %131 = tpu.matmul %128, %130, %cst_145 {dimension_numbers = #tpu.dot_dimension_numbers<[1], [0], [0], [1], [0, 0, 1, 1], [], []>} : vector<128x32xbf16>, vector<32x32xbf16>, vector<128x32xf32> -> vector<128x32xf32>
    %132 = arith.addf %120, %131 : vector<128x32xf32>
    %c0_146 = arith.constant 0 : index
    %c0_147 = arith.constant 0 : index
    %133 = vector.load %arg6[%c0_146, %c0_147] : memref<1x32xf32, #tpu.memory_space<vmem>>, vector<1x32xf32>
    %134 = vector.broadcast %133 : vector<1x32xf32> to vector<128x32xf32>
    %135 = arith.addf %126, %134 : vector<128x32xf32>
    %136 = arith.negf %135 : vector<128x32xf32>
    %137 = math.exp %136 : vector<128x32xf32>
    %cst_148 = arith.constant 1.000000e+00 : f32
    %138 = vector.broadcast %cst_148 : f32 to vector<128x32xf32>
    %139 = arith.addf %138, %137 : vector<128x32xf32>
    %140 = arith.divf %138, %139 : vector<128x32xf32>
    %141 = arith.mulf %135, %140 : vector<128x32xf32>
    %c0_149 = arith.constant 0 : index
    %c0_150 = arith.constant 0 : index
    %142 = vector.load %arg8[%c0_149, %c0_150] : memref<1x32xf32, #tpu.memory_space<vmem>>, vector<1x32xf32>
    %143 = vector.broadcast %142 : vector<1x32xf32> to vector<128x32xf32>
    %144 = arith.addf %132, %143 : vector<128x32xf32>
    %145 = arith.negf %144 : vector<128x32xf32>
    %146 = math.exp %145 : vector<128x32xf32>
    %cst_151 = arith.constant 1.000000e+00 : f32
    %147 = vector.broadcast %cst_151 : f32 to vector<128x32xf32>
    %148 = arith.addf %147, %146 : vector<128x32xf32>
    %149 = arith.divf %147, %148 : vector<128x32xf32>
    %150 = arith.mulf %144, %149 : vector<128x32xf32>
    %151 = tpu.concatenate %141, %150 in 1 : vector<128x32xf32>, vector<128x32xf32> -> vector<128x64xf32>
    %152 = arith.truncf %151 : vector<128x64xf32> to vector<128x64xbf16>
    %c0_152 = arith.constant 0 : index
    %c0_153 = arith.constant 0 : index
    %153 = vector.load %arg9[%c0_152, %c0_153] : memref<13x64xbf16, #tpu.memory_space<vmem>>, vector<13x64xbf16>
    %cst_154 = arith.constant dense<0.000000e+00> : vector<13x128xf32>
    %154 = tpu.matmul %153, %152, %cst_154 {dimension_numbers = #tpu.dot_dimension_numbers<[1], [1], [0], [0], [0, 0, 1, 0], [], []>} : vector<13x64xbf16>, vector<128x64xbf16>, vector<13x128xf32> -> vector<13x128xf32>
    %c0_155 = arith.constant 0 : index
    %c0_156 = arith.constant 0 : index
    %155 = vector.load %arg10[%c0_155, %c0_156] : memref<13x1xf32, #tpu.memory_space<vmem>>, vector<13x1xf32>
    %156 = vector.broadcast %155 : vector<13x1xf32> to vector<13x128xf32>
    %157 = arith.addf %154, %156 : vector<13x128xf32>
    %c0_157 = arith.constant 0 : index
    %c0_158 = arith.constant 0 : index
    %c0_159 = arith.constant 0 : index
    %158 = vector.load %arg11[%c0_157, %c0_158, %c0_159] : memref<1x13x128xf32, #tpu.memory_space<vmem>>, vector<1x13x128xf32>
    %159 = vector.shape_cast %158 : vector<1x13x128xf32> to vector<13x128xf32>
    %160 = vector.shape_cast %157 : vector<13x128xf32> to vector<1x13x128xf32>
    tpu.vector_store %arg11[%c0_157, %c0_158, %c0_159], %160 {strides = array<i32>} : memref<1x13x128xf32, #tpu.memory_space<vmem>>, vector<1x13x128xf32>,
    return
  }
  func.func @transform_0(%arg0: i32, %arg1: i32) -> (i32, i32, i32, i32) {
    %c0_i32 = arith.constant 0 : i32
    %c0_i32_0 = arith.constant 0 : i32
    %c0_i32_1 = arith.constant 0 : i32
    return %arg0, %arg1, %c0_i32, %c0_i32_0 : i32, i32, i32, i32
  }
  func.func @transform_1(%arg0: i32, %arg1: i32) -> (i32, i32, i32, i32) {
    %c8_i32 = arith.constant 8 : i32
    %0 = arith.muli %arg1, %c8_i32 : i32
    %c1_i32 = arith.constant 1 : i32
    %1 = arith.subi %0, %c1_i32 : i32
    %c0_i32 = arith.constant 0 : i32
    %2 = arith.maxsi %1, %c0_i32 : i32
    %c0_i32_0 = arith.constant 0 : i32
    %c0_i32_1 = arith.constant 0 : i32
    %c0_i32_2 = arith.constant 0 : i32
    return %arg0, %2, %c0_i32_0, %c0_i32_1 : i32, i32, i32, i32
  }
  func.func @transform_2(%arg0: i32, %arg1: i32) -> (i32, i32, i32, i32) {
    %c1_i32 = arith.constant 1 : i32
    %0 = arith.addi %arg1, %c1_i32 : i32
    %c8_i32 = arith.constant 8 : i32
    %1 = arith.muli %0, %c8_i32 : i32
    %c15_i32 = arith.constant 15 : i32
    %2 = arith.minsi %1, %c15_i32 : i32
    %c0_i32 = arith.constant 0 : i32
    %c0_i32_0 = arith.constant 0 : i32
    %c0_i32_1 = arith.constant 0 : i32
    return %arg0, %2, %c0_i32, %c0_i32_0 : i32, i32, i32, i32
  }
  func.func @transform_3(%arg0: i32, %arg1: i32) -> (i32, i32, i32) {
    %c0_i32 = arith.constant 0 : i32
    %c0_i32_0 = arith.constant 0 : i32
    %c0_i32_1 = arith.constant 0 : i32
    %c0_i32_2 = arith.constant 0 : i32
    return %c0_i32, %c0_i32_0, %c0_i32_1 : i32, i32, i32
  }
  func.func @transform_4(%arg0: i32, %arg1: i32) -> (i32, i32) {
    %c0_i32 = arith.constant 0 : i32
    %c0_i32_0 = arith.constant 0 : i32
    %c0_i32_1 = arith.constant 0 : i32
    return %c0_i32, %c0_i32_0 : i32, i32
  }
  func.func @transform_5(%arg0: i32, %arg1: i32) -> (i32, i32, i32) {
    %c0_i32 = arith.constant 0 : i32
    %c0_i32_0 = arith.constant 0 : i32
    %c0_i32_1 = arith.constant 0 : i32
    %c0_i32_2 = arith.constant 0 : i32
    return %c0_i32, %c0_i32_0, %c0_i32_1 : i32, i32, i32
  }
  func.func @transform_6(%arg0: i32, %arg1: i32) -> (i32, i32) {
    %c0_i32 = arith.constant 0 : i32
    %c0_i32_0 = arith.constant 0 : i32
    %c0_i32_1 = arith.constant 0 : i32
    return %c0_i32, %c0_i32_0 : i32, i32
  }
  func.func @transform_7(%arg0: i32, %arg1: i32) -> (i32, i32) {
    %c0_i32 = arith.constant 0 : i32
    %c0_i32_0 = arith.constant 0 : i32
    %c0_i32_1 = arith.constant 0 : i32
    return %c0_i32, %c0_i32_0 : i32, i32
  }
  func.func @transform_8(%arg0: i32, %arg1: i32) -> (i32, i32) {
    %c0_i32 = arith.constant 0 : i32
    %c0_i32_0 = arith.constant 0 : i32
    %c0_i32_1 = arith.constant 0 : i32
    return %c0_i32, %c0_i32_0 : i32, i32
  }
  func.func @transform_9(%arg0: i32, %arg1: i32) -> (i32, i32, i32) {
    %c0_i32 = arith.constant 0 : i32
    %c0_i32_0 = arith.constant 0 : i32
    return %arg0, %c0_i32, %arg1 : i32, i32, i32
  }
}

</mosaic_0001>

<bundles_post_ra>
// kernel: dna_head_forward.2
= control target key start
LH: loop header
LB: loop body
LE: loop exit
PB: predicated region body
PF: predicated region fallthrough
CT: control target
= control target key end

     0   :  { %s6572_s0 = inlined_call_operand.hbm [shape: bf16[2,16,16,32], index: 0, kind: input, shape index: {}, may-alias: {0,1,2}]   ;;  %s6573_s1 = inlined_call_operand.hbm [shape: bf16[2,16,16,32], index: 1, kind: input, shape index: {}, may-alias: {0,1,2}]   ;;  %s6574_s2 = inlined_call_operand.hbm [shape: bf16[2,16,16,32], index: 2, kind: input, shape index: {}, may-alias: {0,1,2}]   ;;  %s6575_s3 = inlined_call_operand.hbm [shape: bf16[9,32,64], index: 3, kind: input, shape index: {}]   ;;  %s6576_s4 = inlined_call_operand.hbm [shape: f32[1,64], index: 4, kind: input, shape index: {}]   ;;  %s6577_s5 = inlined_call_operand.hbm [shape: bf16[2,16,16,64], index: 5, kind: output, shape index: {}]  }
   0x1   :  { %6604 = sst [smem:[#allocation32_spill]] %s6572_s0 }
   0x2   :  { %6605 = sst [smem:[#allocation33_spill]] %s6573_s1 }
   0x3   :  { %6606 = sst [smem:[#allocation34_spill]] %s6574_s2 }
   0x4   :  { %6607 = sst [smem:[#allocation35_spill]] %s6575_s3 }
   0x5   :  { %6608 = sst [smem:[#allocation36_spill]] %s6576_s4 }
   0x6   :  { %6609 = sst [smem:[#allocation37_spill]] %s6577_s5 }
   0x7   :  { %10 = vsyncpa [#allocation4], 0 }
   0x8   :  { %12 = vsyncpa [#allocation4 + $0x1], 0 }
   0x9   :  { %13 = vsyncpa [#allocation7], 0 }
   0xa   :  { %15 = vsyncpa [#allocation7 + $0x1], 0 }
   0xb   :  { %16 = vsyncpa [#allocation10], 0 }
   0xc   :  { %17 = vsyncpa [#allocation5], 0 }
   0xd   :  { %19 = vsyncpa [#allocation5 + $0x1], 0  ;;  %s5064_s18 = smov 0   ;;  %s5066_s19 = smov 0  }
   0xe   :  { %s5068_s20 = smov 0   ;;  %s5070_s21 = smov 0  }
   0xf   :  { %s5072_s22 = smov 0   ;;  %s5074_s23 = smov 0  }
  0x10   :  { %s5076_s24 = smov 0   ;;  %s5078_s25 = smov 0  }
  0x11   :  { %s5080_s26 = smov 0   ;;  %s5082_s27 = smov 0  }
  0x12   :  { %s5084_s28 = smov 0   ;;  %s5086_s29 = smov 0  }
  0x13   :  { %s5088_s30 = smov 0   ;;  %s5090_s6 = smov 0  }
  0x14 LB: > { %6610 = sst [smem:[#allocation18_spill]] %s4968_s18  ;;  %s5135_s7 = sadd.s32 4294967295, %s5020_s6   ;;  %s5020_s6 = sphi %s5090_s6, %s25_s6   ;;  %s5016_s30 = sphi %s5088_s30, %s6705_s30   ;;  %s5012_s29 = sphi %s5086_s29, %s6704_s29   ;;  %s5008_s28 = sphi %s5084_s28, %s6713_s28   ;;  %s5004_s27 = sphi %s5082_s27, %s6702_s27   ;;  %s5000_s26 = sphi %s5080_s26, %s6712_s26   ;;  %s4996_s25 = sphi %s5078_s25, %s6711_s25   ;;  %s4992_s24 = sphi %s5076_s24, %s6710_s24   ;;  %s4988_s23 = sphi %s5074_s23, %s6709_s23   ;;  %s4984_s22 = sphi %s5072_s22, %s6708_s22   ;;  %s4980_s21 = sphi %s5070_s21, %s6707_s21   ;;  %s4976_s20 = sphi %s5068_s20, %s6706_s20   ;;  %s4972_s19 = sphi %s5066_s19, %s6699_s19   ;;  %s4968_s18 = sphi %s5064_s18, %s6698_s18  }
  0x15   : > { %6611 = sst [smem:[#allocation19_spill]] %s4972_s19  ;;  %p3762_p0 = scmp.ge.s32.totalorder %s5020_s6, 1 }
  0x16   : > { %6612 = sst [smem:[#allocation20_spill]] %s4976_s20  ;;  %p6578_p1 = scmp.eq.s32.totalorder %s5135_s7, 0 }
  0x17   : > { %6613 = sst [smem:[#allocation21_spill]] %s4984_s22  ;;  %p212_p3 = scmp.lt.s32.totalorder %s5020_s6, 5 }
  0x18   : > { %6614 = sst [smem:[#allocation22_spill]] %s5004_s27  ;;  %s5022_s9 = smov [#allocation9]  }
  0x19   : > { %6615 = sst [smem:[#allocation23_spill]] %s5008_s28  ;;  %p5141_p4 = pnand %p3762_p0, %p212_p3 }
  0x1a   : > { %6616 = sst [smem:[#allocation24_spill]] %s5012_s29  ;;  %s224_s10 = sshll.u32 %s5022_s9, 4  ;;  %s225_s10 = int_to_ptr.vmem [resolvable:$true] %s224_s10 }
  0x1b   : > { %6617 = sst [smem:[#allocation25_spill]] %s5016_s30  ;;  %p4461_p5 = pneg %p5141_p4 }
  0x1c   : > { %s6618_s8 = scalar_select %p5141_p4, 1, 0 }
  0x1d   : > { %p5149_p6 = pnand %p4461_p5, %p6578_p1  ;;  %s6621_s3 = sld [smem:[#allocation35_spill]] }
  0x1e   : > { %6619 = sst [smem:[#allocation26_spill]] %s6618_s8 }
  0x1f   : > { %p6597_p8 = pneg %p5149_p6 }
  0x23   : > { %s4716_s14 = scalar_lea.hbm %s6621_s3, 2304 }
  0x24   : > { %p4717_p7 = scmp.ne.s32.totalorder %s6621_s3, %s4716_s14  ;;  %p4723_p11 = scmp.lt.u32.totalorder %s4716_s14, %s6621_s3 }
  0x26   : > { %p4719_p9 = pnand %p6597_p8, %p4717_p7 }
  0x28   : > { %p4720_p10 = pneg %p4719_p9 }
  0x2a   : > { %p4725_p12 = pnand %p4723_p11, %p4720_p10 }
  0x2c   : > { %4728 = shalt.err (!%p4725_p12)
}
  0x2d   : > { %s4729_s12 = scalar_lea.vmem %s225_s10, 2304  ;;  %p4737_p5 = scmp.lt.s32.totalorder %s225_s10, %s225_s10 }
  0x2e   : > { %p4730_p13 = scmp.ne.s32.totalorder %s225_s10, %s4729_s12  ;;  %p4738_p2 = scmp.lt.s32.totalorder %s4729_s12, %s4729_s12 }
  0x30   : > { %p4732_p0 = pnand %p4730_p13, %p6597_p8  ;;  %p4739_p1 = por %p4738_p2, %p4737_p5 }
  0x32   : > { %p4733_p3 = pneg %p4732_p0 }
  0x34   : > { %p4740_p4 = pnand %p4739_p1, %p4733_p3 }
  0x36   : > { %4743 = shalt.err (!%p4740_p4)
}
  0x37   : > { %s6581_s13 = smov 64   ;;  %s6583_s14 = smov 4  }
  0x38   : > { %4464 = dma.hbm_to_vmem [thread:$0]  (!%p5149_p6), %s6621_s3, 2304, %s225_s10, [#allocation10], %s6581_s13, %s6581_s13, %s6583_s14  }
  0x39   : > { %s34_s17 = sadd.s32 1, %s5012_s29  ;;  %s37_s9 = sadd.s32 1, %s5016_s30 }
  0x3a   : > { %p35_p1 = scmp.ge.s32.totalorder %s34_s17, 2  ;;  %p6596_p2 = scmp.eq.s32.totalorder %s5020_s6, 0 }
  0x3b   : > { %s3756_s12 = sshll.u32 %s5012_s29, 3  ;;  %s82_s5 = sadd.s32 1, %s4988_s23 }
  0x3c   : > { %s6715_s17 = smov (%p35_p1, %s34_s17), 0  ;;  %s6717_s9 = smov (!%p35_p1, %s37_s9), %s5016_s30 }
  0x3d   : > { %6622 = sst [smem:[#allocation27_spill]] %s6715_s17  ;;  %s42_s28 = ssub.s32 %s5012_s29, %s6715_s17 }
  0x3e   : > { %s3757_s27 = sadd.s32 4294967295, %s3756_s12  ;;  %p39_p4 = scmp.ge.s32.totalorder %s6717_s9, 2 }
  0x3f   : > { %p71_p7 = scmp.gt.s32.totalorder %s3757_s27, 0  ;;  %s3758_s10 = sshll.u32 %s6715_s17, 3 }
  0x40   : > { %p89_p9 = scmp.ne.s32.totalorder %s4988_s23, %s4984_s22  ;;  %s6719_s9 = smov (%p39_p4, %s6717_s9), 0 }
  0x41   : > { %6623 = sst [smem:[#allocation28_spill]] %s6719_s9  ;;  %s6721_s27 = smov (!%p71_p7, %s3757_s27), 0 }
  0x42   : > { %s5195_s15 = ssub.s32 %s5016_s30, %s6719_s9  ;;  %s3759_s16 = sadd.s32 4294967295, %s3758_s10 }
  0x43   : > { %6624 = sst [smem:[#allocation29_spill]] %s5195_s15  ;;  %s5198_s13 = sor.u32 %s42_s28, %s5195_s15 }
  0x44   : > { %p75_p10 = scmp.gt.s32.totalorder %s3759_s16, 0  ;;  %p5203_p12 = por %p89_p9, %p6596_p2 }
  0x45   : > { %p95_p13 = scmp.ne.s32.totalorder %s4984_s22, %s4980_s21  ;;  %s5209_s3 = sadd.s32 8, %s3756_s12 }
  0x46   : > { %s6723_s16 = smov (!%p75_p10, %s3759_s16), 0  ;;  %p6626_p3 = scmp.eq.s32.totalorder %s5135_s7, 0 }
  0x47   : > { %s78_s9 = ssub.s32 %s6721_s27, %s6723_s16  ;;  %s5219_s8 = sadd.s32 8, %s3758_s10 }
  0x48   : > { %s79_s28 = sor.u32 %s78_s9, %s5195_s15  ;;  %p5215_p5 = por %p95_p13, %p6626_p3 }
  0x49   : > { %p80_p1 = scmp.eq.s32.totalorder %s79_s28, 0  ;;  %p6595_p7 = scmp.lt.s32.totalorder %s5020_s6, 4 }
  0x4a   : > { %s6627_s17 = scalar_select %p5215_p5, 1, 0 }
  0x4b   : > { %s5224_s21 = scalar_select %p80_p1, %s4988_s23, %s82_s5  }
  0x4c   : > { %6628 = sst [smem:[#allocation30_spill]] %s6627_s17  ;;  %s5227_s12 = sshll.u32 %s5016_s30, 5 }
  0x4d   : > { %s273_s16 = sand.u32 1, %s5020_s6   ;;  %s275_s9 = sand.u32 1, %s4988_s23  }
  0x4e   : > { %s3771_s22 = sshll.u32 %s275_s9, 3  ;;  %s3774_s2 = sshll.u32 %s6721_s27, 1 }
  0x4f   : > { %s287_s15 = sadd.s32 %s3774_s2, %s5227_s12  ;;  %s277_s17 = scalar_lea.vmem [#allocation6], %s3771_s22 }
  0x50   : > { %s3776_s18 = sshll.u32 %s287_s15, 6  ;;  %s290_s28 = sshll.u32 %s277_s17, 4  ;;  %s5237_s28 = int_to_ptr.vmem [resolvable:$true] %s290_s28 }
  0x51   : > { %s6629_s1 = sld [smem:[#allocation33_spill]]  ;;  %p5243_p9 = pnand %p6595_p7, %p5203_p12 }
  0x52   : > { %s5025_s2 = smov [#allocation11]  }
  0x53   : > { %s238_s22 = sshll.u32 %s5025_s2, 4  ;;  %p4746_p13 = pneg %p5243_p9  ;;  %s5247_s22 = int_to_ptr.vmem [resolvable:$true] %s238_s22 }
  0x57   : > { %s5235_s10 = scalar_lea.hbm %s6629_s1, %s3776_s18  ;;  %s5249_s18 = scalar_lea.sflag [#allocation7], %s273_s16 }
  0x58   : > { %s4744_s19 = scalar_lea.hbm %s5235_s10, 128  ;;  %s4749_s14 = scalar_lea.hbm %s6629_s1, 4096 }
  0x59   : > { %p4745_p10 = scmp.ne.s32.totalorder %s5235_s10, %s4744_s19  ;;  %p4750_p12 = scmp.lt.u32.totalorder %s5235_s10, %s6629_s1 }
  0x5a   : > { %p4751_p4 = scmp.lt.u32.totalorder %s4749_s14, %s4744_s19  ;;  %p4753_p7 = scmp.lt.u32.totalorder %s4744_s19, %s5235_s10 }
  0x5b   : > { %p4747_p3 = pnand %p4746_p13, %p4745_p10 }
  0x5c   : > { %p4752_p0 = por %p4751_p4, %p4750_p12 }
  0x5d   : > { %p4748_p1 = pneg %p4747_p3 }
  0x5e   : > { %p4754_p2 = por %p4753_p7, %p4752_p0 }
  0x60   : > { %p4755_p11 = pnand %p4754_p2, %p4748_p1 }
  0x62   : > { %4758 = shalt.err (!%p4755_p11)
}
  0x63   : > { %s4759_s16 = scalar_lea.vmem %s5237_s28, 128  ;;  %s5026_s9 = smov [#allocation6]  }
  0x64   : > { %p4760_p10 = scmp.ne.s32.totalorder %s5237_s28, %s4759_s16  ;;  %s4764_s2 = sshll.u32 %s5026_s9, 4  ;;  %s4765_s2 = int_to_ptr.vmem [resolvable:$false] %s4764_s2 }
  0x65   : > { %s4766_s20 = scalar_lea.vmem %s4765_s2, 256  ;;  %p4767_p5 = scmp.lt.s32.totalorder %s5237_s28, %s4765_s2 }
  0x66   : > { %p4762_p3 = pnand %p4760_p10, %p4746_p13  ;;  %p4768_p4 = scmp.lt.s32.totalorder %s4766_s20, %s4759_s16 }
  0x68   : > { %p4763_p8 = pneg %p4762_p3  ;;  %p4769_p12 = por %p4768_p4, %p4767_p5 }
  0x6a   : > { %p4770_p0 = pnand %p4769_p12, %p4763_p8 }
  0x6c   : > { %4773 = shalt.err (!%p4770_p0)
}
  0x6d   : > { %s6631_s19 = smov 4   ;;  %s6632_s27 = smov 64  }
  0x6e   : > { %4474 = dma.hbm_to_vmem [thread:$0]  (!%p5243_p9), %s5235_s10, 128, %s5237_s28, %s5249_s18, %s6632_s27, %s6632_s27, %s6631_s19  }
  0x6f   : > { %s6633_s4 = sld [smem:[#allocation36_spill]]  ;;  %p6634_p8 = pneg %p5149_p6 }
  0x75   : > { %s4774_s15 = scalar_lea.hbm %s6633_s4, 16 }
  0x76   : > { %p4775_p2 = scmp.ne.s32.totalorder %s6633_s4, %s4774_s15  ;;  %p4781_p7 = scmp.lt.u32.totalorder %s4774_s15, %s6633_s4 }
  0x78   : > { %p4777_p11 = pnand %p4775_p2, %p6634_p8 }
  0x7a   : > { %p4778_p5 = pneg %p4777_p11 }
  0x7c   : > { %p4783_p13 = pnand %p4781_p7, %p4778_p5 }
  0x7e   : > { %4786 = shalt.err (!%p4783_p13)
}
  0x7f   : > { %s4787_s28 = scalar_lea.vmem %s5247_s22, 16  ;;  %p6635_p1 = pmov %p6634_p8 }
  0x80   : > { %p4788_p9 = scmp.ne.s32.totalorder %s5247_s22, %s4787_s28  ;;  %s4794_s10 = scalar_lea.vmem %s5247_s22, 32 }
  0x81   : > { %p4795_p4 = scmp.lt.s32.totalorder %s5247_s22, %s5247_s22  ;;  %p4796_p12 = scmp.lt.s32.totalorder %s4794_s10, %s4787_s28 }
  0x82   : > { %p4790_p10 = pnand %p4788_p9, %p6635_p1 }
  0x83   : > { %p4797_p0 = por %p4796_p12, %p4795_p4 }
  0x84   : > { %p4791_p3 = pneg %p4790_p10 }
  0x86   : > { %p4798_p2 = pnand %p4797_p0, %p4791_p3 }
  0x88   : > { %4801 = shalt.err (!%p4798_p2)
}
  0x89   : > { %4467 = dma.hbm_to_vmem [thread:$0]  (!%p5149_p6), %s6633_s4, 16, %s5247_s22, [#allocation10]  }
  0x8a   : > { %s3755_s11 = sadd.s32 4294967294, %s5020_s6   ;;  %s46_s17 = sadd.s32 1, %s5000_s26 }
  0x8b   : > { %p53_p8 = scmp.ne.s32.totalorder %s5000_s26, %s4996_s25  ;;  %p6636_p11 = scmp.eq.s32.totalorder %s5198_s13, 0 }
  0x8c   : > { %p6637_p5 = scmp.eq.s32.totalorder %s5020_s6, 0  ;;  %p59_p13 = scmp.ne.s32.totalorder %s4996_s25, %s4992_s24 }
  0x8d   : > { %s5313_s15 = scalar_select %p6636_p11, %s5000_s26, %s46_s17  }
  0x8e   : > { %p5317_p7 = por %p6637_p5, %p53_p8  ;;  %p6639_p9 = scmp.eq.s32.totalorder %s5135_s7, 3 }
  0x8f   : > { %p205_p6 = scmp.eq.s32.totalorder %s3755_s11, 3  ;;  %p6641_p10 = scmp.eq.s32.totalorder %s5135_s7, 0 }
  0x90   : > { %p5325_p1 = por %p6639_p9, %p53_p8  ;;  %s249_s13 = sand.u32 1, %s5000_s26  }
  0x91   : > { %p5331_p3 = por %p6641_p10, %p59_p13  ;;  %p5336_p4 = por %p205_p6, %p59_p13 }
  0x92   : > { %s6640_s2 = scalar_select %p5325_p1, 1, 0 }
  0x93   : > { %s6643_s5 = scalar_select %p5336_p4, 1, 0 }
  0x94   : > { %s3766_s16 = sshll.u32 %s249_s13, 6  ;;  %s4023_s28 = sshll.u32 %s5012_s29, 4 }
  0x95   : > { %s260_s10 = sadd.s32 %s4023_s28, %s5227_s12  ;;  %s253_s14 = scalar_lea.vmem [#allocation3], %s3766_s16 }
  0x96   : > { %s3770_s20 = sshll.u32 %s260_s10, 6  ;;  %s263_s17 = sshll.u32 %s253_s14, 4  ;;  %s5347_s17 = int_to_ptr.vmem [resolvable:$true] %s263_s17 }
  0x97   : > { %s6644_s0 = sld [smem:[#allocation32_spill]]  ;;  %p6645_p12 = scmp.lt.s32.totalorder %s5020_s6, 4 }
  0x98   : > { %s5357_s16 = scalar_lea.sflag [#allocation4], %s249_s13 }
  0x99   : > { %p5353_p0 = pnand %p6645_p12, %p5317_p7 }
  0x9b   : > { %p4804_p8 = pneg %p5353_p0 }
  0x9d   : > { %s5345_s11 = scalar_lea.hbm %s6644_s0, %s3770_s20  ;;  %s4807_s9 = scalar_lea.hbm %s6644_s0, 4096 }
  0x9e   : > { %s4802_s28 = scalar_lea.hbm %s5345_s11, 1024  ;;  %p4808_p7 = scmp.lt.u32.totalorder %s5345_s11, %s6644_s0 }
  0x9f   : > { %p4803_p2 = scmp.ne.s32.totalorder %s5345_s11, %s4802_s28  ;;  %p4809_p13 = scmp.lt.u32.totalorder %s4807_s9, %s4802_s28 }
  0xa0   : > { %p4811_p6 = scmp.lt.u32.totalorder %s4802_s28, %s5345_s11 }
  0xa1   : > { %p4805_p11 = pnand %p4804_p8, %p4803_p2  ;;  %p4810_p9 = por %p4809_p13, %p4808_p7 }
  0xa3   : > { %p4806_p5 = pneg %p4805_p11  ;;  %p4812_p10 = por %p4811_p6, %p4810_p9 }
  0xa5   : > { %p4813_p12 = pnand %p4812_p10, %p4806_p5 }
  0xa7   : > { %4816 = shalt.err (!%p4813_p12)
}
  0xa8   : > { %s4817_s13 = scalar_lea.vmem %s5347_s17, 1024  ;;  %s5027_s14 = smov [#allocation3]  }
  0xa9   : > { %p4818_p2 = scmp.ne.s32.totalorder %s5347_s17, %s4817_s13  ;;  %s4822_s1 = sshll.u32 %s5027_s14, 4  ;;  %s4823_s1 = int_to_ptr.vmem [resolvable:$false] %s4822_s1 }
  0xaa   : > { %s4824_s4 = scalar_lea.vmem %s4823_s1, 2048  ;;  %p4825_p1 = scmp.lt.s32.totalorder %s5347_s17, %s4823_s1 }
  0xab   : > { %p4820_p11 = pnand %p4818_p2, %p4804_p8  ;;  %p4826_p7 = scmp.lt.s32.totalorder %s4824_s4, %s4817_s13 }
  0xad   : > { %p4821_p4 = pneg %p4820_p11  ;;  %p4827_p13 = por %p4826_p7, %p4825_p1 }
  0xaf   : > { %p4828_p9 = pnand %p4827_p13, %p4821_p4 }
  0xb1   : > { %4831 = shalt.err (!%p4828_p9)
}
  0xb2   : > { %s6647_s28 = sld [smem:[#allocation20_spill]]  ;;  %s6648_s9 = sld [smem:[#allocation19_spill]] }
  0xb3   : > { %s6649_s10 = sld [smem:[#allocation18_spill]]  ;;  %s6650_s20 = sld [smem:[#allocation29_spill]] }
  0xb4   : > { %4471 = dma.hbm_to_vmem [thread:$0]  (!%p5353_p0), %s5345_s11, 1024, %s5347_s17, %s5357_s16, %s6632_s27, %s6632_s27, %s6631_s19  }
  0xb5   : > { %p6651_p1 = scmp.lt.s32.totalorder %s5209_s3, 15  ;;  %p6652_p4 = scmp.lt.s32.totalorder %s5219_s8, 15 }
  0xb6   : > { %p6653_p6 = scmp.eq.s32.totalorder %s5020_s6, 0  ;;  %p6655_p2 = scmp.eq.s32.totalorder %s5135_s7, 0 }
  0xb7   : > { %s6725_s3 = smov (!%p6651_p1, %s5209_s3), 15  ;;  %s6727_s8 = smov (!%p6652_p4, %s5219_s8), 15 }
  0xb8   : > { %s118_s30 = sadd.s32 1, %s6647_s28  ;;  %p125_p8 = scmp.ne.s32.totalorder %s6647_s28, %s6648_s9 }
  0xb9   : > { %s114_s13 = ssub.s32 %s6725_s3, %s6727_s8  ;;  %p131_p5 = scmp.ne.s32.totalorder %s6648_s9, %s6649_s10 }
  0xba   : > { %s115_s14 = sor.u32 %s114_s13, %s6650_s20  ;;  %p5402_p10 = por %p125_p8, %p6653_p6 }
  0xbb   : > { %p116_p12 = scmp.eq.s32.totalorder %s115_s14, 0  ;;  %p5408_p11 = por %p131_p5, %p6655_p2 }
  0xbc   : > { %s302_s11 = sand.u32 1, %s6647_s28   ;;  %s3779_s16 = sshll.u32 %s6725_s3, 1 }
  0xbd   : > { %s6656_s17 = scalar_select %p5408_p11, 1, 0 }
  0xbe   : > { %s6729_s28 = smov (!%p116_p12, %s6647_s28), %s118_s30  ;;  %s3777_s8 = sshll.u32 %s302_s11, 3 }
  0xbf   : > { %s314_s4 = sadd.s32 %s3779_s16, %s5227_s12  ;;  %s6657_s13 = sld [smem:[#allocation34_spill]] }
  0xc0   : > { %s3781_s9 = sshll.u32 %s314_s4, 6  ;;  %s304_s14 = scalar_lea.vmem [#allocation8], %s3777_s8 }
  0xc1   : > { %s317_s29 = sshll.u32 %s304_s14, 4  ;;  %p6658_p0 = scmp.lt.s32.totalorder %s5020_s6, 4  ;;  %s5422_s29 = int_to_ptr.vmem [resolvable:$true] %s317_s29 }
  0xc3   : > { %p5428_p7 = pnand %p6658_p0, %p5402_p10 }
  0xc5   : > { %s5420_s0 = scalar_lea.hbm %s6657_s13, %s3781_s9  ;;  %p4834_p9 = pneg %p5428_p7 }
  0xc6   : > { %s4832_s12 = scalar_lea.hbm %s5420_s0, 128  ;;  %s4837_s16 = scalar_lea.hbm %s6657_s13, 4096 }
  0xc7   : > { %p4833_p13 = scmp.ne.s32.totalorder %s5420_s0, %s4832_s12  ;;  %p4838_p8 = scmp.lt.u32.totalorder %s5420_s0, %s6657_s13 }
  0xc8   : > { %p4839_p5 = scmp.lt.u32.totalorder %s4837_s16, %s4832_s12  ;;  %p4841_p10 = scmp.lt.u32.totalorder %s4832_s12, %s5420_s0 }
  0xc9   : > { %p4835_p1 = pnand %p4834_p9, %p4833_p13 }
  0xca   : > { %p4840_p6 = por %p4839_p5, %p4838_p8 }
  0xcb   : > { %p4836_p4 = pneg %p4835_p1 }
  0xcc   : > { %p4842_p12 = por %p4841_p10, %p4840_p6 }
  0xce   : > { %p4843_p2 = pnand %p4842_p12, %p4836_p4 }
  0xd0   : > { %4846 = shalt.err (!%p4843_p2)
}
  0xd1   : > { %s4847_s4 = scalar_lea.vmem %s5422_s29, 128  ;;  %s5028_s9 = smov [#allocation8]  }
  0xd2   : > { %p4848_p0 = scmp.ne.s32.totalorder %s5422_s29, %s4847_s4  ;;  %s4852_s10 = sshll.u32 %s5028_s9, 4  ;;  %s4853_s10 = int_to_ptr.vmem [resolvable:$false] %s4852_s10 }
  0xd3   : > { %s4854_s20 = scalar_lea.vmem %s4853_s10, 256  ;;  %p4855_p11 = scmp.lt.s32.totalorder %s5422_s29, %s4853_s10 }
  0xd4   : > { %p4850_p13 = pnand %p4848_p0, %p4834_p9  ;;  %p4856_p8 = scmp.lt.s32.totalorder %s4854_s20, %s4847_s4 }
  0xd6   : > { %p4851_p1 = pneg %p4850_p13  ;;  %p4857_p5 = por %p4856_p8, %p4855_p11 }
  0xd8   : > { %p4858_p6 = pnand %p4857_p5, %p4851_p1 }
  0xda   : > { %4861 = shalt.err (!%p4858_p6)
}
  0xdb   : > { %4477 = dma.hbm_to_vmem [thread:$0]  (!%p5428_p7), %s5420_s0, 128, %s5422_s29, %s5249_s18, %s6632_s27, %s6632_s27, %s6631_s19  }
  0xdc   : > { %s6660_s14 = sld [smem:[#allocation26_spill]] }
  0xe2   : > { %p6661_p9 = scmp.ne.s32.totalorder %s6660_s14, 0 }
  0xe4   : > { %329 = sbr.rel (%p6661_p9) target bundleno = 811 (0x32b), region = 40 }
  0xeb   : > { %s5464_s12 = sand.u32 1, %s4996_s25  }
  0xec   : > { %s3783_s30 = sshll.u32 %s5464_s12, 6  ;;  %s332_s11 = scalar_lea.sflag [#allocation4], %s5464_s12 }
  0xed   : > { %s5470_s3 = scalar_lea.vmem [#allocation3], %s3783_s30 }
  0xee   : > { %4947 = dma.done.wait (%p5331_p3), %s332_s11, 1024  }
  0xef   : > { %4949 = vsyncadd (%p5331_p3), %s332_s11, 4294966272  ;;  %s6662_s0 = sld [smem:[#allocation21_spill]]  ;;  %s6663_s29 = sld [smem:[#allocation30_spill]] }
  0xf0   : > { %s340_s18 = sand.u32 1, %s5135_s7  }
  0xf1   : > { %s341_s16 = scalar_lea.sflag [#allocation7], %s340_s18 }
  0xf5   : > { %s342_s19 = sand.u32 1, %s6662_s0   ;;  %p6664_p11 = scmp.ne.s32.totalorder %s6663_s29, 0 }
  0xf6   : > { %s5478_s27 = sshll.u32 %s342_s19, 3 }
  0xf7   : > { %s344_s1 = scalar_lea.vmem [#allocation6], %s5478_s27 }
  0xf8   : > { %4951 = dma.done.wait (%p6664_p11), %s341_s16, 128  }
  0xf9   : > { %4953 = vsyncadd (%p6664_p11), %s341_s16, 4294967168  ;;  %s6665_s8 = sld [smem:[#allocation19_spill]]  ;;  %p6666_p3 = scmp.ne.s32.totalorder %s6656_s17, 0 }
  0xff   : > { %s351_s4 = sand.u32 1, %s6665_s8  }
 0x100   : > { %s5486_s22 = sshll.u32 %s351_s4, 3 }
 0x101   : > { %s353_s9 = scalar_lea.vmem [#allocation8], %s5486_s22 }
 0x102   : > { %4955 = dma.done.wait (%p6666_p3), %s341_s16, 128  }
 0x103   : > { %4957 = vsyncadd (%p6666_p3), %s341_s16, 4294967168  ;;  %p6667_p7 = scmp.eq.s32.totalorder %s5135_s7, 0 }
 0x105   : > { %4959 = dma.done.wait (%p6667_p7), [#allocation10], 2320   ;;  %p6668_p4 = pmov %p6667_p7 }
 0x106   : > { %vm409_vm0 = vcmask 253952   ;;  %vm410_vm1 = vsmask.f32 256  ;;  %vm442_vm3 = vsmask.f32 7938  ;;  %vm653_vm5 = vcmask 257024  }
 0x107   : > { %4961 = vsyncadd (%p6668_p4), [#allocation10], 4294964976  ;;  %v415_v1 = vld [vmem:[#allocation2 + $0xc] sm:$0x1]  ;;  %v418_v2 = vld [vmem:[#allocation2 + $0x18] sm:$0x1] }
 0x108   : > { %vm5499_vm2 = vmand %vm409_vm0, %vm410_vm1  ;;  %v421_v3 = vld [vmem:[#allocation2 + $0x24] sm:$0x1]  ;;  %v424_v7 = vld [vmem:[#allocation2 + $0x30] sm:$0x1]  ;;  %vm490_vm6 = vsmask.f32 4368 }
 0x109   : > { %v416_v4 = vsel %vm5499_vm2, 0, %v415_v1  ;;  %v419_v5 = vsel %vm5499_vm2, 0, %v418_v2  ;;  %v422_v6 = vsel %vm5499_vm2, 0, %v421_v3  ;;  %v425_v8 = vsel %vm5499_vm2, 0, %v424_v7  ;;  %v427_v9 = vld [vmem:[#allocation2 + $0x3c] sm:$0x1]  ;;  %vm5513_vm4 = vmand %vm409_vm0, %vm442_vm3 }
 0x10a   : > { %417 = vst [vmem:[#allocation2 + $0xc] sm:$0x1] %v416_v4  ;;  %420 = vst [vmem:[#allocation2 + $0x18] sm:$0x1] %v419_v5  ;;  %v430_v10 = vld [vmem:[#allocation2 + $0x48] sm:$0x1] }
 0x10b   : > { %423 = vst [vmem:[#allocation2 + $0x24] sm:$0x1] %v422_v6  ;;  %426 = vst [vmem:[#allocation2 + $0x30] sm:$0x1] %v425_v8  ;;  %v428_v12 = vsel %vm5499_vm2, 0, %v427_v9  ;;  %v431_v13 = vsel %vm5499_vm2, 0, %v430_v10 }
 0x10c   : > { %v433_v14 = vld [vmem:[#allocation2 + $0x54] sm:$0x1]  ;;  %v436_v15 = vld [vmem:[#allocation2 + $0x60] sm:$0x1]  ;;  %429 = vst [vmem:[#allocation2 + $0x3c] sm:$0x1] %v428_v12  ;;  %vm5555_vm7 = vmand %vm653_vm5, %vm442_vm3 }
 0x10d   : > { %432 = vst [vmem:[#allocation2 + $0x48] sm:$0x1] %v431_v13  ;;  %v434_v16 = vsel %vm5499_vm2, 0, %v433_v14  ;;  %v437_v17 = vsel %vm5499_vm2, 0, %v436_v15  ;;  %v447_v18 = vld [vmem:[#allocation2 + $0x14] sm:$0x1]  ;;  %vm5561_vm8 = vmor %vm410_vm1, %vm490_vm6 }
 0x10e   : > { %v450_v19 = vld [vmem:[#allocation2 + $0x20] sm:$0x1]  ;;  %435 = vst [vmem:[#allocation2 + $0x54] sm:$0x1] %v434_v16  ;;  %438 = vst [vmem:[#allocation2 + $0x60] sm:$0x1] %v437_v17 }
 0x10f   : > { %v448_v20 = vsel %vm5513_vm4, 0, %v447_v18  ;;  %v451_v21 = vsel %vm5513_vm4, 0, %v450_v19  ;;  %v453_v22 = vld [vmem:[#allocation2 + $0x2c] sm:$0x1]  ;;  %v456_v23 = vld [vmem:[#allocation2 + $0x38] sm:$0x1] }
 0x110   : > { %449 = vst [vmem:[#allocation2 + $0x14] sm:$0x1] %v448_v20  ;;  %452 = vst [vmem:[#allocation2 + $0x20] sm:$0x1] %v451_v21  ;;  %v454_v24 = vsel %vm5513_vm4, 0, %v453_v22  ;;  %v457_v25 = vsel %vm5513_vm4, 0, %v456_v23 }
 0x111   : > { %v459_v26 = vld [vmem:[#allocation2 + $0x44] sm:$0x1]  ;;  %v462_v27 = vld [vmem:[#allocation2 + $0x50] sm:$0x1]  ;;  %455 = vst [vmem:[#allocation2 + $0x2c] sm:$0x1] %v454_v24 }
 0x112   : > { %458 = vst [vmem:[#allocation2 + $0x38] sm:$0x1] %v457_v25  ;;  %v460_v28 = vsel %vm5513_vm4, 0, %v459_v26  ;;  %v463_v29 = vsel %vm5513_vm4, 0, %v462_v27  ;;  %v465_v30 = vld [vmem:[#allocation2 + $0x5c] sm:$0x1] }
 0x113   : > { %v468_v31 = vld [vmem:[#allocation2 + $0x68] sm:$0x1]  ;;  %461 = vst [vmem:[#allocation2 + $0x44] sm:$0x1] %v460_v28  ;;  %464 = vst [vmem:[#allocation2 + $0x50] sm:$0x1] %v463_v29 }
 0x114   : > { %v466_v32 = vsel %vm5513_vm4, 0, %v465_v30  ;;  %v469_v33 = vsel %vm5513_vm4, 0, %v468_v31  ;;  %v412_v34 = vld [vmem:[#allocation2] sm:$0x1]  ;;  %v439_v35 = vld [vmem:[#allocation2 + $0x6c] sm:$0x1] }
 0x115   : > { %467 = vst [vmem:[#allocation2 + $0x5c] sm:$0x1] %v466_v32  ;;  %470 = vst [vmem:[#allocation2 + $0x68] sm:$0x1] %v469_v33  ;;  %v413_v36 = vsel %vm5499_vm2, 0, %v412_v34  ;;  %v440_v37 = vsel %vm5499_vm2, 0, %v439_v35 }
 0x116   : > { %v444_v38 = vld [vmem:[#allocation2 + $0x8] sm:$0x1]  ;;  %v471_v39 = vld [vmem:[#allocation2 + $0x74] sm:$0x1]  ;;  %414 = vst [vmem:[#allocation2] sm:$0x1] %v413_v36 }
 0x117   : > { %441 = vst [vmem:[#allocation2 + $0x6c] sm:$0x1] %v440_v37  ;;  %v445_v40 = vsel %vm5513_vm4, 0, %v444_v38  ;;  %v472_v41 = vsel %vm5513_vm4, 0, %v471_v39  ;;  %v474_v42 = vld [vmem:[%s5470_s3] sm:$0xf] }
 0x118   : > { %446 = vst [vmem:[#allocation2 + $0x8] sm:$0x1] %v445_v40  ;;  %473 = vst [vmem:[#allocation2 + $0x74] sm:$0x1] %v472_v41  ;;  %v493_v43 = vshrl.u32 %v474_v42, 16  ;;  %v496_v44 = vshll.u32 %v474_v42, 16 }
 0x119   : > { %v475_v45 = vld [vmem:[%s5470_s3 + $0x4] sm:$0xf]  ;;  %v476_v46 = vld [vmem:[%s5470_s3 + $0x8] sm:$0xf]  ;;  %v655_v52 = vld [vmem:[#allocation2 + $0xc] sm:$0xf] }
 0x11a   : > { %v501_v47 = vshrl.u32 %v475_v45, 16  ;;  %v504_v48 = vshll.u32 %v475_v45, 16  ;;  %v510_v49 = vshrl.u32 %v476_v46, 16  ;;  %v513_v50 = vshll.u32 %v476_v46, 16  ;;  %v477_v53 = vld [vmem:[%s5470_s3 + $0xc] sm:$0xf] }
 0x11b   : > { %v495_v51 = vrot.slane %v493_v43, 7  ;;  %v663_v57 = vld [vmem:[#allocation2 + $0x18] sm:$0xf]  ;;  %v518_v58 = vshrl.u32 %v477_v53, 16  ;;  %v660_v62 = vld [vmem:[#allocation2 + $0x14] sm:$0x1] }
 0x11c   : > { %v503_v55 = vrot.slane %v501_v47, 7  ;;  %v512_v56 = vrot.slane %v510_v49, 7  ;;  %v521_v63 = vshll.u32 %v477_v53, 16  ;;  %v478_v1 = vld [vmem:[%s5470_s3 + $0x10] sm:$0xf]  ;;  %s5635_s7 = scalar_lea.vmem [#allocation12], %s3783_s30 }
 0x11d   : > { %v498_v59 = vor.u32 %v496_v44, %v495_v51  ;;  %v499_v61 = vrot.slane %v495_v51, 4  ;;  %v479_v6 = vld [vmem:[%s5470_s3 + $0x14] sm:$0xf]  ;;  %v520_v8 = vrot.slane %v518_v58, 7  ;;  %v527_v9 = vshrl.u32 %v478_v1, 16  ;;  %s6677_s17 = sld [smem:[#allocation22_spill]] }
 0x11e   : > { %v506_v2 = vor.u32 %v504_v48, %v503_v55  ;;  %v508_v3 = vrot.slane %v503_v55, 4  ;;  %v515_v4 = vor.u32 %v513_v50, %v512_v56  ;;  %v516_v5 = vrot.slane %v512_v56, 4  ;;  %v480_v11 = vld [vmem:[%s5470_s3 + $0x18] sm:$0xf]  ;;  %v667_v15 = vld [vmem:[#allocation2 + $0x20] sm:$0x1] }
 0x11f   : > { %v656_v7 = vsel %vm5555_vm7, %v498_v59, %v655_v52  ;;  %v530_v10 = vshll.u32 %v478_v1, 16  ;;  %v535_v16 = vshrl.u32 %v479_v6, 16  ;;  %v481_v17 = vld [vmem:[%s5470_s3 + $0x1c] sm:$0xf]  ;;  %v523_v18 = vor.u32 %v521_v63, %v520_v8  ;;  %v670_v21 = vld [vmem:[#allocation2 + $0x24] sm:$0xf] }
 0x120   : > { %657 = vst [vmem:[#allocation2 + $0xc] sm:$0xf] %v656_v7  ;;  %v507_v12 = vsel %vm5561_vm8, %v499_v61, %v506_v2  ;;  %v661_v13 = vsel %vm5499_vm2, %v508_v3, %v660_v62  ;;  %v664_v14 = vsel %vm5555_vm7, %v515_v4, %v663_v57  ;;  %v525_v19 = vrot.slane %v520_v8, 4  ;;  %v482_v27 = vld [vmem:[%s5470_s3 + $0x20] sm:$0xf] }
 0x121   : > { %659 = vst.msk [vmem:[#allocation2 + $0x10] sm:$0xf] %vm653_vm5, %v507_v12  ;;  %662 = vst [vmem:[#allocation2 + $0x14] sm:$0x1] %v661_v13  ;;  %v529_v20 = vrot.slane %v527_v9, 7  ;;  %v538_v22 = vshll.u32 %v479_v6, 16  ;;  %v524_v28 = vsel %vm5561_vm8, %v516_v5, %v523_v18 }
 0x122   : > { %665 = vst [vmem:[#allocation2 + $0x18] sm:$0xf] %v664_v14  ;;  %v537_v23 = vrot.slane %v535_v16, 7  ;;  %v544_v24 = vshrl.u32 %v480_v11, 16  ;;  %v547_v25 = vshll.u32 %v480_v11, 16  ;;  %v552_v26 = vshrl.u32 %v481_v17, 16 }
 0x123   : > { %v668_v29 = vsel %vm5499_vm2, %v525_v19, %v667_v15  ;;  %v532_v30 = vor.u32 %v530_v10, %v529_v20  ;;  %v533_v31 = vrot.slane %v529_v20, 4  ;;  %v674_v32 = vld [vmem:[#allocation2 + $0x2c] sm:$0x1]  ;;  %v677_v33 = vld [vmem:[#allocation2 + $0x30] sm:$0xf]  ;;  %v555_v40 = vshll.u32 %v481_v17, 16 }
 0x124   : > { %666 = vst.msk [vmem:[#allocation2 + $0x1c] sm:$0xf] %vm653_vm5, %v524_v28  ;;  %669 = vst [vmem:[#allocation2 + $0x20] sm:$0x1] %v668_v29  ;;  %v540_v34 = vor.u32 %v538_v22, %v537_v23  ;;  %v542_v35 = vrot.slane %v537_v23, 4  ;;  %v546_v36 = vrot.slane %v544_v24, 7 }
 0x125   : > { %v554_v37 = vrot.slane %v552_v26, 7  ;;  %v483_v38 = vld [vmem:[%s5470_s3 + $0x24] sm:$0xf]  ;;  %v671_v39 = vsel %vm5555_vm7, %v532_v30, %v670_v21  ;;  %v561_v41 = vshrl.u32 %v482_v27, 16  ;;  %v564_v42 = vshll.u32 %v482_v27, 16  ;;  %p3789_p10 = scmp.le.s32.totalorder %s6677_s17, 0 }
 0x126   : > { %v484_v43 = vld [vmem:[%s5470_s3 + $0x28] sm:$0xf]  ;;  %672 = vst [vmem:[#allocation2 + $0x24] sm:$0xf] %v671_v39  ;;  %v541_v44 = vsel %vm5561_vm8, %v533_v31, %v540_v34  ;;  %v675_v45 = vsel %vm5499_vm2, %v542_v35, %v674_v32  ;;  %v549_v46 = vor.u32 %v547_v25, %v546_v36  ;;  %v550_v47 = vrot.slane %v546_v36, 4 }
 0x127   : > { %v681_v48 = vld [vmem:[#allocation2 + $0x38] sm:$0x1]  ;;  %v684_v49 = vld [vmem:[#allocation2 + $0x3c] sm:$0xf]  ;;  %673 = vst.msk [vmem:[#allocation2 + $0x28] sm:$0xf] %vm653_vm5, %v541_v44  ;;  %v557_v50 = vor.u32 %v555_v40, %v554_v37 }
 0x128   : > { %676 = vst [vmem:[#allocation2 + $0x2c] sm:$0x1] %v675_v45  ;;  %v559_v51 = vrot.slane %v554_v37, 4  ;;  %v563_v52 = vrot.slane %v561_v41, 7  ;;  %v569_v53 = vshrl.u32 %v483_v38, 16  ;;  %v678_v56 = vsel %vm5555_vm7, %v549_v46, %v677_v33 }
 0x129   : > { %v485_v55 = vld [vmem:[%s5470_s3 + $0x2c] sm:$0xf]  ;;  %v572_v57 = vshll.u32 %v483_v38, 16  ;;  %v578_v58 = vshrl.u32 %v484_v43, 16  ;;  %v581_v59 = vshll.u32 %v484_v43, 16  ;;  %v558_v62 = vsel %vm5561_vm8, %v550_v47, %v557_v50 }
 0x12a   : > { %v486_v61 = vld [vmem:[%s5470_s3 + $0x30] sm:$0xf]  ;;  %679 = vst [vmem:[#allocation2 + $0x30] sm:$0xf] %v678_v56  ;;  %v682_v63 = vsel %vm5499_vm2, %v559_v51, %v681_v48  ;;  %v566_v1 = vor.u32 %v564_v42, %v563_v52  ;;  %v567_v2 = vrot.slane %v563_v52, 4  ;;  %v571_v5 = vrot.slane %v569_v53, 7 }
 0x12b   : > { %v688_v3 = vld [vmem:[#allocation2 + $0x44] sm:$0x1]  ;;  %v487_v4 = vld [vmem:[%s5470_s3 + $0x34] sm:$0xf]  ;;  %680 = vst.msk [vmem:[#allocation2 + $0x34] sm:$0xf] %vm653_vm5, %v558_v62 }
 0x12c   : > { %683 = vst [vmem:[#allocation2 + $0x38] sm:$0x1] %v682_v63  ;;  %v580_v6 = vrot.slane %v578_v58, 7  ;;  %v691_v7 = vld [vmem:[#allocation2 + $0x48] sm:$0xf]  ;;  %v586_v8 = vshrl.u32 %v485_v55, 16  ;;  %v685_v10 = vsel %vm5555_vm7, %v566_v1, %v684_v49  ;;  %v574_v15 = vor.u32 %v572_v57, %v571_v5 }
 0x12d   : > { %v589_v9 = vshll.u32 %v485_v55, 16  ;;  %v595_v11 = vshrl.u32 %v486_v61, 16  ;;  %v598_v12 = vshll.u32 %v486_v61, 16  ;;  %v603_v13 = vshrl.u32 %v487_v4, 16  ;;  %v488_v14 = vld [vmem:[%s5470_s3 + $0x38] sm:$0xf] }
 0x12e   : > { %686 = vst [vmem:[#allocation2 + $0x3c] sm:$0xf] %v685_v10  ;;  %v576_v16 = vrot.slane %v571_v5, 4  ;;  %v583_v17 = vor.u32 %v581_v59, %v580_v6  ;;  %v584_v18 = vrot.slane %v580_v6, 4  ;;  %v588_v19 = vrot.slane %v586_v8, 7 }
 0x12f   : > { %v695_v20 = vld [vmem:[#allocation2 + $0x50] sm:$0x1]  ;;  %v597_v21 = vrot.slane %v595_v11, 7  ;;  %v605_v22 = vrot.slane %v603_v13, 7  ;;  %v606_v23 = vshll.u32 %v487_v4, 16  ;;  %v575_v24 = vsel %vm5561_vm8, %v567_v2, %v574_v15 }
 0x130   : > { %v689_v25 = vsel %vm5499_vm2, %v576_v16, %v688_v3  ;;  %v692_v26 = vsel %vm5555_vm7, %v583_v17, %v691_v7  ;;  %v698_v27 = vld [vmem:[#allocation2 + $0x54] sm:$0xf]  ;;  %v612_v28 = vshrl.u32 %v488_v14, 16  ;;  %687 = vst.msk [vmem:[#allocation2 + $0x40] sm:$0xf] %vm653_vm5, %v575_v24  ;;  %v591_v30 = vor.u32 %v589_v9, %v588_v19 }
 0x131   : > { %v489_v29 = vld [vmem:[%s5470_s3 + $0x3c] sm:$0xf]  ;;  %690 = vst [vmem:[#allocation2 + $0x44] sm:$0x1] %v689_v25  ;;  %693 = vst [vmem:[#allocation2 + $0x48] sm:$0xf] %v692_v26  ;;  %v600_v32 = vor.u32 %v598_v12, %v597_v21  ;;  %v608_v35 = vor.u32 %v606_v23, %v605_v22 }
 0x132   : > { %v593_v31 = vrot.slane %v588_v19, 4  ;;  %v601_v33 = vrot.slane %v597_v21, 4  ;;  %v702_v34 = vld [vmem:[#allocation2 + $0x5c] sm:$0x1]  ;;  %v610_v36 = vrot.slane %v605_v22, 4  ;;  %v614_v37 = vrot.slane %v612_v28, 7 }
 0x133   : > { %v615_v38 = vshll.u32 %v488_v14, 16  ;;  %v592_v39 = vsel %vm5561_vm8, %v584_v18, %v591_v30  ;;  %v699_v41 = vsel %vm5555_vm7, %v600_v32, %v698_v27  ;;  %v705_v42 = vld [vmem:[#allocation2 + $0x60] sm:$0xf]  ;;  %v620_v43 = vshrl.u32 %v489_v29, 16  ;;  %v709_v51 = vld [vmem:[#allocation2 + $0x68] sm:$0x1] }
 0x134   : > { %v696_v40 = vsel %vm5499_vm2, %v593_v31, %v695_v20  ;;  %694 = vst.msk [vmem:[#allocation2 + $0x4c] sm:$0xf] %vm653_vm5, %v592_v39  ;;  %700 = vst [vmem:[#allocation2 + $0x54] sm:$0xf] %v699_v41  ;;  %v609_v44 = vsel %vm5561_vm8, %v601_v33, %v608_v35  ;;  %v703_v45 = vsel %vm5499_vm2, %v610_v36, %v702_v34  ;;  %v618_v47 = vrot.slane %v614_v37, 4  ;;  %715 = sbr.rel (%p3789_p10) target bundleno = 320 (0x140), region = 64 }
 0x135   : > { %697 = vst [vmem:[#allocation2 + $0x50] sm:$0x1] %v696_v40  ;;  %v617_v46 = vor.u32 %v615_v38, %v614_v37  ;;  %701 = vst.msk [vmem:[#allocation2 + $0x58] sm:$0xf] %vm653_vm5, %v609_v44  ;;  %v622_v48 = vrot.slane %v620_v43, 7  ;;  %v623_v49 = vshll.u32 %v489_v29, 16 }
 0x136   : > { %704 = vst [vmem:[#allocation2 + $0x5c] sm:$0x1] %v703_v45  ;;  %v716_v57 = vld [vmem:[%s344_s1] sm:$0xf] (!%p3789_p10)  ;;  %v717_v58 = vld [vmem:[%s344_s1 + $0x4] sm:$0xf] (!%p3789_p10) }
 0x137   : > { %v706_v50 = vsel %vm5555_vm7, %v617_v46, %v705_v42  ;;  %v625_v52 = vor.u32 %v623_v49, %v622_v48  ;;  %v627_v53 = vrot.slane %v622_v48, 4  ;;  %v719_v59 = vshrl.u32 (!%p3789_p10), %v716_v57, 16  ;;  %v738_v3 = vld [vmem:[#allocation2] sm:$0xf] (!%p3789_p10)  ;;  %v742_v4 = vld [vmem:[#allocation2 + $0x8] sm:$0x1] (!%p3789_p10) }
 0x138   : > { %707 = vst [vmem:[#allocation2 + $0x60] sm:$0xf] %v706_v50  ;;  %v722_v61 = vshll.u32 (!%p3789_p10), %v716_v57, 16  ;;  %v727_v62 = vshrl.u32 (!%p3789_p10), %v717_v58, 16  ;;  %v730_v63 = vshll.u32 (!%p3789_p10), %v717_v58, 16 }
 0x139   : > { %v626_v55 = vsel %vm5561_vm8, %v618_v47, %v625_v52  ;;  %v710_v56 = vsel %vm5499_vm2, %v627_v53, %v709_v51  ;;  %v721_v1 = vrot.slane (!%p3789_p10), %v719_v59, 7 }
 0x13a   : > { %708 = vst.msk [vmem:[#allocation2 + $0x64] sm:$0xf] %vm653_vm5, %v626_v55  ;;  %711 = vst [vmem:[#allocation2 + $0x68] sm:$0x1] %v710_v56  ;;  %v729_v2 = vrot.slane (!%p3789_p10), %v727_v62, 7 }
 0x13b   : > { %v724_v5 = vor.u32 %v722_v61, %v721_v1  ;;  %v725_v6 = vrot.slane %v721_v1, 4 }
 0x13c   : > { %v732_v7 = vor.u32 %v730_v63, %v729_v2  ;;  %v734_v8 = vrot.slane %v729_v2, 4 }
 0x13d   : > { %v739_v9 = vsel %vm5555_vm7, %v724_v5, %v738_v3 }
 0x13e   : > { %v733_v10 = vsel %vm5561_vm8, %v725_v6, %v732_v7  ;;  %v743_v11 = vsel %vm5499_vm2, %v734_v8, %v742_v4  ;;  %740 = vst [vmem:[#allocation2] sm:$0xf] %v739_v9 }
 0x13f   : > { %741 = vst.msk [vmem:[#allocation2 + $0x4] sm:$0xf] %vm653_vm5, %v733_v10  ;;  %744 = vst [vmem:[#allocation2 + $0x8] sm:$0x1] %v743_v11 }
 0x140 PF: > { %s6678_s10 = sld [smem:[#allocation22_spill]] }
 0x146   : > { %p3790_p12 = scmp.ne.s32.totalorder %s6678_s10, 0 }
 0x147   : > { %v749_v12 = vld [vmem:[#allocation2] sm:$0xf] (!%p3790_p12)  ;;  %v753_v13 = vld [vmem:[#allocation2 + $0x8] sm:$0x1] (!%p3790_p12)  ;;  %v5029_v15 = vmov (!%p3790_p12), 0  }
 0x148   : > { %748 = sbr.rel (%p3790_p12) target bundleno = 335 (0x14f), region = 68  ;;  %v750_v14 = vsel (!%p3790_p12), %vm5555_vm7, 0, %v749_v12  ;;  %752 = vst.msk [vmem:[#allocation2 + $0x4] sm:$0xf] (!%p3790_p12), %vm653_vm5, %v5029_v15  ;;  %v754_v16 = vsel (!%p3790_p12), %vm5499_vm2, 0, %v753_v13 }
 0x149   : > { %751 = vst [vmem:[#allocation2] sm:$0xf] (!%p3790_p12), %v750_v14  ;;  %755 = vst [vmem:[#allocation2 + $0x8] sm:$0x1] (!%p3790_p12), %v754_v16 }
 0x14f PF: > { %s6679_s20 = sld [smem:[#allocation22_spill]] }
 0x155   : > { %p3791_p2 = scmp.ge.s32.totalorder %s6679_s20, 1 }
 0x156   : > { %v760_v17 = vld [vmem:[%s353_s9] sm:$0xf] (!%p3791_p2)  ;;  %v761_v18 = vld [vmem:[%s353_s9 + $0x4] sm:$0xf] (!%p3791_p2) }
 0x157   : > { %759 = sbr.rel (%p3791_p2) target bundleno = 352 (0x160), region = 72  ;;  %v763_v19 = vshrl.u32 (!%p3791_p2), %v760_v17, 16  ;;  %v766_v20 = vshll.u32 (!%p3791_p2), %v760_v17, 16  ;;  %v771_v21 = vshrl.u32 (!%p3791_p2), %v761_v18, 16  ;;  %v774_v22 = vshll.u32 (!%p3791_p2), %v761_v18, 16 }
 0x158   : > { %v783_v25 = vld [vmem:[#allocation2 + $0x6c] sm:$0xf] (!%p3791_p2)  ;;  %v787_v26 = vld [vmem:[#allocation2 + $0x74] sm:$0x1] (!%p3791_p2) }
 0x159   : > { %v765_v23 = vrot.slane (!%p3791_p2), %v763_v19, 7  ;;  %v773_v24 = vrot.slane (!%p3791_p2), %v771_v21, 7 }
 0x15b   : > { %v768_v27 = vor.u32 (!%p3791_p2), %v766_v20, %v765_v23  ;;  %v769_v28 = vrot.slane (!%p3791_p2), %v765_v23, 4  ;;  %v776_v29 = vor.u32 (!%p3791_p2), %v774_v22, %v773_v24  ;;  %v778_v30 = vrot.slane (!%p3791_p2), %v773_v24, 4 }
 0x15d   : > { %v784_v31 = vsel (!%p3791_p2), %vm5555_vm7, %v768_v27, %v783_v25  ;;  %v777_v32 = vsel (!%p3791_p2), %vm5561_vm8, %v769_v28, %v776_v29  ;;  %v788_v33 = vsel (!%p3791_p2), %vm5499_vm2, %v778_v30, %v787_v26 }
 0x15e   : > { %785 = vst [vmem:[#allocation2 + $0x6c] sm:$0xf] %v784_v31  ;;  %786 = vst.msk [vmem:[#allocation2 + $0x70] sm:$0xf] %vm653_vm5, %v777_v32 }
 0x15f   : > { %789 = vst [vmem:[#allocation2 + $0x74] sm:$0x1] %v788_v33 }
 0x160 PF: > { %s6680_s14 = sld [smem:[#allocation22_spill]] }
 0x166   : > { %p3792_p0 = scmp.ne.s32.totalorder %s6680_s14, 1 }
 0x167   : > { %v795_v34 = vld [vmem:[#allocation2 + $0x6c] sm:$0xf] (!%p3792_p0)  ;;  %v799_v35 = vld [vmem:[#allocation2 + $0x74] sm:$0x1] (!%p3792_p0)  ;;  %v5030_v37 = vmov (!%p3792_p0), 0  }
 0x168   : > { %793 = sbr.rel (%p3792_p0) target bundleno = 367 (0x16f), region = 76  ;;  %v796_v36 = vsel (!%p3792_p0), %vm5555_vm7, 0, %v795_v34  ;;  %798 = vst.msk [vmem:[#allocation2 + $0x70] sm:$0xf] (!%p3792_p0), %vm653_vm5, %v5030_v37  ;;  %v800_v60 = vsel (!%p3792_p0), %vm5499_vm2, 0, %v799_v35 }
 0x169   : > { %797 = vst [vmem:[#allocation2 + $0x6c] sm:$0xf] (!%p3792_p0), %v796_v36  ;;  %801 = vst [vmem:[#allocation2 + $0x74] sm:$0x1] (!%p3792_p0), %v800_v60 }
 0x16f PF: > { %v4608_v38 = vld [vmem:[#allocation9 + $0x10] sm:$0xff]   ;;  %v4609_v39 = vld [vmem:[#allocation9 + $0x40] sm:$0xff]   ;;  %v4610_v40 = vld [vmem:[#allocation9 + $0x18] sm:$0xff]   ;;  %vm830_vm9 = vsmask.f32 3328  ;;  %vm1066_vm12 = vcmask 261120  }
 0x170   : > { %4133 = vmatprep.subr.bf16.mxu1 %v4608_v38  ;;  %4213 = vmatprep.subr.bf16.mxu0 %v4609_v39  ;;  %v4611_v41 = vld [vmem:[#allocation9 + $0x48] sm:$0xff]   ;;  %v5677_v43 = vld [vmem:[#allocation2 + $0x8] sm:$0x1]  ;;  %vm831_vm10 = vsmask.f32 7440  ;;  %v5684_v50 = vld [vmem:[#allocation9] sm:$0xff]  }
 0x171   : > { %4134 = vmatpush3.bf16.msra.mxu1 %v4608_v38  ;;  %4214 = vmatpush3.bf16.msra.mxu0 %v4609_v39  ;;  %v5673_v54 = vld [vmem:[#allocation2] sm:$0xf]  ;;  %v5675_v42 = vld [vmem:[#allocation2 + $0x4] sm:$0xf]  ;;  %v853_v47 = vshll.u32 %v5677_v43, 16  ;;  %v5686_v51 = vld [vmem:[#allocation9 + $0x50] sm:$0xff]  }
 0x172   : > { %4135 = vmatprep.subr.bf16.mxu1 %v4610_v40  ;;  %4215 = vmatprep.subr.bf16.mxu0 %v4611_v41  ;;  %v834_v0 = vshrl.u32 %v5673_v54, 16  ;;  %v837_v44 = vshll.u32 %v5673_v54, 16  ;;  %v843_v45 = vshll.u32 %v5675_v42, 16  ;;  %v847_v46 = vshrl.u32 %v5675_v42, 16  ;;  %v1832_v56 = vld [vmem:[#allocation2 + $0xc] sm:$0xf]  ;;  %vm5696_vm11 = vmor %vm830_vm9, %vm831_vm10 }
 0x173   : > { %v855_v55 = vrot.slane %v853_v47, 5  ;;  %v5689_v58 = vld [vmem:[#allocation2 + $0x10] sm:$0xf]  ;;  %v5691_v59 = vld [vmem:[#allocation2 + $0x14] sm:$0x1]  ;;  %v1857_v61 = vshrl.u32 %v1832_v56, 16 }
 0x174   : > { %v836_v48 = vrot.slane %v834_v0, 4  ;;  %v839_v49 = vrot.slane %v837_v44, 5  ;;  %v845_v52 = vrot.slane %v843_v45, 5  ;;  %v849_v53 = vrot.slane %v847_v46, 4  ;;  %v5703_v11 = vld [vmem:[#allocation2 + $0xc] sm:$0xf] }
 0x175   : > { %4136 = vmatpush3.bf16.msra.mxu1 %v4610_v40  ;;  %4216 = vmatpush3.bf16.msra.mxu0 %v4611_v41  ;;  %v1860_v62 = vshll.u32 %v1832_v56, 16  ;;  %v1866_v2 = vshll.u32 %v5689_v58, 16  ;;  %v1870_v3 = vshrl.u32 %v5689_v58, 16  ;;  %v1876_v4 = vshll.u32 %v5691_v59, 16  ;;  %v5707_v15 = vld [vmem:[#allocation2 + $0x10] sm:$0xf] }
 0x176   : > { %v840_v57 = vor.u32 %v839_v49, %v836_v48  ;;  %4153 = vmatprep.subr.bf16.mxu1 %v5684_v50  ;;  %4233 = vmatprep.subr.bf16.mxu0 %v5686_v51  ;;  %v850_v1 = vor.u32 %v849_v53, %v845_v52  ;;  %v1859_v6 = vrot.slane %v1857_v61, 4  ;;  %v5709_v16 = vld [vmem:[#allocation2 + $0x14] sm:$0x1]  ;;  %v858_v17 = vshrl.u32 %v5703_v11, 16  ;;  %v1835_v26 = vld [vmem:[#allocation2 + $0x18] sm:$0xf] }
 0x177   : > { %v1862_v7 = vrot.slane %v1860_v62, 5  ;;  %v1868_v9 = vrot.slane %v1866_v2, 5  ;;  %v1872_v10 = vrot.slane %v1870_v3, 4  ;;  %v1878_v14 = vrot.slane %v1876_v4, 5  ;;  %v5718_v31 = vld [vmem:[#allocation2 + $0x1c] sm:$0xf] }
 0x178   : > { %v841_v5 = vrot.slane %v840_v57, 4  ;;  %v851_v8 = vrot.slane %v850_v1, 4  ;;  %v861_v20 = vshll.u32 %v5703_v11, 16  ;;  %v867_v21 = vshll.u32 %v5707_v15, 16  ;;  %v5725_v36 = vld [vmem:[#allocation2 + $0x20] sm:$0x1] }
 0x179   : > { %v1863_v13 = vor.u32 %v1862_v7, %v1859_v6  ;;  %v1873_v19 = vor.u32 %v1872_v10, %v1868_v9  ;;  %v860_v24 = vrot.slane %v858_v17, 4  ;;  %v871_v25 = vshrl.u32 %v5707_v15, 16  ;;  %v5730_v45 = vld [vmem:[#allocation2 + $0x18] sm:$0xf]  ;;  %v5732_v46 = vld [vmem:[#allocation2 + $0x1c] sm:$0xf] }
 0x17a   : > { %v846_v12 = vsel %vm5696_vm11, %v841_v5, %v845_v52  ;;  %v856_v18 = vsel %vm5696_vm11, %v851_v8, %v855_v55  ;;  %v863_v28 = vrot.slane %v861_v20, 5  ;;  %v869_v29 = vrot.slane %v867_v21, 5  ;;  %v5741_v3 = vld [vmem:[#allocation2 + $0x20] sm:$0x1]  ;;  %v1838_v8 = vld [vmem:[#allocation2 + $0x24] sm:$0xf] }
 0x17b   : > { %v3793_v22 = vcombine.low %v846_v12, %v856_v18  ;;  %v1864_v23 = vrot.slane %v1863_v13, 4  ;;  %v1874_v27 = vrot.slane %v1873_v19, 4  ;;  %v877_v30 = vshll.u32 %v5709_v16, 16  ;;  %v5754_v21 = vld [vmem:[#allocation2 + $0x28] sm:$0xf]  ;;  %s6692_s30 = sld [smem:[#allocation22_spill]] }
 0x17c   : > { %v2260_v33 = vrot.slane %v5689_v58, 5  ;;  %v2263_v34 = vrot.slane %v5691_v59, 5  ;;  %v873_v35 = vrot.slane %v871_v25, 4  ;;  %v864_v60 = vor.u32 %v863_v28, %v860_v24  ;;  %v5757_v25 = vld [vmem:[#allocation2 + $0x2c] sm:$0x1]  ;;  %s6693_s11 = sld [smem:[#allocation23_spill]] }
 0x17d   : > { %4137 = vmatprep.mubr.msk.bf16.mxu1 %vm1066_vm12, %v3793_v22  ;;  %v1869_v32 = vsel %vm5696_vm11, %v1864_v23, %v1868_v9  ;;  %v1879_v37 = vsel %vm5696_vm11, %v1874_v27, %v1878_v14  ;;  %v879_v38 = vrot.slane %v877_v30, 5  ;;  %v1881_v39 = vshrl.u32 %v1835_v26, 16  ;;  %v4615_v14 = vld [vmem:[#allocation9 + $0x8] sm:$0xff]   ;;  %s3596_s19 = sshll.u32 %s5635_s7, 4  ;;  %s6694_s1 = sld [smem:[#allocation37_spill]]  ;;  %s6488_s19 = int_to_ptr.vmem [resolvable:$true] %s3596_s19 }
 0x17e   : > { %v3873_v40 = vcombine.low %v1869_v32, %v1879_v37  ;;  %v874_v41 = vor.u32 %v873_v35, %v869_v29  ;;  %v1884_v0 = vshll.u32 %v1835_v26, 16  ;;  %v1890_v44 = vshll.u32 %v5718_v31, 16  ;;  %v4614_v32 = vld [vmem:[#allocation9 + $0x58] sm:$0xff]   ;;  %v5762_v35 = vld [vmem:[#allocation2 + $0x24] sm:$0xf]  ;;  %v5764_v37 = vld [vmem:[#allocation9 + $0x20] sm:$0xff]  }
 0x17f   : > { %v865_v47 = vrot.slane %v864_v60, 4  ;;  %v1883_v48 = vrot.slane %v1881_v39, 4  ;;  %v1894_v49 = vshrl.u32 %v5718_v31, 16  ;;  %v1900_v52 = vshll.u32 %v5725_v36, 16  ;;  %s3580_s4 = scalar_lea.sflag [#allocation5], %s5464_s12  ;;  %s4862_s22 = scalar_lea.vmem %s6488_s19, 1024 }
 0x180   : > { %4217 = vmatprep.mubr.msk.bf16.mxu0 %vm1066_vm12, %v3873_v40  ;;  %v875_v53 = vrot.slane %v874_v41, 4  ;;  %v1886_v55 = vrot.slane %v1884_v0, 5  ;;  %v1892_v56 = vrot.slane %v1890_v44, 5  ;;  %v2267_v57 = vrot.slane %v5718_v31, 5  ;;  %v5769_v41 = vld [vmem:[#allocation2 + $0x28] sm:$0xf]  ;;  %p4863_p13 = scmp.ne.s32.totalorder %s6488_s19, %s4862_s22 }
 0x181   : > { %v870_v61 = vsel %vm5696_vm11, %v865_v47, %v869_v29  ;;  %v1896_v62 = vrot.slane %v1894_v49, 4  ;;  %v1902_v1 = vrot.slane %v1900_v52, 5  ;;  %v2270_v2 = vrot.slane %v5725_v36, 5  ;;  %s4042_s3 = sshll.u32 %s6692_s30, 4  ;;  %p6695_p1 = scmp.ne.s32.totalorder %s6640_s2, 0 }
 0x182   : > { %v880_v4 = vsel %vm5696_vm11, %v875_v53, %v879_v38  ;;  %v1887_v5 = vor.u32 %v1886_v55, %v1883_v48  ;;  %v5747_v6 = vrot.slane %v2267_v57, 4  ;;  %v882_v7 = vshrl.u32 %v5730_v45, 16  ;;  %v5772_v48 = vld [vmem:[#allocation2 + $0x2c] sm:$0x1]  ;;  %s4015_s0 = sshll.u32 %s6693_s11, 5  ;;  %s5031_s9 = smov [#allocation12]  }
 0x183   : > { %v3794_v9 = vcombine.low %v870_v61, %v880_v4  ;;  %v1897_v10 = vor.u32 %v1896_v62, %v1892_v56  ;;  %v885_v12 = vshll.u32 %v5730_v45, 16  ;;  %v891_v13 = vshll.u32 %v5732_v46, 16  ;;  %s3593_s29 = sadd.s32 %s4042_s3, %s4015_s0  ;;  %p4864_p8 = pnand %p4863_p13, %p6695_p1 }
 0x184   : > { %v1888_v17 = vrot.slane %v1887_v5, 4  ;;  %v884_v18 = vrot.slane %v882_v7, 4  ;;  %v895_v19 = vshrl.u32 %v5732_v46, 16  ;;  %v901_v20 = vshll.u32 %v5741_v3, 16  ;;  %s4016_s18 = sshll.u32 %s3593_s29, 6  ;;  %s4866_s17 = sshll.u32 %s5031_s9, 4  ;;  %s4867_s17 = int_to_ptr.vmem [resolvable:$false] %s4866_s17 }
 0x185   : > { %4138 = vmatmul.mubr.msk.bf16.vlgmr.msra.gmra.mrb[0].mxu1 %vm1066_vm12, %v3794_v9  ;;  %v1898_v22 = vrot.slane %v1897_v10, 4  ;;  %v887_v23 = vrot.slane %v885_v12, 5  ;;  %v893_v24 = vrot.slane %v891_v13, 5  ;;  %v1905_v26 = vshrl.u32 %v1838_v8, 16  ;;  %v1841_v9 = vld [vmem:[#allocation2 + $0x30] sm:$0xf]  ;;  %s6486_s8 = scalar_lea.hbm %s6694_s1, %s4016_s18  ;;  %p4865_p5 = pneg %p4864_p8 }
 0x186   : > { %4154 = vmatpush3.bf16.msra.mxu1 %v5684_v50  ;;  %v1893_v27 = vsel %vm5696_vm11, %v1888_v17, %v1892_v56  ;;  %v897_v28 = vrot.slane %v895_v19, 4  ;;  %v903_v29 = vrot.slane %v901_v20, 5  ;;  %v1908_v30 = vshll.u32 %v1838_v8, 16  ;;  %v5787_v17 = vld [vmem:[#allocation9 + $0x60] sm:$0xff]   ;;  %s4868_s10 = scalar_lea.vmem %s4867_s17, 2048  ;;  %p4869_p6 = scmp.lt.s32.totalorder %s6488_s19, %s4867_s17 }
 0x187   : > { %v1903_v60 = vsel %vm5696_vm11, %v1898_v22, %v1902_v1  ;;  %v888_v38 = vor.u32 %v887_v23, %v884_v18  ;;  %v1907_v39 = vrot.slane %v1905_v26, 4  ;;  %v1914_v40 = vshll.u32 %v5754_v21, 16  ;;  %4155 = vmatprep.subr.bf16.mxu1 %v4615_v14  ;;  %p4870_p9 = scmp.lt.s32.totalorder %s4868_s10, %s4862_s22 }
 0x188   : > { %v3874_v50 = vcombine.low %v1893_v27, %v1903_v60  ;;  %v898_v0 = vor.u32 %v897_v28, %v893_v24  ;;  %v1910_v44 = vrot.slane %v1908_v30, 5  ;;  %v1918_v47 = vshrl.u32 %v5754_v21, 16  ;;  %v5793_v27 = vld [vmem:[#allocation2 + $0x38] sm:$0x1] }
 0x189   : > { %v889_v49 = vrot.slane %v888_v38, 4  ;;  %v1916_v52 = vrot.slane %v1914_v40, 5  ;;  %v1924_v53 = vshll.u32 %v5757_v25, 16  ;;  %v906_v55 = vshrl.u32 %v5762_v35, 16  ;;  %p4871_p11 = por %p4870_p9, %p4869_p6 }
 0x18a   : > { %4218 = vmatmul.mubr.msk.bf16.vlgmr.msra.gmra.mrb[0].mxu0 %vm1066_vm12, %v3874_v50  ;;  %v899_v56 = vrot.slane %v898_v0, 4  ;;  %v1911_v61 = vor.u32 %v1910_v44, %v1907_v39  ;;  %v1920_v62 = vrot.slane %v1918_v47, 4  ;;  %v909_v1 = vshll.u32 %v5762_v35, 16  ;;  %4156 = vmatpush3.bf16.msra.mxu1 %v4615_v14  ;;  %v5797_v39 = vld [vmem:[#allocation2 + $0x30] sm:$0xf] }
 0x18b   : > { %4234 = vmatpush3.bf16.msra.mxu0 %v5686_v51  ;;  %v894_v4 = vsel %vm5696_vm11, %v889_v49, %v893_v24  ;;  %v1926_v5 = vrot.slane %v1924_v53, 5  ;;  %v908_v7 = vrot.slane %v906_v55, 4  ;;  %v915_v8 = vshll.u32 %v5769_v41, 16  ;;  %4173 = vmatprep.subr.bf16.mxu1 %v5764_v37  ;;  %v5785_v51 = vld [vmem:[#allocation2 + $0x34] sm:$0xf]  ;;  %p4872_p3 = pnand %p4871_p11, %p4865_p5 }
 0x18c   : > { %vm1385_vm13 = vcmask 1042432   ;;  %vm1386_vm14 = vcmask 1046532   ;;  %v904_v10 = vsel %vm5696_vm11, %v899_v56, %v903_v29  ;;  %v1912_v12 = vrot.slane %v1911_v61, 4  ;;  %4235 = vmatprep.subr.bf16.mxu0 %v4614_v32  ;;  %v5802_v47 = vld [vmem:[#allocation2 + $0x34] sm:$0xf] }
 0x18d   : > { %v1921_v13 = vor.u32 %v1920_v62, %v1916_v52  ;;  %v911_v14 = vrot.slane %v909_v1, 5  ;;  %v3795_v18 = vcombine.low %v894_v4, %v904_v10  ;;  %v917_v19 = vrot.slane %v915_v8, 5  ;;  %v5805_v56 = vld [vmem:[#allocation2 + $0x38] sm:$0x1]  ;;  %v2226_v4 = vld [vmem:[#allocation2 + $0xc] sm:$0xe]  ;;  %vm5822_vm15 = vmor %vm1385_vm13, %vm1386_vm14 }
 0x18e   : > { %v919_v20 = vshrl.u32 %v5769_v41, 16  ;;  %v925_v22 = vshll.u32 %v5772_v48, 16  ;;  %v1917_v23 = vsel %vm5696_vm11, %v1912_v12, %v1916_v52  ;;  %v1929_v28 = vshrl.u32 %v1841_v9, 16  ;;  %v5814_v10 = vld [vmem:[#allocation2 + $0x3c] sm:$0xf] }
 0x18f   : > { %v1922_v24 = vrot.slane %v1921_v13, 4  ;;  %v912_v26 = vor.u32 %v911_v14, %v908_v7  ;;  %4141 = vmatprep.mubr.msk.bf16.mxu1 %vm1066_vm12, %v3795_v18  ;;  %v1932_v60 = vshll.u32 %v1841_v9, 16  ;;  %v1938_v38 = vshll.u32 %v5785_v51, 16  ;;  %4236 = vmatpush3.bf16.msra.mxu0 %v4614_v32 }
 0x190   : > { %v921_v29 = vrot.slane %v919_v20, 4  ;;  %v927_v30 = vrot.slane %v925_v22, 5  ;;  %v1931_v0 = vrot.slane %v1929_v28, 4  ;;  %v1942_v44 = vshrl.u32 %v5785_v51, 16  ;;  %4253 = vmatprep.subr.bf16.mxu0 %v5787_v17 }
 0x191   : > { %v1927_v40 = vsel %vm5696_vm11, %v1922_v24, %v1926_v5  ;;  %v913_v50 = vrot.slane %v912_v26, 4  ;;  %v1934_v53 = vrot.slane %v1932_v60, 5  ;;  %v1940_v55 = vrot.slane %v1938_v38, 5 }
 0x192   : > { %v3875_v49 = vcombine.low %v1917_v23, %v1927_v40  ;;  %v922_v52 = vor.u32 %v921_v29, %v917_v19  ;;  %v1944_v61 = vrot.slane %v1942_v44, 4  ;;  %v1948_v62 = vshll.u32 %v5793_v27, 16  ;;  %v5832_v44 = vld [vmem:[#allocation2 + $0x44] sm:$0x1] }
 0x193   : > { %v918_v32 = vsel %vm5696_vm11, %v913_v50, %v917_v19  ;;  %v930_v1 = vshrl.u32 %v5797_v39, 16  ;;  %v1935_v7 = vor.u32 %v1934_v53, %v1931_v0  ;;  %v933_v8 = vshll.u32 %v5797_v39, 16  ;;  %v5830_v0 = vld [vmem:[#allocation2 + $0x40] sm:$0xf] }
 0x194   : > { %4221 = vmatprep.mubr.msk.bf16.mxu0 %vm1066_vm12, %v3875_v49  ;;  %v923_v5 = vrot.slane %v922_v52, 4  ;;  %v939_v9 = vshll.u32 %v5802_v47, 16  ;;  %v1945_v12 = vor.u32 %v1944_v61, %v1940_v55  ;;  %v1950_v13 = vrot.slane %v1948_v62, 5 }
 0x195   : > { %v932_v14 = vrot.slane %v930_v1, 4  ;;  %v943_v18 = vshrl.u32 %v5802_v47, 16  ;;  %v1936_v20 = vrot.slane %v1935_v7, 4  ;;  %v935_v22 = vrot.slane %v933_v8, 5 }
 0x196   : > { %v928_v19 = vsel %vm5696_vm11, %v923_v5, %v927_v30  ;;  %v941_v23 = vrot.slane %v939_v9, 5  ;;  %v1946_v26 = vrot.slane %v1945_v12, 4  ;;  %v949_v29 = vshll.u32 %v5805_v56, 16 }
 0x197   : > { %v3796_v24 = vcombine.low %v918_v32, %v928_v19  ;;  %v945_v28 = vrot.slane %v943_v18, 4  ;;  %v1941_v38 = vsel %vm5696_vm11, %v1936_v20, %v1940_v55  ;;  %v936_v40 = vor.u32 %v935_v22, %v932_v14  ;;  %v5863_v20 = vld [vmem:[#allocation2 + $0x4c] sm:$0xf] }
 0x198   : > { %v3891_v50 = vrot.slane %v2226_v4, 9  ;;  %v2262_v30 = vrot.slane %v2260_v33, 4  ;;  %v1951_v49 = vsel %vm5696_vm11, %v1946_v26, %v1950_v13  ;;  %v951_v53 = vrot.slane %v949_v29, 5  ;;  %v2227_v4 = vld [vmem:[#allocation2 + $0x18] sm:$0xe] }
 0x199   : > { %4142 = vmatmul.mubr.msk.bf16.gmra.mrb[4].mxu1 %vm1066_vm12, %v3796_v24  ;;  %v946_v52 = vor.u32 %v945_v28, %v941_v23  ;;  %v954_v32 = vshrl.u32 %v5814_v10, 16  ;;  %v3876_v61 = vcombine.low %v1941_v38, %v1951_v49  ;;  %v937_v55 = vrot.slane %v936_v40, 4  ;;  %v5853_v13 = vld [vmem:[#allocation2 + $0x48] sm:$0xf]  ;;  %v5865_v28 = vld [vmem:[#allocation2 + $0x50] sm:$0x1] }
 0x19a   : > { %v2261_v62 = vsel %vm5822_vm15, %v3891_v50, %v2260_v33  ;;  %v2264_v1 = vsel %vm5822_vm15, %v2262_v30, %v2263_v34  ;;  %v957_v9 = vshll.u32 %v5814_v10, 16  ;;  %v963_v58 = vshll.u32 %v5830_v0, 16  ;;  %v2228_v50 = vld [vmem:[#allocation2 + $0x24] sm:$0xe] }
 0x19b   : > { %v947_v5 = vrot.slane %v946_v52, 4  ;;  %v3899_v7 = vcombine.low %v2261_v62, %v2264_v1  ;;  %v956_v8 = vrot.slane %v954_v32, 4  ;;  %4222 = vmatmul.mubr.msk.bf16.gmra.mrb[4].mxu0 %vm1066_vm12, %v3876_v61  ;;  %v942_v12 = vsel %vm5696_vm11, %v937_v55, %v941_v23  ;;  %v5879_v55 = vld [vmem:[#allocation2 + $0x58] sm:$0xf] }
 0x19c   : > { %v967_v33 = vshrl.u32 %v5830_v0, 16  ;;  %v973_v59 = vshll.u32 %v5832_v44, 16  ;;  %v959_v14 = vrot.slane %v957_v9, 5  ;;  %v3892_v18 = vrot.slane %v2227_v4, 9 }
 0x19d   : > { %v952_v34 = vsel %vm5696_vm11, %v947_v5, %v951_v53  ;;  %4237 = vmatprep.mubr.msk.bf16.mxu0 %vm1066_vm12, %v3899_v7  ;;  %v2271_v19 = vsel %vm5822_vm15, %v5747_v6, %v2270_v2  ;;  %v965_v23 = vrot.slane %v963_v58, 5  ;;  %v978_v36 = vshrl.u32 %v5853_v13, 16  ;;  %v5873_v2 = vld [vmem:[#allocation2 + $0x54] sm:$0xf]  ;;  %v4619_v53 = vld [vmem:[#allocation9 + $0x68] sm:$0xff]  }
 0x19e   : > { %v3797_v22 = vcombine.low %v942_v12, %v952_v34  ;;  %v969_v24 = vrot.slane %v967_v33, 4  ;;  %v975_v26 = vrot.slane %v973_v59, 5  ;;  %v960_v29 = vor.u32 %v959_v14, %v956_v8  ;;  %v5881_v7 = vld [vmem:[#allocation2 + $0x5c] sm:$0x1] }
 0x19f   : > { %v2268_v38 = vsel %vm5822_vm15, %v3892_v18, %v2267_v57  ;;  %v981_v40 = vshll.u32 %v5853_v13, 16  ;;  %v987_v49 = vshll.u32 %v5863_v20, 16  ;;  %v991_v52 = vshrl.u32 %v5863_v20, 16  ;;  %v2229_v18 = vld [vmem:[#allocation2 + $0x30] sm:$0xe] }
 0x1a0   : > { %4145 = vmatprep.mubr.msk.bf16.mxu1 %vm1066_vm12, %v3797_v22  ;;  %v970_v6 = vor.u32 %v969_v24, %v965_v23  ;;  %v3900_v30 = vcombine.low %v2268_v38, %v2271_v19  ;;  %v961_v31 = vrot.slane %v960_v29, 4  ;;  %v980_v32 = vrot.slane %v978_v36, 4  ;;  %v5891_v19 = vld [vmem:[#allocation9 + $0x70] sm:$0xff]  }
 0x1a1   : > { %v983_v61 = vrot.slane %v981_v40, 5  ;;  %v997_v57 = vshll.u32 %v5865_v28, 16  ;;  %v989_v1 = vrot.slane %v987_v49, 5  ;;  %v993_v4 = vrot.slane %v991_v52, 4  ;;  %v5900_v40 = vld [vmem:[#allocation2 + $0x44] sm:$0x1] }
 0x1a2   : > { %v971_v62 = vrot.slane %v970_v6, 4  ;;  %v3893_v5 = vrot.slane %v2228_v50, 9  ;;  %v966_v8 = vsel %vm5696_vm11, %v961_v31, %v965_v23  ;;  %v2274_v58 = vrot.slane %v5754_v21, 5  ;;  %v2230_v49 = vld [vmem:[#allocation2 + $0x3c] sm:$0xe] }
 0x1a3   : > { %v984_v9 = vor.u32 %v983_v61, %v980_v32  ;;  %v999_v12 = vrot.slane %v997_v57, 5  ;;  %4238 = vmatmul.mubr.msk.bf16.vlgmr.msra.gmra.mrb[0].mxu0 %vm1066_vm12, %v3900_v30  ;;  %v994_v59 = vor.u32 %v993_v4, %v989_v1  ;;  %v2277_v34 = vrot.slane %v5757_v25, 5  ;;  %v5898_v25 = vld [vmem:[#allocation2 + $0x40] sm:$0xf] }
 0x1a4   : > { %v976_v33 = vsel %vm5696_vm11, %v971_v62, %v975_v26  ;;  %v1002_v14 = vshrl.u32 %v5873_v2, 16  ;;  %4254 = vmatpush3.bf16.msra.mxu0 %v5787_v17  ;;  %v2275_v21 = vsel %vm5822_vm15, %v3893_v5, %v2274_v58  ;;  %v2276_v24 = vrot.slane %v2274_v58, 4 }
 0x1a5   : > { %v3798_v22 = vcombine.low %v966_v8, %v976_v33  ;;  %v985_v23 = vrot.slane %v984_v9, 4  ;;  %v995_v29 = vrot.slane %v994_v59, 4  ;;  %v1005_v38 = vshll.u32 %v5873_v2, 16  ;;  %4255 = vmatprep.subr.bf16.mxu0 %v4619_v53 }
 0x1a6   : > { %v1004_v26 = vrot.slane %v1002_v14, 4  ;;  %v1011_v36 = vshll.u32 %v5879_v55, 16  ;;  %v2278_v50 = vsel %vm5822_vm15, %v2276_v24, %v2277_v34  ;;  %v1015_v6 = vshrl.u32 %v5879_v55, 16  ;;  %v5926_v24 = vld [vmem:[#allocation2 + $0x58] sm:$0xf] }
 0x1a7   : > { %4146 = vmatmul.mubr.msk.bf16.gmra.mrb[8].mxu1 %vm1066_vm12, %v3798_v22  ;;  %v990_v17 = vsel %vm5696_vm11, %v985_v23, %v989_v1  ;;  %v1021_v30 = vshll.u32 %v5881_v7, 16  ;;  %v1000_v52 = vsel %vm5696_vm11, %v995_v29, %v999_v12  ;;  %v3901_v31 = vcombine.low %v2275_v21, %v2278_v50 }
 0x1a8   : > { %v1007_v32 = vrot.slane %v1005_v38, 5  ;;  %v1013_v61 = vrot.slane %v1011_v36, 5  ;;  %v3799_v57 = vcombine.low %v990_v17, %v1000_v52  ;;  %v1017_v62 = vrot.slane %v1015_v6, 4  ;;  %4256 = vmatpush3.bf16.msra.mxu0 %v4619_v53  ;;  %v5932_v38 = vld [vmem:[#allocation2 + $0x5c] sm:$0x1] }
 0x1a9   : > { %v1023_v4 = vrot.slane %v1021_v30, 5  ;;  %v3894_v5 = vrot.slane %v2229_v18, 9  ;;  %4241 = vmatprep.mubr.msk.bf16.mxu0 %vm1066_vm12, %v3901_v31  ;;  %v2281_v8 = vrot.slane %v5785_v51, 5  ;;  %v2284_v9 = vrot.slane %v5793_v27, 5  ;;  %4273 = vmatprep.subr.bf16.mxu0 %v5891_v19  ;;  %v5920_v18 = vld [vmem:[#allocation2 + $0x4c] sm:$0xf] }
 0x1aa   : > { %v1008_v1 = vor.u32 %v1007_v32, %v1004_v26  ;;  %v3895_v58 = vrot.slane %v2230_v49, 9  ;;  %4149 = vmatprep.mubr.msk.bf16.mxu1 %vm1066_vm12, %v3799_v57  ;;  %v1018_v12 = vor.u32 %v1017_v62, %v1013_v61  ;;  %v2288_v33 = vrot.slane %v5898_v25, 5  ;;  %v5922_v51 = vld [vmem:[#allocation2 + $0x50] sm:$0x1]  ;;  %v2231_v27 = vld [vmem:[#allocation2 + $0x48] sm:$0xe] }
 0x1ab   : > { %v2291_v59 = vrot.slane %v5900_v40, 5  ;;  %v2282_v53 = vsel %vm5822_vm15, %v3894_v5, %v2281_v8  ;;  %v2283_v14 = vrot.slane %v2281_v8, 4  ;;  %v2232_v36 = vld [vmem:[#allocation2 + $0x54] sm:$0xe]  ;;  %v3811_v6 = vcombine.low %v5673_v54, %v5675_v42  ;;  %v5940_v49 = vld [vmem:[#allocation2 + $0x64] sm:$0xf] }
 0x1ac   : > { %v1009_v34 = vrot.slane %v1008_v1, 4  ;;  %v1019_v22 = vrot.slane %v1018_v12, 4  ;;  %v2289_v23 = vsel %vm5822_vm15, %v3895_v58, %v2288_v33  ;;  %v2290_v21 = vrot.slane %v2288_v33, 4 }
 0x1ad   : > { %v2285_v26 = vsel %vm5822_vm15, %v2283_v14, %v2284_v9  ;;  %v3896_v32 = vrot.slane %v2231_v27, 9  ;;  %v2295_v57 = vrot.slane %v5920_v18, 5  ;;  %v2298_v62 = vrot.slane %v5922_v51, 5 }
 0x1ae   : > { %v1014_v29 = vsel %vm5696_vm11, %v1009_v34, %v1013_v61  ;;  %v1024_v17 = vsel %vm5696_vm11, %v1019_v22, %v1023_v4  ;;  %v3902_v50 = vcombine.low %v2282_v53, %v2285_v26  ;;  %v2292_v30 = vsel %vm5822_vm15, %v2290_v21, %v2291_v59  ;;  %v5942_v61 = vld [vmem:[#allocation2 + $0x68] sm:$0x1]  ;;  %v2233_v4 = vld [vmem:[#allocation2 + $0x60] sm:$0xe]  ;;  %v1362_v53 = vld [vmem:[#allocation2 + $0xc] sm:$0xe] }
 0x1af   : > { %v3800_v52 = vcombine.low %v1014_v29, %v1024_v17  ;;  %v3903_v31 = vcombine.low %v2289_v23, %v2292_v30  ;;  %6685 = vst [vmem:[#allocation31_spill] sm:$0xff] %v5942_v61  ;;  %v3897_v54 = vrot.slane %v2232_v36, 9  ;;  %v2302_v5 = vrot.slane %v5926_v24, 5  ;;  %v1363_v23 = vld [vmem:[#allocation2 + $0x18] sm:$0xe] }
 0x1b0   : > { %4242 = vmatmul.mubr.msk.bf16.gmra.mrb[4].mxu0 %vm1066_vm12, %v3902_v50  ;;  %v2305_v1 = vrot.slane %v5932_v38, 5  ;;  %v1397_v8 = vrot.slane %v5707_v15, 5  ;;  %v2296_v9 = vsel %vm5822_vm15, %v3896_v32, %v2295_v57  ;;  %v2297_v58 = vrot.slane %v2295_v57, 4  ;;  %v1364_v50 = vld [vmem:[#allocation2 + $0x24] sm:$0xe] }
 0x1b1   : > { %4150 = vmatmul.mubr.msk.bf16.gmra.mrb[12].mxu1 %vm1066_vm12, %v3800_v52  ;;  %4245 = vmatprep.mubr.msk.bf16.mxu0 %vm1066_vm12, %v3903_v31  ;;  %v1400_v12 = vrot.slane %v5709_v16, 5  ;;  %v2303_v33 = vsel %vm5822_vm15, %v3897_v54, %v2302_v5  ;;  %v2304_v59 = vrot.slane %v2302_v5, 4  ;;  %v2309_v34 = vrot.slane %v5940_v49, 5  ;;  %v1365_v57 = vld [vmem:[#allocation2 + $0x30] sm:$0xe] }
 0x1b2   : > { %4157 = vmatprep.mubr.msk.bf16.mxu1 %vm1066_vm12, %v3811_v6  ;;  %v2299_v14 = vsel %vm5822_vm15, %v2297_v58, %v2298_v62  ;;  %v3898_v27 = vrot.slane %v2233_v4, 9  ;;  %v2312_v22 = vrot.slane %v5942_v61, 5  ;;  %v3812_v21 = vcombine.low %v5703_v11, %v5707_v15  ;;  %v4624_v6 = vld [vmem:[#allocation9 + $0x28] sm:$0xff]   ;;  %v6157_v61 = vld [vmem:[#allocation2 + $0x58] sm:$0xf] }
 0x1b3   : > { %v3904_v29 = vcombine.low %v2296_v9, %v2299_v14  ;;  %v2306_v16 = vsel %vm5822_vm15, %v2304_v59, %v2305_v1  ;;  %v2311_v26 = vrot.slane %v2309_v34, 4  ;;  %v3813_v36 = vcombine.low %v5730_v45, %v5732_v46  ;;  %v4625_v14 = vld [vmem:[#allocation2 + $0x18] sm:$0xff]  }
 0x1b4   : > { %v3905_v17 = vcombine.low %v2303_v33, %v2306_v16  ;;  %v3830_v30 = vrot.slane %v1362_v53, 9  ;;  %v1399_v52 = vrot.slane %v1397_v8, 4  ;;  %v3831_v31 = vrot.slane %v1363_v23, 9  ;;  %v2703_v16 = vld [vmem:[#allocation2 + $0x18] sm:$0xf] }
 0x1b5   : > { %v2310_v32 = vsel %vm5822_vm15, %v3898_v27, %v2309_v34  ;;  %v2313_v11 = vsel %vm5822_vm15, %v2311_v26, %v2312_v22  ;;  %v1404_v15 = vrot.slane %v5732_v46, 5  ;;  %v1407_v4 = vrot.slane %v5741_v3, 5  ;;  %v1366_v34 = vld [vmem:[#allocation2 + $0x3c] sm:$0xe] }
 0x1b6   : > { %v5978_v45 = vsel %vm5822_vm15, %v3830_v30, %v1397_v8  ;;  %v5982_v62 = vsel %vm5822_vm15, %v1399_v52, %v1400_v12  ;;  %v3832_v54 = vrot.slane %v1364_v50, 9  ;;  %v5993_v8 = vld [vmem:[#allocation9 + $0x30] sm:$0xff]   ;;  %v1411_v9 = vrot.slane %v5769_v41, 5 }
 0x1b7   : > { %v3838_v46 = vcombine.low %v5978_v45, %v5982_v62  ;;  %v5991_v5 = vsel %vm5822_vm15, %v3831_v31, %v1404_v15  ;;  %v1406_v1 = vrot.slane %v1404_v15, 4  ;;  %v1414_v3 = vrot.slane %v5772_v48, 5  ;;  %v4628_v15 = vld [vmem:[#allocation2 + $0x24] sm:$0xff]  }
 0x1b8   : > { %4246 = vmatmul.mubr.msk.bf16.gmra.mrb[8].mxu0 %vm1066_vm12, %v3904_v29  ;;  %v3833_v58 = vrot.slane %v1365_v57, 9  ;;  %v3906_v12 = vcombine.low %v2310_v32, %v2313_v11  ;;  %v1418_v33 = vrot.slane %v5802_v47, 5  ;;  %v1421_v59 = vrot.slane %v5805_v56, 5  ;;  %v1361_v29 = vld [vmem:[#allocation2] sm:$0xe] }
 0x1b9   : > { %4158 = vmatmul.mubr.msk.bf16.vlgmr.msra.gmra.mrb[0].mxu1 %vm1066_vm12, %v3812_v21  ;;  %4249 = vmatprep.mubr.msk.bf16.mxu0 %vm1066_vm12, %v3905_v17  ;;  %v3814_v53 = vcombine.low %v5762_v35, %v5769_v41  ;;  %v6009_v48 = vsel %vm5822_vm15, %v3832_v54, %v1411_v9  ;;  %v1413_v22 = vrot.slane %v1411_v9, 4  ;;  %v3815_v23 = vcombine.low %v5797_v39, %v5802_v47  ;;  %v1367_v11 = vld [vmem:[#allocation2 + $0x48] sm:$0xe] }
 0x1ba   : > { %4174 = vmatpush3.bf16.msra.mxu1 %v5764_v37  ;;  %4161 = vmatprep.mubr.msk.bf16.mxu1 %vm1066_vm12, %v3813_v36  ;;  %v5999_v37 = vsel %vm5822_vm15, %v1406_v1, %v1407_v4  ;;  %v6015_v56 = vsel %vm5822_vm15, %v3833_v58, %v1418_v33  ;;  %v1420_v21 = vrot.slane %v1418_v33, 4  ;;  %v1390_v35 = vrot.slane %v5675_v42, 5  ;;  %v6034_v36 = vld [vmem:[#allocation2 + $0x1c] sm:$0xf]  ;;  %v4635_v33 = vld [vmem:[#allocation9 + $0x78] sm:$0xff]  }
 0x1bb   : > { %4175 = vmatprep.subr.bf16.mxu1 %v4624_v6  ;;  %v3839_v27 = vcombine.low %v5991_v5, %v5999_v37  ;;  %v6021_v41 = vsel %vm5822_vm15, %v1413_v22, %v1414_v3  ;;  %v3834_v26 = vrot.slane %v1366_v34, 9  ;;  %v3829_v17 = vrot.slane %v1361_v29, 9  ;;  %v2706_v29 = vld [vmem:[#allocation2 + $0x24] sm:$0xf] }
 0x1bc   : > { %v6028_v47 = vsel %vm5822_vm15, %v1420_v21, %v1421_v59  ;;  %v1425_v50 = vrot.slane %v5830_v0, 5  ;;  %v1393_v30 = vrot.slane %v5677_v43, 5  ;;  %v1392_v52 = vrot.slane %v1390_v35, 4  ;;  %v6071_v21 = vld [vmem:[#allocation9 + $0x80] sm:$0xff]  }
 0x1bd   : > { %v2728_v31 = vshrl.u32 %v2703_v16, 16  ;;  %v2731_v32 = vshll.u32 %v2703_v16, 16  ;;  %v2737_v57 = vshll.u32 %v6034_v36, 16  ;;  %v2741_v4 = vshrl.u32 %v6034_v36, 16 }
 0x1be   : > { %4176 = vmatpush3.bf16.msra.mxu1 %v4624_v6  ;;  %v1428_v6 = vrot.slane %v5832_v44, 5  ;;  %v6044_v54 = vsel %vm5822_vm15, %v3834_v26, %v1425_v50  ;;  %v1427_v1 = vrot.slane %v1425_v50, 4  ;;  %v3816_v9 = vcombine.low %v5814_v10, %v5830_v0  ;;  %v4630_v44 = vld [vmem:[#allocation2 + $0x30] sm:$0xff]  }
 0x1bf   : > { %4193 = vmatprep.subr.bf16.mxu1 %v5993_v8  ;;  %v3817_v43 = vcombine.low %v5853_v13, %v5863_v20  ;;  %v6052_v3 = vsel %vm5822_vm15, %v3829_v17, %v1390_v35  ;;  %v2730_v59 = vrot.slane %v2728_v31, 4  ;;  %v2733_v34 = vrot.slane %v2731_v32, 5  ;;  %v6064_v13 = vld [vmem:[#allocation2 + $0x20] sm:$0x1]  ;;  %v1368_v26 = vld [vmem:[#allocation2 + $0x54] sm:$0xe] }
 0x1c0   : > { %4250 = vmatmul.mubr.msk.bf16.gmra.mrb[12].mxu0 %vm1066_vm12, %v3906_v12  ;;  %v6056_v58 = vsel %vm5822_vm15, %v1427_v1, %v1428_v6  ;;  %v3835_v12 = vrot.slane %v1367_v11, 9  ;;  %v1432_v10 = vrot.slane %v5863_v20, 5  ;;  %v1394_v0 = vsel %vm5822_vm15, %v1392_v52, %v1393_v30  ;;  %v2709_v30 = vld [vmem:[#allocation2 + $0x30] sm:$0xf]  ;;  %v6089_v52 = vld [vmem:[#allocation2 + $0x34] sm:$0xf] }
 0x1c1   : > { %4162 = vmatmul.mubr.msk.bf16.gmra.mrb[4].mxu1 %vm1066_vm12, %v3814_v53  ;;  %4257 = vmatprep.mubr.msk.bf16.mxu0 %vm1066_vm12, %v4625_v14  ;;  %v6066_v14 = vrot.slane %v2737_v57, 5  ;;  %v2743_v22 = vrot.slane %v2741_v4, 4  ;;  %v3818_v16 = vcombine.low %v5873_v2, %v5879_v55  ;;  %v2734_v17 = vor.u32 %v2733_v34, %v2730_v59  ;;  %v4632_v31 = vld [vmem:[#allocation2 + $0x3c] sm:$0xff]   ;;  %v4634_v32 = vld [vmem:[#allocation2 + $0x48] sm:$0xff]  }
 0x1c2   : > { %4165 = vmatprep.mubr.msk.bf16.mxu1 %vm1066_vm12, %v3815_v23  ;;  %v1435_v23 = vrot.slane %v5865_v28, 5  ;;  %v6075_v20 = vsel %vm5822_vm15, %v3835_v12, %v1432_v10  ;;  %v1434_v35 = vrot.slane %v1432_v10, 4  ;;  %v6081_v28 = vld [vmem:[#allocation2 + $0x28] sm:$0xf]  ;;  %v2747_v50 = vshll.u32 %v6064_v13, 16 }
 0x1c3   : > { %v2744_v2 = vor.u32 %v2743_v22, %v6066_v14  ;;  %v2752_v11 = vshrl.u32 %v2706_v29, 16  ;;  %v2761_v4 = vshll.u32 %v6081_v28, 16  ;;  %v2765_v1 = vshrl.u32 %v6081_v28, 16  ;;  %v2712_v22 = vld [vmem:[#allocation2 + $0x3c] sm:$0xf] }
 0x1c4   : > { %v6087_v6 = vsel %vm5822_vm15, %v1434_v35, %v1435_v23  ;;  %v2785_v12 = vshll.u32 %v6089_v52, 16  ;;  %v1442_v59 = vrot.slane %v5881_v7, 5  ;;  %v2789_v34 = vshrl.u32 %v6089_v52, 16 }
 0x1c5   : > { %v2735_v23 = vrot.slane %v2734_v17, 4  ;;  %v2754_v7 = vrot.slane %v2752_v11, 4  ;;  %v2800_v57 = vshrl.u32 %v2712_v22, 16  ;;  %vm3562_vm0 = vcmask 519168  }
 0x1c6   : > { %v6123_v11 = vrot.slane %v2785_v12, 5  ;;  %v6132_v12 = vld [vmem:[#allocation2 + $0x4c] sm:$0xf] }
 0x1c8   : > { %4258 = vmatmul.mubr.msk.bf16.vlgmr.msra.gmra.mrb[0].mxu0 %vm1066_vm12, %v4628_v15  ;;  %v2755_v15 = vshll.u32 %v2706_v29, 16  ;;  %v6110_v29 = vld [vmem:[#allocation2 + $0x2c] sm:$0x1] }
 0x1c9   : > { %4166 = vmatmul.mubr.msk.bf16.gmra.mrb[8].mxu1 %vm1066_vm12, %v3816_v9  ;;  %4274 = vmatpush3.bf16.msra.mxu0 %v5891_v19  ;;  %v3837_v19 = vcombine.low %v6052_v3, %v1394_v0  ;;  %v3836_v9 = vrot.slane %v1368_v26, 9  ;;  %v2779_v3 = vshll.u32 %v2709_v30, 16  ;;  %v2749_v0 = vrot.slane %v2747_v50, 5 }
 0x1ca   : > { %4169 = vmatprep.mubr.msk.bf16.mxu1 %vm1066_vm12, %v3817_v43  ;;  %4261 = vmatprep.mubr.msk.bf16.mxu0 %vm1066_vm12, %v4630_v44  ;;  %v1439_v43 = vrot.slane %v5879_v55, 5  ;;  %v2776_v44 = vshrl.u32 %v2709_v30, 16  ;;  %v6106_v55 = vld [vmem:[#allocation2 + $0x40] sm:$0xf]  ;;  %v2757_v35 = vrot.slane %v2755_v15, 5  ;;  %v4636_v30 = vld [vmem:[#allocation2 + $0x54] sm:$0xff]  }
 0x1cb   : > { %4275 = vmatprep.subr.bf16.mxu0 %v4635_v33  ;;  %v2745_v50 = vrot.slane %v2744_v2, 4  ;;  %v2791_v15 = vrot.slane %v2789_v34, 4  ;;  %v4637_v2 = vld [vmem:[#allocation2 + $0x60] sm:$0xff]   ;;  %v4639_v34 = vld [vmem:[#allocation9 + $0x38] sm:$0xff]  }
 0x1cc   : > { %v1441_v10 = vrot.slane %v1439_v43, 4  ;;  %v2778_v17 = vrot.slane %v2776_v44, 4  ;;  %v2771_v44 = vshll.u32 %v6110_v29, 16 }
 0x1cd   : > { %4276 = vmatpush3.bf16.msra.mxu0 %v4635_v33  ;;  %v6103_v33 = vsel %vm5822_vm15, %v3836_v9, %v1439_v43  ;;  %v2767_v9 = vrot.slane %v2765_v1, 4  ;;  %v6119_v43 = vld [vmem:[#allocation2 + $0x38] sm:$0x1]  ;;  %v2758_v1 = vor.u32 %v2757_v35, %v2754_v7  ;;  %v2792_v42 = vor.u32 %v2791_v15, %v6123_v11 }
 0x1ce   : > { %4293 = vmatprep.subr.bf16.mxu0 %v6071_v21  ;;  %v6114_v26 = vsel %vm5822_vm15, %v1441_v10, %v1442_v59  ;;  %v2803_v59 = vshll.u32 %v2712_v22, 16  ;;  %v2809_v10 = vshll.u32 %v6106_v55, 16  ;;  %v2750_v22 = vsel %vm5696_vm11, %v2745_v50, %v2749_v0  ;;  %v6146_v0 = vld [vmem:[#allocation2 + $0x44] sm:$0x1] }
 0x1cf   : > { %v2795_v39 = vshll.u32 %v6119_v43, 16  ;;  %v2759_v45 = vrot.slane %v2758_v1, 4  ;;  %v1986_v1 = vshll.u32 %v5920_v18, 16 }
 0x1d0   : > { %4262 = vmatmul.mubr.msk.bf16.gmra.mrb[4].mxu0 %vm1066_vm12, %v4632_v31  ;;  %v6117_v31 = vrot.slane %v2761_v4, 5  ;;  %v2740_v4 = vsel %vm5696_vm11, %v2735_v23, %v6066_v14  ;;  %v2802_v14 = vrot.slane %v2800_v57, 4  ;;  %v2805_v23 = vrot.slane %v2803_v59, 5  ;;  %v4638_v57 = vld [vmem:[#allocation2 + $0x6c] sm:$0xff]  }
 0x1d1   : > { %4170 = vmatmul.mubr.msk.bf16.gmra.mrb[12].mxu1 %vm1066_vm12, %v3818_v16  ;;  %4265 = vmatprep.mubr.msk.bf16.mxu0 %vm1066_vm12, %v4634_v32  ;;  %v2781_v32 = vrot.slane %v2779_v3, 5  ;;  %v2715_v3 = vld [vmem:[#allocation2 + $0x48] sm:$0xf]  ;;  %v6139_v7 = vrot.slane %v2809_v10, 5  ;;  %v2797_v59 = vrot.slane %v2795_v39, 5  ;;  %v2793_v10 = vrot.slane %v2792_v42, 4 }
 0x1d2   : > { %4177 = vmatprep.mubr.msk.bf16.mxu1 %vm1066_vm12, %v3837_v19  ;;  %v2813_v19 = vshrl.u32 %v6106_v55, 16  ;;  %v2768_v53 = vor.u32 %v2767_v9, %v6117_v31  ;;  %v2824_v50 = vshrl.u32 %v2715_v3, 16  ;;  %v2827_v9 = vshll.u32 %v2715_v3, 16 }
 0x1d3   : > { %v2782_v16 = vor.u32 %v2781_v32, %v2778_v17  ;;  %v2833_v17 = vshll.u32 %v6132_v12, 16  ;;  %v3935_v32 = vcombine.low %v2740_v4, %v2750_v22  ;;  %v2819_v3 = vshll.u32 %v6146_v0, 16  ;;  %v6170_v22 = vld [vmem:[#allocation9 + $0x40] sm:$0xff]  }
 0x1d4   : > { %v2815_v35 = vrot.slane %v2813_v19, 4  ;;  %v2769_v62 = vrot.slane %v2768_v53, 4  ;;  %v2806_v19 = vor.u32 %v2805_v23, %v2802_v14  ;;  %v2826_v5 = vrot.slane %v2824_v50, 4 }
 0x1d5   : > { %v2783_v15 = vrot.slane %v2782_v16, 4  ;;  %v2829_v37 = vrot.slane %v2827_v9, 5  ;;  %v1990_v4 = vshrl.u32 %v5920_v18, 16  ;;  %v2764_v39 = vsel %vm5696_vm11, %v2759_v45, %v6117_v31  ;;  %v6168_v16 = vld [vmem:[#allocation2 + $0x50] sm:$0x1] }
 0x1d6   : > { %v2861_v18 = vshrl.u32 %v6157_v61, 16  ;;  %v2798_v50 = vsel %vm5696_vm11, %v2793_v10, %v2797_v59  ;;  %v2807_v9 = vrot.slane %v2806_v19, 4 }
 0x1d7   : > { %v2788_v31 = vsel %vm5696_vm11, %v2783_v15, %v6123_v11  ;;  %v6687_v11 = vcombine.low %v6015_v56, %v6028_v47  ;;  %v2724_v56 = vld [vmem:[#allocation2 + $0x6c] sm:$0xf] }
 0x1d8   : > { %4266 = vmatmul.mubr.msk.bf16.gmra.mrb[8].mxu0 %vm1066_vm12, %v4636_v30  ;;  %v2837_v30 = vshrl.u32 %v6132_v12, 16  ;;  %v2812_v47 = vsel %vm5696_vm11, %v2807_v9, %v6139_v7  ;;  %v2896_v9 = vshrl.u32 %v2724_v56, 16 }
 0x1d9   : > { %4178 = vmatmul.mubr.msk.bf16.vlgmr.msra.gmra.mrb[0].mxu1 %vm1066_vm12, %v3838_v46  ;;  %4269 = vmatprep.mubr.msk.bf16.mxu0 %vm1066_vm12, %v4637_v2  ;;  %v2773_v46 = vrot.slane %v2771_v44, 5  ;;  %v2816_v2 = vor.u32 %v2815_v35, %v6139_v7  ;;  %v2721_v44 = vld [vmem:[#allocation2 + $0x60] sm:$0xf]  ;;  %v2857_v35 = vshll.u32 %v6157_v61, 16  ;;  %v6213_v7 = vld [vmem:[#allocation2 + $0x68] sm:$0x1] }
 0x1da   : > { %4194 = vmatpush3.bf16.msra.mxu1 %v5993_v8  ;;  %4181 = vmatprep.mubr.msk.bf16.mxu1 %vm1066_vm12, %v3839_v27  ;;  %v2718_v8 = vld [vmem:[#allocation2 + $0x54] sm:$0xf]  ;;  %v6159_v27 = vrot.slane %v2833_v17, 5  ;;  %v2839_v53 = vrot.slane %v2837_v30, 4  ;;  %v2821_v17 = vrot.slane %v2819_v3, 5  ;;  %v6686_v30 = vcombine.low %v6009_v48, %v6021_v41 }
 0x1db   : > { %4195 = vmatprep.subr.bf16.mxu1 %v4639_v34  ;;  %v2774_v42 = vsel %vm5696_vm11, %v2769_v62, %v2773_v46  ;;  %v2848_v14 = vshrl.u32 %v2718_v8, 16  ;;  %v2851_v23 = vshll.u32 %v2718_v8, 16  ;;  %v2817_v45 = vrot.slane %v2816_v2, 4 }
 0x1dc   : > { %v2830_v62 = vor.u32 %v2829_v37, %v2826_v5  ;;  %v2840_v46 = vor.u32 %v2839_v53, %v6159_v27  ;;  %v2872_v15 = vshrl.u32 %v2721_v44, 16  ;;  %v2875_v59 = vshll.u32 %v2721_v44, 16  ;;  %v6200_v53 = vld [vmem:[#allocation2 + $0x5c] sm:$0x1] }
 0x1dd   : > { %v2850_v41 = vrot.slane %v2848_v14, 4  ;;  %v2853_v19 = vrot.slane %v2851_v23, 5  ;;  %v2863_v2 = vrot.slane %v2861_v18, 4  ;;  %v6198_v3 = vrot.slane %v1986_v1, 5  ;;  %v6205_v14 = vld [vmem:[#allocation2 + $0x70] sm:$0xf] }
 0x1de   : > { %4196 = vmatpush3.bf16.msra.mxu1 %v4639_v34  ;;  %v6175_v34 = vld [vmem:[#allocation2 + $0x64] sm:$0xf]  ;;  %v1992_v8 = vrot.slane %v1990_v4, 4  ;;  %v3936_v5 = vcombine.low %v2764_v39, %v2774_v42  ;;  %v3937_v37 = vcombine.low %v2788_v31, %v2798_v50  ;;  %v2831_v44 = vrot.slane %v2830_v62, 4 }
 0x1df   : > { %4313 = vmatprep.subr.bf16.mxu1 %v6170_v22  ;;  %v2881_v10 = vshll.u32 %v6175_v34, 16  ;;  %v2885_v48 = vshrl.u32 %v6175_v34, 16  ;;  %v2874_v23 = vrot.slane %v2872_v15, 4  ;;  %v2822_v4 = vsel %vm5696_vm11, %v2817_v45, %v2821_v17  ;;  %v4642_v39 = vld [vmem:[#allocation9 + $0x88] sm:$0xff]  }
 0x1e0   : > { %4270 = vmatmul.mubr.msk.bf16.gmra.mrb[12].mxu0 %vm1066_vm12, %v4638_v57  ;;  %v2843_v57 = vshll.u32 %v6168_v16, 16  ;;  %v2854_v42 = vor.u32 %v2853_v19, %v2850_v41  ;;  %v2867_v50 = vshll.u32 %v6200_v53, 16  ;;  %v2899_v62 = vshll.u32 %v2724_v56, 16 }
 0x1e1   : > { %4182 = vmatmul.mubr.msk.bf16.gmra.mrb[4].mxu1 %vm1066_vm12, %v6686_v30  ;;  %4277 = vmatprep.mubr.msk.bf16.mxu0 %vm1066_vm12, %v3935_v32  ;;  %v6196_v32 = vrot.slane %v2857_v35, 5  ;;  %v2841_v30 = vrot.slane %v2840_v46, 4  ;;  %v2877_v35 = vrot.slane %v2875_v59, 5  ;;  %v6207_v18 = vrot.slane %v2881_v10, 5 }
 0x1e2   : > { %4185 = vmatprep.mubr.msk.bf16.mxu1 %vm1066_vm12, %v6687_v11  ;;  %v2845_v11 = vrot.slane %v2843_v57, 5  ;;  %v2887_v1 = vrot.slane %v2885_v48, 4  ;;  %v2905_v46 = vshll.u32 %v6205_v14, 16  ;;  %v2909_v57 = vshrl.u32 %v6205_v14, 16 }
 0x1e3   : > { %v2864_v31 = vor.u32 %v2863_v2, %v6196_v32  ;;  %v1993_v15 = vor.u32 %v1992_v8, %v6198_v3  ;;  %v1996_v17 = vshll.u32 %v5922_v51, 16  ;;  %v6688_v45 = vcombine.low %v6044_v54, %v6056_v58 }
 0x1e4   : > { %v2836_v59 = vsel %vm5696_vm11, %v2831_v44, %v6159_v27  ;;  %v6689_v10 = vcombine.low %v6075_v20, %v6087_v6  ;;  %v2846_v51 = vsel %vm5696_vm11, %v2841_v30, %v2845_v11  ;;  %v2878_v48 = vor.u32 %v2877_v35, %v2874_v23  ;;  %v6241_v44 = vld [vmem:[#allocation2 + $0x74] sm:$0x1]  ;;  %v1847_v35 = vld [vmem:[#allocation2 + $0x48] sm:$0xf] }
 0x1e5   : > { %v2888_v54 = vor.u32 %v2887_v1, %v6207_v18  ;;  %v2891_v58 = vshll.u32 %v6213_v7, 16  ;;  %v2855_v41 = vrot.slane %v2854_v42, 4  ;;  %v2865_v19 = vrot.slane %v2864_v31, 4 }
 0x1e6   : > { %v2869_v27 = vrot.slane %v2867_v50, 5  ;;  %v2898_v2 = vrot.slane %v2896_v9, 4  ;;  %v2901_v8 = vrot.slane %v2899_v62, 5  ;;  %v6237_v20 = vrot.slane %v2905_v46, 5  ;;  %v3097_v9 = vld [vmem:[#allocation2 + $0x18] sm:$0xe] }
 0x1e7   : > { %v2911_v6 = vrot.slane %v2909_v57, 4  ;;  %v3939_v56 = vcombine.low %v2836_v59, %v2846_v51  ;;  %v1994_v30 = vrot.slane %v1993_v15, 4  ;;  %v2879_v11 = vrot.slane %v2878_v48, 4 }
 0x1e8   : > { %4278 = vmatmul.mubr.msk.bf16.vlgmr.msra.gmra.mrb[0].mxu0 %vm1066_vm12, %v3936_v5  ;;  %v6239_v5 = vrot.slane %v1996_v17, 5  ;;  %v2889_v23 = vrot.slane %v2888_v54, 4  ;;  %v2860_v1 = vsel %vm5696_vm11, %v2855_v41, %v6196_v32  ;;  %v3131_v42 = vrot.slane %v6034_v36, 5  ;;  %v4644_v41 = vld [vmem:[#allocation2 + $0x24] sm:$0xff]  }
 0x1e9   : > { %4186 = vmatmul.mubr.msk.bf16.gmra.mrb[8].mxu1 %vm1066_vm12, %v6688_v45  ;;  %4294 = vmatpush3.bf16.msra.mxu0 %v6071_v21  ;;  %v3938_v21 = vcombine.low %v2812_v47, %v2822_v4  ;;  %v2893_v47 = vrot.slane %v2891_v58, 5  ;;  %v2870_v4 = vsel %vm5696_vm11, %v2865_v19, %v2869_v27  ;;  %v2902_v31 = vor.u32 %v2901_v8, %v2898_v2  ;;  %v4643_v58 = vld [vmem:[#allocation2 + $0x18] sm:$0xff]   ;;  %v3098_v8 = vld [vmem:[#allocation2 + $0x24] sm:$0xe] }
 0x1ea   : > { %4189 = vmatprep.mubr.msk.bf16.mxu1 %vm1066_vm12, %v6689_v10  ;;  %4281 = vmatprep.mubr.msk.bf16.mxu0 %vm1066_vm12, %v3937_v37  ;;  %v4641_v37 = vld [vmem:[#allocation2 + $0xc] sm:$0xff]   ;;  %v2915_v50 = vshll.u32 %v6241_v44, 16  ;;  %v6690_v62 = vcombine.low %v6103_v33, %v6114_v26  ;;  %v1977_v32 = vshrl.u32 %v1847_v35, 16  ;;  %v1980_v46 = vshll.u32 %v1847_v35, 16  ;;  %v4715_v35 = vld [vmem:[#allocation9 + $0x48] sm:$0xff]  }
 0x1eb   : > { %4295 = vmatprep.subr.bf16.mxu0 %v4642_v39  ;;  %v3940_v36 = vcombine.low %v2860_v1, %v2870_v4  ;;  %v2884_v57 = vsel %vm5696_vm11, %v2879_v11, %v6207_v18  ;;  %v2894_v15 = vsel %vm5696_vm11, %v2889_v23, %v2893_v47  ;;  %v1999_v33 = vsel %vm5696_vm11, %v1994_v30, %v6239_v5  ;;  %v1844_v18 = vld [vmem:[#allocation2 + $0x3c] sm:$0xf] }
 0x1ec   : > { %v3953_v26 = vrot.slane %v3097_v9, 9  ;;  %v3133_v17 = vrot.slane %v3131_v42, 4  ;;  %v3134_v45 = vrot.slane %v6064_v13, 5  ;;  %v1979_v59 = vrot.slane %v1977_v32, 4  ;;  %v4645_v9 = vld [vmem:[#allocation2 + $0x30] sm:$0xff]  }
 0x1ed   : > { %4296 = vmatpush3.bf16.msra.mxu0 %v4642_v39  ;;  %v2912_v39 = vor.u32 %v2911_v6, %v6237_v20  ;;  %v2903_v10 = vrot.slane %v2902_v31, 4  ;;  %v2917_v48 = vrot.slane %v2915_v50, 5  ;;  %v1982_v54 = vrot.slane %v1980_v46, 5 }
 0x1ee   : > { %v3132_v27 = vsel %vm5822_vm15, %v3953_v26, %v3131_v42  ;;  %v3135_v2 = vsel %vm5822_vm15, %v3133_v17, %v3134_v45  ;;  %v3138_v6 = vrot.slane %v6081_v28, 5  ;;  %v1953_v11 = vshrl.u32 %v1844_v18, 16  ;;  %v1850_v17 = vld [vmem:[#allocation2 + $0x54] sm:$0xf] }
 0x1ef   : > { %v2913_v51 = vrot.slane %v2912_v39, 4  ;;  %v1983_v19 = vor.u32 %v1982_v54, %v1979_v59  ;;  %v2908_v13 = vsel %vm5696_vm11, %v2903_v10, %v6237_v20  ;;  %v1956_v23 = vshll.u32 %v1844_v18, 16 }
 0x1f0   : > { %4282 = vmatmul.mubr.msk.bf16.gmra.mrb[4].mxu0 %vm1066_vm12, %v3938_v21  ;;  %v3941_v21 = vcombine.low %v2884_v57, %v2894_v15  ;;  %v1962_v28 = vshll.u32 %v5898_v25, 16  ;;  %v1966_v47 = vshrl.u32 %v5898_v25, 16  ;;  %v3954_v20 = vrot.slane %v3098_v8, 9  ;;  %v3100_v15 = vld [vmem:[#allocation2 + $0x3c] sm:$0xe] }
 0x1f1   : > { %4190 = vmatmul.mubr.msk.bf16.gmra.mrb[12].mxu1 %vm1066_vm12, %v6690_v62  ;;  %4285 = vmatprep.mubr.msk.bf16.mxu0 %vm1066_vm12, %v3939_v56  ;;  %v2918_v5 = vsel %vm5696_vm11, %v2913_v51, %v2917_v48  ;;  %v3145_v56 = vrot.slane %v6089_v52, 5  ;;  %v1984_v30 = vrot.slane %v1983_v19, 4  ;;  %v3140_v1 = vrot.slane %v3138_v6, 4  ;;  %v3101_v51 = vld [vmem:[#allocation2 + $0x48] sm:$0xe] }
 0x1f2   : > { %4197 = vmatprep.mubr.msk.bf16.mxu1 %vm1066_vm12, %v4641_v37  ;;  %v3099_v37 = vld [vmem:[#allocation2 + $0x30] sm:$0xe]  ;;  %v3141_v4 = vrot.slane %v6110_v29, 5  ;;  %v3942_v39 = vcombine.low %v2908_v13, %v2918_v5  ;;  %v3961_v50 = vcombine.low %v3132_v27, %v3135_v2  ;;  %v1955_v62 = vrot.slane %v1953_v11, 4 }
 0x1f3   : > { %v1989_v52 = vsel %vm5696_vm11, %v1984_v30, %v6198_v3  ;;  %v3955_v42 = vrot.slane %v3099_v37, 9  ;;  %v3147_v25 = vrot.slane %v3145_v56, 4  ;;  %v1958_v32 = vrot.slane %v1956_v23, 5  ;;  %v4646_v3 = vld [vmem:[#allocation2 + $0x3c] sm:$0xff]  }
 0x1f4   : > { %v6289_v31 = vcombine.low %v1989_v52, %v1999_v33  ;;  %v6292_v46 = vrot.slane %v1962_v28, 5  ;;  %v3139_v57 = vsel %vm5822_vm15, %v3954_v20, %v3138_v6  ;;  %v3142_v29 = vsel %vm5822_vm15, %v3140_v1, %v3141_v4  ;;  %v4647_v6 = vld [vmem:[#allocation2 + $0x48] sm:$0xff]   ;;  %v1853_v28 = vld [vmem:[#allocation2 + $0x60] sm:$0xf]  ;;  %v3102_v4 = vld [vmem:[#allocation2 + $0x54] sm:$0xe] }
 0x1f5   : > { %v3152_v33 = vrot.slane %v6106_v55, 5  ;;  %v1972_v26 = vshll.u32 %v5900_v40, 16  ;;  %v1959_v59 = vor.u32 %v1958_v32, %v1955_v62  ;;  %v3159_v48 = vrot.slane %v6132_v12, 5 }
 0x1f6   : > { %v3962_v54 = vcombine.low %v3139_v57, %v3142_v29  ;;  %v3956_v55 = vrot.slane %v3100_v15, 9  ;;  %v3155_v40 = vrot.slane %v6146_v0, 5  ;;  %v2014_v18 = vshrl.u32 %v5926_v24, 16 }
 0x1f7   : > { %v3154_v27 = vrot.slane %v3152_v33, 4  ;;  %v1974_v2 = vrot.slane %v1972_v26, 5  ;;  %v3957_v8 = vrot.slane %v3101_v51, 9  ;;  %v1960_v13 = vrot.slane %v1959_v59, 4 }
 0x1f8   : > { %4286 = vmatmul.mubr.msk.bf16.gmra.mrb[8].mxu0 %vm1066_vm12, %v3940_v36  ;;  %v1968_v36 = vrot.slane %v1966_v47, 4  ;;  %v3161_v12 = vrot.slane %v3159_v48, 4  ;;  %v3162_v37 = vrot.slane %v6168_v16, 5  ;;  %v2016_v23 = vrot.slane %v2014_v18, 4  ;;  %v3104_v18 = vld [vmem:[#allocation2 + $0x6c] sm:$0xe] }
 0x1f9   : > { %4198 = vmatmul.mubr.msk.bf16.vlgmr.msra.gmra.mrb[0].mxu1 %vm1066_vm12, %v4643_v58  ;;  %4289 = vmatprep.mubr.msk.bf16.mxu0 %vm1066_vm12, %v3941_v21  ;;  %v2001_v58 = vshrl.u32 %v1850_v17, 16  ;;  %v2004_v21 = vshll.u32 %v1850_v17, 16  ;;  %v3156_v47 = vsel %vm5822_vm15, %v3154_v27, %v3155_v40  ;;  %v3160_v20 = vsel %vm5822_vm15, %v3957_v8, %v3159_v48 }
 0x1fa   : > { %4315 = vmatpush3.bf16.msra.mxu1 %v6170_v22  ;;  %4201 = vmatprep.mubr.msk.bf16.mxu1 %vm1066_vm12, %v4644_v41  ;;  %v3148_v22 = vrot.slane %v6119_v43, 5  ;;  %v3146_v43 = vsel %vm5822_vm15, %v3955_v42, %v3145_v56  ;;  %v1969_v10 = vor.u32 %v1968_v36, %v6292_v46  ;;  %v2010_v41 = vshll.u32 %v5926_v24, 16  ;;  %v4648_v56 = vld [vmem:[#allocation2 + $0x54] sm:$0xff]  }
 0x1fb   : > { %4314 = vmatprep.subr.bf16.mxu1 %v4715_v35  ;;  %v2003_v30 = vrot.slane %v2001_v58, 4  ;;  %v2006_v11 = vrot.slane %v2004_v21, 5  ;;  %v3153_v24 = vsel %vm5822_vm15, %v3956_v55, %v3152_v33  ;;  %v3166_v52 = vrot.slane %v6157_v61, 5  ;;  %v3103_v61 = vld [vmem:[#allocation2 + $0x60] sm:$0xe]  ;;  %v6691_v21 = vld [vmem:[#allocation31_spill] sm:$0xff] }
 0x1fc   : > { %v3149_v45 = vsel %vm5822_vm15, %v3147_v25, %v3148_v22  ;;  %v1970_v5 = vrot.slane %v1969_v10, 4  ;;  %v2012_v0 = vrot.slane %v2010_v41, 5  ;;  %v1965_v16 = vsel %vm5696_vm11, %v1960_v13, %v6292_v46 }
 0x1fd   : > { %v3963_v19 = vcombine.low %v3146_v43, %v3149_v45  ;;  %v3163_v1 = vsel %vm5822_vm15, %v3161_v12, %v3162_v37  ;;  %v3173_v42 = vrot.slane %v6175_v34, 5  ;;  %v2034_v25 = vshll.u32 %v5940_v49, 16  ;;  %v4649_v34 = vld [vmem:[#allocation2 + $0x60] sm:$0xff]  }
 0x1fe   : > { %4316 = vmatpush3.bf16.msra.mxu1 %v4715_v35  ;;  %v1975_v35 = vsel %vm5696_vm11, %v1970_v5, %v1974_v2  ;;  %v2038_v22 = vshrl.u32 %v5940_v49, 16  ;;  %v2007_v62 = vor.u32 %v2006_v11, %v2003_v30  ;;  %v2017_v32 = vor.u32 %v2016_v23, %v2012_v0 }
 0x1ff   : > { %v2020_v46 = vshll.u32 %v5932_v38, 16  ;;  %v3965_v36 = vcombine.low %v3160_v20, %v3163_v1  ;;  %v3168_v57 = vrot.slane %v3166_v52, 4  ;;  %v3169_v29 = vrot.slane %v6200_v53, 5 }
 0x200   : > { %4290 = vmatmul.mubr.msk.bf16.gmra.mrb[12].mxu0 %vm1066_vm12, %v3942_v39  ;;  %v2025_v39 = vshrl.u32 %v1853_v28, 16  ;;  %v3877_v15 = vcombine.low %v1965_v16, %v1975_v35  ;;  %v3959_v43 = vrot.slane %v3103_v61, 9  ;;  %v3175_v33 = vrot.slane %v3173_v42, 4 }
 0x201   : > { %4202 = vmatmul.mubr.msk.bf16.gmra.mrb[4].mxu1 %vm1066_vm12, %v4645_v9  ;;  %4297 = vmatprep.mubr.msk.bf16.mxu0 %vm1066_vm12, %v3961_v50  ;;  %v2028_v50 = vshll.u32 %v1853_v28, 16  ;;  %v3964_v9 = vcombine.low %v3153_v24, %v3156_v47  ;;  %v3176_v26 = vrot.slane %v6213_v7, 5  ;;  %v2036_v59 = vrot.slane %v2034_v25, 5 }
 0x202   : > { %4205 = vmatprep.mubr.msk.bf16.mxu1 %vm1066_vm12, %v4646_v3  ;;  %v3958_v3 = vrot.slane %v3102_v4, 9  ;;  %v2027_v17 = vrot.slane %v2025_v39, 4  ;;  %v2040_v49 = vrot.slane %v2038_v22, 4  ;;  %v2008_v10 = vrot.slane %v2007_v62, 4  ;;  %v6372_v4 = vld [vmem:[#allocation11] ss:$0 sm:$0xff] }
 0x203   : > { %v2030_v45 = vrot.slane %v2028_v50, 5  ;;  %v2018_v51 = vrot.slane %v2017_v32, 4  ;;  %v2022_v48 = vrot.slane %v2020_v46, 5  ;;  %v3170_v53 = vsel %vm5822_vm15, %v3168_v57, %v3169_v29 }
 0x204   : > { %v3167_v38 = vsel %vm5822_vm15, %v3958_v3, %v3166_v52  ;;  %v3174_v7 = vsel %vm5822_vm15, %v3959_v43, %v3173_v42  ;;  %v3177_v55 = vsel %vm5822_vm15, %v3175_v33, %v3176_v26  ;;  %v2041_v58 = vor.u32 %v2040_v49, %v2036_v59 }
 0x205   : > { %v2031_v40 = vor.u32 %v2030_v45, %v2027_v17  ;;  %v2044_v41 = vshll.u32 %v6691_v21, 16  ;;  %v2023_v27 = vsel %vm5696_vm11, %v2018_v51, %v2022_v48  ;;  %v3966_v2 = vcombine.low %v3167_v38, %v3170_v53 }
 0x206   : > { %v3967_v8 = vcombine.low %v3174_v7, %v3177_v55  ;;  %v3183_v13 = vrot.slane %v6241_v44, 5  ;;  %v2042_v37 = vrot.slane %v2041_v58, 4 }
 0x207   : > { %v2032_v12 = vrot.slane %v2031_v40, 4 }
 0x208   : > { %4298 = vmatmul.mubr.msk.bf16.vlgmr.msra.gmra.mrb[0].mxu0 %vm1066_vm12, %v3962_v54  ;;  %v3180_v54 = vrot.slane %v6205_v14, 5 }
 0x209   : > { %4206 = vmatmul.mubr.msk.bf16.gmra.mrb[8].mxu1 %vm1066_vm12, %v4647_v6  ;;  %4301 = vmatprep.mubr.msk.bf16.mxu0 %vm1066_vm12, %v3963_v19  ;;  %v2013_v19 = vsel %vm5696_vm11, %v2008_v10, %v2012_v0  ;;  %v3960_v6 = vrot.slane %v3104_v18, 9  ;;  %v2037_v44 = vsel %vm5696_vm11, %v2032_v12, %v2036_v59 }
 0x20a   : > { %4209 = vmatprep.mubr.msk.bf16.mxu1 %vm1066_vm12, %v4648_v56  ;;  %v3182_v14 = vrot.slane %v3180_v54, 4  ;;  %v3879_v5 = vcombine.low %v2013_v19, %v2023_v27  ;;  %v2046_v56 = vrot.slane %v2044_v41, 5 }
 0x20b   : > { %v3181_v30 = vsel %vm5822_vm15, %v3960_v6, %v3180_v54 }
 0x20c   : > { %v3184_v11 = vsel %vm5822_vm15, %v3182_v14, %v3183_v13  ;;  %v2047_v0 = vsel %vm5696_vm11, %v2042_v37, %v2046_v56 }
 0x20d   : > { %v3968_v23 = vcombine.low %v3181_v30, %v3184_v11  ;;  %v3880_v28 = vcombine.low %v2037_v44, %v2047_v0 }
 0x210   : > { %4302 = vmatmul.mubr.msk.bf16.gmra.mrb[4].mxu0 %vm1066_vm12, %v3964_v9 }
 0x211   : > { %4210 = vmatmul.mubr.msk.bf16.gmra.mrb[12].mxu1 %vm1066_vm12, %v4649_v34  ;;  %4305 = vmatprep.mubr.msk.bf16.mxu0 %vm1066_vm12, %v3965_v36 }
 0x212   : > { %4225 = vmatprep.mubr.msk.bf16.mxu1 %vm1066_vm12, %v3877_v15 }
 0x218   : > { %4306 = vmatmul.mubr.msk.bf16.gmra.mrb[8].mxu0 %vm1066_vm12, %v3966_v2 }
 0x219   : > { %4226 = vmatmul.mubr.msk.bf16.vlgmr.msra.gmra.mrb[8].mxu1 %vm1066_vm12, %v6289_v31  ;;  %4309 = vmatprep.mubr.msk.bf16.mxu0 %vm1066_vm12, %v3967_v8 }
 0x21a   : > { %4229 = vmatprep.mubr.msk.bf16.mxu1 %vm1066_vm12, %v3879_v5 }
 0x220   : > { %4310 = vmatmul.mubr.msk.bf16.gmra.mrb[12].mxu0 %vm1066_vm12, %v3968_v23 }
 0x221   : > { %4230 = vmatmul.mubr.msk.bf16.gmra.mrb[12].mxu1 %vm1066_vm12, %v3880_v28 }
 0x2cc   : > { %v4199_v31 = vpop.f32.mrb[0].mxu1 }
 0x2cd   : > { %v1753_v24 = vpop.f32.mrb[1].mxu1 }
 0x2ce   : > { %v4200_v47 = vpop.f32.mrb[2].mxu1 }
 0x2cf   : > { %v1756_v20 = vpop.f32.mrb[3].mxu1 }
 0x2d4   : > { %v4203_v60 = vpop.f32.mrb[4].mxu1 }
 0x2d5   : > { %v1769_v52 = vpop.f32.mrb[5].mxu1 }
 0x2d6   : > { %v4204_v16 = vpop.f32.mrb[6].mxu1 }
 0x2d7   : > { %v1772_v35 = vpop.f32.mrb[7].mxu1 }
 0x2db   : > { %v4299_v1 = vpop.f32.mrb[0].mxu0 }
 0x2dc   : > { %v4317_v42 = vadd.f32 %v4299_v1, %v4199_v31  ;;  %v3284_v63 = vpop.f32.mrb[1].mxu0 }
 0x2dd   : > { %v4318_v61 = vadd.f32 %v3284_v63, %v1753_v24  ;;  %v4300_v39 = vpop.f32.mrb[2].mxu0 }
 0x2de   : > { %v6375_v50 = vadd.f32 %v4317_v42, %v6372_v4  ;;  %v4319_v25 = vadd.f32 %v4300_v39, %v4200_v47  ;;  %v3287_v22 = vpop.f32.mrb[3].mxu0 }
 0x2df   : > { %v6378_v9 = vadd.f32 %v4318_v61, %v6372_v4  ;;  %v4320_v62 = vadd.f32 %v3287_v22, %v1756_v20 }
 0x2e0   : > { %v3982_v32 = vmul.f32 -1.442695, %v6375_v50  ;;  %v6382_v46 = vadd.f32 %v4319_v25, %v6372_v4 }
 0x2e1   : > { %v3980_v36 = vmul.f32 -1.442695, %v6378_v9  ;;  %v6386_v3 = vadd.f32 %v4320_v62, %v6372_v4 }
 0x2e2   : > { %4650 = vpow2.f32 %v3982_v32  ;;  %v3983_v57 = vmul.f32 -1.442695, %v6382_v46 }
 0x2e3   : > { %4652 = vpow2.f32 %v3980_v36  ;;  %v3981_v29 = vmul.f32 -1.442695, %v6386_v3  ;;  %v4303_v34 = vpop.f32.mrb[4].mxu0 }
 0x2e4   : > { %4654 = vpow2.f32 %v3983_v57  ;;  %v4321_v15 = vadd.f32 %v4303_v34, %v4203_v60  ;;  %v3300_v43 = vpop.f32.mrb[5].mxu0 }
 0x2e5   : > { %4656 = vpow2.f32 %v3981_v29  ;;  %v4322_v33 = vadd.f32 %v3300_v43, %v1769_v52  ;;  %v4304_v26 = vpop.f32.mrb[6].mxu0 }
 0x2e6   : > { %v6391_v17 = vadd.f32 %v4321_v15, %v6372_v4  ;;  %v4323_v45 = vadd.f32 %v4304_v26, %v4204_v16  ;;  %v3303_v59 = vpop.f32.mrb[7].mxu0 }
 0x2e7   : > { %v6394_v49 = vadd.f32 %v4322_v33, %v6372_v4  ;;  %v4324_v10 = vadd.f32 %v3303_v59, %v1772_v35 }
 0x2e8   : > { %v3986_v51 = vmul.f32 -1.442695, %v6391_v17  ;;  %v6398_v48 = vadd.f32 %v4323_v45, %v6372_v4 }
 0x2e9   : > { %v3984_v38 = vmul.f32 -1.442695, %v6394_v49  ;;  %v6402_v53 = vadd.f32 %v4324_v10, %v6372_v4 }
 0x2ea   : > { %4658 = vpow2.f32 %v3986_v51  ;;  %v3987_v7 = vmul.f32 -1.442695, %v6398_v48 }
 0x2eb   : > { %4660 = vpow2.f32 %v3984_v38  ;;  %v3985_v54 = vmul.f32 -1.442695, %v6402_v53  ;;  %v4307_v55 = vpop.f32.mrb[8].mxu0 }
 0x2ec   : > { %v4651_v40 = vpop.eup %4650  ;;  %4662 = vpow2.f32 %v3987_v7  ;;  %v4227_v58 = vpop.f32.mrb[8].mxu1 }
 0x2ed   : > { %v3316_v21 = vpop.f32.mrb[9].mxu0  ;;  %v4653_v41 = vpop.eup %4652  ;;  %v3436_v18 = vadd.f32 1.0, %v4651_v40  ;;  %4664 = vpow2.f32 %v3985_v54  ;;  %v4325_v19 = vadd.f32 %v4307_v55, %v4227_v58 }
 0x2ee   : > { %v2179_v27 = vpop.f32.mrb[9].mxu1  ;;  %v4308_v2 = vpop.f32.mrb[10].mxu0  ;;  %v3434_v6 = vadd.f32 1.0, %v4653_v41 }
 0x2ef   : > { %v4655_v8 = vpop.eup %4654  ;;  %v4326_v14 = vadd.f32 %v3316_v21, %v2179_v27  ;;  %v4228_v13 = vpop.f32.mrb[10].mxu1  ;;  %4666 = vrcp.f32 %v3436_v18  ;;  %v6407_v56 = vadd.f32 %v4325_v19, %v6372_v4 }
 0x2f0   : > { %v3319_v5 = vpop.f32.mrb[11].mxu0  ;;  %v4657_v12 = vpop.eup %4656  ;;  %v3437_v37 = vadd.f32 1.0, %v4655_v8  ;;  %v4327_v30 = vadd.f32 %v4308_v2, %v4228_v13  ;;  %4668 = vrcp.f32 %v3434_v6 }
 0x2f1   : > { %v2182_v11 = vpop.f32.mrb[11].mxu1  ;;  %v3435_v44 = vadd.f32 1.0, %v4657_v12  ;;  %v6410_v0 = vadd.f32 %v4326_v14, %v6372_v4  ;;  %v3990_v28 = vmul.f32 -1.442695, %v6407_v56 }
 0x2f2   : > { %v4328_v23 = vadd.f32 %v3319_v5, %v2182_v11  ;;  %4670 = vrcp.f32 %v3437_v37  ;;  %v6414_v31 = vadd.f32 %v4327_v30, %v6372_v4 }
 0x2f3   : > { %4672 = vrcp.f32 %v3435_v44  ;;  %v3988_v24 = vmul.f32 -1.442695, %v6410_v0  ;;  %v4311_v60 = vpop.f32.mrb[12].mxu0 }
 0x2f4   : > { %v6418_v47 = vadd.f32 %v4328_v23, %v6372_v4  ;;  %4674 = vpow2.f32 %v3990_v28  ;;  %v3991_v20 = vmul.f32 -1.442695, %v6414_v31  ;;  %v4659_v52 = vpop.eup %4658  ;;  %v4231_v35 = vpop.f32.mrb[12].mxu1 }
 0x2f5   : > { %4676 = vpow2.f32 %v3988_v24  ;;  %v3332_v1 = vpop.f32.mrb[13].mxu0  ;;  %v4661_v42 = vpop.eup %4660  ;;  %v3440_v63 = vadd.f32 1.0, %v4659_v52  ;;  %v4329_v61 = vadd.f32 %v4311_v60, %v4231_v35 }
 0x2f6   : > { %v3989_v16 = vmul.f32 -1.442695, %v6418_v47  ;;  %4678 = vpow2.f32 %v3991_v20  ;;  %v2195_v39 = vpop.f32.mrb[13].mxu1  ;;  %v4312_v25 = vpop.f32.mrb[14].mxu0  ;;  %v3438_v62 = vadd.f32 1.0, %v4661_v42 }
 0x2f7   : > { %v4663_v22 = vpop.eup %4662  ;;  %v4330_v32 = vadd.f32 %v3332_v1, %v2195_v39  ;;  %v4232_v36 = vpop.f32.mrb[14].mxu1  ;;  %v6423_v15 = vadd.f32 %v4329_v61, %v6372_v4 }
 0x2f8   : > { %4680 = vpow2.f32 %v3989_v16  ;;  %v3335_v57 = vpop.f32.mrb[15].mxu0  ;;  %v4665_v29 = vpop.eup %4664  ;;  %v3441_v34 = vadd.f32 1.0, %v4663_v22  ;;  %v4331_v43 = vadd.f32 %v4312_v25, %v4232_v36 }
 0x2f9   : > { %4682 = vrcp.f32 %v3440_v63  ;;  %v2198_v33 = vpop.f32.mrb[15].mxu1  ;;  %v3439_v26 = vadd.f32 1.0, %v4665_v29  ;;  %v6426_v45 = vadd.f32 %v4330_v32, %v6372_v4  ;;  %v4667_v10 = vpop.eup %4666  ;;  %v3994_v51 = vmul.f32 -1.442695, %v6423_v15 }
 0x2fa   : > { %4684 = vrcp.f32 %v3438_v62  ;;  %v4332_v59 = vadd.f32 %v3335_v57, %v2198_v33  ;;  %v6430_v38 = vadd.f32 %v4331_v43, %v6372_v4  ;;  %v4669_v7 = vpop.eup %4668  ;;  %v3484_v54 = vmul.f32 %v4667_v10, %v6375_v50 }
 0x2fb   : > { %4686 = vrcp.f32 %v3441_v34  ;;  %v3992_v55 = vmul.f32 -1.442695, %v6426_v45  ;;  %v3482_v21 = vmul.f32 %v4669_v7, %v6378_v9 }
 0x2fc   : > { %4688 = vrcp.f32 %v3439_v26  ;;  %v6435_v40 = vadd.f32 %v4332_v59, %v6372_v4  ;;  %v4671_v58 = vpop.eup %4670  ;;  %v3995_v41 = vmul.f32 -1.442695, %v6430_v38  ;;  %v4028_v19 = vpack.c.bf16 %v3484_v54, %v3484_v54 }
 0x2fd   : > { %4690 = vpow2.f32 %v3994_v51  ;;  %v4673_v18 = vpop.eup %4672  ;;  %v3485_v27 = vmul.f32 %v4671_v58, %v6382_v46  ;;  %v4026_v4 = vpack.c.bf16 %v3482_v21, %v3482_v21 }
 0x2fe   : > { %4692 = vpow2.f32 %v3992_v55  ;;  %v3993_v50 = vmul.f32 -1.442695, %v6435_v40  ;;  %v4675_v2 = vpop.eup %4674  ;;  %v3483_v8 = vmul.f32 %v4673_v18, %v6386_v3  ;;  %3565 = vst.msk [vmem:[%s5635_s7 + $0x8] sm:$0xf] %vm3562_vm0, %v4028_v19 }
 0x2ff   : > { %4694 = vpow2.f32 %v3995_v41  ;;  %v4677_v6 = vpop.eup %4676  ;;  %v4029_v9 = vpack.c.bf16 %v3485_v27, %v3485_v27  ;;  %v3444_v14 = vadd.f32 1.0, %v4675_v2  ;;  %3563 = vst.msk [vmem:[%s5635_s7] sm:$0xf] %vm3562_vm0, %v4026_v4 }
 0x300   : > { %4696 = vpow2.f32 %v3993_v50  ;;  %v4679_v13 = vpop.eup %4678  ;;  %v4027_v46 = vpack.c.bf16 %v3483_v8, %v3483_v8  ;;  %v3442_v5 = vadd.f32 1.0, %v4677_v6 }
 0x301   : > { %3566 = vst.msk [vmem:[%s5635_s7 + $0xc] sm:$0xf] %vm3562_vm0, %v4029_v9  ;;  %4698 = vrcp.f32 %v3444_v14  ;;  %v3445_v37 = vadd.f32 1.0, %v4679_v13 }
 0x302   : > { %v4681_v12 = vpop.eup %4680  ;;  %3564 = vst.msk [vmem:[%s5635_s7 + $0x4] sm:$0xf] %vm3562_vm0, %v4027_v46  ;;  %4700 = vrcp.f32 %v3442_v5 }
 0x303   : > { %v4683_v30 = vpop.eup %4682  ;;  %v3443_v3 = vadd.f32 1.0, %v4681_v12  ;;  %4702 = vrcp.f32 %v3445_v37 }
 0x304   : > { %v4685_v11 = vpop.eup %4684  ;;  %v3488_v44 = vmul.f32 %v4683_v30, %v6391_v17 }
 0x305   : > { %v4687_v23 = vpop.eup %4686  ;;  %v3486_v28 = vmul.f32 %v4685_v11, %v6394_v49  ;;  %4704 = vrcp.f32 %v3443_v3 }
 0x306   : > { %v4689_v24 = vpop.eup %4688  ;;  %v4032_v20 = vpack.c.bf16 %v3488_v44, %v3488_v44  ;;  %v3489_v60 = vmul.f32 %v4687_v23, %v6398_v48 }
 0x307   : > { %v4691_v52 = vpop.eup %4690  ;;  %v4030_v16 = vpack.c.bf16 %v3486_v28, %v3486_v28  ;;  %v3487_v35 = vmul.f32 %v4689_v24, %v6402_v53 }
 0x308   : > { %v4693_v1 = vpop.eup %4692  ;;  %3569 = vst.msk [vmem:[%s5635_s7 + $0x18] sm:$0xf] %vm3562_vm0, %v4032_v20  ;;  %v4033_v17 = vpack.c.bf16 %v3489_v60, %v3489_v60  ;;  %v3448_v42 = vadd.f32 1.0, %v4691_v52 }
 0x309   : > { %v4695_v63 = vpop.eup %4694  ;;  %3567 = vst.msk [vmem:[%s5635_s7 + $0x10] sm:$0xf] %vm3562_vm0, %v4030_v16  ;;  %v4031_v49 = vpack.c.bf16 %v3487_v35, %v3487_v35  ;;  %v3446_v61 = vadd.f32 1.0, %v4693_v1 }
 0x30a   : > { %v4697_v39 = vpop.eup %4696  ;;  %3570 = vst.msk [vmem:[%s5635_s7 + $0x1c] sm:$0xf] %vm3562_vm0, %v4033_v17  ;;  %4706 = vrcp.f32 %v3448_v42  ;;  %v3449_v48 = vadd.f32 1.0, %v4695_v63 }
 0x30b   : > { %3568 = vst.msk [vmem:[%s5635_s7 + $0x14] sm:$0xf] %vm3562_vm0, %v4031_v49  ;;  %4708 = vrcp.f32 %v3446_v61  ;;  %v3447_v53 = vadd.f32 1.0, %v4697_v39  ;;  %v4699_v25 = vpop.eup %4698 }
 0x30c   : > { %4710 = vrcp.f32 %v3449_v48  ;;  %v4701_v22 = vpop.eup %4700  ;;  %v3492_v62 = vmul.f32 %v4699_v25, %v6407_v56 }
 0x30d   : > { %4712 = vrcp.f32 %v3447_v53  ;;  %v4703_v32 = vpop.eup %4702  ;;  %v3490_v36 = vmul.f32 %v4701_v22, %v6410_v0 }
 0x30e   : > { %v4036_v29 = vpack.c.bf16 %v3492_v62, %v3492_v62  ;;  %v3493_v34 = vmul.f32 %v4703_v32, %v6414_v31 }
 0x30f   : > { %v4705_v57 = vpop.eup %4704  ;;  %v4034_v43 = vpack.c.bf16 %v3490_v36, %v3490_v36 }
 0x310   : > { %v3491_v33 = vmul.f32 %v4705_v57, %v6418_v47  ;;  %3573 = vst.msk [vmem:[%s5635_s7 + $0x28] sm:$0xf] %vm3562_vm0, %v4036_v29  ;;  %v4037_v26 = vpack.c.bf16 %v3493_v34, %v3493_v34 }
 0x311   : > { %3571 = vst.msk [vmem:[%s5635_s7 + $0x20] sm:$0xf] %vm3562_vm0, %v4034_v43 }
 0x312   : > { %v4035_v56 = vpack.c.bf16 %v3491_v33, %v3491_v33  ;;  %3574 = vst.msk [vmem:[%s5635_s7 + $0x2c] sm:$0xf] %vm3562_vm0, %v4037_v26 }
 0x314   : > { %v4707_v0 = vpop.eup %4706  ;;  %3572 = vst.msk [vmem:[%s5635_s7 + $0x24] sm:$0xf] %vm3562_vm0, %v4035_v56 }
 0x315   : > { %v4709_v31 = vpop.eup %4708  ;;  %v3496_v47 = vmul.f32 %v4707_v0, %v6423_v15 }
 0x316   : > { %v4711_v59 = vpop.eup %4710  ;;  %v3494_v10 = vmul.f32 %v4709_v31, %v6426_v45 }
 0x317   : > { %v4713_v51 = vpop.eup %4712  ;;  %v4040_v7 = vpack.c.bf16 %v3496_v47, %v3496_v47  ;;  %v3497_v54 = vmul.f32 %v4711_v59, %v6430_v38 }
 0x318   : > { %v4038_v55 = vpack.c.bf16 %v3494_v10, %v3494_v10  ;;  %v3495_v58 = vmul.f32 %v4713_v51, %v6435_v40 }
 0x319   : > { %3577 = vst.msk [vmem:[%s5635_s7 + $0x38] sm:$0xf] %vm3562_vm0, %v4040_v7  ;;  %v4041_v21 = vpack.c.bf16 %v3497_v54, %v3497_v54 }
 0x31a   : > { %3575 = vst.msk [vmem:[%s5635_s7 + $0x30] sm:$0xf] %vm3562_vm0, %v4038_v55  ;;  %v4039_v15 = vpack.c.bf16 %v3495_v58, %v3495_v58 }
 0x31b   : > { %3578 = vst.msk [vmem:[%s5635_s7 + $0x3c] sm:$0xf] %vm3562_vm0, %v4041_v21 }
 0x31c   : > { %3576 = vst.msk [vmem:[%s5635_s7 + $0x34] sm:$0xf] %vm3562_vm0, %v4039_v15 }
 0x31d   : > { %4875 = shalt.err (!%p4872_p3)
}
 0x31e   : > { %s4876_s7 = scalar_lea.hbm %s6486_s8, 1024  ;;  %s4880_s30 = scalar_lea.hbm %s6694_s1, 4096 }
 0x31f   : > { %p4877_p7 = scmp.ne.s32.totalorder %s6486_s8, %s4876_s7  ;;  %p4881_p12 = scmp.lt.u32.totalorder %s6486_s8, %s6694_s1 }
 0x320   : > { %p4882_p2 = scmp.lt.u32.totalorder %s4880_s30, %s4876_s7  ;;  %p4884_p13 = scmp.lt.u32.totalorder %s4876_s7, %s6486_s8 }
 0x321   : > { %p4878_p4 = pnand %p4877_p7, %p6695_p1 }
 0x322   : > { %p4883_p0 = por %p4882_p2, %p4881_p12 }
 0x323   : > { %p4879_p10 = pneg %p4878_p4 }
 0x324   : > { %p4885_p8 = por %p4884_p13, %p4883_p0 }
 0x326   : > { %p4886_p5 = pnand %p4885_p8, %p4879_p10 }
 0x328   : > { %4889 = shalt.err (!%p4886_p5)
}
 0x329   : > { %s5032_s0 = smov 64   ;;  %s5033_s29 = smov 4  }
 0x32a   : > { %4459 = dma.vmem_to_hbm [thread:$0]  (%p6695_p1), %s6488_s19, 1024, %s6486_s8, %s3580_s4, %s5032_s0, %s5032_s0, %s5033_s29  }
 0x32b PF: > { %p4487_p6 = scmp.ge.s32.totalorder %s5020_s6, 2  ;;  %s3611_s18 = sand.u32 1, %s4992_s24  }
 0x32c   : > { %p6696_p9 = scmp.ne.s32.totalorder %s6643_s5, 0  ;;  %s3612_s27 = scalar_lea.sflag [#allocation5], %s3611_s18 }
 0x32e   : > { %p4479_p11 = pnand %p4487_p6, %p6696_p9 }
 0x330   : > { %4963 = dma.done.wait (!%p4479_p11), %s3612_s27, 1024  }
 0x331   : > { %4965 = vsyncadd (!%p4479_p11), %s3612_s27, 4294966272  ;;  %s25_s6 = sadd.s32 1, %s5020_s6   ;;  %s6698_s18 = sld [smem:[#allocation19_spill]] }
 0x332   : > { %p6525_p3 = scmp.ge.s32.totalorder %s25_s6, 6   ;;  %s6699_s19 = sld [smem:[#allocation20_spill]] }
 0x333   : > { %s6700_s2 = sld [smem:[#allocation21_spill]]  ;;  %s6701_s12 = smov %s5224_s21 }
 0x334   : > { %s6702_s27 = sld [smem:[#allocation24_spill]]  ;;  %s6703_s5 = sld [smem:[#allocation25_spill]] }
 0x335   : > { %s6704_s29 = sld [smem:[#allocation27_spill]]  ;;  %s6705_s30 = sld [smem:[#allocation28_spill]] }
 0x336   : > { %s6706_s20 = smov %s6729_s28  ;;  %s6708_s22 = smov %s4988_s23 }
 0x337   : > { %s6709_s23 = smov %s6701_s12  ;;  %s6710_s24 = smov %s4996_s25 }
 0x338   : > { %s6711_s25 = smov %s5000_s26  ;;  %s6712_s26 = smov %s5313_s15 }
 0x339   : > { %s6707_s21 = smov %s6700_s2  ;;  %24 = sbr.rel (!%p6525_p3) target bundleno = 20 (0x14), region = 145 }
 0x33a   : > { %s6713_s28 = smov %s6703_s5 }
 0x340   :  { %3617 = vsyncpa [#allocation4], 1 }
 0x341   :  { %3619 = vsyncpa [#allocation4 + $0x1], 1 }
 0x342   :  { %3620 = vsyncpa [#allocation7], 1 }
 0x343   :  { %3622 = vsyncpa [#allocation7 + $0x1], 1 }
 0x344   :  { %3623 = vsyncpa [#allocation10], 1 }
 0x345   :  { %3624 = vsyncpa [#allocation5], 1 }
 0x346   :  { %3626 = vsyncpa [#allocation5 + $0x1], 1 }

// kernel: dna_head_forward.3
= control target key start
LH: loop header
LB: loop body
LE: loop exit
PB: predicated region body
PF: predicated region fallthrough
CT: control target
= control target key end

     0   :  { %s12089_s0 = inlined_call_operand.hbm [shape: bf16[2,16,16,64], index: 0, kind: input, shape index: {}, may-alias: {0,1,2}]   ;;  %s12090_s1 = inlined_call_operand.hbm [shape: bf16[2,16,16,64], index: 1, kind: input, shape index: {}, may-alias: {0,1,2}]   ;;  %s12091_s2 = inlined_call_operand.hbm [shape: bf16[2,16,16,64], index: 2, kind: input, shape index: {}, may-alias: {0,1,2}]   ;;  %s12092_s3 = inlined_call_operand.hbm [shape: bf16[9,32,32], index: 3, kind: input, shape index: {}]   ;;  %s12093_s4 = inlined_call_operand.hbm [shape: f32[1,32], index: 4, kind: input, shape index: {}]   ;;  %s12094_s5 = inlined_call_operand.hbm [shape: bf16[9,32,32], index: 5, kind: input, shape index: {}]   ;;  %s12095_s6 = inlined_call_operand.hbm [shape: f32[1,32], index: 6, kind: input, shape index: {}]   ;;  %s12096_s7 = inlined_call_operand.hbm [shape: bf16[13,64], index: 7, kind: input, shape index: {}]   ;;  %s12097_s8 = inlined_call_operand.hbm [shape: f32[13,1], index: 8, kind: input, shape index: {}]   ;;  %s12098_s9 = inlined_call_operand.hbm [shape: f32[2,13,256], index: 9, kind: output, shape index: {}]  }
   0x1   :  { %12128 = sst [smem:[#allocation47_spill]] %s12089_s0 }
   0x2   :  { %12129 = sst [smem:[#allocation48_spill]] %s12090_s1 }
   0x3   :  { %12130 = sst [smem:[#allocation49_spill]] %s12091_s2 }
   0x4   :  { %12131 = sst [smem:[#allocation50_spill]] %s12092_s3 }
   0x5   :  { %12132 = sst [smem:[#allocation51_spill]] %s12093_s4 }
   0x6   :  { %12133 = sst [smem:[#allocation52_spill]] %s12094_s5 }
   0x7   :  { %12134 = sst [smem:[#allocation53_spill]] %s12095_s6 }
   0x8   :  { %12135 = sst [smem:[#allocation54_spill]] %s12096_s7 }
   0x9   :  { %12136 = sst [smem:[#allocation55_spill]] %s12097_s8 }
   0xa   :  { %12137 = sst [smem:[#allocation56_spill]] %s12098_s9 }
   0xb   :  { %14 = vsyncpa [#allocation5], 0 }
   0xc   :  { %16 = vsyncpa [#allocation5 + $0x1], 0 }
   0xd   :  { %17 = vsyncpa [#allocation8], 0 }
   0xe   :  { %19 = vsyncpa [#allocation8 + $0x1], 0 }
   0xf   :  { %20 = vsyncpa [#allocation11], 0 }
  0x10   :  { %21 = vsyncpa [#allocation14], 0 }
  0x11   :  { %22 = vsyncpa [#allocation17], 0 }
  0x12   :  { %23 = vsyncpa [#allocation6], 0 }
  0x13   :  { %25 = vsyncpa [#allocation6 + $0x1], 0  ;;  %s9265_s30 = smov 0   ;;  %s9267_s10 = smov 0  }
  0x14   :  { %s9269_s11 = smov 0   ;;  %s9271_s12 = smov 0  }
  0x15   :  { %s9273_s13 = smov 0   ;;  %s9275_s14 = smov 0  }
  0x16   :  { %s9277_s15 = smov 0   ;;  %s9279_s16 = smov 0  }
  0x17   :  { %s9281_s17 = smov 0   ;;  %s9283_s18 = smov 0  }
  0x18   :  { %s9285_s19 = smov 0   ;;  %s9287_s20 = smov 0  }
  0x19   :  { %s9289_s21 = smov 0   ;;  %s9291_s22 = smov 0  }
  0x1a LB: > { %12138 = sst [smem:[#allocation27_spill]] %s9135_s30  ;;  %s9336_s23 = sadd.s32 4294967295, %s9187_s22   ;;  %s9187_s22 = sphi %s9291_s22, %s31_s22   ;;  %s9183_s21 = sphi %s9289_s21, %s12266_s21   ;;  %s9179_s20 = sphi %s9287_s20, %s12273_s20   ;;  %s9175_s19 = sphi %s9285_s19, %s12264_s19   ;;  %s9171_s18 = sphi %s9283_s18, %s12272_s18   ;;  %s9167_s17 = sphi %s9281_s17, %s12271_s17   ;;  %s9163_s16 = sphi %s9279_s16, %s12270_s16   ;;  %s9159_s15 = sphi %s9277_s15, %s12263_s15   ;;  %s9155_s14 = sphi %s9275_s14, %s12269_s14   ;;  %s9151_s13 = sphi %s9273_s13, %s12268_s13   ;;  %s9147_s12 = sphi %s9271_s12, %s12262_s12   ;;  %s9143_s11 = sphi %s9269_s11, %s12267_s11   ;;  %s9139_s10 = sphi %s9267_s10, %s12261_s10   ;;  %s9135_s30 = sphi %s9265_s30, %s12260_s30  }
  0x1b   : > { %12139 = sst [smem:[#allocation28_spill]] %s9139_s10  ;;  %p7007_p0 = scmp.ge.s32.totalorder %s9187_s22, 1 }
  0x1c   : > { %12140 = sst [smem:[#allocation29_spill]] %s9143_s11  ;;  %p12106_p1 = scmp.eq.s32.totalorder %s9336_s23, 0 }
  0x1d   : > { %12141 = sst [smem:[#allocation30_spill]] %s9151_s13  ;;  %p302_p2 = scmp.lt.s32.totalorder %s9187_s22, 5 }
  0x1e   : > { %12142 = sst [smem:[#allocation31_spill]] %s9159_s15  ;;  %s9189_s25 = smov [#allocation10]  }
  0x1f   : > { %12143 = sst [smem:[#allocation32_spill]] %s9163_s16  ;;  %p9341_p3 = pnand %p7007_p0, %p302_p2 }
  0x20   : > { %12144 = sst [smem:[#allocation33_spill]] %s9171_s18  ;;  %s314_s26 = sshll.u32 %s9189_s25, 4  ;;  %s9345_s26 = int_to_ptr.vmem [resolvable:$true] %s314_s26 }
  0x21   : > { %12145 = sst [smem:[#allocation34_spill]] %s9175_s19  ;;  %p8327_p4 = pneg %p9341_p3 }
  0x22   : > { %12146 = sst [smem:[#allocation35_spill]] %s9183_s21  ;;  %s9190_s28 = smov [#allocation13]  }
  0x23   : > { %s12147_s24 = scalar_select %p9341_p3, 1, 0 }
  0x24   : > { %p9351_p5 = pnand %p8327_p4, %p12106_p1  ;;  %s338_s29 = sshll.u32 %s9190_s28, 4  ;;  %s9355_s29 = int_to_ptr.vmem [resolvable:$true] %s338_s29 }
  0x25   : > { %12148 = sst [smem:[#allocation36_spill]] %s12147_s24  ;;  %s9191_s9 = smov [#allocation16]  }
  0x26   : > { %s12149_s27 = scalar_select %p9351_p5, 1, 0 }
  0x27   : > { %s9357_s19 = sshll.u32 %s9191_s9, 4  ;;  %s12150_s3 = sld [smem:[#allocation50_spill]]  ;;  %s363_s19 = int_to_ptr.vmem [resolvable:$true] %s9357_s19 }
  0x28   : > { %p9367_p7 = pneg %p9351_p5 }
  0x2d   : > { %s8763_s25 = scalar_lea.hbm %s12150_s3, 2304 }
  0x2e   : > { %p8764_p6 = scmp.ne.s32.totalorder %s12150_s3, %s8763_s25  ;;  %p8770_p10 = scmp.lt.u32.totalorder %s8763_s25, %s12150_s3 }
  0x30   : > { %p8766_p8 = pnand %p9367_p7, %p8764_p6 }
  0x32   : > { %p8767_p9 = pneg %p8766_p8 }
  0x34   : > { %p8772_p11 = pnand %p8770_p10, %p8767_p9 }
  0x36   : > { %8775 = shalt.err (!%p8772_p11)
}
  0x37   : > { %s8776_s2 = scalar_lea.vmem %s9345_s26, 2304  ;;  %p8784_p2 = scmp.lt.s32.totalorder %s9345_s26, %s9345_s26 }
  0x38   : > { %p8777_p12 = scmp.ne.s32.totalorder %s9345_s26, %s8776_s2  ;;  %p8785_p4 = scmp.lt.s32.totalorder %s8776_s2, %s8776_s2 }
  0x3a   : > { %p8779_p13 = pnand %p8777_p12, %p9367_p7  ;;  %p8786_p6 = por %p8785_p4, %p8784_p2 }
  0x3c   : > { %p8780_p0 = pneg %p8779_p13 }
  0x3e   : > { %p8787_p8 = pnand %p8786_p6, %p8780_p0 }
  0x40   : > { %8790 = shalt.err (!%p8787_p8)
}
  0x41   : > { %s12108_s30 = smov 64   ;;  %s12110_s18 = smov 4  }
  0x42   : > { %8330 = dma.hbm_to_vmem [thread:$0]  (!%p9351_p5), %s12150_s3, 2304, %s9345_s26, [#allocation11], %s12108_s30, %s12108_s30, %s12110_s18  }
  0x43   : > { %s12152_s5 = sld [smem:[#allocation52_spill]] }
  0x49   : > { %s8791_s2 = scalar_lea.hbm %s12152_s5, 2304 }
  0x4a   : > { %p8792_p9 = scmp.ne.s32.totalorder %s12152_s5, %s8791_s2  ;;  %p8798_p12 = scmp.lt.u32.totalorder %s8791_s2, %s12152_s5 }
  0x4c   : > { %p8794_p10 = pnand %p8792_p9, %p9367_p7 }
  0x4e   : > { %p8795_p11 = pneg %p8794_p10 }
  0x50   : > { %p8800_p13 = pnand %p8798_p12, %p8795_p11 }
  0x52   : > { %8803 = shalt.err (!%p8800_p13)
}
  0x53   : > { %s8804_s26 = scalar_lea.vmem %s9355_s29, 2304  ;;  %p8812_p6 = scmp.lt.s32.totalorder %s9355_s29, %s9355_s29 }
  0x54   : > { %p8805_p0 = scmp.ne.s32.totalorder %s9355_s29, %s8804_s26  ;;  %p8813_p8 = scmp.lt.s32.totalorder %s8804_s26, %s8804_s26 }
  0x56   : > { %p8807_p2 = pnand %p8805_p0, %p9367_p7  ;;  %p8814_p9 = por %p8813_p8, %p8812_p6 }
  0x58   : > { %p8808_p4 = pneg %p8807_p2 }
  0x5a   : > { %p8815_p10 = pnand %p8814_p9, %p8808_p4 }
  0x5c   : > { %8818 = shalt.err (!%p8815_p10)
}
  0x5d   : > { %8336 = dma.hbm_to_vmem [thread:$0]  (!%p9351_p5), %s12152_s5, 2304, %s9355_s29, [#allocation14], %s12108_s30, %s12108_s30, %s12110_s18  }
  0x5e   : > { %s12153_s7 = sld [smem:[#allocation54_spill]] }
  0x64   : > { %s8819_s24 = scalar_lea.hbm %s12153_s7, 128 }
  0x65   : > { %p8820_p11 = scmp.ne.s32.totalorder %s12153_s7, %s8819_s24  ;;  %p8826_p0 = scmp.lt.u32.totalorder %s8819_s24, %s12153_s7 }
  0x67   : > { %p8822_p12 = pnand %p8820_p11, %p9367_p7 }
  0x69   : > { %p8823_p13 = pneg %p8822_p12 }
  0x6b   : > { %p8828_p2 = pnand %p8826_p0, %p8823_p13 }
  0x6d   : > { %8831 = shalt.err (!%p8828_p2)
}
  0x6e   : > { %s8832_s26 = scalar_lea.vmem %s363_s19, 128  ;;  %p8840_p9 = scmp.lt.s32.totalorder %s363_s19, %s363_s19 }
  0x6f   : > { %p8833_p4 = scmp.ne.s32.totalorder %s363_s19, %s8832_s26  ;;  %p8841_p10 = scmp.lt.s32.totalorder %s8832_s26, %s8832_s26 }
  0x71   : > { %p8835_p6 = pnand %p8833_p4, %p9367_p7  ;;  %p8842_p1 = por %p8841_p10, %p8840_p9 }
  0x73   : > { %p8836_p8 = pneg %p8835_p6 }
  0x75   : > { %p8843_p3 = pnand %p8842_p1, %p8836_p8 }
  0x77   : > { %8846 = shalt.err (!%p8843_p3)
}
  0x78   : > { %8342 = dma.hbm_to_vmem [thread:$0]  (!%p9351_p5), %s12153_s7, 128, %s363_s19, [#allocation17], %s12108_s30, %s12108_s30, %s12110_s18  }
  0x79   : > { %s40_s11 = sadd.s32 1, %s9179_s20  ;;  %s43_s15 = sadd.s32 1, %s9183_s21 }
  0x7a   : > { %p41_p1 = scmp.ge.s32.totalorder %s40_s11, 2  ;;  %p12119_p3 = scmp.eq.s32.totalorder %s9187_s22, 0 }
  0x7b   : > { %s7001_s16 = sshll.u32 %s9179_s20, 3  ;;  %s88_s28 = sadd.s32 1, %s9155_s14 }
  0x7c   : > { %s12275_s11 = smov (%p41_p1, %s40_s11), 0  ;;  %s12277_s15 = smov (!%p41_p1, %s43_s15), %s9183_s21 }
  0x7d   : > { %12154 = sst [smem:[#allocation37_spill]] %s12275_s11  ;;  %s48_s24 = ssub.s32 %s9179_s20, %s12275_s11 }
  0x7e   : > { %s7002_s25 = sadd.s32 4294967295, %s7001_s16  ;;  %p45_p11 = scmp.ge.s32.totalorder %s12277_s15, 2 }
  0x7f   : > { %p77_p12 = scmp.gt.s32.totalorder %s7002_s25, 0  ;;  %s7003_s19 = sshll.u32 %s12275_s11, 3 }
  0x80   : > { %s12279_s15 = smov (%p45_p11, %s12277_s15), 0  ;;  %s7004_s2 = sadd.s32 4294967295, %s7003_s19 }
  0x81   : > { %12155 = sst [smem:[#allocation38_spill]] %s12279_s15  ;;  %s12281_s25 = smov (!%p77_p12, %s7002_s25), 0 }
  0x82   : > { %s9454_s9 = ssub.s32 %s9183_s21, %s12279_s15  ;;  %p81_p13 = scmp.gt.s32.totalorder %s7004_s2, 0 }
  0x83   : > { %12156 = sst [smem:[#allocation39_spill]] %s9454_s9  ;;  %s9457_s26 = sor.u32 %s48_s24, %s9454_s9 }
  0x84   : > { %p95_p2 = scmp.ne.s32.totalorder %s9155_s14, %s9151_s13  ;;  %s12283_s2 = smov (!%p81_p13, %s7004_s2), 0 }
  0x85   : > { %p101_p6 = scmp.ne.s32.totalorder %s9151_s13, %s9147_s12  ;;  %s84_s0 = ssub.s32 %s12281_s25, %s12283_s2 }
  0x86   : > { %p9464_p4 = por %p95_p2, %p12119_p3  ;;  %s9470_s30 = sadd.s32 8, %s7001_s16 }
  0x87   : > { %s85_s24 = sor.u32 %s84_s0, %s9454_s9  ;;  %p12158_p8 = scmp.eq.s32.totalorder %s9336_s23, 0 }
  0x88   : > { %p86_p10 = scmp.eq.s32.totalorder %s85_s24, 0  ;;  %s9480_s3 = sadd.s32 8, %s7003_s19 }
  0x89   : > { %p9475_p9 = por %p101_p6, %p12158_p8  ;;  %p12118_p11 = scmp.lt.s32.totalorder %s9187_s22, 4 }
  0x8a   : > { %s9484_s5 = scalar_select %p86_p10, %s9155_s14, %s88_s28  }
  0x8b   : > { %s12159_s18 = scalar_select %p9475_p9, 1, 0 }
  0x8c   : > { %s9488_s12 = sshll.u32 %s9183_s21, 5  ;;  %s413_s16 = sand.u32 1, %s9187_s22  }
  0x8d   : > { %12160 = sst [smem:[#allocation40_spill]] %s12159_s18  ;;  %s415_s2 = sand.u32 1, %s9155_s14  }
  0x8e   : > { %s7020_s0 = sshll.u32 %s415_s2, 3  ;;  %s7023_s7 = sshll.u32 %s12281_s25, 1 }
  0x8f   : > { %s427_s15 = sadd.s32 %s7023_s7, %s9488_s12  ;;  %s417_s11 = scalar_lea.vmem [#allocation7], %s7020_s0 }
  0x90   : > { %s430_s24 = sshll.u32 %s417_s11, 4  ;;  %s7025_s18 = sshll.u32 %s427_s15, 6  ;;  %s9493_s24 = int_to_ptr.vmem [resolvable:$true] %s430_s24 }
  0x91   : > { %s12161_s1 = sld [smem:[#allocation48_spill]]  ;;  %p9504_p13 = pnand %p12118_p11, %p9464_p4 }
  0x92   : > { %s9194_s7 = smov [#allocation12]   ;;  %s9510_s15 = scalar_lea.sflag [#allocation8], %s413_s16 }
  0x93   : > { %s9508_s11 = sshll.u32 %s9194_s7, 4  ;;  %p8849_p6 = pneg %p9504_p13  ;;  %s329_s11 = int_to_ptr.vmem [resolvable:$true] %s9508_s11 }
  0x97   : > { %s9498_s9 = scalar_lea.hbm %s12161_s1, %s7025_s18  ;;  %s8852_s29 = scalar_lea.hbm %s12161_s1, 4096 }
  0x98   : > { %s8847_s13 = scalar_lea.hbm %s9498_s9, 128  ;;  %p8853_p4 = scmp.lt.u32.totalorder %s9498_s9, %s12161_s1 }
  0x99   : > { %p8848_p2 = scmp.ne.s32.totalorder %s9498_s9, %s8847_s13  ;;  %p8854_p12 = scmp.lt.u32.totalorder %s8852_s29, %s8847_s13 }
  0x9a   : > { %p8856_p11 = scmp.lt.u32.totalorder %s8847_s13, %s9498_s9 }
  0x9b   : > { %p8850_p8 = pnand %p8849_p6, %p8848_p2  ;;  %p8855_p1 = por %p8854_p12, %p8853_p4 }
  0x9d   : > { %p8851_p10 = pneg %p8850_p8  ;;  %p8857_p3 = por %p8856_p11, %p8855_p1 }
  0x9f   : > { %p8858_p0 = pnand %p8857_p3, %p8851_p10 }
  0xa1   : > { %8861 = shalt.err (!%p8858_p0)
}
  0xa2   : > { %s8862_s16 = scalar_lea.vmem %s9493_s24, 128  ;;  %s9195_s19 = smov [#allocation7]  }
  0xa3   : > { %p8863_p2 = scmp.ne.s32.totalorder %s9493_s24, %s8862_s16  ;;  %s8867_s7 = sshll.u32 %s9195_s19, 4  ;;  %s8868_s7 = int_to_ptr.vmem [resolvable:$false] %s8867_s7 }
  0xa4   : > { %s8869_s18 = scalar_lea.vmem %s8868_s7, 256  ;;  %p8870_p5 = scmp.lt.s32.totalorder %s9493_s24, %s8868_s7 }
  0xa5   : > { %p8865_p8 = pnand %p8863_p2, %p8849_p6  ;;  %p8871_p12 = scmp.lt.s32.totalorder %s8869_s18, %s8862_s16 }
  0xa7   : > { %p8866_p9 = pneg %p8865_p8  ;;  %p8872_p4 = por %p8871_p12, %p8870_p5 }
  0xa9   : > { %p8873_p1 = pnand %p8872_p4, %p8866_p9 }
  0xab   : > { %8876 = shalt.err (!%p8873_p1)
}
  0xac   : > { %s12163_s13 = smov 4   ;;  %s12164_s25 = smov 64  }
  0xad   : > { %8352 = dma.hbm_to_vmem [thread:$0]  (!%p9504_p13), %s9498_s9, 128, %s9493_s24, %s9510_s15, %s12164_s25, %s12164_s25, %s12163_s13  }
  0xae   : > { %s9196_s29 = smov [#allocation15]   ;;  %s12165_s4 = sld [smem:[#allocation51_spill]] }
  0xaf   : > { %s352_s2 = sshll.u32 %s9196_s29, 4  ;;  %s353_s2 = int_to_ptr.vmem [resolvable:$true] %s352_s2 }
  0xb4   : > { %s8877_s16 = scalar_lea.hbm %s12165_s4, 16 }
  0xb5   : > { %p8878_p5 = scmp.ne.s32.totalorder %s12165_s4, %s8877_s16  ;;  %p8884_p9 = scmp.lt.u32.totalorder %s8877_s16, %s12165_s4 }
  0xb7   : > { %p8880_p3 = pnand %p8878_p5, %p9367_p7 }
  0xb9   : > { %p8881_p0 = pneg %p8880_p3 }
  0xbb   : > { %p8886_p11 = pnand %p8884_p9, %p8881_p0 }
  0xbd   : > { %8889 = shalt.err (!%p8886_p11)
}
  0xbe   : > { %s8890_s9 = scalar_lea.vmem %s329_s11, 16  ;;  %s8897_s24 = scalar_lea.vmem %s329_s11, 32 }
  0xbf   : > { %p8891_p13 = scmp.ne.s32.totalorder %s329_s11, %s8890_s9  ;;  %p8898_p2 = scmp.lt.s32.totalorder %s329_s11, %s329_s11 }
  0xc0   : > { %p8899_p8 = scmp.lt.s32.totalorder %s8897_s24, %s8890_s9 }
  0xc1   : > { %p8893_p6 = pnand %p8891_p13, %p9367_p7 }
  0xc2   : > { %p8900_p12 = por %p8899_p8, %p8898_p2 }
  0xc3   : > { %p8894_p10 = pneg %p8893_p6 }
  0xc5   : > { %p8901_p4 = pnand %p8900_p12, %p8894_p10 }
  0xc7   : > { %8904 = shalt.err (!%p8901_p4)
}
  0xc8   : > { %p12166_p1 = scmp.ne.s32.totalorder %s12149_s27, 0  ;;  %s12167_s6 = sld [smem:[#allocation53_spill]] }
  0xca   : > { %8333 = dma.hbm_to_vmem [thread:$0]  (!%p12166_p1), %s12165_s4, 16, %s329_s11, [#allocation11]  }
  0xce   : > { %s8905_s16 = scalar_lea.hbm %s12167_s6, 16 }
  0xcf   : > { %p8906_p5 = scmp.ne.s32.totalorder %s12167_s6, %s8905_s16  ;;  %p8912_p9 = scmp.lt.u32.totalorder %s8905_s16, %s12167_s6 }
  0xd1   : > { %p8908_p3 = pnand %p8906_p5, %p9367_p7 }
  0xd3   : > { %p8909_p0 = pneg %p8908_p3 }
  0xd5   : > { %p8914_p11 = pnand %p8912_p9, %p8909_p0 }
  0xd7   : > { %8917 = shalt.err (!%p8914_p11)
}
  0xd8   : > { %s8918_s24 = scalar_lea.vmem %s353_s2, 16  ;;  %s8925_s11 = scalar_lea.vmem %s353_s2, 32 }
  0xd9   : > { %p8919_p13 = scmp.ne.s32.totalorder %s353_s2, %s8918_s24  ;;  %p8926_p2 = scmp.lt.s32.totalorder %s353_s2, %s353_s2 }
  0xda   : > { %p8927_p8 = scmp.lt.s32.totalorder %s8925_s11, %s8918_s24 }
  0xdb   : > { %p8921_p6 = pnand %p8919_p13, %p9367_p7 }
  0xdc   : > { %p8928_p12 = por %p8927_p8, %p8926_p2 }
  0xdd   : > { %p8922_p10 = pneg %p8921_p6 }
  0xdf   : > { %p8929_p4 = pnand %p8928_p12, %p8922_p10 }
  0xe1   : > { %8932 = shalt.err (!%p8929_p4)
}
  0xe2   : > { %8339 = dma.hbm_to_vmem [thread:$0]  (!%p12166_p1), %s12167_s6, 16, %s353_s2, [#allocation14]  }
  0xe3   : > { %s9197_s1 = smov [#allocation18]   ;;  %s12168_s8 = sld [smem:[#allocation55_spill]] }
  0xe4   : > { %s375_s19 = sshll.u32 %s9197_s1, 4  ;;  %s376_s19 = int_to_ptr.vmem [resolvable:$true] %s375_s19 }
  0xe9   : > { %s8933_s18 = scalar_lea.hbm %s12168_s8, 256 }
  0xea   : > { %p8934_p5 = scmp.ne.s32.totalorder %s12168_s8, %s8933_s18  ;;  %p8940_p9 = scmp.lt.u32.totalorder %s8933_s18, %s12168_s8 }
  0xec   : > { %p8936_p3 = pnand %p8934_p5, %p9367_p7 }
  0xee   : > { %p8937_p0 = pneg %p8936_p3 }
  0xf0   : > { %p8942_p11 = pnand %p8940_p9, %p8937_p0 }
  0xf2   : > { %8945 = shalt.err (!%p8942_p11)
}
  0xf3   : > { %s8946_s2 = scalar_lea.vmem %s376_s19, 256  ;;  %p8954_p2 = scmp.lt.s32.totalorder %s376_s19, %s376_s19 }
  0xf4   : > { %p8947_p13 = scmp.ne.s32.totalorder %s376_s19, %s8946_s2  ;;  %p8955_p8 = scmp.lt.s32.totalorder %s8946_s2, %s8946_s2 }
  0xf6   : > { %p8949_p6 = pnand %p8947_p13, %p9367_p7  ;;  %p8956_p12 = por %p8955_p8, %p8954_p2 }
  0xf8   : > { %p8950_p10 = pneg %p8949_p6 }
  0xfa   : > { %p8957_p4 = pnand %p8956_p12, %p8950_p10 }
  0xfc   : > { %8960 = shalt.err (!%p8957_p4)
}
  0xfd   : > { %s9198_s29 = smov 128   ;;  %s12169_s0 = sld [smem:[#allocation32_spill]] }
  0xfe   : > { %s12170_s1 = sld [smem:[#allocation31_spill]]  ;;  %s9199_s10 = smov 8  }
  0xff   : > { %8345 = dma.hbm_to_vmem [thread:$0]  (!%p12166_p1), %s12168_s8, 256, %s376_s19, [#allocation17], %s9198_s29, %s9198_s29, %s9199_s10  }
 0x100   : > { %s7000_s18 = sadd.s32 4294967294, %s9187_s22   ;;  %s52_s28 = sadd.s32 1, %s9167_s17 }
 0x101   : > { %p12171_p7 = scmp.eq.s32.totalorder %s9457_s26, 0  ;;  %p289_p0 = scmp.eq.s32.totalorder %s9336_s23, 3 }
 0x102   : > { %p295_p9 = scmp.eq.s32.totalorder %s7000_s18, 3  ;;  %p12172_p11 = scmp.eq.s32.totalorder %s9187_s22, 0 }
 0x103   : > { %s9601_s9 = scalar_select %p12171_p7, %s9167_s17, %s52_s28  }
 0x104   : > { %p59_p5 = scmp.ne.s32.totalorder %s9167_s17, %s12169_s0  ;;  %p65_p3 = scmp.ne.s32.totalorder %s12169_s0, %s12170_s1 }
 0x105   : > { %p12174_p6 = scmp.eq.s32.totalorder %s9336_s23, 0  ;;  %s389_s11 = sand.u32 1, %s9167_s17  }
 0x106   : > { %p9610_p13 = por %p12172_p11, %p59_p5  ;;  %p9620_p1 = por %p289_p0, %p59_p5 }
 0x107   : > { %p9616_p10 = por %p12174_p6, %p65_p3  ;;  %p9624_p2 = por %p295_p9, %p65_p3 }
 0x108   : > { %s12176_s26 = scalar_select %p9620_p1, 1, 0 }
 0x109   : > { %s12177_s19 = scalar_select %p9624_p2, 1, 0 }
 0x10a   : > { %s7463_s2 = sshll.u32 %s9179_s20, 4  ;;  %s7015_s29 = sshll.u32 %s389_s11, 6 }
 0x10b   : > { %s400_s0 = sadd.s32 %s7463_s2, %s9488_s12  ;;  %s393_s10 = scalar_lea.vmem [#allocation4], %s7015_s29 }
 0x10c   : > { %s7019_s1 = sshll.u32 %s400_s0, 6  ;;  %s403_s16 = sshll.u32 %s393_s10, 4  ;;  %s9636_s16 = int_to_ptr.vmem [resolvable:$true] %s403_s16 }
 0x10d   : > { %s12178_s28 = sld [smem:[#allocation47_spill]]  ;;  %p12179_p8 = scmp.lt.s32.totalorder %s9187_s22, 4 }
 0x10e   : > { %s9646_s2 = scalar_lea.sflag [#allocation5], %s389_s11 }
 0x10f   : > { %p9642_p12 = pnand %p12179_p8, %p9610_p13 }
 0x111   : > { %p8963_p7 = pneg %p9642_p12 }
 0x113   : > { %s9634_s4 = scalar_lea.hbm %s12178_s28, %s7019_s1  ;;  %s8966_s24 = scalar_lea.hbm %s12178_s28, 4096 }
 0x114   : > { %s8961_s29 = scalar_lea.hbm %s9634_s4, 1024  ;;  %p8967_p0 = scmp.lt.u32.totalorder %s9634_s4, %s12178_s28 }
 0x115   : > { %p8962_p4 = scmp.ne.s32.totalorder %s9634_s4, %s8961_s29  ;;  %p8968_p9 = scmp.lt.u32.totalorder %s8966_s24, %s8961_s29 }
 0x116   : > { %p8970_p13 = scmp.lt.u32.totalorder %s8961_s29, %s9634_s4 }
 0x117   : > { %p8964_p5 = pnand %p8963_p7, %p8962_p4  ;;  %p8969_p11 = por %p8968_p9, %p8967_p0 }
 0x119   : > { %p8965_p3 = pneg %p8964_p5  ;;  %p8971_p6 = por %p8970_p13, %p8969_p11 }
 0x11b   : > { %p8972_p8 = pnand %p8971_p6, %p8965_p3 }
 0x11d   : > { %8975 = shalt.err (!%p8972_p8)
}
 0x11e   : > { %s8976_s11 = scalar_lea.vmem %s9636_s16, 1024  ;;  %s9200_s18 = smov [#allocation4]  }
 0x11f   : > { %p8977_p4 = scmp.ne.s32.totalorder %s9636_s16, %s8976_s11  ;;  %s8981_s0 = sshll.u32 %s9200_s18, 4  ;;  %s8982_s0 = int_to_ptr.vmem [resolvable:$false] %s8981_s0 }
 0x120   : > { %s8983_s1 = scalar_lea.vmem %s8982_s0, 2048  ;;  %p8984_p1 = scmp.lt.s32.totalorder %s9636_s16, %s8982_s0 }
 0x121   : > { %p8979_p5 = pnand %p8977_p4, %p8963_p7  ;;  %p8985_p0 = scmp.lt.s32.totalorder %s8983_s1, %s8976_s11 }
 0x123   : > { %p8980_p2 = pneg %p8979_p5  ;;  %p8986_p9 = por %p8985_p0, %p8984_p1 }
 0x125   : > { %p8987_p11 = pnand %p8986_p9, %p8980_p2 }
 0x127   : > { %8990 = shalt.err (!%p8987_p11)
}
 0x128   : > { %s12181_s29 = sld [smem:[#allocation29_spill]]  ;;  %s12182_s24 = sld [smem:[#allocation28_spill]] }
 0x129   : > { %s12183_s10 = sld [smem:[#allocation27_spill]]  ;;  %s12184_s7 = sld [smem:[#allocation39_spill]] }
 0x12a   : > { %8349 = dma.hbm_to_vmem [thread:$0]  (!%p9642_p12), %s9634_s4, 1024, %s9636_s16, %s9646_s2, %s12164_s25, %s12164_s25, %s12163_s13  }
 0x12b   : > { %p12185_p1 = scmp.lt.s32.totalorder %s9470_s30, 15  ;;  %p12186_p2 = scmp.lt.s32.totalorder %s9480_s3, 15 }
 0x12c   : > { %p12187_p13 = scmp.eq.s32.totalorder %s9187_s22, 0  ;;  %p12189_p4 = scmp.eq.s32.totalorder %s9336_s23, 0 }
 0x12d   : > { %s12285_s30 = smov (!%p12185_p1, %s9470_s30), 15  ;;  %s12287_s3 = smov (!%p12186_p2, %s9480_s3), 15 }
 0x12e   : > { %s124_s6 = sadd.s32 1, %s12181_s29  ;;  %p131_p7 = scmp.ne.s32.totalorder %s12181_s29, %s12182_s24 }
 0x12f   : > { %s120_s11 = ssub.s32 %s12285_s30, %s12287_s3  ;;  %p137_p3 = scmp.ne.s32.totalorder %s12182_s24, %s12183_s10 }
 0x130   : > { %s121_s18 = sor.u32 %s120_s11, %s12184_s7  ;;  %p9691_p6 = por %p131_p7, %p12187_p13 }
 0x131   : > { %p122_p8 = scmp.eq.s32.totalorder %s121_s18, 0  ;;  %p9697_p5 = por %p137_p3, %p12189_p4 }
 0x132   : > { %s442_s16 = sand.u32 1, %s12181_s29   ;;  %s7028_s2 = sshll.u32 %s12285_s30, 1 }
 0x133   : > { %s12190_s4 = scalar_select %p9697_p5, 1, 0 }
 0x134   : > { %s12289_s29 = smov (!%p122_p8, %s12181_s29), %s124_s6  ;;  %s7026_s3 = sshll.u32 %s442_s16, 3 }
 0x135   : > { %s454_s1 = sadd.s32 %s7028_s2, %s9488_s12  ;;  %s12191_s11 = sld [smem:[#allocation49_spill]] }
 0x136   : > { %s7030_s24 = sshll.u32 %s454_s1, 6  ;;  %s444_s18 = scalar_lea.vmem [#allocation9], %s7026_s3 }
 0x137   : > { %s457_s21 = sshll.u32 %s444_s18, 4  ;;  %p12193_p12 = scmp.lt.s32.totalorder %s9187_s22, 4  ;;  %s9711_s21 = int_to_ptr.vmem [resolvable:$true] %s457_s21 }
 0x139   : > { %p9717_p0 = pnand %p12193_p12, %p9691_p6 }
 0x13b   : > { %s12192_s8 = smov %s12191_s11  ;;  %s9709_s28 = scalar_lea.hbm %s12191_s11, %s7030_s24 }
 0x13c   : > { %s8991_s12 = scalar_lea.hbm %s9709_s28, 128  ;;  %p8993_p11 = pneg %p9717_p0 }
 0x13d   : > { %p8992_p9 = scmp.ne.s32.totalorder %s9709_s28, %s8991_s12  ;;  %s8996_s2 = scalar_lea.hbm %s12192_s8, 4096 }
 0x13e   : > { %p8997_p7 = scmp.lt.u32.totalorder %s9709_s28, %s12192_s8  ;;  %p8998_p3 = scmp.lt.u32.totalorder %s8996_s2, %s8991_s12 }
 0x13f   : > { %p8994_p1 = pnand %p8993_p11, %p8992_p9  ;;  %p9000_p6 = scmp.lt.u32.totalorder %s8991_s12, %s9709_s28 }
 0x140   : > { %p8999_p13 = por %p8998_p3, %p8997_p7 }
 0x141   : > { %p8995_p2 = pneg %p8994_p1 }
 0x142   : > { %p9001_p8 = por %p9000_p6, %p8999_p13 }
 0x144   : > { %p9002_p4 = pnand %p9001_p8, %p8995_p2 }
 0x146   : > { %9005 = shalt.err (!%p9002_p4)
}
 0x147   : > { %s9006_s1 = scalar_lea.vmem %s9711_s21, 128  ;;  %s9201_s24 = smov [#allocation9]  }
 0x148   : > { %p9007_p12 = scmp.ne.s32.totalorder %s9711_s21, %s9006_s1  ;;  %s9011_s10 = sshll.u32 %s9201_s24, 4  ;;  %s9012_s10 = int_to_ptr.vmem [resolvable:$false] %s9011_s10 }
 0x149   : > { %s9013_s7 = scalar_lea.vmem %s9012_s10, 256  ;;  %p9014_p5 = scmp.lt.s32.totalorder %s9711_s21, %s9012_s10 }
 0x14a   : > { %p9009_p9 = pnand %p9007_p12, %p8993_p11  ;;  %p9015_p7 = scmp.lt.s32.totalorder %s9013_s7, %s9006_s1 }
 0x14c   : > { %p9010_p1 = pneg %p9009_p9  ;;  %p9016_p3 = por %p9015_p7, %p9014_p5 }
 0x14e   : > { %p9017_p13 = pnand %p9016_p3, %p9010_p1 }
 0x150   : > { %9020 = shalt.err (!%p9017_p13)
}
 0x151   : > { %8355 = dma.hbm_to_vmem [thread:$0]  (!%p9717_p0), %s9709_s28, 128, %s9711_s21, %s9510_s15, %s12164_s25, %s12164_s25, %s12163_s13  }
 0x152   : > { %s12195_s11 = sld [smem:[#allocation36_spill]] }
 0x158   : > { %p12196_p11 = scmp.ne.s32.totalorder %s12195_s11, 0 }
 0x15a   : > { %469 = sbr.rel (%p12196_p11) target bundleno = 1790 (0x6fe), region = 56 }
 0x161   : > { %s12197_s18 = sld [smem:[#allocation32_spill]] }
 0x167   : > { %s9753_s12 = sand.u32 1, %s12197_s18  }
 0x168   : > { %s7032_s6 = sshll.u32 %s9753_s12, 6  ;;  %s472_s16 = scalar_lea.sflag [#allocation5], %s9753_s12 }
 0x169   : > { %s9757_s2 = scalar_lea.vmem [#allocation4], %s7032_s6 }
 0x16a   : > { %9106 = dma.done.wait (%p9616_p10), %s472_s16, 1024  }
 0x16b   : > { %9108 = vsyncadd (%p9616_p10), %s472_s16, 4294966272  ;;  %s12198_s21 = sld [smem:[#allocation30_spill]]  ;;  %s12199_s15 = sld [smem:[#allocation40_spill]] }
 0x16c   : > { %s480_s13 = sand.u32 1, %s9336_s23  }
 0x16d   : > { %s481_s30 = scalar_lea.sflag [#allocation8], %s480_s13 }
 0x171   : > { %s482_s25 = sand.u32 1, %s12198_s21   ;;  %p12200_p5 = scmp.ne.s32.totalorder %s12199_s15, 0 }
 0x172   : > { %s9765_s28 = sshll.u32 %s482_s25, 3 }
 0x173   : > { %s484_s0 = scalar_lea.vmem [#allocation7], %s9765_s28 }
 0x174   : > { %9110 = dma.done.wait (%p12200_p5), %s481_s30, 128  }
 0x175   : > { %9112 = vsyncadd (%p12200_p5), %s481_s30, 4294967168  ;;  %s12201_s3 = sld [smem:[#allocation28_spill]]  ;;  %p12202_p10 = scmp.ne.s32.totalorder %s12190_s4, 0 }
 0x17b   : > { %s491_s1 = sand.u32 1, %s12201_s3  }
 0x17c   : > { %s9773_s27 = sshll.u32 %s491_s1, 3 }
 0x17d   : > { %s493_s24 = scalar_lea.vmem [#allocation9], %s9773_s27 }
 0x17e   : > { %9114 = dma.done.wait (%p12202_p10), %s481_s30, 128  }
 0x17f   : > { %9116 = vsyncadd (%p12202_p10), %s481_s30, 4294967168  ;;  %p12203_p0 = scmp.eq.s32.totalorder %s9336_s23, 0 }
 0x181   : > { %9118 = dma.done.wait (%p12203_p0), [#allocation11], 2320   ;;  %p12204_p2 = pmov %p12203_p0 }
 0x182   : > { %p12205_p6 = pmov %p12203_p0 }
 0x183   : > { %9120 = vsyncadd (%p12204_p2), [#allocation11], 4294964976 }
 0x184   : > { %9122 = dma.done.wait (%p12205_p6), [#allocation14], 2320   ;;  %p12206_p8 = pmov %p12203_p0 }
 0x185   : > { %p12207_p4 = pmov %p12203_p0 }
 0x186   : > { %9124 = vsyncadd (%p12206_p8), [#allocation14], 4294964976 }
 0x187   : > { %9126 = dma.done.wait (%p12207_p4), [#allocation17], 384   ;;  %p12208_p12 = pmov %p12203_p0 }
 0x188   : > { %vm572_vm0 = vcmask 253952   ;;  %vm605_vm1 = vsmask.f32 7938  ;;  %vm573_vm2 = vsmask.f32 256  ;;  %vm876_vm6 = vcmask 257024  }
 0x189   : > { %9128 = vsyncadd (%p12208_p12), [#allocation17], 4294966912  ;;  %vm713_vm5 = vsmask.f32 4368  ;;  %v575_v2 = vld [vmem:[#allocation2] sm:$0x1] }
 0x18a   : > { %vm9793_vm3 = vmand %vm572_vm0, %vm573_vm2  ;;  %v602_v3 = vld [vmem:[#allocation2 + $0x6c] sm:$0x1]  ;;  %v607_v4 = vld [vmem:[#allocation2 + $0x8] sm:$0x1]  ;;  %s9202_s23 = smov 96   ;;  %s7041_s4 = sshll.u32 %s9753_s12, 4 }
 0x18b   : > { %vm9798_vm4 = vmand %vm572_vm0, %vm605_vm1  ;;  %v576_v5 = vsel %vm9793_vm3, 0, %v575_v2  ;;  %v603_v6 = vsel %vm9793_vm3, 0, %v602_v3  ;;  %v634_v8 = vld [vmem:[#allocation2 + $0x74] sm:$0x1]  ;;  %v637_v10 = vld [vmem:[#allocation3] sm:$0x1] }
 0x18c   : > { %v608_v7 = vsel %vm9798_vm4, 0, %v607_v4  ;;  %577 = vst [vmem:[#allocation2] sm:$0x1] %v576_v5  ;;  %604 = vst [vmem:[#allocation2 + $0x6c] sm:$0x1] %v603_v6  ;;  %v635_v9 = vsel %vm9798_vm4, 0, %v634_v8 }
 0x18d   : > { %609 = vst [vmem:[#allocation2 + $0x8] sm:$0x1] %v608_v7  ;;  %v664_v11 = vld [vmem:[#allocation3 + $0x6c] sm:$0x1]  ;;  %636 = vst [vmem:[#allocation2 + $0x74] sm:$0x1] %v635_v9 }
 0x18e   : > { %v638_v12 = vsel %vm9793_vm3, 0, %v637_v10  ;;  %v665_v13 = vsel %vm9793_vm3, 0, %v664_v11  ;;  %v667_v14 = vld [vmem:[#allocation3 + $0x8] sm:$0x1]  ;;  %v694_v15 = vld [vmem:[#allocation3 + $0x74] sm:$0x1]  ;;  %vm9840_vm7 = vmor %vm573_vm2, %vm713_vm5 }
 0x18f   : > { %639 = vst [vmem:[#allocation3] sm:$0x1] %v638_v12  ;;  %666 = vst [vmem:[#allocation3 + $0x6c] sm:$0x1] %v665_v13  ;;  %v668_v16 = vsel %vm9798_vm4, 0, %v667_v14  ;;  %v695_v17 = vsel %vm9798_vm4, 0, %v694_v15 }
 0x190   : > { %v699_v18 = vld [vmem:[%s9757_s2 + $0x8] sm:$0xf]  ;;  %669 = vst [vmem:[#allocation3 + $0x8] sm:$0x1] %v668_v16  ;;  %696 = vst [vmem:[#allocation3 + $0x74] sm:$0x1] %v695_v17 }
 0x191   : > { %v581_v19 = vld [vmem:[#allocation2 + $0x18] sm:$0x1]  ;;  %v733_v20 = vshrl.u32 %v699_v18, 16  ;;  %v736_v21 = vshll.u32 %v699_v18, 16  ;;  %v697_v23 = vld [vmem:[%s9757_s2] sm:$0xf]  ;;  %vm9853_vm8 = vmand %vm876_vm6, %vm605_vm1 }
 0x192   : > { %v582_v22 = vsel %vm9793_vm3, 0, %v581_v19  ;;  %v716_v24 = vshrl.u32 %v697_v23, 16  ;;  %v719_v25 = vshll.u32 %v697_v23, 16  ;;  %v578_v26 = vld [vmem:[#allocation2 + $0xc] sm:$0x1]  ;;  %s10123_s10 = scalar_lea.vmem [#allocation19], %s7041_s4 }
 0x193   : > { %583 = vst [vmem:[#allocation2 + $0x18] sm:$0x1] %v582_v22  ;;  %v700_v27 = vld [vmem:[%s9757_s2 + $0xc] sm:$0xf]  ;;  %v735_v28 = vrot.slane %v733_v20, 7  ;;  %v579_v29 = vsel %vm9793_vm3, 0, %v578_v26 }
 0x194   : > { %v741_v30 = vshrl.u32 %v700_v27, 16  ;;  %v613_v31 = vld [vmem:[#allocation2 + $0x20] sm:$0x1]  ;;  %v744_v32 = vshll.u32 %v700_v27, 16  ;;  %v9825_v33 = vrot.slane %v716_v24, 7  ;;  %s12217_s7 = sld [smem:[#allocation33_spill]] }
 0x195   : > { %580 = vst [vmem:[#allocation2 + $0xc] sm:$0x1] %v579_v29  ;;  %v614_v34 = vsel %vm9798_vm4, 0, %v613_v31  ;;  %v698_v35 = vld [vmem:[%s9757_s2 + $0x4] sm:$0xf]  ;;  %v738_v37 = vor.u32 %v736_v21, %v735_v28  ;;  %v739_v38 = vrot.slane %v735_v28, 4 }
 0x196   : > { %v610_v36 = vld [vmem:[#allocation2 + $0x14] sm:$0x1]  ;;  %v743_v39 = vrot.slane %v741_v30, 7  ;;  %615 = vst [vmem:[#allocation2 + $0x20] sm:$0x1] %v614_v34  ;;  %v724_v40 = vshrl.u32 %v698_v35, 16  ;;  %v721_v42 = vor.u32 %v719_v25, %v9825_v33 }
 0x197   : > { %v9831_v41 = vld [vmem:[%s9757_s2 + $0x14] sm:$0xf]  ;;  %v722_v43 = vrot.slane %v9825_v33, 4  ;;  %v611_v44 = vsel %vm9798_vm4, 0, %v610_v36  ;;  %v616_v46 = vld [vmem:[#allocation2 + $0x2c] sm:$0x1]  ;;  %941 = vrot.lane.b32.xlu1 %v738_v37, %s9202_s23 }
 0x198   : > { %v758_v45 = vshrl.u32 %v9831_v41, 16  ;;  %v748_v48 = vrot.slane %v743_v39, 4  ;;  %v726_v49 = vrot.slane %v724_v40, 7  ;;  %612 = vst [vmem:[#allocation2 + $0x14] sm:$0x1] %v611_v44  ;;  %v617_v50 = vsel %vm9798_vm4, 0, %v616_v46  ;;  %935 = vrot.lane.b32.xlu0 %v721_v42, %s9202_s23 }
 0x199   : > { %v701_v51 = vld [vmem:[%s9757_s2 + $0x10] sm:$0xf]  ;;  %v746_v52 = vor.u32 %v744_v32, %v743_v39  ;;  %618 = vst [vmem:[#allocation2 + $0x2c] sm:$0x1] %v617_v50  ;;  %v584_v56 = vld [vmem:[#allocation2 + $0x24] sm:$0x1] }
 0x19a   : > { %v9849_v53 = vrot.slane %v758_v45, 7  ;;  %v750_v54 = vshrl.u32 %v701_v51, 16  ;;  %v753_v55 = vshll.u32 %v701_v51, 16  ;;  %v727_v57 = vshll.u32 %v698_v35, 16  ;;  %v886_v59 = vld [vmem:[#allocation2 + $0x18] sm:$0xf] }
 0x19b   : > { %v731_v60 = vrot.slane %v726_v49, 4  ;;  %v585_v61 = vsel %vm9793_vm3, 0, %v584_v56  ;;  %v9860_v62 = vld [vmem:[%s9757_s2 + $0x1c] sm:$0xf]  ;;  %v9864_v63 = vsel %vm9840_vm7, %v739_v38, %v746_v52  ;;  %v887_v2 = vsel %vm9853_vm8, %v738_v37, %v886_v59  ;;  %v619_v6 = vld [vmem:[#allocation2 + $0x38] sm:$0x1]  ;;  %945 = vrot.lane.b32.xlu1 %v748_v48, %s9202_s23 }
 0x19c   : > { %v765_v3 = vrot.slane %v9849_v53, 4  ;;  %v9869_v4 = vrot.slane %v750_v54, 7  ;;  %586 = vst [vmem:[#allocation2 + $0x24] sm:$0x1] %v585_v61  ;;  %v775_v5 = vshrl.u32 %v9860_v62, 16  ;;  %v620_v8 = vsel %vm9798_vm4, 0, %v619_v6 }
 0x19d   : > { %889 = vst.msk [vmem:[#allocation2 + $0x1c] sm:$0xf] %vm876_vm6, %v9864_v63  ;;  %888 = vst [vmem:[#allocation2 + $0x18] sm:$0xf] %v887_v2  ;;  %v878_v7 = vld [vmem:[#allocation2 + $0xc] sm:$0xf]  ;;  %v729_v10 = vor.u32 %v727_v57, %v726_v49  ;;  %939 = vrot.lane.b32.xlu0 %v731_v60, %s9202_s23 }
 0x19e   : > { %v703_v9 = vld [vmem:[%s9757_s2 + $0x18] sm:$0xf]  ;;  %v778_v11 = vshll.u32 %v9860_v62, 16  ;;  %v879_v12 = vsel %vm9853_vm8, %v721_v42, %v878_v7  ;;  %v890_v13 = vld [vmem:[#allocation2 + $0x20] sm:$0x1]  ;;  %v755_v14 = vor.u32 %v753_v55, %v9869_v4  ;;  %v9883_v15 = vrot.slane %v775_v5, 7 }
 0x19f   : > { %621 = vst [vmem:[#allocation2 + $0x38] sm:$0x1] %v620_v8  ;;  %v767_v16 = vshrl.u32 %v703_v9, 16  ;;  %v587_v17 = vld [vmem:[#allocation2 + $0x30] sm:$0x1]  ;;  %v891_v18 = vsel %vm9793_vm3, %v748_v48, %v890_v13  ;;  %v770_v19 = vshll.u32 %v703_v9, 16  ;;  %v9894_v23 = vsel %vm9840_vm7, %v722_v43, %v729_v10  ;;  %951 = vrot.lane.b32.xlu1 %v765_v3, %s9202_s23 }
 0x1a0   : > { %880 = vst [vmem:[#allocation2 + $0xc] sm:$0xf] %v879_v12  ;;  %v588_v20 = vsel %vm9793_vm3, 0, %v587_v17  ;;  %v9890_v21 = vld [vmem:[%s9757_s2 + $0x24] sm:$0xf]  ;;  %v782_v25 = vrot.slane %v9883_v15, 4 }
 0x1a1   : > { %v622_v22 = vld [vmem:[#allocation2 + $0x44] sm:$0x1]  ;;  %892 = vst [vmem:[#allocation2 + $0x20] sm:$0x1] %v891_v18  ;;  %v883_v24 = vld [vmem:[#allocation2 + $0x14] sm:$0x1]  ;;  %947 = vrot.lane.b32.xlu0 %v755_v14, %s9202_s23 }
 0x1a2   : > { %v9897_v26 = vrot.slane %v767_v16, 7  ;;  %589 = vst [vmem:[#allocation2 + $0x30] sm:$0x1] %v588_v20  ;;  %v792_v27 = vshrl.u32 %v9890_v21, 16  ;;  %v623_v28 = vsel %vm9798_vm4, 0, %v622_v22  ;;  %v884_v29 = vsel %vm9793_vm3, %v731_v60, %v883_v24  ;;  %p7042_p9 = scmp.le.s32.totalorder %s12217_s7, 0 }
 0x1a3   : > { %882 = vst.msk [vmem:[#allocation2 + $0x10] sm:$0xf] %vm876_vm6, %v9894_v23  ;;  %v897_v30 = vld [vmem:[#allocation2 + $0x2c] sm:$0x1]  ;;  %624 = vst [vmem:[#allocation2 + $0x44] sm:$0x1] %v623_v28  ;;  %957 = vrot.lane.b32.xlu1 %v782_v25, %s9202_s23  ;;  %v780_v16 = vor.u32 %v778_v11, %v9883_v15 }
 0x1a4   : > { %v705_v31 = vld [vmem:[%s9757_s2 + $0x20] sm:$0xf]  ;;  %v590_v32 = vld [vmem:[#allocation2 + $0x3c] sm:$0x1]  ;;  %885 = vst [vmem:[#allocation2 + $0x14] sm:$0x1] %v884_v29  ;;  %v898_v33 = vsel %vm9793_vm3, %v765_v3, %v897_v30  ;;  %v772_v34 = vor.u32 %v770_v19, %v9897_v26 }
 0x1a5   : > { %v9912_v35 = vrot.slane %v792_v27, 7  ;;  %v784_v36 = vshrl.u32 %v705_v31, 16  ;;  %v9915_v37 = vld [vmem:[%s9757_s2 + $0x2c] sm:$0xf]  ;;  %v625_v38 = vld [vmem:[#allocation2 + $0x50] sm:$0x1] }
 0x1a6   : > { %899 = vst [vmem:[#allocation2 + $0x2c] sm:$0x1] %v898_v33  ;;  %v893_v39 = vld [vmem:[#allocation2 + $0x24] sm:$0xf]  ;;  %v787_v40 = vshll.u32 %v705_v31, 16  ;;  %v591_v42 = vsel %vm9793_vm3, 0, %v590_v32  ;;  %953 = vrot.lane.b32.xlu0 %v772_v34, %s9202_s23 }
 0x1a7   : > { %v809_v43 = vshrl.u32 %v9915_v37, 16  ;;  %v626_v44 = vsel %vm9798_vm4, 0, %v625_v38  ;;  %v894_v45 = vsel %vm9853_vm8, %v755_v14, %v893_v39  ;;  %v799_v46 = vrot.slane %v9912_v35, 4  ;;  %592 = vst [vmem:[#allocation2 + $0x3c] sm:$0x1] %v591_v42  ;;  %s9203_s11 = smov (!%p7042_p9), 96  }
 0x1a8   : > { %v9925_v48 = vrot.slane %v784_v36, 7  ;;  %627 = vst [vmem:[#allocation2 + $0x50] sm:$0x1] %v626_v44  ;;  %v707_v49 = vld [vmem:[%s9757_s2 + $0x28] sm:$0xf]  ;;  %v773_v27 = vrot.slane %v9897_v26, 4 }
 0x1a9   : > { %v593_v50 = vld [vmem:[#allocation2 + $0x48] sm:$0x1]  ;;  %895 = vst [vmem:[#allocation2 + $0x24] sm:$0xf] %v894_v45  ;;  %v904_v51 = vld [vmem:[#allocation2 + $0x38] sm:$0x1]  ;;  %963 = vrot.lane.b32.xlu1 %v799_v46, %s9202_s23 }
 0x1aa   : > { %v9929_v52 = vrot.slane %v809_v43, 7  ;;  %v801_v54 = vshrl.u32 %v707_v49, 16  ;;  %v804_v55 = vshll.u32 %v707_v49, 16  ;;  %v594_v56 = vsel %vm9793_vm3, 0, %v593_v50  ;;  %v9938_v60 = vld [vmem:[%s9757_s2 + $0x34] sm:$0xf] }
 0x1ab   : > { %v905_v57 = vsel %vm9793_vm3, %v782_v25, %v904_v51  ;;  %v789_v59 = vor.u32 %v787_v40, %v9925_v48  ;;  %595 = vst [vmem:[#allocation2 + $0x48] sm:$0x1] %v594_v56  ;;  %v628_v61 = vld [vmem:[#allocation2 + $0x5c] sm:$0x1]  ;;  %v709_v2 = vld [vmem:[%s9757_s2 + $0x30] sm:$0xf]  ;;  %v9982_v43 = vsel %vm9840_vm7, %v773_v27, %v780_v16 }
 0x1ac   : > { %906 = vst [vmem:[#allocation2 + $0x38] sm:$0x1] %v905_v57  ;;  %v900_v3 = vld [vmem:[#allocation2 + $0x30] sm:$0xf]  ;;  %v816_v5 = vrot.slane %v9929_v52, 4  ;;  %v9942_v6 = vrot.slane %v801_v54, 7 }
 0x1ad   : > { %v826_v7 = vshrl.u32 %v9938_v60, 16  ;;  %v629_v8 = vsel %vm9798_vm4, 0, %v628_v61  ;;  %v901_v9 = vsel %vm9853_vm8, %v772_v34, %v900_v3  ;;  %v911_v10 = vld [vmem:[#allocation2 + $0x44] sm:$0x1]  ;;  %v818_v12 = vshrl.u32 %v709_v2, 16  ;;  %959 = vrot.lane.b32.xlu0 %v789_v59, %s9202_s23 }
 0x1ae   : > { %630 = vst [vmem:[#allocation2 + $0x5c] sm:$0x1] %v629_v8  ;;  %v821_v13 = vshll.u32 %v709_v2, 16  ;;  %v596_v14 = vld [vmem:[#allocation2 + $0x54] sm:$0x1]  ;;  %v912_v17 = vsel %vm9793_vm3, %v799_v46, %v911_v10  ;;  %v806_v18 = vor.u32 %v804_v55, %v9942_v6  ;;  %969 = vrot.lane.b32.xlu1 %v816_v5, %s9202_s23  ;;  %v756_v46 = vrot.slane %v9869_v4, 4 }
 0x1af   : > { %902 = vst [vmem:[#allocation2 + $0x30] sm:$0xf] %v901_v9  ;;  %v9956_v19 = vrot.slane %v826_v7, 7  ;;  %v597_v20 = vsel %vm9793_vm3, 0, %v596_v14  ;;  %v9961_v22 = vld [vmem:[%s9757_s2 + $0x3c] sm:$0xf] }
 0x1b0   : > { %v631_v24 = vld [vmem:[#allocation2 + $0x68] sm:$0x1]  ;;  %913 = vst [vmem:[#allocation2 + $0x44] sm:$0x1] %v912_v17  ;;  %v9964_v62 = vrot.slane %v818_v12, 7  ;;  %v843_v11 = vshrl.u32 %v9961_v22, 16 }
 0x1b1   : > { %598 = vst [vmem:[#allocation2 + $0x54] sm:$0x1] %v597_v20  ;;  %v632_v15 = vsel %vm9798_vm4, 0, %v631_v24  ;;  %v711_v25 = vld [vmem:[%s9757_s2 + $0x38] sm:$0xf]  ;;  %v833_v30 = vrot.slane %v9956_v19, 4  ;;  %965 = vrot.lane.b32.xlu0 %v806_v18, %s9202_s23 }
 0x1b2   : > { %v907_v28 = vld [vmem:[#allocation2 + $0x3c] sm:$0xf]  ;;  %v918_v29 = vld [vmem:[#allocation2 + $0x50] sm:$0x1]  ;;  %633 = vst [vmem:[#allocation2 + $0x68] sm:$0x1] %v632_v15  ;;  %v823_v34 = vor.u32 %v821_v13, %v9964_v62 }
 0x1b3   : > { %v835_v31 = vshrl.u32 %v711_v25, 16  ;;  %v908_v32 = vsel %vm9853_vm8, %v789_v59, %v907_v28  ;;  %v919_v33 = vsel %vm9793_vm3, %v816_v5, %v918_v29  ;;  %v845_v36 = vrot.slane %v843_v11, 7  ;;  %v599_v38 = vld [vmem:[#allocation2 + $0x60] sm:$0x1]  ;;  %v914_v26 = vld [vmem:[#allocation2 + $0x48] sm:$0xf]  ;;  %975 = vrot.lane.b32.xlu1 %v833_v30, %s9202_s23 }
 0x1b4   : > { %909 = vst [vmem:[#allocation2 + $0x3c] sm:$0xf] %v908_v32  ;;  %920 = vst [vmem:[#allocation2 + $0x50] sm:$0x1] %v919_v33  ;;  %v838_v40 = vshll.u32 %v711_v25, 16  ;;  %v600_v42 = vsel %vm9793_vm3, 0, %v599_v38  ;;  %v915_v44 = vsel %vm9853_vm8, %v806_v18, %v914_v26 }
 0x1b5   : > { %v837_v39 = vrot.slane %v835_v31, 7  ;;  %v850_v45 = vrot.slane %v845_v36, 4  ;;  %601 = vst [vmem:[#allocation2 + $0x60] sm:$0x1] %v600_v42  ;;  %903 = vst.msk [vmem:[#allocation2 + $0x34] sm:$0xf] %vm876_vm6, %v9982_v43  ;;  %971 = vrot.lane.b32.xlu0 %v823_v34, %s9202_s23 }
 0x1b6   : > { %v761_v49 = vshll.u32 %v9831_v41, 16  ;;  %v643_v50 = vld [vmem:[#allocation3 + $0x18] sm:$0x1]  ;;  %916 = vst [vmem:[#allocation2 + $0x48] sm:$0xf] %v915_v44  ;;  %v807_v55 = vrot.slane %v9942_v6, 4 }
 0x1b7   : > { %v925_v51 = vld [vmem:[#allocation2 + $0x5c] sm:$0x1]  ;;  %v9991_v54 = vor.u32 %v838_v40, %v837_v39  ;;  %v812_v56 = vshll.u32 %v9915_v37, 16  ;;  %v790_v57 = vrot.slane %v9925_v48, 4  ;;  %v640_v59 = vld [vmem:[#allocation3 + $0xc] sm:$0x1]  ;;  %981 = vrot.lane.b32.xlu1 %v850_v45, %s9202_s23 }
 0x1b8   : > { %v926_v61 = vsel %vm9793_vm3, %v833_v30, %v925_v51  ;;  %v763_v2 = vor.u32 %v761_v49, %v9849_v53  ;;  %v795_v4 = vshll.u32 %v9890_v21, 16  ;;  %v841_v41 = vrot.slane %v837_v39, 4  ;;  %v673_v3 = vld [vmem:[#allocation3 + $0x20] sm:$0x1]  ;;  %v670_v5 = vld [vmem:[#allocation3 + $0x14] sm:$0x1] }
 0x1b9   : > { %927 = vst [vmem:[#allocation2 + $0x5c] sm:$0x1] %v926_v61  ;;  %v921_v7 = vld [vmem:[#allocation2 + $0x54] sm:$0xf]  ;;  %v814_v6 = vor.u32 %v812_v56, %v9929_v52  ;;  %v846_v37 = vshll.u32 %v9961_v22, 16  ;;  %v824_v48 = vrot.slane %v9964_v62, 4  ;;  %977 = vrot.lane.b32.xlu0 %v9991_v54, %s9202_s23 }
 0x1ba   : > { %v829_v8 = vshll.u32 %v9938_v60, 16  ;;  %v922_v53 = vsel %vm9853_vm8, %v823_v34, %v921_v7  ;;  %v932_v21 = vld [vmem:[#allocation2 + $0x68] sm:$0x1]  ;;  %v10010_v9 = vsel %vm9840_vm7, %v756_v46, %v763_v2  ;;  %v797_v10 = vor.u32 %v795_v4, %v9912_v35  ;;  %v676_v12 = vld [vmem:[#allocation3 + $0x2c] sm:$0x1] }
 0x1bb   : > { %v644_v52 = vsel %vm9793_vm3, 0, %v643_v50  ;;  %923 = vst [vmem:[#allocation2 + $0x54] sm:$0xf] %v922_v53  ;;  %v933_v60 = vsel %vm9793_vm3, %v850_v45, %v932_v21  ;;  %896 = vst.msk [vmem:[#allocation2 + $0x28] sm:$0xf] %vm876_vm6, %v10010_v9  ;;  %v815_v13 = vsel %vm9840_vm7, %v807_v55, %v814_v6  ;;  %v848_v14 = vor.u32 %v846_v37, %v845_v36 }
 0x1bc   : > { %v831_v16 = vor.u32 %v829_v8, %v9956_v19  ;;  %645 = vst [vmem:[#allocation3 + $0x18] sm:$0x1] %v644_v52  ;;  %v646_v17 = vld [vmem:[#allocation3 + $0x24] sm:$0x1]  ;;  %v679_v35 = vld [vmem:[#allocation3 + $0x38] sm:$0x1]  ;;  %v798_v20 = vsel %vm9840_vm7, %v790_v57, %v797_v10  ;;  %943 = vrot.lane.b32.xlu1 %v9864_v63, %s9202_s23 }
 0x1bd   : > { %v649_v18 = vld [vmem:[#allocation3 + $0x30] sm:$0x1]  ;;  %934 = vst [vmem:[#allocation2 + $0x68] sm:$0x1] %v933_v60  ;;  %917 = vst.msk [vmem:[#allocation2 + $0x4c] sm:$0xf] %vm876_vm6, %v815_v13  ;;  %v849_v15 = vsel %vm9840_vm7, %v841_v41, %v848_v14  ;;  %937 = vrot.lane.b32.xlu0 %v9894_v23, %s9202_s23 }
 0x1be   : > { %v641_v22 = vsel %vm9793_vm3, 0, %v640_v59  ;;  %v674_v24 = vsel %vm9798_vm4, 0, %v673_v3  ;;  %v671_v62 = vsel %vm9798_vm4, 0, %v670_v5  ;;  %v682_v19 = vld [vmem:[#allocation3 + $0x44] sm:$0x1]  ;;  %v832_v25 = vsel %vm9840_vm7, %v824_v48, %v831_v16 }
 0x1bf   : > { %v928_v11 = vld [vmem:[#allocation2 + $0x60] sm:$0xf]  ;;  %910 = vst.msk [vmem:[#allocation2 + $0x40] sm:$0xf] %vm876_vm6, %v798_v20  ;;  %642 = vst [vmem:[#allocation3 + $0xc] sm:$0x1] %v641_v22 }
 0x1c0   : > { %675 = vst [vmem:[#allocation3 + $0x20] sm:$0x1] %v674_v24  ;;  %672 = vst [vmem:[#allocation3 + $0x14] sm:$0x1] %v671_v62  ;;  %v677_v27 = vsel %vm9798_vm4, 0, %v676_v12  ;;  %v647_v28 = vsel %vm9793_vm3, 0, %v646_v17  ;;  %v929_v30 = vsel %vm9853_vm8, %v9991_v54, %v928_v11  ;;  %955 = vrot.lane.b32.xlu1 %v9982_v43, %s9202_s23 }
 0x1c1   : > { %v652_v29 = vld [vmem:[#allocation3 + $0x3c] sm:$0x1]  ;;  %931 = vst.msk [vmem:[#allocation2 + $0x64] sm:$0xf] %vm876_vm6, %v849_v15  ;;  %924 = vst.msk [vmem:[#allocation2 + $0x58] sm:$0xf] %vm876_vm6, %v832_v25  ;;  %949 = vrot.lane.b32.xlu0 %v10010_v9, %s9202_s23 }
 0x1c2   : > { %678 = vst [vmem:[#allocation3 + $0x2c] sm:$0x1] %v677_v27  ;;  %648 = vst [vmem:[#allocation3 + $0x24] sm:$0x1] %v647_v28  ;;  %v680_v31 = vsel %vm9798_vm4, 0, %v679_v35  ;;  %v650_v32 = vsel %vm9793_vm3, 0, %v649_v18 }
 0x1c3   : > { %v683_v33 = vsel %vm9798_vm4, 0, %v682_v19  ;;  %v685_v34 = vld [vmem:[#allocation3 + $0x50] sm:$0x1]  ;;  %930 = vst [vmem:[#allocation2 + $0x60] sm:$0xf] %v929_v30  ;;  %v653_v36 = vsel %vm9793_vm3, 0, %v652_v29 }
 0x1c4   : > { %681 = vst [vmem:[#allocation3 + $0x38] sm:$0x1] %v680_v31  ;;  %651 = vst [vmem:[#allocation3 + $0x30] sm:$0x1] %v650_v32  ;;  %v686_v38 = vsel %vm9798_vm4, 0, %v685_v34  ;;  %967 = vrot.lane.b32.xlu1 %v815_v13, %s9202_s23 }
 0x1c5   : > { %684 = vst [vmem:[#allocation3 + $0x44] sm:$0x1] %v683_v33  ;;  %v655_v26 = vld [vmem:[#allocation3 + $0x48] sm:$0x1]  ;;  %v688_v39 = vld [vmem:[#allocation3 + $0x5c] sm:$0x1]  ;;  %961 = vrot.lane.b32.xlu0 %v798_v20, %s9202_s23 }
 0x1c6   : > { %654 = vst [vmem:[#allocation3 + $0x3c] sm:$0x1] %v653_v36  ;;  %687 = vst [vmem:[#allocation3 + $0x50] sm:$0x1] %v686_v38  ;;  %v656_v40 = vsel %vm9793_vm3, 0, %v655_v26  ;;  %v689_v42 = vsel %vm9798_vm4, 0, %v688_v39 }
 0x1c7   : > { %v658_v44 = vld [vmem:[#allocation3 + $0x54] sm:$0x1]  ;;  %v691_v45 = vld [vmem:[#allocation3 + $0x68] sm:$0x1]  ;;  %657 = vst [vmem:[#allocation3 + $0x48] sm:$0x1] %v656_v40 }
 0x1c8   : > { %690 = vst [vmem:[#allocation3 + $0x5c] sm:$0x1] %v689_v42  ;;  %v659_v46 = vsel %vm9793_vm3, 0, %v658_v44  ;;  %v692_v49 = vsel %vm9798_vm4, 0, %v691_v45  ;;  %v661_v50 = vld [vmem:[#allocation3 + $0x60] sm:$0x1]  ;;  %979 = vrot.lane.b32.xlu1 %v849_v15, %s9202_s23 }
 0x1c9   : > { %660 = vst [vmem:[#allocation3 + $0x54] sm:$0x1] %v659_v46  ;;  %693 = vst [vmem:[#allocation3 + $0x68] sm:$0x1] %v692_v49  ;;  %v662_v51 = vsel %vm9793_vm3, 0, %v661_v50  ;;  %973 = vrot.lane.b32.xlu0 %v832_v25, %s9202_s23 }
 0x1ca   : > { %663 = vst [vmem:[#allocation3 + $0x60] sm:$0x1] %v662_v51  ;;  %v1015_v1 = vld [vmem:[#allocation3 + $0x18] sm:$0xf]  ;;  %v1008_v63 = vld [vmem:[#allocation3 + $0xc] sm:$0xf] }
 0x1cb   : > { %v1019_v56 = vld [vmem:[#allocation3 + $0x20] sm:$0x1]  ;;  %v1012_v57 = vld [vmem:[#allocation3 + $0x14] sm:$0x1]  ;;  %v1026_v41 = vld [vmem:[#allocation3 + $0x2c] sm:$0x1] }
 0x1cc   : > { %v1022_v3 = vld [vmem:[#allocation3 + $0x24] sm:$0xf]  ;;  %v1033_v48 = vld [vmem:[#allocation3 + $0x38] sm:$0x1]  ;;  %v1029_v8 = vld [vmem:[#allocation3 + $0x30] sm:$0xf] }
 0x1cd   : > { %v1040_v52 = vld [vmem:[#allocation3 + $0x44] sm:$0x1]  ;;  %v1036_v12 = vld [vmem:[#allocation3 + $0x3c] sm:$0xf]  ;;  %v1047_v17 = vld [vmem:[#allocation3 + $0x50] sm:$0x1] }
 0x1ce   : > { %v1043_v35 = vld [vmem:[#allocation3 + $0x48] sm:$0xf]  ;;  %v1068_v45 = vld [vmem:[%s484_s0] sm:$0xf] (!%p7042_p9)  ;;  %v1069_v50 = vld [vmem:[%s484_s0 + $0x4] sm:$0xf] (!%p7042_p9) }
 0x1cf   : > { %v1054_v62 = vld [vmem:[#allocation3 + $0x5c] sm:$0x1]  ;;  %v1071_v46 = vshrl.u32 (!%p7042_p9), %v1068_v45, 16  ;;  %v1074_v49 = vshll.u32 (!%p7042_p9), %v1068_v45, 16  ;;  %v1079_v51 = vshrl.u32 (!%p7042_p9), %v1069_v50, 16 }
 0x1d0   : > { %v1050_v19 = vld [vmem:[#allocation3 + $0x54] sm:$0xf]  ;;  %v1061_v28 = vld [vmem:[#allocation3 + $0x68] sm:$0x1] }
 0x1d1   : > { %v1057_v29 = vld [vmem:[#allocation3 + $0x60] sm:$0xf] }
 0x209   : > { %v942_v23 = vpop.permute.xlu1 %941 }
 0x20a   : > { %v1016_v54 = vsel %vm9853_vm8, %v942_v23, %v1015_v1  ;;  %v936_v55 = vpop.permute.xlu0 %935  ;;  %v1082_v1 = vshll.u32 (!%p7042_p9), %v1069_v50, 16  ;;  %v1090_v23 = vld [vmem:[#allocation2] sm:$0xf] (!%p7042_p9) }
 0x20b   : > { %1017 = vst [vmem:[#allocation3 + $0x18] sm:$0xf] %v1016_v54  ;;  %v1009_v43 = vsel %vm9853_vm8, %v936_v55, %v1008_v63  ;;  %v1073_v63 = vrot.slane (!%p7042_p9), %v1071_v46, 7  ;;  %v1081_v54 = vrot.slane (!%p7042_p9), %v1079_v51, 7 }
 0x20c   : > { %1010 = vst [vmem:[#allocation3 + $0xc] sm:$0xf] %v1009_v43  ;;  %v1094_v43 = vld [vmem:[#allocation2 + $0x8] sm:$0x1] (!%p7042_p9) }
 0x20d   : > { %v946_v59 = vpop.permute.xlu1 %945  ;;  %v1076_v55 = vor.u32 (!%p7042_p9), %v1074_v49, %v1073_v63 }
 0x20e   : > { %v1020_v61 = vsel %vm9793_vm3, %v946_v59, %v1019_v56  ;;  %v1077_v56 = vrot.slane (!%p7042_p9), %v1073_v63, 4  ;;  %v1084_v59 = vor.u32 (!%p7042_p9), %v1082_v1, %v1081_v54 }
 0x20f   : > { %v940_v2 = vpop.permute.xlu0 %939  ;;  %1021 = vst [vmem:[#allocation3 + $0x20] sm:$0x1] %v1020_v61  ;;  %1097 = vrot.lane.b32.xlu0 (!%p7042_p9), %v1076_v55, %s9203_s11  ;;  %v1091_v61 = vsel (!%p7042_p9), %vm9853_vm8, %v1076_v55, %v1090_v23 }
 0x210   : > { %v1013_v4 = vsel %vm9793_vm3, %v940_v2, %v1012_v57  ;;  %v1086_v57 = vrot.slane (!%p7042_p9), %v1081_v54, 4  ;;  %1092 = vst [vmem:[#allocation2] sm:$0xf] (!%p7042_p9), %v1091_v61 }
 0x211   : > { %1014 = vst [vmem:[#allocation3 + $0x14] sm:$0x1] %v1013_v4  ;;  %v952_v5 = vpop.permute.xlu1 %951  ;;  %v1085_v4 = vsel (!%p7042_p9), %vm9840_vm7, %v1077_v56, %v1084_v59 }
 0x212   : > { %v1027_v7 = vsel %vm9793_vm3, %v952_v5, %v1026_v41  ;;  %v1095_v2 = vsel (!%p7042_p9), %vm9793_vm3, %v1086_v57, %v1094_v43  ;;  %1099 = vrot.lane.b32.xlu1 (!%p7042_p9), %v1085_v4, %s9203_s11  ;;  %1093 = vst.msk [vmem:[#allocation2 + $0x4] sm:$0xf] (!%p7042_p9), %vm876_vm6, %v1085_v4  ;;  %v1106_v41 = vld [vmem:[#allocation3] sm:$0xf] (!%p7042_p9) }
 0x213   : > { %v948_v6 = vpop.permute.xlu0 %947  ;;  %1028 = vst [vmem:[#allocation3 + $0x2c] sm:$0x1] %v1027_v7  ;;  %1096 = vst [vmem:[#allocation2 + $0x8] sm:$0x1] (!%p7042_p9), %v1095_v2  ;;  %1101 = vrot.lane.b32.xlu0 (!%p7042_p9), %v1086_v57, %s9203_s11  ;;  %v1110_v7 = vld [vmem:[#allocation3 + $0x8] sm:$0x1] (!%p7042_p9) }
 0x214   : > { %v1023_v37 = vsel %vm9853_vm8, %v948_v6, %v1022_v3 }
 0x215   : > { %1024 = vst [vmem:[#allocation3 + $0x24] sm:$0xf] %v1023_v37  ;;  %v958_v53 = vpop.permute.xlu1 %957 }
 0x216   : > { %v1034_v21 = vsel %vm9793_vm3, %v958_v53, %v1033_v48 }
 0x217   : > { %1035 = vst [vmem:[#allocation3 + $0x38] sm:$0x1] %v1034_v21 }
 0x218   : > { %v954_v9 = vpop.permute.xlu0 %953 }
 0x219   : > { %v1030_v10 = vsel %vm9853_vm8, %v954_v9, %v1029_v8 }
 0x21a   : > { %1031 = vst [vmem:[#allocation3 + $0x30] sm:$0xf] %v1030_v10 }
 0x21b   : > { %v964_v60 = vpop.permute.xlu1 %963 }
 0x21c   : > { %v1041_v13 = vsel %vm9793_vm3, %v964_v60, %v1040_v52 }
 0x21d   : > { %1042 = vst [vmem:[#allocation3 + $0x44] sm:$0x1] %v1041_v13 }
 0x21f   : > { %v960_v14 = vpop.permute.xlu0 %959 }
 0x220   : > { %v1037_v16 = vsel %vm9853_vm8, %v960_v14, %v1036_v12  ;;  %v970_v18 = vpop.permute.xlu1 %969 }
 0x221   : > { %1038 = vst [vmem:[#allocation3 + $0x3c] sm:$0xf] %v1037_v16  ;;  %v1048_v20 = vsel %vm9793_vm3, %v970_v18, %v1047_v17 }
 0x222   : > { %1049 = vst [vmem:[#allocation3 + $0x50] sm:$0x1] %v1048_v20 }
 0x223   : > { %v966_v22 = vpop.permute.xlu0 %965 }
 0x224   : > { %v1044_v24 = vsel %vm9853_vm8, %v966_v22, %v1043_v35 }
 0x225   : > { %1045 = vst [vmem:[#allocation3 + $0x48] sm:$0xf] %v1044_v24  ;;  %v976_v11 = vpop.permute.xlu1 %975 }
 0x226   : > { %v1055_v15 = vsel %vm9793_vm3, %v976_v11, %v1054_v62 }
 0x227   : > { %v972_v25 = vpop.permute.xlu0 %971  ;;  %1056 = vst [vmem:[#allocation3 + $0x5c] sm:$0x1] %v1055_v15 }
 0x228   : > { %v1051_v27 = vsel %vm9853_vm8, %v972_v25, %v1050_v19 }
 0x229   : > { %1052 = vst [vmem:[#allocation3 + $0x54] sm:$0xf] %v1051_v27  ;;  %v982_v30 = vpop.permute.xlu1 %981 }
 0x22a   : > { %v1062_v31 = vsel %vm9793_vm3, %v982_v30, %v1061_v28 }
 0x22b   : > { %v978_v32 = vpop.permute.xlu0 %977  ;;  %1063 = vst [vmem:[#allocation3 + $0x68] sm:$0x1] %v1062_v31 }
 0x22c   : > { %v1058_v33 = vsel %vm9853_vm8, %v978_v32, %v1057_v29 }
 0x22d   : > { %1059 = vst [vmem:[#allocation3 + $0x60] sm:$0xf] %v1058_v33 }
 0x22e   : > { %v944_v34 = vpop.permute.xlu1 %943 }
 0x22f   : > { %1018 = vst.msk [vmem:[#allocation3 + $0x1c] sm:$0xf] %vm876_vm6, %v944_v34  ;;  %v938_v36 = vpop.permute.xlu0 %937 }
 0x230   : > { %1011 = vst.msk [vmem:[#allocation3 + $0x10] sm:$0xf] %vm876_vm6, %v938_v36 }
 0x232   : > { %v956_v38 = vpop.permute.xlu1 %955 }
 0x233   : > { %1032 = vst.msk [vmem:[#allocation3 + $0x34] sm:$0xf] %vm876_vm6, %v956_v38  ;;  %v950_v26 = vpop.permute.xlu0 %949 }
 0x234   : > { %1025 = vst.msk [vmem:[#allocation3 + $0x28] sm:$0xf] %vm876_vm6, %v950_v26 }
 0x236   : > { %v968_v39 = vpop.permute.xlu1 %967  ;;  %1067 = sbr.rel (%p7042_p9) target bundleno = 648 (0x288), region = 96 }
 0x237   : > { %1046 = vst.msk [vmem:[#allocation3 + $0x4c] sm:$0xf] %vm876_vm6, %v968_v39  ;;  %v962_v40 = vpop.permute.xlu0 %961 }
 0x238   : > { %1039 = vst.msk [vmem:[#allocation3 + $0x40] sm:$0xf] %vm876_vm6, %v962_v40 }
 0x23a   : > { %v980_v42 = vpop.permute.xlu1 %979 }
 0x23b   : > { %1060 = vst.msk [vmem:[#allocation3 + $0x64] sm:$0xf] %vm876_vm6, %v980_v42  ;;  %v974_v44 = vpop.permute.xlu0 %973 }
 0x23c   : > { %1053 = vst.msk [vmem:[#allocation3 + $0x58] sm:$0xf] %vm876_vm6, %v974_v44 }
 0x281   : > { %v1098_v3 = vpop.permute.xlu0 %1097 }
 0x282   : > { %v1107_v5 = vsel %vm9853_vm8, %v1098_v3, %v1106_v41 }
 0x283   : > { %1108 = vst [vmem:[#allocation3] sm:$0xf] %v1107_v5 }
 0x284   : > { %v1100_v6 = vpop.permute.xlu1 %1099 }
 0x285   : > { %1109 = vst.msk [vmem:[#allocation3 + $0x4] sm:$0xf] %vm876_vm6, %v1100_v6  ;;  %v1102_v37 = vpop.permute.xlu0 %1101 }
 0x286   : > { %v1111_v48 = vsel %vm9793_vm3, %v1102_v37, %v1110_v7 }
 0x287   : > { %1112 = vst [vmem:[#allocation3 + $0x8] sm:$0x1] %v1111_v48 }
 0x288 PF: > { %s12218_s18 = sld [smem:[#allocation33_spill]] }
 0x28e   : > { %p7043_p1 = scmp.ne.s32.totalorder %s12218_s18, 0 }
 0x28f   : > { %v1117_v8 = vld [vmem:[#allocation2] sm:$0xf] (!%p7043_p1)  ;;  %v1121_v53 = vld [vmem:[#allocation2 + $0x8] sm:$0x1] (!%p7043_p1)  ;;  %v9204_v9 = vmov (!%p7043_p1), 0  }
 0x290   : > { %1116 = sbr.rel (%p7043_p1) target bundleno = 663 (0x297), region = 100  ;;  %v1118_v21 = vsel (!%p7043_p1), %vm9853_vm8, 0, %v1117_v8  ;;  %1120 = vst.msk [vmem:[#allocation2 + $0x4] sm:$0xf] (!%p7043_p1), %vm876_vm6, %v9204_v9  ;;  %1127 = vst.msk [vmem:[#allocation3 + $0x4] sm:$0xf] (!%p7043_p1), %vm876_vm6, %v9204_v9 }
 0x291   : > { %v1122_v10 = vsel (!%p7043_p1), %vm9793_vm3, 0, %v1121_v53  ;;  %v1124_v52 = vld [vmem:[#allocation3] sm:$0xf] (!%p7043_p1)  ;;  %v1128_v12 = vld [vmem:[#allocation3 + $0x8] sm:$0x1] (!%p7043_p1) }
 0x292   : > { %1119 = vst [vmem:[#allocation2] sm:$0xf] (!%p7043_p1), %v1118_v21  ;;  %1123 = vst [vmem:[#allocation2 + $0x8] sm:$0x1] (!%p7043_p1), %v1122_v10  ;;  %v1125_v60 = vsel (!%p7043_p1), %vm9853_vm8, 0, %v1124_v52  ;;  %v1129_v13 = vsel (!%p7043_p1), %vm9793_vm3, 0, %v1128_v12 }
 0x293   : > { %1126 = vst [vmem:[#allocation3] sm:$0xf] (!%p7043_p1), %v1125_v60  ;;  %1130 = vst [vmem:[#allocation3 + $0x8] sm:$0x1] (!%p7043_p1), %v1129_v13 }
 0x297 PF: > { %s12219_s6 = sld [smem:[#allocation33_spill]] }
 0x29d   : > { %p7044_p7 = scmp.ge.s32.totalorder %s12219_s6, 1 }
 0x29e   : > { %v1135_v14 = vld [vmem:[%s493_s24] sm:$0xf] (!%p7044_p7)  ;;  %v1136_v35 = vld [vmem:[%s493_s24 + $0x4] sm:$0xf] (!%p7044_p7)  ;;  %v1162_v11 = vld [vmem:[#allocation2 + $0x74] sm:$0x1] (!%p7044_p7) }
 0x29f   : > { %1134 = sbr.rel (%p7044_p7) target bundleno = 798 (0x31e), region = 104  ;;  %v1138_v16 = vshrl.u32 (!%p7044_p7), %v1135_v14, 16  ;;  %v1141_v17 = vshll.u32 (!%p7044_p7), %v1135_v14, 16  ;;  %v1146_v18 = vshrl.u32 (!%p7044_p7), %v1136_v35, 16  ;;  %v1149_v20 = vshll.u32 (!%p7044_p7), %v1136_v35, 16  ;;  %s9205_s16 = smov (!%p7044_p7), 96  }
 0x2a0   : > { %v1158_v24 = vld [vmem:[#allocation2 + $0x6c] sm:$0xf] (!%p7044_p7)  ;;  %v1175_v31 = vld [vmem:[#allocation3 + $0x6c] sm:$0xf] (!%p7044_p7) }
 0x2a1   : > { %v1140_v22 = vrot.slane (!%p7044_p7), %v1138_v16, 7  ;;  %v1148_v62 = vrot.slane (!%p7044_p7), %v1146_v18, 7  ;;  %v1179_v34 = vld [vmem:[#allocation3 + $0x74] sm:$0x1] (!%p7044_p7) }
 0x2a3   : > { %v1143_v19 = vor.u32 (!%p7044_p7), %v1141_v17, %v1140_v22  ;;  %v1144_v15 = vrot.slane (!%p7044_p7), %v1140_v22, 4  ;;  %v1153_v25 = vrot.slane (!%p7044_p7), %v1148_v62, 4  ;;  %v1151_v27 = vor.u32 (!%p7044_p7), %v1149_v20, %v1148_v62 }
 0x2a5   : > { %1165 = vrot.lane.b32.xlu0 (!%p7044_p7), %v1143_v19, %s9205_s16  ;;  %v1159_v28 = vsel (!%p7044_p7), %vm9853_vm8, %v1143_v19, %v1158_v24  ;;  %v1163_v29 = vsel (!%p7044_p7), %vm9793_vm3, %v1153_v25, %v1162_v11  ;;  %v1152_v30 = vsel (!%p7044_p7), %vm9840_vm7, %v1144_v15, %v1151_v27 }
 0x2a6   : > { %1160 = vst [vmem:[#allocation2 + $0x6c] sm:$0xf] %v1159_v28  ;;  %1164 = vst [vmem:[#allocation2 + $0x74] sm:$0x1] %v1163_v29  ;;  %1167 = vrot.lane.b32.xlu1 %v1152_v30, %s9205_s16 }
 0x2a7   : > { %1161 = vst.msk [vmem:[#allocation2 + $0x70] sm:$0xf] %vm876_vm6, %v1152_v30 }
 0x2a9   : > { %1169 = vrot.lane.b32.xlu0 %v1153_v25, %s9205_s16 }
 0x317   : > { %v1166_v32 = vpop.permute.xlu0 %1165 }
 0x318   : > { %v1176_v33 = vsel %vm9853_vm8, %v1166_v32, %v1175_v31  ;;  %v1168_v36 = vpop.permute.xlu1 %1167 }
 0x319   : > { %1177 = vst [vmem:[#allocation3 + $0x6c] sm:$0xf] %v1176_v33  ;;  %1178 = vst.msk [vmem:[#allocation3 + $0x70] sm:$0xf] %vm876_vm6, %v1168_v36 }
 0x31b   : > { %v1170_v38 = vpop.permute.xlu0 %1169 }
 0x31c   : > { %v1180_v47 = vsel %vm9793_vm3, %v1170_v38, %v1179_v34 }
 0x31d   : > { %1181 = vst [vmem:[#allocation3 + $0x74] sm:$0x1] %v1180_v47 }
 0x31e PF: > { %s12220_s2 = sld [smem:[#allocation33_spill]] }
 0x324   : > { %p7045_p3 = scmp.ne.s32.totalorder %s12220_s2, 1 }
 0x325   : > { %v1187_v26 = vld [vmem:[#allocation2 + $0x6c] sm:$0xf] (!%p7045_p3)  ;;  %v1191_v39 = vld [vmem:[#allocation2 + $0x74] sm:$0x1] (!%p7045_p3)  ;;  %v9206_v42 = vmov (!%p7045_p3), 0  }
 0x326   : > { %1185 = sbr.rel (%p7045_p3) target bundleno = 813 (0x32d), region = 108  ;;  %v1188_v40 = vsel (!%p7045_p3), %vm9853_vm8, 0, %v1187_v26  ;;  %1190 = vst.msk [vmem:[#allocation2 + $0x70] sm:$0xf] (!%p7045_p3), %vm876_vm6, %v9206_v42  ;;  %1198 = vst.msk [vmem:[#allocation3 + $0x70] sm:$0xf] (!%p7045_p3), %vm876_vm6, %v9206_v42 }
 0x327   : > { %v1192_v44 = vsel (!%p7045_p3), %vm9793_vm3, 0, %v1191_v39  ;;  %v1195_v45 = vld [vmem:[#allocation3 + $0x6c] sm:$0xf] (!%p7045_p3)  ;;  %v1199_v46 = vld [vmem:[#allocation3 + $0x74] sm:$0x1] (!%p7045_p3) }
 0x328   : > { %1189 = vst [vmem:[#allocation2 + $0x6c] sm:$0xf] (!%p7045_p3), %v1188_v40  ;;  %1193 = vst [vmem:[#allocation2 + $0x74] sm:$0x1] (!%p7045_p3), %v1192_v44  ;;  %v1196_v49 = vsel (!%p7045_p3), %vm9853_vm8, 0, %v1195_v45  ;;  %v1200_v50 = vsel (!%p7045_p3), %vm9793_vm3, 0, %v1199_v46 }
 0x329   : > { %1197 = vst [vmem:[#allocation3 + $0x6c] sm:$0xf] (!%p7045_p3), %v1196_v49  ;;  %1201 = vst [vmem:[#allocation3 + $0x74] sm:$0x1] (!%p7045_p3), %v1200_v50 }
 0x32d PF: > { %v8550_v51 = vld [vmem:[#allocation10 + $0x10] sm:$0xff]   ;;  %v8551_v1 = vld [vmem:[#allocation10 + $0x18] sm:$0xff]   ;;  %vm1250_vm9 = vsmask.f32 3328  ;;  %vm1251_vm10 = vsmask.f32 7440 }
 0x32e   : > { %8035 = vmatprep.subr.bf16.mxu1 %v8550_v51  ;;  %7655 = vmatprep.subr.bf16.mxu0 %v8550_v51  ;;  %v10181_v63 = vld [vmem:[#allocation2] sm:$0xf]  ;;  %v10183_v23 = vld [vmem:[#allocation2 + $0x4] sm:$0xf]  ;;  %v10185_v54 = vld [vmem:[#allocation2 + $0x8] sm:$0x1] }
 0x32f   : > { %8037 = vmatpush3.bf16.msra.mxu1 %v8550_v51  ;;  %7656 = vmatpush3.bf16.msra.mxu0 %v8550_v51  ;;  %v1254_v0 = vshrl.u32 %v10181_v63, 16  ;;  %v1257_v58 = vshll.u32 %v10181_v63, 16  ;;  %v1263_v55 = vshll.u32 %v10183_v23, 16  ;;  %v1267_v43 = vshrl.u32 %v10183_v23, 16  ;;  %v10193_v59 = vld [vmem:[#allocation2 + $0x18] sm:$0xf]  ;;  %vm10209_vm12 = vmor %vm1250_vm9, %vm1251_vm10 }
 0x330   : > { %8036 = vmatprep.subr.bf16.mxu1 %v8551_v1  ;;  %7657 = vmatprep.subr.bf16.mxu0 %v8551_v1  ;;  %v1273_v56 = vshll.u32 %v10185_v54, 16  ;;  %vm1486_vm11 = vcmask 261120   ;;  %v2364_v57 = vrot.slane %v10185_v54, 5  ;;  %v10195_v4 = vld [vmem:[#allocation2 + $0x1c] sm:$0xf]  ;;  %v7064_v3 = vcombine.low %v10181_v63, %v10183_v23  ;;  %v10205_v9 = vld [vmem:[#allocation13 + $0x10] sm:$0xff]  }
 0x331   : > { %v1256_v61 = vrot.slane %v1254_v0, 4  ;;  %v1259_v2 = vrot.slane %v1257_v58, 5  ;;  %v10197_v41 = vld [vmem:[#allocation2 + $0x20] sm:$0x1]  ;;  %v1265_v5 = vrot.slane %v1263_v55, 5  ;;  %v1269_v7 = vrot.slane %v1267_v43, 4 }
 0x332   : > { %v1275_v6 = vrot.slane %v1273_v56, 5  ;;  %v1302_v37 = vshrl.u32 %v10193_v59, 16  ;;  %v1305_v8 = vshll.u32 %v10193_v59, 16  ;;  %v1311_v53 = vshll.u32 %v10195_v4, 16  ;;  %v10215_v14 = vld [vmem:[#allocation2 + $0xc] sm:$0xf] }
 0x333   : > { %8038 = vmatpush3.bf16.msra.mxu1 %v8551_v1  ;;  %7658 = vmatpush3.bf16.msra.mxu0 %v8551_v1  ;;  %v1260_v48 = vor.u32 %v1259_v2, %v1256_v61  ;;  %v1315_v21 = vshrl.u32 %v10195_v4, 16  ;;  %v1270_v52 = vor.u32 %v1269_v7, %v1265_v5  ;;  %v1321_v60 = vshll.u32 %v10197_v41, 16  ;;  %v10217_v16 = vld [vmem:[#allocation10] sm:$0xff]   ;;  %v10230_v30 = vld [vmem:[#allocation2 + $0x24] sm:$0xf]  ;;  %s9208_s21 = smov 32  }
 0x334   : > { %v1304_v12 = vrot.slane %v1302_v37, 4  ;;  %v2378_v13 = vrot.slane %v10197_v41, 5  ;;  %v1307_v35 = vrot.slane %v1305_v8, 5  ;;  %v1313_v18 = vrot.slane %v1311_v53, 5  ;;  %7695 = vmatprep.subr.bf16.mxu1 %v10205_v9  ;;  %v10220_v22 = vld [vmem:[#allocation2 + $0x10] sm:$0xf]  ;;  %7675 = vmatprep.subr.bf16.mxu0 %v10217_v16 }
 0x335   : > { %v1261_v17 = vrot.slane %v1260_v48, 4  ;;  %v1317_v20 = vrot.slane %v1315_v21, 4  ;;  %v1271_v24 = vrot.slane %v1270_v52, 4  ;;  %v1323_v62 = vrot.slane %v1321_v60, 5  ;;  %v10227_v28 = vld [vmem:[#allocation2 + $0x14] sm:$0x1] }
 0x336   : > { %v1278_v19 = vshrl.u32 %v10215_v14, 16  ;;  %v1281_v11 = vshll.u32 %v10215_v14, 16  ;;  %v1308_v25 = vor.u32 %v1307_v35, %v1304_v12  ;;  %v1287_v29 = vshll.u32 %v10220_v22, 16  ;;  %v10235_v36 = vld [vmem:[#allocation2 + $0x28] sm:$0xf]  ;;  %s12253_s15 = sld [smem:[#allocation34_spill]] }
 0x337   : > { %v1266_v15 = vsel %vm10209_vm12, %v1261_v17, %v1265_v5  ;;  %v1318_v27 = vor.u32 %v1317_v20, %v1313_v18  ;;  %v1276_v31 = vsel %vm10209_vm12, %v1271_v24, %v1275_v6  ;;  %v1291_v34 = vshrl.u32 %v10220_v22, 16  ;;  %v10245_v51 = vld [vmem:[#allocation2 + $0x2c] sm:$0x1]  ;;  %v10248_v0 = vld [vmem:[#allocation2 + $0x30] sm:$0xf]  ;;  %s12254_s13 = sld [smem:[#allocation33_spill]] }
 0x338   : > { %v1280_v32 = vrot.slane %v1278_v19, 4  ;;  %v1283_v33 = vrot.slane %v1281_v11, 5  ;;  %v7046_v38 = vcombine.low %v1266_v15, %v1276_v31  ;;  %v1309_v47 = vrot.slane %v1308_v25, 4  ;;  %v10250_v61 = vld [vmem:[#allocation2 + $0x34] sm:$0xf]  ;;  %s6804_s0 = sshll.u32 %s10123_s10, 4  ;;  %s12009_s0 = int_to_ptr.vmem [resolvable:$true] %s6804_s0 }
 0x339   : > { %v1319_v26 = vrot.slane %v1318_v27, 4  ;;  %v1289_v39 = vrot.slane %v1287_v29, 5  ;;  %v1293_v42 = vrot.slane %v1291_v34, 4  ;;  %v1297_v44 = vshll.u32 %v10227_v28, 16  ;;  %v10255_v37 = vld [vmem:[#allocation2 + $0x38] sm:$0x1] }
 0x33a   : > { %v1284_v40 = vor.u32 %v1283_v33, %v1280_v32  ;;  %v2368_v45 = vrot.slane %v10220_v22, 5  ;;  %7659 = vmatprep.mubr.msk.bf16.mxu0 %vm1486_vm11, %v7046_v38  ;;  %v1314_v46 = vsel %vm10209_vm12, %v1309_v47, %v1313_v18  ;;  %v2371_v50 = vrot.slane %v10227_v28, 5  ;;  %v10262_v52 = vld [vmem:[#allocation2 + $0x3c] sm:$0xf]  ;;  %v10265_v18 = vld [vmem:[#allocation2 + $0x40] sm:$0xf] }
 0x33b   : > { %v1324_v49 = vsel %vm10209_vm12, %v1319_v26, %v1323_v62  ;;  %v1326_v1 = vshrl.u32 %v10230_v30, 16  ;;  %v1294_v43 = vor.u32 %v1293_v42, %v1289_v39  ;;  %v1299_v56 = vrot.slane %v1297_v44, 5  ;;  %v8554_v29 = vld [vmem:[#allocation10 + $0x8] sm:$0xff]   ;;  %v10276_v44 = vld [vmem:[#allocation2 + $0x44] sm:$0x1]  ;;  %s12255_s27 = sld [smem:[#allocation56_spill]] }
 0x33c   : > { %v7048_v58 = vcombine.low %v1314_v46, %v1324_v49  ;;  %v1285_v55 = vrot.slane %v1284_v40, 4  ;;  %v1329_v5 = vshll.u32 %v10230_v30, 16  ;;  %v1335_v7 = vshll.u32 %v10235_v36, 16  ;;  %s7455_s25 = sshll.u32 %s12253_s15, 2  ;;  %s6790_s23 = scalar_lea.sflag [#allocation6], %s9753_s12 }
 0x33d   : > { %v1328_v2 = vrot.slane %v1326_v1, 4  ;;  %v1339_v6 = vshrl.u32 %v10235_v36, 16  ;;  %v1295_v8 = vrot.slane %v1294_v43, 4  ;;  %v1345_v53 = vshll.u32 %v10245_v51, 16  ;;  %v10287_v43 = vld [vmem:[#allocation2 + $0x48] sm:$0xf]  ;;  %s6801_s28 = sadd.s32 %s12254_s13, %s7455_s25 }
 0x33e   : > { %7663 = vmatprep.mubr.msk.bf16.mxu1 %vm1486_vm11, %v7048_v58  ;;  %v1290_v48 = vsel %vm10209_vm12, %v1285_v55, %v1289_v39  ;;  %v1350_v21 = vshrl.u32 %v10248_v0, 16  ;;  %v1331_v12 = vrot.slane %v1329_v5, 5  ;;  %v1337_v60 = vrot.slane %v1335_v7, 5  ;;  %s7456_s30 = sshll.u32 %s6801_s28, 7  ;;  %s9021_s4 = scalar_lea.vmem %s12009_s0, 256 }
 0x33f   : > { %v1341_v17 = vrot.slane %v1339_v6, 4  ;;  %v1353_v35 = vshll.u32 %v10248_v0, 16  ;;  %v1300_v20 = vsel %vm10209_vm12, %v1295_v8, %v1299_v56  ;;  %v1347_v24 = vrot.slane %v1345_v53, 5  ;;  %v10289_v56 = vld [vmem:[#allocation10 + $0x20] sm:$0xff]   ;;  %v8556_v6 = vld [vmem:[#allocation13 + $0x18] sm:$0xff]   ;;  %p9022_p13 = scmp.ne.s32.totalorder %s12009_s0, %s9021_s4  ;;  %p12256_p11 = scmp.ne.s32.totalorder %s12176_s26, 0 }
 0x340   : > { %v1352_v62 = vrot.slane %v1350_v21, 4  ;;  %v1359_v19 = vshll.u32 %v10250_v61, 16  ;;  %v7047_v11 = vcombine.low %v1290_v48, %v1300_v20  ;;  %v1332_v15 = vor.u32 %v1331_v12, %v1328_v2  ;;  %v10299_v12 = vld [vmem:[#allocation2 + $0x50] sm:$0x1]  ;;  %s9211_s7 = smov [#allocation19]  }
 0x341   : > { %v1342_v25 = vor.u32 %v1341_v17, %v1337_v60  ;;  %v1355_v27 = vrot.slane %v1353_v35, 5  ;;  %v1363_v32 = vshrl.u32 %v10250_v61, 16  ;;  %v1369_v33 = vshll.u32 %v10255_v37, 16  ;;  %s12007_s24 = scalar_lea.hbm %s12255_s27, %s7456_s30  ;;  %p9023_p5 = pnand %p9022_p13, %p12256_p11 }
 0x342   : > { %v1361_v31 = vrot.slane %v1359_v19, 5  ;;  %v1374_v34 = vshrl.u32 %v10262_v52, 16  ;;  %7660 = vmatmul.mubr.msk.bf16.vlgmr.msra.gmra.mrb[0].mxu0 %vm1486_vm11, %v7047_v11  ;;  %v1333_v38 = vrot.slane %v1332_v15, 4  ;;  %v1377_v39 = vshll.u32 %v10262_v52, 16  ;;  %s9025_s11 = sshll.u32 %s9211_s7, 4  ;;  %s9026_s11 = int_to_ptr.vmem [resolvable:$false] %s9025_s11 }
 0x343   : > { %v1343_v47 = vrot.slane %v1342_v25, 4  ;;  %v1356_v26 = vor.u32 %v1355_v27, %v1352_v62  ;;  %7676 = vmatpush3.bf16.msra.mxu0 %v10217_v16  ;;  %v1365_v40 = vrot.slane %v1363_v32, 4  ;;  %v1371_v42 = vrot.slane %v1369_v33, 5  ;;  %7679 = vmatprep.mubr.msk.bf16.mxu0 %vm1486_vm11, %v7064_v3  ;;  %v10292_v3 = vld [vmem:[#allocation2 + $0x4c] sm:$0xf]  ;;  %v10314_v32 = vld [vmem:[#allocation13] sm:$0xff]   ;;  %p9024_p10 = pneg %p9023_p5  ;;  %p9028_p0 = scmp.lt.s32.totalorder %s12009_s0, %s9026_s11 }
 0x344   : > { %v1376_v46 = vrot.slane %v1374_v34, 4  ;;  %v1383_v49 = vshll.u32 %v10265_v18, 16  ;;  %v1338_v1 = vsel %vm10209_vm12, %v1333_v38, %v1337_v60  ;;  %v1379_v16 = vrot.slane %v1377_v39, 5  ;;  %7677 = vmatprep.subr.bf16.mxu0 %v8554_v29  ;;  %v10301_v60 = vld [vmem:[#allocation2 + $0x54] sm:$0xf]  ;;  %s9027_s18 = scalar_lea.vmem %s9026_s11, 512 }
 0x345   : > { %v1348_v58 = vsel %vm10209_vm12, %v1343_v47, %v1347_v24  ;;  %v1357_v55 = vrot.slane %v1356_v26, 4  ;;  %v1366_v5 = vor.u32 %v1365_v40, %v1361_v31  ;;  %v1387_v63 = vshrl.u32 %v10265_v18, 16  ;;  %p9029_p2 = scmp.lt.s32.totalorder %s9027_s18, %s9021_s4 }
 0x346   : > { %v7049_v2 = vcombine.low %v1338_v1, %v1348_v58  ;;  %v1385_v7 = vrot.slane %v1383_v49, 5  ;;  %v1380_v8 = vor.u32 %v1379_v16, %v1376_v46  ;;  %v1393_v53 = vshll.u32 %v10276_v44, 16  ;;  %v10321_v46 = vld [vmem:[#allocation2 + $0x5c] sm:$0x1] }
 0x347   : > { %v1362_v48 = vsel %vm10209_vm12, %v1357_v55, %v1361_v31  ;;  %v7065_v21 = vcombine.low %v10215_v14, %v10220_v22  ;;  %v1367_v17 = vrot.slane %v1366_v5, 4  ;;  %v1389_v35 = vrot.slane %v1387_v63, 4  ;;  %7678 = vmatpush3.bf16.msra.mxu0 %v8554_v29  ;;  %v10312_v31 = vld [vmem:[#allocation2 + $0x58] sm:$0xf]  ;;  %p9030_p6 = por %p9029_p2, %p9028_p0 }
 0x348   : > { %7664 = vmatmul.mubr.msk.bf16.vlgmr.msra.gmra.mrb[0].mxu1 %vm1486_vm11, %v7049_v2  ;;  %v1398_v20 = vshrl.u32 %v10287_v43, 16  ;;  %v1401_v24 = vshll.u32 %v10287_v43, 16  ;;  %v1381_v62 = vrot.slane %v1380_v8, 4  ;;  %v1395_v19 = vrot.slane %v1393_v53, 5  ;;  %7735 = vmatprep.subr.bf16.mxu0 %v10289_v56  ;;  %v8567_v55 = vld [vmem:[#allocation10 + $0x28] sm:$0xff]  }
 0x349   : > { %7696 = vmatpush3.bf16.msra.mxu1 %v10205_v9  ;;  %v1407_v11 = vshll.u32 %v10292_v3, 16  ;;  %v1411_v14 = vshrl.u32 %v10292_v3, 16  ;;  %v1372_v15 = vsel %vm10209_vm12, %v1367_v17, %v1371_v42  ;;  %v1390_v25 = vor.u32 %v1389_v35, %v1385_v7  ;;  %v1781_v63 = vld [vmem:[#allocation3] sm:$0xf]  ;;  %v10330_v17 = vld [vmem:[#allocation3 + $0x4] sm:$0xf]  ;;  %p9031_p8 = pnand %p9030_p6, %p9024_p10 }
 0x34a   : > { %7697 = vmatprep.subr.bf16.mxu1 %v8556_v6  ;;  %v1400_v27 = vrot.slane %v1398_v20, 4  ;;  %v1403_v29 = vrot.slane %v1401_v24, 5  ;;  %v7050_v9 = vcombine.low %v1362_v48, %v1372_v15  ;;  %v1386_v33 = vsel %vm10209_vm12, %v1381_v62, %v1385_v7 }
 0x34b   : > { %v1409_v34 = vrot.slane %v1407_v11, 5  ;;  %v1413_v38 = vrot.slane %v1411_v14, 4  ;;  %v1391_v47 = vrot.slane %v1390_v25, 4  ;;  %v1417_v39 = vshll.u32 %v10299_v12, 16  ;;  %v1784_v25 = vld [vmem:[#allocation3 + $0xc] sm:$0xf] }
 0x34c   : > { %v1404_v26 = vor.u32 %v1403_v29, %v1400_v27  ;;  %v1422_v40 = vshrl.u32 %v10301_v60, 16  ;;  %7667 = vmatprep.mubr.msk.bf16.mxu1 %vm1486_vm11, %v7050_v9  ;;  %v1425_v49 = vshll.u32 %v10301_v60, 16  ;;  %v1431_v1 = vshll.u32 %v10312_v31, 16  ;;  %v10345_v27 = vld [vmem:[#allocation10 + $0x30] sm:$0xff]  }
 0x34d   : > { %7698 = vmatpush3.bf16.msra.mxu1 %v8556_v6  ;;  %v1414_v42 = vor.u32 %v1413_v38, %v1409_v34  ;;  %v1435_v58 = vshrl.u32 %v10312_v31, 16  ;;  %v1396_v16 = vsel %vm10209_vm12, %v1391_v47, %v1395_v19  ;;  %v1419_v5 = vrot.slane %v1417_v39, 5  ;;  %v10337_v19 = vld [vmem:[#allocation3 + $0x8] sm:$0x1] }
 0x34e   : > { %v1405_v2 = vrot.slane %v1404_v26, 4  ;;  %v1424_v7 = vrot.slane %v1422_v40, 4  ;;  %7715 = vmatprep.subr.bf16.mxu1 %v10314_v32  ;;  %v7051_v6 = vcombine.low %v1386_v33, %v1396_v16  ;;  %7680 = vmatmul.mubr.msk.bf16.vlgmr.msra.gmra.mrb[0].mxu0 %vm1486_vm11, %v7065_v21  ;;  %v1427_v8 = vrot.slane %v1425_v49, 5  ;;  %v10348_v33 = vld [vmem:[#allocation3 + $0x10] sm:$0xf] }
 0x34f   : > { %v1415_v48 = vrot.slane %v1414_v42, 4  ;;  %v1433_v53 = vrot.slane %v1431_v1, 5  ;;  %v1437_v20 = vrot.slane %v1435_v58, 4  ;;  %v1441_v24 = vshll.u32 %v10321_v46, 16  ;;  %7736 = vmatpush3.bf16.msra.mxu0 %v10289_v56  ;;  %v10356_v16 = vld [vmem:[#allocation3 + $0x14] sm:$0x1] }
 0x350   : > { %v1410_v35 = vsel %vm10209_vm12, %v1405_v2, %v1409_v34  ;;  %v7066_v62 = vcombine.low %v10193_v59, %v10195_v4  ;;  %7668 = vmatmul.mubr.msk.bf16.gmra.mrb[4].mxu1 %vm1486_vm11, %v7051_v6  ;;  %v1428_v11 = vor.u32 %v1427_v8, %v1424_v7  ;;  %v7067_v14 = vcombine.low %v10230_v30, %v10235_v36 }
 0x351   : > { %v1420_v21 = vsel %vm10209_vm12, %v1415_v48, %v1419_v5  ;;  %v1806_v15 = vshrl.u32 %v1781_v63, 16  ;;  %7737 = vmatprep.subr.bf16.mxu0 %v8567_v55  ;;  %v1438_v59 = vor.u32 %v1437_v20, %v1433_v53  ;;  %v1443_v9 = vrot.slane %v1441_v24, 5  ;;  %v1787_v48 = vld [vmem:[#allocation3 + $0x18] sm:$0xf] }
 0x352   : > { %v7052_v29 = vcombine.low %v1410_v35, %v1420_v21  ;;  %7683 = vmatprep.mubr.msk.bf16.mxu0 %vm1486_vm11, %v7066_v62  ;;  %v1809_v56 = vshll.u32 %v1781_v63, 16  ;;  %v1429_v34 = vrot.slane %v1428_v11, 4  ;;  %v1815_v47 = vshll.u32 %v10330_v17, 16  ;;  %v10367_v11 = vld [vmem:[#allocation3 + $0x1c] sm:$0xf] }
 0x353   : > { %v1808_v38 = vrot.slane %v1806_v15, 4  ;;  %v1819_v26 = vshrl.u32 %v10330_v17, 16  ;;  %v1439_v30 = vrot.slane %v1438_v59, 4  ;;  %v1825_v40 = vshll.u32 %v10337_v19, 16  ;;  %7738 = vmatpush3.bf16.msra.mxu0 %v8567_v55 }
 0x354   : > { %7671 = vmatprep.mubr.msk.bf16.mxu1 %vm1486_vm11, %v7052_v29  ;;  %v1811_v39 = vrot.slane %v1809_v56, 5  ;;  %v1830_v42 = vshrl.u32 %v1784_v25, 16  ;;  %v1434_v49 = vsel %vm10209_vm12, %v1429_v34, %v1433_v53  ;;  %v1817_v1 = vrot.slane %v1815_v47, 5  ;;  %7775 = vmatprep.subr.bf16.mxu0 %v10345_v27  ;;  %v10375_v34 = vld [vmem:[#allocation3 + $0x20] sm:$0x1] }
 0x355   : > { %v1821_v58 = vrot.slane %v1819_v26, 4  ;;  %v1833_v2 = vshll.u32 %v1784_v25, 16  ;;  %v1444_v5 = vsel %vm10209_vm12, %v1439_v30, %v1443_v9  ;;  %v1827_v63 = vrot.slane %v1825_v40, 5 }
 0x356   : > { %v1812_v7 = vor.u32 %v1811_v39, %v1808_v38  ;;  %v1832_v6 = vrot.slane %v1830_v42, 4  ;;  %v7053_v8 = vcombine.low %v1434_v49, %v1444_v5  ;;  %7684 = vmatmul.mubr.msk.bf16.gmra.mrb[4].mxu0 %vm1486_vm11, %v7067_v14  ;;  %v1839_v53 = vshll.u32 %v10348_v33, 16  ;;  %v1790_v39 = vld [vmem:[#allocation3 + $0x24] sm:$0xf] }
 0x357   : > { %v1822_v55 = vor.u32 %v1821_v58, %v1817_v1  ;;  %v1835_v35 = vrot.slane %v1833_v2, 5  ;;  %v1843_v24 = vshrl.u32 %v10348_v33, 16  ;;  %v1849_v62 = vshll.u32 %v10356_v16, 16 }
 0x358   : > { %v1813_v20 = vrot.slane %v1812_v7, 4  ;;  %v7068_v21 = vcombine.low %v10248_v0, %v10250_v61  ;;  %7672 = vmatmul.mubr.msk.bf16.gmra.mrb[8].mxu1 %vm1486_vm11, %v7053_v8  ;;  %v1841_v29 = vrot.slane %v1839_v53, 5  ;;  %v7069_v14 = vcombine.low %v10262_v52, %v10265_v18 }
 0x359   : > { %v1823_v15 = vrot.slane %v1822_v55, 4  ;;  %v1836_v25 = vor.u32 %v1835_v35, %v1832_v6  ;;  %v1845_v9 = vrot.slane %v1843_v24, 4  ;;  %v1851_v56 = vrot.slane %v1849_v62, 5  ;;  %v1793_v62 = vld [vmem:[#allocation3 + $0x30] sm:$0xf] }
 0x35a   : > { %v1818_v59 = vsel %vm10209_vm12, %v1813_v20, %v1817_v1  ;;  %7687 = vmatprep.mubr.msk.bf16.mxu0 %vm1486_vm11, %v7068_v21  ;;  %v1854_v0 = vshrl.u32 %v1787_v48, 16  ;;  %v1857_v26 = vshll.u32 %v1787_v48, 16  ;;  %v1863_v30 = vshll.u32 %v10367_v11, 16  ;;  %v10381_v1 = vld [vmem:[#allocation3 + $0x28] sm:$0xf] }
 0x35b   : > { %v1828_v38 = vsel %vm10209_vm12, %v1823_v15, %v1827_v63  ;;  %v1837_v47 = vrot.slane %v1836_v25, 4  ;;  %v1846_v52 = vor.u32 %v1845_v9, %v1841_v29  ;;  %v1867_v49 = vshrl.u32 %v10367_v11, 16  ;;  %v10387_v48 = vld [vmem:[#allocation3 + $0x2c] sm:$0x1] }
 0x35c   : > { %v7082_v40 = vcombine.low %v1818_v59, %v1828_v38  ;;  %v1856_v42 = vrot.slane %v1854_v0, 4  ;;  %v1859_v2 = vrot.slane %v1857_v26, 5  ;;  %v1865_v5 = vrot.slane %v1863_v30, 5  ;;  %v10394_v59 = vld [vmem:[#allocation3 + $0x34] sm:$0xf] }
 0x35d   : > { %v1842_v58 = vsel %vm10209_vm12, %v1837_v47, %v1841_v29  ;;  %v1873_v7 = vshll.u32 %v10375_v34, 16  ;;  %v1847_v63 = vrot.slane %v1846_v52, 4  ;;  %v1869_v6 = vrot.slane %v1867_v49, 4  ;;  %v10396_v47 = vld [vmem:[#allocation3 + $0x38] sm:$0x1] }
 0x35e   : > { %7699 = vmatprep.mubr.msk.bf16.mxu1 %vm1486_vm11, %v7082_v40  ;;  %v1878_v8 = vshrl.u32 %v1790_v39, 16  ;;  %v1881_v55 = vshll.u32 %v1790_v39, 16  ;;  %7688 = vmatmul.mubr.msk.bf16.gmra.mrb[8].mxu0 %vm1486_vm11, %v7069_v14  ;;  %v1860_v35 = vor.u32 %v1859_v2, %v1856_v42  ;;  %v1887_v20 = vshll.u32 %v10381_v1, 16  ;;  %v8566_v26 = vld [vmem:[#allocation13 + $0x8] sm:$0xff]   ;;  %v1796_v2 = vld [vmem:[#allocation3 + $0x3c] sm:$0xf] }
 0x35f   : > { %v1875_v53 = vrot.slane %v1873_v7, 5  ;;  %v1891_v24 = vshrl.u32 %v10381_v1, 16  ;;  %v1852_v21 = vsel %vm10209_vm12, %v1847_v63, %v1851_v56  ;;  %v1870_v15 = vor.u32 %v1869_v6, %v1865_v5 }
 0x360   : > { %v1880_v25 = vrot.slane %v1878_v8, 4  ;;  %v1883_v29 = vrot.slane %v1881_v55, 5  ;;  %vm2356_vm13 = vcmask 1042432   ;;  %v7083_v9 = vcombine.low %v1842_v58, %v1852_v21  ;;  %v10410_v8 = vld [vmem:[#allocation3 + $0x40] sm:$0xf] }
 0x361   : > { %v1861_v0 = vrot.slane %v1860_v35, 4  ;;  %v1889_v38 = vrot.slane %v1887_v20, 5  ;;  %v1893_v14 = vrot.slane %v1891_v24, 4  ;;  %v1871_v30 = vrot.slane %v1870_v15, 4  ;;  %v10415_v24 = vld [vmem:[#allocation13 + $0x20] sm:$0xff]  }
 0x362   : > { %v1884_v39 = vor.u32 %v1883_v29, %v1880_v25  ;;  %v1897_v40 = vshll.u32 %v10387_v48, 16  ;;  %v7070_v56 = vcombine.low %v10287_v43, %v10292_v3  ;;  %7700 = vmatmul.mubr.msk.bf16.vlgmr.msra.gmra.mrb[12].mxu1 %vm1486_vm11, %v7083_v9  ;;  %v7071_v49 = vcombine.low %v10301_v60, %v10312_v31  ;;  %v10413_v60 = vld [vmem:[#allocation3 + $0x44] sm:$0x1]  ;;  %v2332_v15 = vld [vmem:[#allocation2] sm:$0xe] }
 0x363   : > { %v1866_v52 = vsel %vm10209_vm12, %v1861_v0, %v1865_v5  ;;  %v1894_v42 = vor.u32 %v1893_v14, %v1889_v38  ;;  %v1902_v58 = vshrl.u32 %v1793_v62, 16  ;;  %7716 = vmatpush3.bf16.msra.mxu1 %v10314_v32  ;;  %v1876_v7 = vsel %vm10209_vm12, %v1871_v30, %v1875_v53 }
 0x364   : > { %v1885_v63 = vrot.slane %v1884_v39, 4  ;;  %v1899_v6 = vrot.slane %v1897_v40, 5  ;;  %7691 = vmatprep.mubr.msk.bf16.mxu0 %vm1486_vm11, %v7070_v56  ;;  %v1905_v43 = vshll.u32 %v1793_v62, 16  ;;  %v7084_v55 = vcombine.low %v1866_v52, %v1876_v7  ;;  %7717 = vmatprep.subr.bf16.mxu1 %v8566_v26  ;;  %v2333_v40 = vld [vmem:[#allocation2 + $0xc] sm:$0xe] }
 0x365   : > { %v1895_v5 = vrot.slane %v1894_v42, 4  ;;  %v1904_v35 = vrot.slane %v1902_v58, 4  ;;  %v1911_v20 = vshll.u32 %v10394_v59, 16  ;;  %v1915_v21 = vshrl.u32 %v10394_v59, 16  ;;  %v1799_v7 = vld [vmem:[#allocation3 + $0x48] sm:$0xf] }
 0x366   : > { %v1890_v32 = vsel %vm10209_vm12, %v1885_v63, %v1889_v38  ;;  %v1907_v53 = vrot.slane %v1905_v43, 5  ;;  %v1921_v62 = vshll.u32 %v10396_v47, 16  ;;  %7703 = vmatprep.mubr.msk.bf16.mxu1 %vm1486_vm11, %v7084_v55  ;;  %7692 = vmatmul.mubr.msk.bf16.gmra.mrb[12].mxu0 %vm1486_vm11, %v7071_v49  ;;  %v1926_v9 = vshrl.u32 %v1796_v2, 16 }
 0x367   : > { %v1900_v25 = vsel %vm10209_vm12, %v1895_v5, %v1899_v6  ;;  %v1913_v29 = vrot.slane %v1911_v20, 5  ;;  %v1929_v0 = vshll.u32 %v1796_v2, 16  ;;  %v1917_v39 = vrot.slane %v1915_v21, 4  ;;  %7718 = vmatpush3.bf16.msra.mxu1 %v8566_v26  ;;  %v10438_v21 = vld [vmem:[#allocation3 + $0x4c] sm:$0xf] }
 0x368   : > { %v7085_v14 = vcombine.low %v1890_v32, %v1900_v25  ;;  %v1908_v30 = vor.u32 %v1907_v53, %v1904_v35  ;;  %v1923_v38 = vrot.slane %v1921_v62, 5  ;;  %v1928_v56 = vrot.slane %v1926_v9, 4  ;;  %7755 = vmatprep.subr.bf16.mxu1 %v10415_v24 }
 0x369   : > { %v1931_v52 = vrot.slane %v1929_v0, 5  ;;  %v1935_v42 = vshll.u32 %v10410_v8, 16  ;;  %v1939_v58 = vshrl.u32 %v10410_v8, 16  ;;  %v1918_v49 = vor.u32 %v1917_v39, %v1913_v29 }
 0x36a   : > { %v1909_v63 = vrot.slane %v1908_v30, 4  ;;  %v1945_v6 = vshll.u32 %v10413_v60, 16  ;;  %vm2357_vm14 = vcmask 1046532   ;;  %7704 = vmatmul.mubr.msk.bf16.gmra.mrb[16].mxu1 %vm1486_vm11, %v7085_v14  ;;  %v7118_v5 = vrot.slane %v2332_v15, 9  ;;  %v10442_v14 = vld [vmem:[#allocation3 + $0x50] sm:$0x1] }
 0x36b   : > { %v1932_v2 = vor.u32 %v1931_v52, %v1928_v56  ;;  %v1937_v43 = vrot.slane %v1935_v42, 5  ;;  %v1941_v26 = vrot.slane %v1939_v58, 4  ;;  %vm10431_vm15 = vmor %vm2356_vm13, %vm2357_vm14  ;;  %v1919_v20 = vrot.slane %v1918_v49, 4  ;;  %v1802_v56 = vld [vmem:[#allocation3 + $0x54] sm:$0xf] }
 0x36c   : > { %v1914_v35 = vsel %vm10209_vm12, %v1909_v63, %v1913_v29  ;;  %v1947_v32 = vrot.slane %v1945_v6, 5  ;;  %v2361_v53 = vrot.slane %v10183_v23, 5  ;;  %v7119_v9 = vrot.slane %v2333_v40, 9  ;;  %v10448_v23 = vld [vmem:[#allocation3 + $0x58] sm:$0xf] }
 0x36d   : > { %v1933_v62 = vrot.slane %v1932_v2, 4  ;;  %v1942_v25 = vor.u32 %v1941_v26, %v1937_v43  ;;  %v2370_v0 = vrot.slane %v2368_v45, 4  ;;  %v1924_v15 = vsel %vm10209_vm12, %v1919_v20, %v1923_v38  ;;  %v10464_v2 = vld [vmem:[#allocation3 + $0x5c] sm:$0x1]  ;;  %v2334_v26 = vld [vmem:[#allocation2 + $0x18] sm:$0xe] }
 0x36e   : > { %v2362_v29 = vsel %vm10431_vm15, %v7118_v5, %v2361_v53  ;;  %v2363_v30 = vrot.slane %v2361_v53, 4  ;;  %v1950_v39 = vshrl.u32 %v1799_v7, 16  ;;  %v7086_v52 = vcombine.low %v1914_v35, %v1924_v15  ;;  %v2335_v35 = vld [vmem:[#allocation2 + $0x24] sm:$0xe] }
 0x36f   : > { %v1938_v40 = vsel %vm10209_vm12, %v1933_v62, %v1937_v43  ;;  %v1943_v42 = vrot.slane %v1942_v25, 4  ;;  %v2369_v58 = vsel %vm10431_vm15, %v7119_v9, %v2368_v45  ;;  %v2372_v63 = vsel %vm10431_vm15, %v2370_v0, %v2371_v50 }
 0x370   : > { %v2365_v38 = vsel %vm10431_vm15, %v2363_v30, %v2364_v57  ;;  %v1952_v49 = vrot.slane %v1950_v39, 4  ;;  %v1953_v6 = vshll.u32 %v1799_v7, 16  ;;  %7707 = vmatprep.mubr.msk.bf16.mxu1 %vm1486_vm11, %v7086_v52  ;;  %v7127_v43 = vcombine.low %v2369_v58, %v2372_v63  ;;  %v8577_v7 = vld [vmem:[#allocation10 + $0x38] sm:$0xff]   ;;  %v10479_v63 = vld [vmem:[#allocation10 + $0x40] sm:$0xff]  }
 0x371   : > { %v1948_v22 = vsel %vm10209_vm12, %v1943_v42, %v1947_v32  ;;  %v7126_v45 = vcombine.low %v2362_v29, %v2365_v38  ;;  %v1959_v54 = vshll.u32 %v10438_v21, 16  ;;  %v1963_v28 = vshrl.u32 %v10438_v21, 16  ;;  %v2336_v38 = vld [vmem:[#allocation2 + $0x30] sm:$0xe] }
 0x372   : > { %v7087_v57 = vcombine.low %v1938_v40, %v1948_v22  ;;  %v1955_v5 = vrot.slane %v1953_v6, 5  ;;  %v1969_v50 = vshll.u32 %v10442_v14, 16  ;;  %v1974_v53 = vshrl.u32 %v1802_v56, 16 }
 0x373   : > { %7739 = vmatprep.mubr.msk.bf16.mxu0 %vm1486_vm11, %v7126_v45  ;;  %v1961_v20 = vrot.slane %v1959_v54, 5  ;;  %v1977_v62 = vshll.u32 %v1802_v56, 16  ;;  %v1983_v32 = vshll.u32 %v10448_v23, 16  ;;  %v1965_v9 = vrot.slane %v1963_v28, 4 }
 0x374   : > { %7708 = vmatmul.mubr.msk.bf16.gmra.mrb[20].mxu1 %vm1486_vm11, %v7087_v57  ;;  %7740 = vmatmul.mubr.msk.bf16.vlgmr.msra.gmra.mrb[0].mxu0 %vm1486_vm11, %v7127_v43  ;;  %v1956_v25 = vor.u32 %v1955_v5, %v1952_v49  ;;  %v1971_v0 = vrot.slane %v1969_v50, 5  ;;  %v1987_v15 = vshrl.u32 %v10448_v23, 16  ;;  %v1976_v29 = vrot.slane %v1974_v53, 4  ;;  %v2337_v5 = vld [vmem:[#allocation2 + $0x3c] sm:$0xe] }
 0x375   : > { %v1979_v30 = vrot.slane %v1977_v62, 5  ;;  %v1985_v39 = vrot.slane %v1983_v32, 5  ;;  %v1993_v52 = vshll.u32 %v10464_v2, 16  ;;  %7776 = vmatpush3.bf16.msra.mxu0 %v10345_v27  ;;  %v1966_v56 = vor.u32 %v1965_v9, %v1961_v20  ;;  %v2338_v32 = vld [vmem:[#allocation2 + $0x48] sm:$0xe] }
 0x376   : > { %v1957_v40 = vrot.slane %v1956_v25, 4  ;;  %v1989_v42 = vrot.slane %v1987_v15, 4  ;;  %v7120_v58 = vrot.slane %v2334_v26, 9  ;;  %7777 = vmatprep.subr.bf16.mxu0 %v8577_v7  ;;  %v2375_v22 = vrot.slane %v10195_v4, 5 }
 0x377   : > { %v1980_v49 = vor.u32 %v1979_v30, %v1976_v29  ;;  %v1995_v6 = vrot.slane %v1993_v52, 5  ;;  %v7121_v45 = vrot.slane %v2335_v35, 9  ;;  %v1967_v54 = vrot.slane %v1966_v56, 4  ;;  %v8568_v29 = vld [vmem:[#allocation3] sm:$0xff]   ;;  %v2339_v52 = vld [vmem:[#allocation2 + $0x54] sm:$0xe] }
 0x378   : > { %v1962_v43 = vsel %vm10209_vm12, %v1957_v40, %v1961_v20  ;;  %v1990_v57 = vor.u32 %v1989_v42, %v1985_v39  ;;  %v2382_v27 = vrot.slane %v10235_v36, 5  ;;  %v2376_v26 = vsel %vm10431_vm15, %v7120_v58, %v2375_v22 }
 0x379   : > { %v1981_v28 = vrot.slane %v1980_v49, 4  ;;  %v2377_v50 = vrot.slane %v2375_v22, 4  ;;  %v2385_v53 = vrot.slane %v10245_v51, 5  ;;  %7778 = vmatpush3.bf16.msra.mxu0 %v8577_v7  ;;  %v1972_v4 = vsel %vm10209_vm12, %v1967_v54, %v1971_v0  ;;  %v2593_v22 = vld [vmem:[#allocation3] sm:$0xe] }
 0x37a   : > { %v1991_v35 = vrot.slane %v1990_v57, 4  ;;  %v2383_v20 = vsel %vm10431_vm15, %v7121_v45, %v2382_v27  ;;  %v2384_v62 = vrot.slane %v2382_v27, 4  ;;  %7815 = vmatprep.subr.bf16.mxu0 %v10479_v63  ;;  %v7088_v36 = vcombine.low %v1962_v43, %v1972_v4  ;;  %v2594_v54 = vld [vmem:[#allocation3 + $0xc] sm:$0xe] }
 0x37b   : > { %v1986_v25 = vsel %vm10209_vm12, %v1981_v28, %v1985_v39  ;;  %v2379_v51 = vsel %vm10431_vm15, %v2377_v50, %v2378_v13  ;;  %v7122_v7 = vrot.slane %v2336_v38, 9  ;;  %v2389_v30 = vrot.slane %v10250_v61, 5  ;;  %v8570_v57 = vld [vmem:[#allocation3 + $0xc] sm:$0xff]   ;;  %v2595_v28 = vld [vmem:[#allocation3 + $0x18] sm:$0xe] }
 0x37c   : > { %v1996_v9 = vsel %vm10209_vm12, %v1991_v35, %v1995_v6  ;;  %v7128_v0 = vcombine.low %v2376_v26, %v2379_v51  ;;  %v2386_v15 = vsel %vm10431_vm15, %v2384_v62, %v2385_v53  ;;  %7711 = vmatprep.mubr.msk.bf16.mxu1 %vm1486_vm11, %v7088_v36  ;;  %v2392_v41 = vrot.slane %v10255_v37, 5  ;;  %v8571_v50 = vld [vmem:[#allocation3 + $0x18] sm:$0xff]  }
 0x37d   : > { %v7089_v39 = vcombine.low %v1986_v25, %v1996_v9  ;;  %v7129_v40 = vcombine.low %v2383_v20, %v2386_v15  ;;  %v7123_v56 = vrot.slane %v2337_v5, 9  ;;  %v2390_v13 = vsel %vm10431_vm15, %v7122_v7, %v2389_v30 }
 0x37e   : > { %7743 = vmatprep.mubr.msk.bf16.mxu0 %vm1486_vm11, %v7128_v0  ;;  %v2391_v42 = vrot.slane %v2389_v30, 4  ;;  %v2396_v58 = vrot.slane %v10265_v18, 5  ;;  %v2399_v38 = vrot.slane %v10276_v44, 5  ;;  %v7124_v61 = vrot.slane %v2338_v32, 9  ;;  %v2596_v32 = vld [vmem:[#allocation3 + $0x24] sm:$0xe] }
 0x37f   : > { %7712 = vmatmul.mubr.msk.bf16.gmra.mrb[24].mxu1 %vm1486_vm11, %v7089_v39  ;;  %7744 = vmatmul.mubr.msk.bf16.gmra.mrb[4].mxu0 %vm1486_vm11, %v7129_v40  ;;  %v2403_v49 = vrot.slane %v10292_v3, 5  ;;  %v2406_v37 = vrot.slane %v10299_v12, 5  ;;  %v7125_v6 = vrot.slane %v2339_v52, 9  ;;  %v2410_v43 = vrot.slane %v10312_v31, 5  ;;  %v8575_v0 = vld [vmem:[#allocation13 + $0x28] sm:$0xff]  }
 0x380   : > { %7719 = vmatprep.mubr.msk.bf16.mxu1 %vm1486_vm11, %v8568_v29  ;;  %v2393_v45 = vsel %vm10431_vm15, %v2391_v42, %v2392_v41  ;;  %v2397_v18 = vsel %vm10431_vm15, %v7123_v56, %v2396_v58  ;;  %v2398_v44 = vrot.slane %v2396_v58, 4  ;;  %v2413_v5 = vrot.slane %v10321_v46, 5  ;;  %v2597_v56 = vld [vmem:[#allocation3 + $0x30] sm:$0xe]  ;;  %v2598_v58 = vld [vmem:[#allocation3 + $0x3c] sm:$0xe] }
 0x381   : > { %v7130_v27 = vcombine.low %v2390_v13, %v2393_v45  ;;  %v2404_v3 = vsel %vm10431_vm15, %v7124_v61, %v2403_v49  ;;  %v2405_v12 = vrot.slane %v2403_v49, 4  ;;  %v10528_v53 = vsel %vm10431_vm15, %v7125_v6, %v2410_v43 }
 0x382   : > { %v2400_v26 = vsel %vm10431_vm15, %v2398_v44, %v2399_v38  ;;  %v2412_v4 = vrot.slane %v2410_v43, 4  ;;  %v7144_v31 = vrot.slane %v2593_v22, 9  ;;  %v2627_v62 = vrot.slane %v10330_v17, 5 }
 0x383   : > { %7747 = vmatprep.mubr.msk.bf16.mxu0 %vm1486_vm11, %v7130_v27  ;;  %v7131_v35 = vcombine.low %v2397_v18, %v2400_v26  ;;  %v2407_v20 = vsel %vm10431_vm15, %v2405_v12, %v2406_v37  ;;  %v2630_v46 = vrot.slane %v10337_v19, 5  ;;  %v7145_v51 = vrot.slane %v2594_v54, 9  ;;  %v8572_v18 = vld [vmem:[#allocation3 + $0x24] sm:$0xff]   ;;  %v8578_v27 = vld [vmem:[#allocation2 + $0xc] sm:$0xff]  }
 0x384   : > { %v7132_v36 = vcombine.low %v2404_v3, %v2407_v20  ;;  %v2414_v25 = vsel %vm10431_vm15, %v2412_v4, %v2413_v5  ;;  %v2634_v7 = vrot.slane %v10348_v33, 5  ;;  %v10541_v15 = vsel %vm10431_vm15, %v7144_v31, %v2627_v62  ;;  %v3279_v5 = vld [vmem:[#allocation2 + $0xc] sm:$0xf]  ;;  %v10604_v26 = vld [vmem:[#allocation2 + $0x10] sm:$0xf] }
 0x385   : > { %v7133_v9 = vcombine.low %v10528_v53, %v2414_v25  ;;  %v2629_v29 = vrot.slane %v2627_v62, 4  ;;  %v2637_v17 = vrot.slane %v10356_v16, 5  ;;  %v7146_v52 = vrot.slane %v2595_v28, 9  ;;  %v8580_v25 = vld [vmem:[#allocation3 + $0x48] sm:$0xff]  }
 0x386   : > { %v10546_v19 = vsel %vm10431_vm15, %v7145_v51, %v2634_v7  ;;  %v2636_v30 = vrot.slane %v2634_v7, 4  ;;  %v2641_v39 = vrot.slane %v10367_v11, 5  ;;  %v2644_v40 = vrot.slane %v10375_v34, 5  ;;  %v2600_v51 = vld [vmem:[#allocation3 + $0x54] sm:$0xe] }
 0x387   : > { %7720 = vmatmul.mubr.msk.bf16.vlgmr.msra.gmra.mrb[12].mxu1 %vm1486_vm11, %v8570_v57  ;;  %7748 = vmatmul.mubr.msk.bf16.gmra.mrb[8].mxu0 %vm1486_vm11, %v7131_v35  ;;  %v10553_v33 = vsel %vm10431_vm15, %v2629_v29, %v2630_v46  ;;  %v7147_v41 = vrot.slane %v2596_v32, 9  ;;  %v2648_v16 = vrot.slane %v10381_v1, 5  ;;  %v10570_v1 = vld [vmem:[#allocation13 + $0x30] sm:$0xff]   ;;  %v2651_v49 = vrot.slane %v10387_v48, 5  ;;  %v8574_v57 = vld [vmem:[#allocation3 + $0x30] sm:$0xff]  }
 0x388   : > { %7756 = vmatpush3.bf16.msra.mxu1 %v10415_v24  ;;  %7723 = vmatprep.mubr.msk.bf16.mxu1 %vm1486_vm11, %v8571_v50  ;;  %v7152_v11 = vcombine.low %v10541_v15, %v10553_v33  ;;  %v10563_v13 = vsel %vm10431_vm15, %v2636_v30, %v2637_v17  ;;  %v10567_v42 = vsel %vm10431_vm15, %v7146_v52, %v2641_v39  ;;  %v2643_v34 = vrot.slane %v2641_v39, 4  ;;  %v8576_v46 = vld [vmem:[#allocation3 + $0x3c] sm:$0xff]   ;;  %v8582_v29 = vld [vmem:[#allocation2 + $0x24] sm:$0xff]   ;;  %v10629_v39 = vld [vmem:[#allocation2 + $0x1c] sm:$0xf] }
 0x389   : > { %7751 = vmatprep.mubr.msk.bf16.mxu0 %vm1486_vm11, %v7132_v36  ;;  %7757 = vmatprep.subr.bf16.mxu1 %v8575_v0  ;;  %v7153_v24 = vcombine.low %v10546_v19, %v10563_v13  ;;  %v10576_v38 = vsel %vm10431_vm15, %v7147_v41, %v2648_v16  ;;  %v2650_v61 = vrot.slane %v2648_v16, 4  ;;  %v7148_v6 = vrot.slane %v2597_v56, 9  ;;  %v8579_v32 = vld [vmem:[#allocation2 + $0x18] sm:$0xff]   ;;  %v10624_v36 = vld [vmem:[#allocation2 + $0x14] sm:$0x1] }
 0x38a   : > { %v10581_v37 = vsel %vm10431_vm15, %v2643_v34, %v2644_v40  ;;  %v2655_v22 = vrot.slane %v10394_v59, 5  ;;  %v2658_v45 = vrot.slane %v10396_v47, 5  ;;  %v7149_v54 = vrot.slane %v2598_v58, 9  ;;  %v8591_v41 = vld [vmem:[#allocation10 + $0x48] sm:$0xff]   ;;  %v3285_v34 = vld [vmem:[#allocation2 + $0x24] sm:$0xf] }
 0x38b   : > { %v7154_v44 = vcombine.low %v10567_v42, %v10581_v37  ;;  %v10589_v43 = vsel %vm10431_vm15, %v2650_v61, %v2651_v49  ;;  %v2662_v48 = vrot.slane %v10410_v8, 5  ;;  %v2665_v12 = vrot.slane %v10413_v60, 5  ;;  %v10633_v61 = vld [vmem:[#allocation2 + $0x20] sm:$0x1]  ;;  %v2599_v49 = vld [vmem:[#allocation3 + $0x48] sm:$0xe] }
 0x38c   : > { %7758 = vmatpush3.bf16.msra.mxu1 %v8575_v0  ;;  %v10596_v59 = vsel %vm10431_vm15, %v7148_v6, %v2655_v22  ;;  %v2657_v47 = vrot.slane %v2655_v22, 4  ;;  %v3304_v4 = vshrl.u32 %v3279_v5, 16  ;;  %v3307_v31 = vshll.u32 %v3279_v5, 16  ;;  %v3282_v0 = vld [vmem:[#allocation2 + $0x18] sm:$0xf] }
 0x38d   : > { %7795 = vmatprep.subr.bf16.mxu1 %v10570_v1  ;;  %v10602_v28 = vsel %vm10431_vm15, %v7149_v54, %v2662_v48  ;;  %v2664_v8 = vrot.slane %v2662_v48, 4  ;;  %v3313_v20 = vshll.u32 %v10604_v26, 16  ;;  %v3317_v62 = vshrl.u32 %v10604_v26, 16 }
 0x38e   : > { %v10608_v50 = vsel %vm10431_vm15, %v2657_v47, %v2658_v45  ;;  %v3306_v7 = vrot.slane %v3304_v4, 4  ;;  %v3323_v52 = vshll.u32 %v10624_v36, 16  ;;  %v7151_v40 = vrot.slane %v2600_v51, 9  ;;  %v8583_v47 = vld [vmem:[#allocation2 + $0x30] sm:$0xff]  }
 0x38f   : > { %7724 = vmatmul.mubr.msk.bf16.gmra.mrb[16].mxu1 %vm1486_vm11, %v8572_v18  ;;  %7752 = vmatmul.mubr.msk.bf16.gmra.mrb[12].mxu0 %vm1486_vm11, %v7133_v9  ;;  %v10616_v53 = vsel %vm10431_vm15, %v2664_v8, %v2665_v12  ;;  %v3309_v9 = vrot.slane %v3307_v31, 5  ;;  %v10626_v17 = vrot.slane %v3313_v20, 5  ;;  %v3319_v30 = vrot.slane %v3317_v62, 4  ;;  %v10651_v8 = vld [vmem:[#allocation10 + $0x50] sm:$0xff]  }
 0x390   : > { %7727 = vmatprep.mubr.msk.bf16.mxu1 %vm1486_vm11, %v8574_v57  ;;  %7779 = vmatprep.mubr.msk.bf16.mxu0 %vm1486_vm11, %v8578_v27  ;;  %v3328_v16 = vshrl.u32 %v3282_v0, 16  ;;  %v3331_v56 = vshll.u32 %v3282_v0, 16  ;;  %v2676_v6 = vrot.slane %v10448_v23, 5  ;;  %v2679_v22 = vrot.slane %v10464_v2, 5  ;;  %v10644_v57 = vld [vmem:[#allocation2 + $0x28] sm:$0xf] }
 0x391   : > { %v3310_v58 = vor.u32 %v3309_v9, %v3306_v7  ;;  %v3320_v45 = vor.u32 %v3319_v30, %v10626_v17  ;;  %v10640_v18 = vrot.slane %v3323_v52, 5  ;;  %v3337_v54 = vshll.u32 %v10629_v39, 16  ;;  %v8581_v27 = vld [vmem:[#allocation3 + $0x54] sm:$0xff]  }
 0x392   : > { %v3341_v48 = vshrl.u32 %v10629_v39, 16  ;;  %v10649_v23 = vsel %vm10431_vm15, %v7151_v40, %v2676_v6  ;;  %v2678_v2 = vrot.slane %v2676_v6, 4  ;;  %v3352_v12 = vshrl.u32 %v3285_v34, 16 }
 0x393   : > { %v3355_v5 = vshll.u32 %v3285_v34, 16  ;;  %v3330_v4 = vrot.slane %v3328_v16, 4  ;;  %v3333_v31 = vrot.slane %v3331_v56, 5  ;;  %v3347_v20 = vshll.u32 %v10633_v61, 16 }
 0x394   : > { %v2669_v62 = vrot.slane %v10438_v21, 5  ;;  %v3321_v51 = vrot.slane %v3320_v45, 4  ;;  %v10659_v7 = vrot.slane %v3337_v54, 5  ;;  %v3343_v9 = vrot.slane %v3341_v48, 4  ;;  %v10686_v45 = vld [vmem:[#allocation2 + $0x34] sm:$0xf] }
 0x395   : > { %v3354_v30 = vrot.slane %v3352_v12, 4  ;;  %v3357_v52 = vrot.slane %v3355_v5, 5  ;;  %v3361_v21 = vshll.u32 %v10644_v57, 16  ;;  %v3365_v40 = vshrl.u32 %v10644_v57, 16  ;;  %v3291_v54 = vld [vmem:[#allocation2 + $0x3c] sm:$0xf] }
 0x396   : > { %v3334_v16 = vor.u32 %v3333_v31, %v3330_v4  ;;  %v2671_v56 = vrot.slane %v2669_v62, 4  ;;  %v2672_v34 = vrot.slane %v10442_v14, 5  ;;  %v3344_v6 = vor.u32 %v3343_v9, %v10659_v7  ;;  %v8587_v5 = vld [vmem:[#allocation2 + $0x54] sm:$0xff]  }
 0x397   : > { %7728 = vmatmul.mubr.msk.bf16.gmra.mrb[20].mxu1 %vm1486_vm11, %v8576_v46  ;;  %7780 = vmatmul.mubr.msk.bf16.vlgmr.msra.gmra.mrb[0].mxu0 %vm1486_vm11, %v8579_v32  ;;  %v3311_v46 = vrot.slane %v3310_v58, 4  ;;  %v7150_v32 = vrot.slane %v2599_v49, 9  ;;  %v10671_v58 = vrot.slane %v3347_v20, 5  ;;  %v3326_v49 = vsel %vm10209_vm12, %v3321_v51, %v10640_v18 }
 0x398   : > { %7731 = vmatprep.mubr.msk.bf16.mxu1 %vm1486_vm11, %v8580_v25  ;;  %7783 = vmatprep.mubr.msk.bf16.mxu0 %vm1486_vm11, %v8582_v29  ;;  %v8585_v25 = vld [vmem:[#allocation2 + $0x3c] sm:$0xff]   ;;  %v10663_v29 = vld [vmem:[#allocation2 + $0x2c] sm:$0x1]  ;;  %v3358_v33 = vor.u32 %v3357_v52, %v3354_v30  ;;  %v3367_v48 = vrot.slane %v3365_v40, 4  ;;  %v10700_v18 = vsel %vm10431_vm15, %v2671_v56, %v2672_v34  ;;  %v3385_v4 = vshll.u32 %v10686_v45, 16 }
 0x399   : > { %7816 = vmatpush3.bf16.msra.mxu0 %v10479_v63  ;;  %v10657_v63 = vsel %vm10431_vm15, %v2678_v2, %v2679_v22  ;;  %v3316_v14 = vsel %vm10209_vm12, %v3311_v46, %v10626_v17  ;;  %v3371_v22 = vshll.u32 %v10663_v29, 16  ;;  %v10690_v15 = vsel %vm10431_vm15, %v7150_v32, %v2669_v62  ;;  %v10694_v17 = vld [vmem:[#allocation2 + $0x40] sm:$0xf]  ;;  %v3294_v46 = vld [vmem:[#allocation2 + $0x48] sm:$0xf] }
 0x39a   : > { %7817 = vmatprep.subr.bf16.mxu0 %v8591_v41  ;;  %v3389_v31 = vshrl.u32 %v10686_v45, 16  ;;  %v3400_v20 = vshrl.u32 %v3291_v54, 16  ;;  %v3403_v62 = vshll.u32 %v3291_v54, 16  ;;  %v10704_v32 = vld [vmem:[#allocation2 + $0x4c] sm:$0xf]  ;;  %v10708_v51 = vrot.slane %v3344_v6, 4 }
 0x39b   : > { %v10710_v9 = vrot.slane %v3371_v22, 5  ;;  %v10712_v30 = vld [vmem:[#allocation2 + $0x38] sm:$0x1]  ;;  %v8590_v52 = vld [vmem:[#allocation13 + $0x38] sm:$0xff]   ;;  %v3413_v56 = vshrl.u32 %v10694_v17, 16  ;;  %v3433_v19 = vshll.u32 %v10704_v32, 16 }
 0x39c   : > { %v3297_v34 = vld [vmem:[#allocation2 + $0x54] sm:$0xf]  ;;  %v10727_v54 = vld [vmem:[#allocation2 + $0x44] sm:$0x1]  ;;  %v3402_v0 = vrot.slane %v3400_v20, 4  ;;  %v3405_v35 = vrot.slane %v3403_v62, 5 }
 0x39d   : > { %7818 = vmatpush3.bf16.msra.mxu0 %v8591_v41  ;;  %v3288_v41 = vld [vmem:[#allocation2 + $0x30] sm:$0xf]  ;;  %v3437_v13 = vshrl.u32 %v10704_v32, 16  ;;  %v3448_v42 = vshrl.u32 %v3297_v34, 16  ;;  %v3451_v37 = vshll.u32 %v3297_v34, 16  ;;  %v8588_v62 = vld [vmem:[#allocation2 + $0x60] sm:$0xff]   ;;  %v3350_v34 = vsel %vm10209_vm12, %v10708_v51, %v10671_v58 }
 0x39e   : > { %7855 = vmatprep.subr.bf16.mxu0 %v10651_v8  ;;  %v3376_v2 = vshrl.u32 %v3288_v41, 16  ;;  %v3379_v12 = vshll.u32 %v3288_v41, 16  ;;  %v10719_v41 = vld [vmem:[#allocation2 + $0x58] sm:$0xf]  ;;  %v10755_v3 = vrot.slane %v3433_v19, 5  ;;  %v12225_v58 = vcombine.low %v10576_v38, %v10589_v43 }
 0x39f   : > { %7732 = vmatmul.mubr.msk.bf16.gmra.mrb[24].mxu1 %vm1486_vm11, %v8581_v27  ;;  %7784 = vmatmul.mubr.msk.bf16.gmra.mrb[4].mxu0 %vm1486_vm11, %v8583_v47  ;;  %v8586_v27 = vld [vmem:[#allocation2 + $0x48] sm:$0xff]   ;;  %v10696_v47 = vrot.slane %v3334_v16, 4  ;;  %v3409_v16 = vshll.u32 %v10694_v17, 16  ;;  %v3461_v20 = vshrl.u32 %v10719_v41, 16  ;;  %v3300_v19 = vld [vmem:[#allocation2 + $0x60] sm:$0xf] }
 0x3a0   : > { %7759 = vmatprep.mubr.msk.bf16.mxu1 %vm1486_vm11, %v7152_v11  ;;  %7787 = vmatprep.mubr.msk.bf16.mxu0 %vm1486_vm11, %v8585_v25  ;;  %v10692_v11 = vrot.slane %v3361_v21, 5  ;;  %v10706_v25 = vcombine.low %v3316_v14, %v3326_v49  ;;  %v10714_v21 = vrot.slane %v3358_v33, 4  ;;  %v3378_v6 = vrot.slane %v3376_v2, 4  ;;  %v10753_v14 = vld [vmem:[#allocation2 + $0x50] sm:$0x1] }
 0x3a1   : > { %v3381_v22 = vrot.slane %v3379_v12, 5  ;;  %v10734_v33 = vrot.slane %v3385_v4, 5  ;;  %v3424_v2 = vshrl.u32 %v3294_v46, 16  ;;  %v3427_v12 = vshll.u32 %v3294_v46, 16  ;;  %v10745_v4 = vld [vmem:[#allocation13 + $0x40] sm:$0xff]  }
 0x3a2   : > { %v3368_v40 = vor.u32 %v3367_v48, %v10692_v11  ;;  %v3391_v48 = vrot.slane %v3389_v31, 4  ;;  %v3415_v31 = vrot.slane %v3413_v56, 4  ;;  %v3439_v56 = vrot.slane %v3437_v13, 4 }
 0x3a3   : > { %v3382_v46 = vor.u32 %v3381_v22, %v3378_v6  ;;  %v3426_v60 = vrot.slane %v3424_v2, 4  ;;  %v10767_v6 = vld [vmem:[#allocation2 + $0x5c] sm:$0x1]  ;;  %v3450_v22 = vrot.slane %v3448_v42, 4  ;;  %vm9209_vm0 = vmmov 0  }
 0x3a4   : > { %v3392_v49 = vor.u32 %v3391_v48, %v10734_v33  ;;  %v3453_v48 = vrot.slane %v3451_v37, 5  ;;  %v3440_v42 = vor.u32 %v3439_v56, %v10755_v3  ;;  %v3443_v37 = vshll.u32 %v10753_v14, 16 }
 0x3a5   : > { %v3383_v51 = vrot.slane %v3382_v46, 4  ;;  %vm6718_vm1 = vcmask 523264  }
 0x3a7   : > { %7760 = vmatmul.mubr.msk.bf16.vlgmr.msra.gmra.mrb[12].mxu1 %vm1486_vm11, %v7153_v24  ;;  %7788 = vmatmul.mubr.msk.bf16.gmra.mrb[8].mxu0 %vm1486_vm11, %v8586_v27  ;;  %v3369_v24 = vrot.slane %v3368_v40, 4  ;;  %v3395_v27 = vshll.u32 %v10712_v30, 16  ;;  %v3419_v40 = vshll.u32 %v10727_v54, 16 }
 0x3a8   : > { %7796 = vmatpush3.bf16.msra.mxu1 %v10570_v1  ;;  %7763 = vmatprep.mubr.msk.bf16.mxu1 %vm1486_vm11, %v7154_v44  ;;  %v10747_v1 = vrot.slane %v3409_v16, 5  ;;  %v3457_v44 = vshll.u32 %v10719_v41, 16  ;;  %v3429_v16 = vrot.slane %v3427_v12, 5  ;;  %v3463_v12 = vrot.slane %v3461_v20, 4 }
 0x3a9   : > { %7791 = vmatprep.mubr.msk.bf16.mxu0 %vm1486_vm11, %v8587_v5  ;;  %7797 = vmatprep.subr.bf16.mxu1 %v8590_v52  ;;  %v3406_v5 = vor.u32 %v3405_v35, %v3402_v0  ;;  %v3364_v35 = vsel %vm10209_vm12, %v10714_v21, %v10692_v11  ;;  %v3397_v0 = vrot.slane %v3395_v27, 5  ;;  %v3374_v11 = vsel %vm10209_vm12, %v3369_v24, %v10710_v9  ;;  %v10779_v27 = vld [vmem:[#allocation2 + $0x64] sm:$0xf] }
 0x3aa   : > { %v10769_v2 = vrot.slane %v3457_v44, 5  ;;  %v3393_v21 = vrot.slane %v3392_v49, 4  ;;  %v3421_v13 = vrot.slane %v3419_v40, 5  ;;  %v3430_v43 = vor.u32 %v3429_v16, %v3426_v60 }
 0x3ab   : > { %v3407_v38 = vrot.slane %v3406_v5, 4  ;;  %v3467_v49 = vshll.u32 %v10767_v6, 16  ;;  %v3472_v24 = vshrl.u32 %v3300_v19, 16  ;;  %v3475_v44 = vshll.u32 %v3300_v19, 16 }
 0x3ac   : > { %7798 = vmatpush3.bf16.msra.mxu1 %v8590_v52  ;;  %v3416_v52 = vor.u32 %v3415_v31, %v10747_v1  ;;  %v12226_v31 = vcombine.low %v10596_v59, %v10608_v50  ;;  %v3454_v20 = vor.u32 %v3453_v48, %v3450_v22  ;;  %v3481_v59 = vshll.u32 %v10779_v27, 16 }
 0x3ad   : > { %7835 = vmatprep.subr.bf16.mxu1 %v10745_v4  ;;  %v3485_v50 = vshrl.u32 %v10779_v27, 16  ;;  %v12227_v60 = vsel %vm10209_vm12, %v10696_v47, %v10659_v7  ;;  %v7208_v46 = vcombine.low %v3364_v35, %v3374_v11  ;;  %v3388_v5 = vsel %vm10209_vm12, %v3383_v51, %v10734_v33  ;;  %v10808_v47 = vld [vmem:[#allocation2 + $0x68] sm:$0x1] }
 0x3ae   : > { %v3417_v9 = vrot.slane %v3416_v52, 4  ;;  %v3398_v40 = vsel %vm10209_vm12, %v3393_v21, %v3397_v0  ;;  %v3412_v16 = vsel %vm10209_vm12, %v3407_v38, %v10747_v1  ;;  %v3431_v56 = vrot.slane %v3430_v43, 4 }
 0x3af   : > { %7764 = vmatmul.mubr.msk.bf16.gmra.mrb[16].mxu1 %vm1486_vm11, %v12225_v58  ;;  %7792 = vmatmul.mubr.msk.bf16.gmra.mrb[12].mxu0 %vm1486_vm11, %v8588_v62  ;;  %v3464_v62 = vor.u32 %v3463_v12, %v10769_v2  ;;  %v3441_v52 = vrot.slane %v3440_v42, 4  ;;  %v3445_v22 = vrot.slane %v3443_v37, 5  ;;  %v3469_v7 = vrot.slane %v3467_v49, 5  ;;  %v8601_v58 = vld [vmem:[#allocation10 + $0x58] sm:$0xff]   ;;  %v10838_v49 = vld [vmem:[#allocation10 + $0x60] sm:$0xff]  }
 0x3b0   : > { %7767 = vmatprep.mubr.msk.bf16.mxu1 %vm1486_vm11, %v12226_v31  ;;  %7819 = vmatprep.mubr.msk.bf16.mxu0 %vm1486_vm11, %v10706_v25  ;;  %v7207_v25 = vcombine.low %v12227_v60, %v3350_v34  ;;  %v3422_v48 = vsel %vm10209_vm12, %v3417_v9, %v3421_v13  ;;  %v3474_v34 = vrot.slane %v3472_v24, 4  ;;  %v3477_v35 = vrot.slane %v3475_v44, 5  ;;  %v10836_v9 = vld [vmem:[#allocation3 + $0x10] sm:$0xf] }
 0x3b1   : > { %v3455_v12 = vrot.slane %v3454_v20, 4  ;;  %v3465_v33 = vrot.slane %v3464_v62, 4  ;;  %v10810_v19 = vrot.slane %v3481_v59, 5  ;;  %v3487_v0 = vrot.slane %v3485_v50, 4  ;;  %v8592_v24 = vld [vmem:[#allocation3 + $0xc] sm:$0xff]  }
 0x3b2   : > { %v12228_v1 = vcombine.low %v10602_v28, %v10616_v53  ;;  %v12229_v11 = vcombine.low %v10690_v15, %v10700_v18  ;;  %v3436_v51 = vsel %vm10209_vm12, %v3431_v56, %v10755_v3  ;;  %v3446_v21 = vsel %vm10209_vm12, %v3441_v52, %v3445_v22  ;;  %v4067_v53 = vld [vmem:[#allocation2 + $0xc] sm:$0xe]  ;;  %v4068_v15 = vld [vmem:[#allocation2 + $0x18] sm:$0xe]  ;;  %v3673_v18 = vld [vmem:[#allocation3 + $0xc] sm:$0xf] }
 0x3b3   : > { %v3491_v28 = vshll.u32 %v10808_v47, 16  ;;  %v7209_v13 = vcombine.low %v3388_v5, %v3398_v40  ;;  %v7210_v31 = vcombine.low %v3412_v16, %v3422_v48  ;;  %v3478_v38 = vor.u32 %v3477_v35, %v3474_v34  ;;  %v4069_v50 = vld [vmem:[#allocation2 + $0x24] sm:$0xe]  ;;  %v3676_v16 = vld [vmem:[#allocation3 + $0x18] sm:$0xf] }
 0x3b4   : > { %v3460_v43 = vsel %vm10209_vm12, %v3455_v12, %v10769_v2  ;;  %v3470_v3 = vsel %vm10209_vm12, %v3465_v33, %v3469_v7  ;;  %v3488_v42 = vor.u32 %v3487_v0, %v10810_v19  ;;  %v4101_v37 = vrot.slane %v10604_v26, 5  ;;  %v10850_v22 = vld [vmem:[#allocation3 + $0x14] sm:$0x1] }
 0x3b5   : > { %v7242_v44 = vrot.slane %v4067_v53, 9  ;;  %v4108_v20 = vrot.slane %v10629_v39, 5  ;;  %v4115_v2 = vrot.slane %v10644_v57, 5  ;;  %v3493_v62 = vrot.slane %v3491_v28, 5 }
 0x3b6   : > { %v4104_v59 = vrot.slane %v10624_v36, 5  ;;  %v3698_v60 = vshrl.u32 %v3673_v18, 16  ;;  %v3479_v26 = vrot.slane %v3478_v38, 4  ;;  %v3707_v5 = vshll.u32 %v10836_v9, 16  ;;  %v10852_v36 = vld [vmem:[#allocation3 + $0x1c] sm:$0xf] }
 0x3b7   : > { %7768 = vmatmul.mubr.msk.bf16.gmra.mrb[20].mxu1 %vm1486_vm11, %v12228_v1  ;;  %7820 = vmatmul.mubr.msk.bf16.vlgmr.msra.gmra.mrb[0].mxu0 %vm1486_vm11, %v7207_v25  ;;  %v3701_v25 = vshll.u32 %v3673_v18, 16  ;;  %v3711_v40 = vshrl.u32 %v10836_v9, 16  ;;  %v3489_v56 = vrot.slane %v3488_v42, 4  ;;  %v4103_v52 = vrot.slane %v4101_v37, 4 }
 0x3b8   : > { %7771 = vmatprep.mubr.msk.bf16.mxu1 %vm1486_vm11, %v12229_v11  ;;  %7823 = vmatprep.mubr.msk.bf16.mxu0 %vm1486_vm11, %v7208_v46  ;;  %v10845_v46 = vcombine.low %v3460_v43, %v3470_v3  ;;  %v7243_v39 = vrot.slane %v4068_v15, 9  ;;  %v4111_v57 = vrot.slane %v10633_v61, 5  ;;  %v12230_v48 = vcombine.low %v10649_v23, %v10657_v63  ;;  %v8599_v15 = vld [vmem:[#allocation13 + $0x48] sm:$0xff]   ;;  %v10890_v3 = vld [vmem:[#allocation3 + $0x20] sm:$0x1] }
 0x3b9   : > { %7856 = vmatpush3.bf16.msra.mxu0 %v10651_v8  ;;  %v10840_v8 = vcombine.low %v3436_v51, %v3446_v21  ;;  %v4110_v7 = vrot.slane %v4108_v20, 4  ;;  %v7244_v34 = vrot.slane %v4069_v50, 9  ;;  %v4117_v35 = vrot.slane %v4115_v2, 4  ;;  %v8594_v51 = vld [vmem:[#allocation3 + $0x18] sm:$0xff]   ;;  %v8595_v21 = vld [vmem:[#allocation3 + $0x24] sm:$0xff]  }
 0x3ba   : > { %7857 = vmatprep.subr.bf16.mxu0 %v8601_v58  ;;  %v4118_v12 = vrot.slane %v10663_v29, 5  ;;  %v3700_v61 = vrot.slane %v3698_v60, 4  ;;  %v3703_v33 = vrot.slane %v3701_v25, 5  ;;  %v3722_v0 = vshrl.u32 %v3676_v16, 16  ;;  %v3679_v60 = vld [vmem:[#allocation3 + $0x24] sm:$0xf] }
 0x3bb   : > { %v10863_v1 = vrot.slane %v3707_v5, 5  ;;  %v3713_v23 = vrot.slane %v3711_v40, 4  ;;  %v3731_v63 = vshll.u32 %v10852_v36, 16  ;;  %v3735_v11 = vshrl.u32 %v10852_v36, 16 }
 0x3bc   : > { %v3484_v29 = vsel %vm10209_vm12, %v3479_v26, %v10810_v19  ;;  %v10872_v28 = vsel %vm10431_vm15, %v7242_v44, %v4101_v37  ;;  %v10876_v53 = vsel %vm10431_vm15, %v4103_v52, %v4104_v59  ;;  %v3494_v38 = vsel %vm10209_vm12, %v3489_v56, %v3493_v62 }
 0x3bd   : > { %7858 = vmatpush3.bf16.msra.mxu0 %v8601_v58  ;;  %v3725_v58 = vshll.u32 %v3676_v16, 16  ;;  %v10886_v19 = vsel %vm10431_vm15, %v7244_v34, %v4115_v2  ;;  %v4122_v18 = vrot.slane %v10686_v45, 5  ;;  %v3717_v43 = vshll.u32 %v10850_v22, 16  ;;  %v10911_v16 = vld [vmem:[#allocation3 + $0x28] sm:$0xf]  ;;  %v10920_v34 = vld [vmem:[#allocation13 + $0x50] sm:$0xff]  }
 0x3be   : > { %7895 = vmatprep.subr.bf16.mxu0 %v10838_v49  ;;  %v10894_v42 = vsel %vm10431_vm15, %v4110_v7, %v4111_v57  ;;  %v3704_v37 = vor.u32 %v3703_v33, %v3700_v61  ;;  %v3714_v2 = vor.u32 %v3713_v23, %v10863_v1  ;;  %v10901_v62 = vrot.slane %v3731_v63, 5  ;;  %v4071_v57 = vld [vmem:[#allocation2 + $0x3c] sm:$0xe]  ;;  %v3682_v23 = vld [vmem:[#allocation3 + $0x30] sm:$0xf] }
 0x3bf   : > { %7772 = vmatmul.mubr.msk.bf16.gmra.mrb[24].mxu1 %vm1486_vm11, %v12230_v48  ;;  %7824 = vmatmul.mubr.msk.bf16.gmra.mrb[4].mxu0 %vm1486_vm11, %v7209_v13  ;;  %v10880_v13 = vsel %vm10431_vm15, %v7243_v39, %v4108_v20  ;;  %v3727_v44 = vrot.slane %v3725_v58, 5  ;;  %v10898_v20 = vsel %vm10431_vm15, %v4117_v35, %v4118_v12  ;;  %v3737_v45 = vrot.slane %v3735_v11, 4  ;;  %v8596_v48 = vld [vmem:[#allocation3 + $0x30] sm:$0xff]  }
 0x3c0   : > { %7799 = vmatprep.mubr.msk.bf16.mxu1 %vm1486_vm11, %v8592_v24  ;;  %7827 = vmatprep.mubr.msk.bf16.mxu0 %vm1486_vm11, %v7210_v31  ;;  %v4070_v31 = vld [vmem:[#allocation2 + $0x30] sm:$0xe]  ;;  %v3724_v24 = vrot.slane %v3722_v0, 4  ;;  %v7213_v59 = vcombine.low %v3484_v29, %v3494_v38  ;;  %v7250_v50 = vcombine.low %v10872_v28, %v10876_v53  ;;  %v7251_v25 = vcombine.low %v10880_v13, %v10894_v42  ;;  %v4072_v12 = vld [vmem:[#allocation2 + $0x48] sm:$0xe] }
 0x3c1   : > { %v7245_v26 = vrot.slane %v4070_v31, 9  ;;  %v4124_v5 = vrot.slane %v4122_v18, 4  ;;  %v4125_v40 = vrot.slane %v10712_v30, 5  ;;  %v7252_v56 = vcombine.low %v10886_v19, %v10898_v20  ;;  %v11025_v20 = vld [vmem:[#allocation3 + $0x58] sm:$0xf] }
 0x3c2   : > { %v3705_v52 = vrot.slane %v3704_v37, 4  ;;  %v3728_v39 = vor.u32 %v3727_v44, %v3724_v24  ;;  %v3715_v30 = vrot.slane %v3714_v2, 4  ;;  %v3719_v7 = vrot.slane %v3717_v43, 5  ;;  %v10944_v37 = vld [vmem:[#allocation3 + $0x2c] sm:$0x1] }
 0x3c3   : > { %v4129_v35 = vrot.slane %v10694_v17, 5  ;;  %v3746_v61 = vshrl.u32 %v3679_v60, 16  ;;  %v3749_v33 = vshll.u32 %v3679_v60, 16  ;;  %v3755_v0 = vshll.u32 %v10911_v16, 16  ;;  %v10935_v17 = vld [vmem:[#allocation3 + $0x34] sm:$0xf] }
 0x3c4   : > { %v3759_v58 = vshrl.u32 %v10911_v16, 16  ;;  %v10932_v63 = vsel %vm10431_vm15, %v4124_v5, %v4125_v40  ;;  %v7246_v11 = vrot.slane %v4071_v57, 9  ;;  %v3710_v29 = vsel %vm10209_vm12, %v3705_v52, %v10863_v1  ;;  %v10948_v1 = vld [vmem:[#allocation3 + $0x38] sm:$0x1] }
 0x3c5   : > { %v3729_v28 = vrot.slane %v3728_v39, 4  ;;  %v4132_v31 = vrot.slane %v10727_v54, 5  ;;  %v3720_v38 = vsel %vm10209_vm12, %v3715_v30, %v3719_v7  ;;  %v4131_v43 = vrot.slane %v4129_v35, 4  ;;  %v8600_v30 = vld [vmem:[#allocation3 + $0x48] sm:$0xff]  }
 0x3c6   : > { %v3748_v24 = vrot.slane %v3746_v61, 4  ;;  %v10946_v44 = vrot.slane %v3755_v0, 5  ;;  %v3761_v2 = vrot.slane %v3759_v58, 4  ;;  %v3770_v5 = vshrl.u32 %v3682_v23, 16  ;;  %v10980_v61 = vld [vmem:[#allocation3 + $0x40] sm:$0xf] }
 0x3c7   : > { %7800 = vmatmul.mubr.msk.bf16.vlgmr.msra.gmra.mrb[12].mxu1 %vm1486_vm11, %v8594_v51  ;;  %7828 = vmatmul.mubr.msk.bf16.gmra.mrb[8].mxu0 %vm1486_vm11, %v10840_v8  ;;  %v3741_v8 = vshll.u32 %v10890_v3, 16  ;;  %v4136_v51 = vrot.slane %v10704_v32, 5  ;;  %v7247_v32 = vrot.slane %v4072_v12, 9  ;;  %v10959_v40 = vsel %vm10431_vm15, %v7246_v11, %v4129_v35 }
 0x3c8   : > { %7836 = vmatpush3.bf16.msra.mxu1 %v10745_v4  ;;  %7803 = vmatprep.mubr.msk.bf16.mxu1 %vm1486_vm11, %v8595_v21  ;;  %v3738_v4 = vor.u32 %v3737_v45, %v10901_v62  ;;  %v8598_v21 = vld [vmem:[#allocation3 + $0x3c] sm:$0xff]   ;;  %v3773_v52 = vshll.u32 %v3682_v23, 16  ;;  %v3779_v39 = vshll.u32 %v10935_v17, 16  ;;  %v10970_v57 = vsel %vm10431_vm15, %v4131_v43, %v4132_v31  ;;  %v3688_v43 = vld [vmem:[#allocation3 + $0x48] sm:$0xf] }
 0x3c9   : > { %7831 = vmatprep.mubr.msk.bf16.mxu0 %vm1486_vm11, %v10845_v46  ;;  %7837 = vmatprep.subr.bf16.mxu1 %v8599_v15  ;;  %v10928_v46 = vsel %vm10431_vm15, %v7245_v26, %v4122_v18  ;;  %v3743_v53 = vrot.slane %v3741_v8, 5  ;;  %v4073_v45 = vld [vmem:[#allocation2 + $0x54] sm:$0xe]  ;;  %v4138_v60 = vrot.slane %v4136_v51, 4  ;;  %v4139_v26 = vrot.slane %v10753_v14, 5 }
 0x3ca   : > { %v3739_v18 = vrot.slane %v3738_v4, 4  ;;  %v7253_v54 = vcombine.low %v10928_v46, %v10932_v63  ;;  %v10963_v8 = vcombine.low %v3710_v29, %v3720_v38  ;;  %v3734_v14 = vsel %vm10209_vm12, %v3729_v28, %v10901_v62  ;;  %v8602_v62 = vld [vmem:[#allocation3 + $0x54] sm:$0xff]   ;;  %v10990_v28 = vld [vmem:[#allocation2 + $0x60] sm:$0xe] }
 0x3cb   : > { %v3762_v35 = vor.u32 %v3761_v2, %v10946_v44  ;;  %v3765_v12 = vshll.u32 %v10944_v37, 16  ;;  %v3772_v0 = vrot.slane %v3770_v5, 4  ;;  %v3789_v58 = vshll.u32 %v10948_v1, 16 }
 0x3cc   : > { %7838 = vmatpush3.bf16.msra.mxu1 %v8599_v15  ;;  %v3751_v15 = vrot.slane %v3749_v33, 5  ;;  %v3744_v7 = vsel %vm10209_vm12, %v3739_v18, %v3743_v53  ;;  %v10984_v33 = vsel %vm10431_vm15, %v4138_v60, %v4139_v26  ;;  %v7248_v23 = vrot.slane %v4073_v45, 9  ;;  %v10998_v45 = vld [vmem:[#allocation3 + $0x4c] sm:$0xf]  ;;  %v8607_v60 = vld [vmem:[#allocation10 + $0x68] sm:$0xff]  }
 0x3cd   : > { %7875 = vmatprep.subr.bf16.mxu1 %v10920_v34  ;;  %v3775_v11 = vrot.slane %v3773_v52, 5  ;;  %v4143_v29 = vrot.slane %v10719_v41, 5  ;;  %v10992_v53 = vcombine.low %v3734_v14, %v3744_v7  ;;  %v7254_v31 = vcombine.low %v10959_v40, %v10970_v57  ;;  %v11020_v14 = vld [vmem:[#allocation10 + $0x70] sm:$0xff]  }
 0x3ce   : > { %v3752_v4 = vor.u32 %v3751_v15, %v3748_v24  ;;  %v3763_v15 = vrot.slane %v3762_v35, 4  ;;  %v3767_v2 = vrot.slane %v3765_v12, 5  ;;  %v11005_v41 = vrot.slane %v3789_v58, 5 }
 0x3cf   : > { %7804 = vmatmul.mubr.msk.bf16.gmra.mrb[16].mxu1 %vm1486_vm11, %v8596_v48  ;;  %7832 = vmatmul.mubr.msk.bf16.gmra.mrb[12].mxu0 %vm1486_vm11, %v7213_v59  ;;  %v3783_v59 = vshrl.u32 %v10935_v17, 16  ;;  %v3685_v48 = vld [vmem:[#allocation3 + $0x3c] sm:$0xf]  ;;  %v11009_v26 = vsel %vm10431_vm15, %v7248_v23, %v4143_v29  ;;  %v3803_v5 = vshll.u32 %v10980_v61, 16  ;;  %v3807_v52 = vshrl.u32 %v10980_v61, 16 }
 0x3d0   : > { %7807 = vmatprep.mubr.msk.bf16.mxu1 %vm1486_vm11, %v8598_v21  ;;  %7859 = vmatprep.mubr.msk.bf16.mxu0 %vm1486_vm11, %v7250_v50  ;;  %v10974_v50 = vsel %vm10431_vm15, %v7247_v32, %v4136_v51  ;;  %v10987_v51 = vrot.slane %v3779_v39, 5  ;;  %v3794_v38 = vshrl.u32 %v3685_v48, 16  ;;  %v3797_v18 = vshll.u32 %v3685_v48, 16  ;;  %v8603_v48 = vld [vmem:[#allocation3 + $0x60] sm:$0xff]  }
 0x3d1   : > { %v3785_v21 = vrot.slane %v3783_v59, 4  ;;  %v7255_v32 = vcombine.low %v10974_v50, %v10984_v33  ;;  %v3753_v24 = vrot.slane %v3752_v4, 4  ;;  %v3776_v13 = vor.u32 %v3775_v11, %v3772_v0  ;;  %v3691_v59 = vld [vmem:[#allocation3 + $0x54] sm:$0xf] }
 0x3d2   : > { %v4146_v39 = vrot.slane %v10767_v6, 5  ;;  %v4150_v7 = vrot.slane %v10779_v27, 5  ;;  %v3796_v4 = vrot.slane %v3794_v38, 4  ;;  %v3799_v19 = vrot.slane %v3797_v18, 5 }
 0x3d3   : > { %v3786_v42 = vor.u32 %v3785_v21, %v10987_v51  ;;  %v3768_v6 = vsel %vm10209_vm12, %v3763_v15, %v3767_v2  ;;  %v3818_v35 = vshrl.u32 %v3688_v43, 16  ;;  %v3821_v12 = vshll.u32 %v3688_v43, 16 }
 0x3d4   : > { %v11034_v0 = vrot.slane %v3803_v5, 5  ;;  %v3809_v27 = vrot.slane %v3807_v52, 4  ;;  %v3831_v58 = vshrl.u32 %v10998_v45, 16  ;;  %v3842_v23 = vshrl.u32 %v3691_v59, 16  ;;  %v3694_v5 = vld [vmem:[#allocation3 + $0x60] sm:$0xf] }
 0x3d5   : > { %v3845_v11 = vshll.u32 %v3691_v59, 16  ;;  %v3851_v21 = vshll.u32 %v11025_v20, 16  ;;  %v11042_v38 = vrot.slane %v3786_v42, 4  ;;  %v4153_v18 = vrot.slane %v10808_v47, 5  ;;  %v11069_v59 = vld [vmem:[#allocation3 + $0x64] sm:$0xf] }
 0x3d6   : > { %v3820_v15 = vrot.slane %v3818_v35, 4  ;;  %v3823_v2 = vrot.slane %v3821_v12, 5  ;;  %v3800_v52 = vor.u32 %v3799_v19, %v3796_v4  ;;  %v3810_v47 = vor.u32 %v3809_v27, %v11034_v0 }
 0x3d7   : > { %7808 = vmatmul.mubr.msk.bf16.gmra.mrb[20].mxu1 %vm1486_vm11, %v8600_v30  ;;  %7860 = vmatmul.mubr.msk.bf16.vlgmr.msra.gmra.mrb[0].mxu0 %vm1486_vm11, %v7251_v25  ;;  %v4145_v25 = vrot.slane %v4143_v29, 4  ;;  %v7249_v30 = vrot.slane %v10990_v28, 9  ;;  %v11040_v28 = vrot.slane %v3776_v13, 4  ;;  %v3833_v42 = vrot.slane %v3831_v58, 4  ;;  %v8606_v58 = vld [vmem:[#allocation13 + $0x58] sm:$0xff]  }
 0x3d8   : > { %7811 = vmatprep.mubr.msk.bf16.mxu1 %vm1486_vm11, %v8602_v62  ;;  %7863 = vmatprep.mubr.msk.bf16.mxu0 %vm1486_vm11, %v7252_v56  ;;  %v3758_v56 = vsel %vm10209_vm12, %v3753_v24, %v10946_v44  ;;  %v11032_v62 = vld [vmem:[#allocation3 + $0x44] sm:$0x1]  ;;  %v3855_v44 = vshrl.u32 %v11025_v20, 16  ;;  %v3844_v46 = vrot.slane %v3842_v23, 4  ;;  %v3847_v63 = vrot.slane %v3845_v11, 5 }
 0x3d9   : > { %7896 = vmatpush3.bf16.msra.mxu0 %v10838_v49  ;;  %v3827_v49 = vshll.u32 %v10998_v45, 16  ;;  %v7226_v29 = vcombine.low %v3758_v56, %v3768_v6  ;;  %v4147_v43 = vsel %vm10431_vm15, %v4145_v25, %v4146_v39  ;;  %v3813_v24 = vshll.u32 %v11032_v62, 16  ;;  %v11059_v25 = vld [vmem:[#allocation3 + $0x5c] sm:$0x1] }
 0x3da   : > { %7897 = vmatprep.subr.bf16.mxu0 %v8607_v60  ;;  %v3857_v39 = vrot.slane %v3855_v44, 4  ;;  %v11074_v4 = vsel %vm10431_vm15, %v7249_v30, %v4150_v7  ;;  %v3866_v19 = vshrl.u32 %v3694_v5, 16  ;;  %v4152_v56 = vrot.slane %v4150_v7, 4 }
 0x3db   : > { %v11057_v13 = vrot.slane %v3827_v49, 5  ;;  %v3815_v6 = vrot.slane %v3813_v24, 5  ;;  %v3824_v40 = vor.u32 %v3823_v2, %v3820_v15  ;;  %v3861_v35 = vshll.u32 %v11059_v25, 16  ;;  %v4333_v24 = vld [vmem:[#allocation3 + $0xc] sm:$0xe] }
 0x3dc   : > { %v3875_v12 = vshll.u32 %v11069_v59, 16  ;;  %v3879_v27 = vshrl.u32 %v11069_v59, 16  ;;  %v3811_v49 = vrot.slane %v3810_v47, 4  ;;  %v3848_v30 = vor.u32 %v3847_v63, %v3844_v46  ;;  %v11103_v47 = vld [vmem:[#allocation13 + $0x60] sm:$0xff]  }
 0x3dd   : > { %7898 = vmatpush3.bf16.msra.mxu0 %v8607_v60  ;;  %v11055_v60 = vld [vmem:[#allocation3 + $0x50] sm:$0x1]  ;;  %v3782_v7 = vsel %vm10209_vm12, %v11040_v28, %v10987_v51  ;;  %v3792_v11 = vsel %vm10209_vm12, %v11042_v38, %v11005_v41  ;;  %v3868_v44 = vrot.slane %v3866_v19, 4  ;;  %v4154_v15 = vsel %vm10431_vm15, %v4152_v56, %v4153_v18  ;;  %v4334_v19 = vld [vmem:[#allocation3 + $0x18] sm:$0xe]  ;;  %v8608_v56 = vld [vmem:[#allocation2 + $0x18] sm:$0xff]  }
 0x3de   : > { %7935 = vmatprep.subr.bf16.mxu0 %v11020_v14  ;;  %v3837_v57 = vshll.u32 %v11055_v60, 16  ;;  %v3825_v2 = vrot.slane %v3824_v40, 4  ;;  %v3863_v41 = vrot.slane %v3861_v35, 5  ;;  %v11101_v28 = vrot.slane %v3875_v12, 5  ;;  %v5021_v40 = vld [vmem:[#allocation2 + $0x18] sm:$0xf] }
 0x3df   : > { %7812 = vmatmul.mubr.msk.bf16.gmra.mrb[24].mxu1 %vm1486_vm11, %v8603_v48  ;;  %7864 = vmatmul.mubr.msk.bf16.gmra.mrb[4].mxu0 %vm1486_vm11, %v7253_v54  ;;  %v11067_v54 = vrot.slane %v3851_v21, 5  ;;  %v7256_v48 = vcombine.low %v11009_v26, %v4147_v43  ;;  %v3801_v26 = vrot.slane %v3800_v52, 4  ;;  %v11090_v21 = vld [vmem:[#allocation3 + $0x68] sm:$0x1]  ;;  %v4367_v52 = vrot.slane %v10836_v9, 5 }
 0x3e0   : > { %7839 = vmatprep.mubr.msk.bf16.mxu1 %vm1486_vm11, %v10963_v8  ;;  %7867 = vmatprep.mubr.msk.bf16.mxu0 %vm1486_vm11, %v7254_v31  ;;  %v3869_v8 = vshll.u32 %v3694_v5, 16  ;;  %v3834_v31 = vor.u32 %v3833_v42, %v11057_v13  ;;  %v3839_v5 = vrot.slane %v3837_v57, 5  ;;  %v3881_v38 = vrot.slane %v3879_v27, 4 }
 0x3e1   : > { %v3858_v23 = vor.u32 %v3857_v39, %v11067_v54  ;;  %v3806_v9 = vsel %vm10209_vm12, %v3801_v26, %v11034_v0  ;;  %v3816_v50 = vsel %vm10209_vm12, %v3811_v49, %v3815_v6  ;;  %v3849_v33 = vrot.slane %v3848_v30, 4  ;;  %v4335_v6 = vld [vmem:[#allocation3 + $0x24] sm:$0xe] }
 0x3e2   : > { %v3871_v43 = vrot.slane %v3869_v8, 5  ;;  %v3835_v51 = vrot.slane %v3834_v31, 4  ;;  %v3885_v18 = vshll.u32 %v11090_v21, 16  ;;  %v7268_v42 = vrot.slane %v4333_v24, 9 }
 0x3e3   : > { %v4369_v46 = vrot.slane %v4367_v52, 4  ;;  %v7257_v63 = vcombine.low %v11074_v4, %v4154_v15  ;;  %v7228_v39 = vcombine.low %v3806_v9, %v3816_v50  ;;  %v3882_v0 = vor.u32 %v3881_v38, %v11101_v28  ;;  %v4337_v15 = vld [vmem:[#allocation3 + $0x3c] sm:$0xe]  ;;  %v8609_v38 = vld [vmem:[#allocation2 + $0x24] sm:$0xff]  }
 0x3e4   : > { %v3830_v8 = vsel %vm10209_vm12, %v3825_v2, %v11057_v13  ;;  %v3887_v31 = vrot.slane %v3885_v18, 5  ;;  %v11129_v35 = vsel %vm10431_vm15, %v7268_v42, %v4367_v52  ;;  %v11132_v13 = vld [vmem:[#allocation2 + $0x1c] sm:$0xf]  ;;  %v4374_v27 = vrot.slane %v10852_v36, 5 }
 0x3e5   : > { %v4381_v26 = vrot.slane %v10911_v16, 5  ;;  %v3883_v30 = vrot.slane %v3882_v0, 4  ;;  %v5046_v36 = vshrl.u32 %v5021_v40, 16  ;;  %v5059_v2 = vshrl.u32 %v11132_v13, 16 }
 0x3e6   : > { %v4395_v42 = vrot.slane %v10980_v61, 5  ;;  %v8619_v61 = vld [vmem:[#allocation10 + $0x78] sm:$0xff]  }
 0x3e7   : > { %7840 = vmatmul.mubr.msk.bf16.vlgmr.msra.gmra.mrb[12].mxu1 %vm1486_vm11, %v10992_v53  ;;  %7868 = vmatmul.mubr.msk.bf16.gmra.mrb[8].mxu0 %vm1486_vm11, %v7255_v32  ;;  %v3859_v53 = vrot.slane %v3858_v23, 4  ;;  %v3872_v32 = vor.u32 %v3871_v43, %v3868_v44  ;;  %v4388_v23 = vrot.slane %v10935_v17, 5  ;;  %v4336_v44 = vld [vmem:[#allocation3 + $0x30] sm:$0xe]  ;;  %v5049_v43 = vshll.u32 %v5021_v40, 16 }
 0x3e8   : > { %7876 = vmatpush3.bf16.msra.mxu1 %v10920_v34  ;;  %7843 = vmatprep.mubr.msk.bf16.mxu1 %vm1486_vm11, %v7226_v29  ;;  %v4370_v34 = vrot.slane %v10850_v22, 5  ;;  %v7227_v29 = vcombine.low %v3782_v7, %v3792_v11  ;;  %v3854_v22 = vsel %vm10209_vm12, %v3849_v33, %v11067_v54  ;;  %v7269_v54 = vrot.slane %v4334_v19, 9 }
 0x3e9   : > { %7871 = vmatprep.mubr.msk.bf16.mxu0 %vm1486_vm11, %v7256_v48  ;;  %7877 = vmatprep.subr.bf16.mxu1 %v8606_v58  ;;  %v3840_v48 = vsel %vm10209_vm12, %v3835_v51, %v3839_v5  ;;  %v3864_v4 = vsel %vm10209_vm12, %v3859_v53, %v3863_v41  ;;  %v3873_v57 = vrot.slane %v3872_v32, 4  ;;  %v4377_v7 = vrot.slane %v10890_v3, 5  ;;  %v5024_v41 = vld [vmem:[#allocation2 + $0x24] sm:$0xf]  ;;  %v11161_v53 = vld [vmem:[#allocation2 + $0x20] sm:$0x1] }
 0x3ea   : > { %v11136_v12 = vsel %vm10431_vm15, %v4369_v46, %v4370_v34  ;;  %v7229_v49 = vcombine.low %v3830_v8, %v3840_v48  ;;  %v7270_v11 = vrot.slane %v4335_v6, 9  ;;  %v5055_v17 = vshll.u32 %v11132_v13, 16  ;;  %v8610_v32 = vld [vmem:[#allocation2 + $0x30] sm:$0xff]   ;;  %v11168_v34 = vld [vmem:[#allocation2 + $0x28] sm:$0xf] }
 0x3eb   : > { %v3878_v16 = vsel %vm10209_vm12, %v3873_v57, %v11101_v28  ;;  %v7276_v24 = vcombine.low %v11129_v35, %v11136_v12  ;;  %v11155_v5 = vsel %vm10431_vm15, %v7269_v54, %v4374_v27  ;;  %v4376_v3 = vrot.slane %v4374_v27, 4  ;;  %v4338_v6 = vld [vmem:[#allocation3 + $0x48] sm:$0xe] }
 0x3ec   : > { %7878 = vmatpush3.bf16.msra.mxu1 %v8606_v58  ;;  %v7230_v58 = vcombine.low %v3854_v22, %v3864_v4  ;;  %v4383_v52 = vrot.slane %v4381_v26, 4  ;;  %v4384_v51 = vrot.slane %v10944_v37, 5  ;;  %v3888_v28 = vsel %vm10209_vm12, %v3883_v30, %v3887_v31  ;;  %v8611_v30 = vld [vmem:[#allocation2 + $0x3c] sm:$0xff]  }
 0x3ed   : > { %7915 = vmatprep.subr.bf16.mxu1 %v11103_v47  ;;  %v7271_v9 = vrot.slane %v4336_v44, 9  ;;  %v4390_v50 = vrot.slane %v4388_v23, 4  ;;  %v4391_v33 = vrot.slane %v10948_v1, 5  ;;  %v11165_v18 = vsel %vm10431_vm15, %v7270_v11, %v4381_v26  ;;  %v4339_v26 = vld [vmem:[#allocation3 + $0x54] sm:$0xe] }
 0x3ee   : > { %v5048_v46 = vrot.slane %v5046_v36, 4  ;;  %v5051_v37 = vrot.slane %v5049_v43, 5  ;;  %v5073_v0 = vshll.u32 %v5024_v41, 16  ;;  %v7231_v19 = vcombine.low %v3878_v16, %v3888_v28  ;;  %v11205_v36 = vld [vmem:[#allocation2 + $0x2c] sm:$0x1] }
 0x3ef   : > { %7844 = vmatmul.mubr.msk.bf16.gmra.mrb[16].mxu1 %vm1486_vm11, %v7227_v29  ;;  %7872 = vmatmul.mubr.msk.bf16.gmra.mrb[12].mxu0 %vm1486_vm11, %v7257_v63  ;;  %v11170_v29 = vrot.slane %v5055_v17, 5  ;;  %v5061_v63 = vrot.slane %v5059_v2, 4  ;;  %v11174_v1 = vsel %vm10431_vm15, %v4376_v3, %v4377_v7  ;;  %v11178_v8 = vsel %vm10431_vm15, %v4383_v52, %v4384_v51  ;;  %v5027_v16 = vld [vmem:[#allocation2 + $0x30] sm:$0xf]  ;;  %v8613_v3 = vld [vmem:[#allocation2 + $0x48] sm:$0xff]  }
 0x3f0   : > { %7847 = vmatprep.mubr.msk.bf16.mxu1 %vm1486_vm11, %v7228_v39  ;;  %7899 = vmatprep.mubr.msk.bf16.mxu0 %vm1486_vm11, %v8608_v56  ;;  %v5070_v39 = vshrl.u32 %v5024_v41, 16  ;;  %v7272_v48 = vrot.slane %v4337_v15, 9  ;;  %v11184_v56 = vsel %vm10431_vm15, %v7271_v9, %v4388_v23  ;;  %v11188_v22 = vsel %vm10431_vm15, %v4390_v50, %v4391_v33  ;;  %v11221_v28 = vld [vmem:[#allocation2 + $0x34] sm:$0xf] }
 0x3f1   : > { %v4398_v4 = vrot.slane %v11032_v62, 5  ;;  %v4402_v40 = vrot.slane %v10998_v45, 5  ;;  %v4397_v57 = vrot.slane %v4395_v42, 4  ;;  %v5065_v31 = vshll.u32 %v11161_v53, 16 }
 0x3f2   : > { %v5079_v54 = vshll.u32 %v11168_v34, 16  ;;  %v5083_v27 = vshrl.u32 %v11168_v34, 16  ;;  %v5052_v62 = vor.u32 %v5051_v37, %v5048_v46  ;;  %v5062_v45 = vor.u32 %v5061_v63, %v11170_v29 }
 0x3f3   : > { %v5072_v23 = vrot.slane %v5070_v39, 4  ;;  %v7277_v7 = vcombine.low %v11155_v5, %v11174_v1  ;;  %v7278_v11 = vcombine.low %v11165_v18, %v11178_v8  ;;  %v7273_v44 = vrot.slane %v4338_v6, 9  ;;  %v8616_v8 = vld [vmem:[#allocation2 + $0x6c] sm:$0xff]  }
 0x3f4   : > { %v4409_v43 = vrot.slane %v11025_v20, 5  ;;  %v11212_v15 = vsel %vm10431_vm15, %v7272_v48, %v4395_v42  ;;  %v4404_v17 = vrot.slane %v4402_v40, 4  ;;  %v4405_v2 = vrot.slane %v11055_v60, 5 }
 0x3f5   : > { %v11217_v52 = vsel %vm10431_vm15, %v4397_v57, %v4398_v4  ;;  %v5067_v51 = vrot.slane %v5065_v31, 5  ;;  %v11219_v41 = vrot.slane %v5079_v54, 5  ;;  %v5085_v20 = vrot.slane %v5083_v27, 4  ;;  %v8614_v4 = vld [vmem:[#allocation2 + $0x54] sm:$0xff]  }
 0x3f6   : > { %v5053_v9 = vrot.slane %v5052_v62, 4  ;;  %v5063_v50 = vrot.slane %v5062_v45, 4  ;;  %v4411_v42 = vrot.slane %v4409_v43, 4  ;;  %v4412_v60 = vrot.slane %v11059_v25, 5 }
 0x3f7   : > { %7848 = vmatmul.mubr.msk.bf16.gmra.mrb[20].mxu1 %vm1486_vm11, %v7229_v49  ;;  %7900 = vmatmul.mubr.msk.bf16.vlgmr.msra.gmra.mrb[0].mxu0 %vm1486_vm11, %v8609_v38  ;;  %v11197_v49 = vld [vmem:[#allocation10 + $0x80] sm:$0xff]   ;;  %v4340_v38 = vld [vmem:[#allocation3 + $0x60] sm:$0xe]  ;;  %v5094_v46 = vshrl.u32 %v5027_v16, 16  ;;  %v5097_v37 = vshll.u32 %v5027_v16, 16  ;;  %v11229_v63 = vsel %vm10431_vm15, %v7273_v44, %v4402_v40  ;;  %v5089_v39 = vshll.u32 %v11205_v36, 16 }
 0x3f8   : > { %7851 = vmatprep.mubr.msk.bf16.mxu1 %vm1486_vm11, %v7230_v58  ;;  %7903 = vmatprep.mubr.msk.bf16.mxu0 %vm1486_vm11, %v8610_v32  ;;  %v5075_v58 = vrot.slane %v5073_v0, 5  ;;  %v7274_v32 = vrot.slane %v4339_v26, 9  ;;  %v5103_v0 = vshll.u32 %v11221_v28, 16  ;;  %v5107_v48 = vshrl.u32 %v11221_v28, 16  ;;  %v11253_v40 = vld [vmem:[#allocation2 + $0x38] sm:$0x1] }
 0x3f9   : > { %7936 = vmatpush3.bf16.msra.mxu0 %v11020_v14  ;;  %v7279_v14 = vcombine.low %v11184_v56, %v11188_v22  ;;  %v5058_v6 = vsel %vm10209_vm12, %v5053_v9, %v11170_v29  ;;  %v5068_v35 = vsel %vm10209_vm12, %v5063_v50, %v5067_v51  ;;  %v11261_v31 = vsel %vm10431_vm15, %v4411_v42, %v4412_v60  ;;  %v5030_v26 = vld [vmem:[#allocation2 + $0x3c] sm:$0xf]  ;;  %v11263_v29 = vld [vmem:[#allocation2 + $0x40] sm:$0xf]  ;;  %v5033_v44 = vld [vmem:[#allocation2 + $0x48] sm:$0xf] }
 0x3fa   : > { %7937 = vmatprep.subr.bf16.mxu0 %v8619_v61  ;;  %v5076_v33 = vor.u32 %v5075_v58, %v5072_v23  ;;  %v11257_v57 = vsel %vm10431_vm15, %v7274_v32, %v4409_v43  ;;  %v5096_v54 = vrot.slane %v5094_v46, 4  ;;  %v5099_v27 = vrot.slane %v5097_v37, 5  ;;  %v8618_v43 = vld [vmem:[#allocation13 + $0x68] sm:$0xff]   ;;  %v11293_v37 = vld [vmem:[#allocation2 + $0x58] sm:$0xf] }
 0x3fb   : > { %v11267_v45 = vrot.slane %v5089_v39, 5  ;;  %v11269_v23 = vrot.slane %v5103_v0, 5  ;;  %v5109_v58 = vrot.slane %v5107_v48, 4  ;;  %v11271_v16 = vcombine.low %v5058_v6, %v5068_v35  ;;  %v11277_v51 = vld [vmem:[#allocation2 + $0x4c] sm:$0xf]  ;;  %v11307_v6 = vld [vmem:[#allocation13 + $0x70] sm:$0xff]  }
 0x3fc   : > { %v11251_v12 = vrot.slane %v5076_v33, 4  ;;  %v5118_v9 = vshrl.u32 %v5030_v26, 16  ;;  %v5121_v50 = vshll.u32 %v5030_v26, 16  ;;  %v5036_v33 = vld [vmem:[#allocation2 + $0x54] sm:$0xf]  ;;  %v5100_v42 = vor.u32 %v5099_v27, %v5096_v54 }
 0x3fd   : > { %7938 = vmatpush3.bf16.msra.mxu0 %v8619_v61  ;;  %v5086_v61 = vor.u32 %v5085_v20, %v11219_v41  ;;  %v5113_v60 = vshll.u32 %v11253_v40, 16  ;;  %v5127_v46 = vshll.u32 %v11263_v29, 16  ;;  %v5110_v39 = vor.u32 %v5109_v58, %v11269_v23  ;;  %v11312_v35 = vld [vmem:[#allocation2 + $0x44] sm:$0x1] }
 0x3fe   : > { %7975 = vmatprep.subr.bf16.mxu0 %v11197_v49  ;;  %v5131_v0 = vshrl.u32 %v11263_v29, 16  ;;  %v5142_v48 = vshrl.u32 %v5033_v44, 16  ;;  %v5151_v5 = vshll.u32 %v11277_v51, 16  ;;  %v5155_v1 = vshrl.u32 %v11277_v51, 16 }
 0x3ff   : > { %7852 = vmatmul.mubr.msk.bf16.gmra.mrb[24].mxu1 %vm1486_vm11, %v7231_v19  ;;  %7904 = vmatmul.mubr.msk.bf16.gmra.mrb[4].mxu0 %vm1486_vm11, %v8611_v30  ;;  %v11243_v19 = vsel %vm10431_vm15, %v4404_v17, %v4405_v2  ;;  %v8615_v30 = vld [vmem:[#allocation2 + $0x60] sm:$0xff]   ;;  %v11273_v17 = vrot.slane %v5086_v61, 4  ;;  %v12127_v2 = vrot.slane %v11069_v59, 5  ;;  %v5145_v61 = vshll.u32 %v5033_v44, 16 }
 0x400   : > { %7879 = vmatprep.mubr.msk.bf16.mxu1 %vm1486_vm11, %v7276_v24  ;;  %7907 = vmatprep.mubr.msk.bf16.mxu0 %vm1486_vm11, %v8613_v3  ;;  %v7275_v24 = vrot.slane %v4340_v38, 9  ;;  %v5175_v54 = vshll.u32 %v11293_v37, 16  ;;  %v5179_v18 = vshrl.u32 %v11293_v37, 16  ;;  %v5101_v27 = vrot.slane %v5100_v42, 4  ;;  %v11324_v3 = vld [vmem:[#allocation2 + $0x50] sm:$0x1] }
 0x401   : > { %v5115_v26 = vrot.slane %v5113_v60, 5  ;;  %v11320_v58 = vrot.slane %v5127_v46, 5  ;;  %v5111_v44 = vrot.slane %v5110_v39, 4  ;;  %v5144_v38 = vrot.slane %v5142_v48, 4  ;;  %v11330_v42 = vld [vmem:[#allocation2 + $0x5c] sm:$0x1] }
 0x402   : > { %v11289_v32 = vsel %vm10431_vm15, %v7275_v24, %v12127_v2  ;;  %v5120_v24 = vrot.slane %v5118_v9, 4  ;;  %v5147_v9 = vrot.slane %v5145_v61, 5  ;;  %v11326_v62 = vrot.slane %v5151_v5, 5 }
 0x403   : > { %v5157_v20 = vrot.slane %v5155_v1, 4  ;;  %v11332_v60 = vrot.slane %v5175_v54, 5  ;;  %v5181_v46 = vrot.slane %v5179_v18, 4  ;;  %v5106_v61 = vsel %vm10209_vm12, %v5101_v27, %v11269_v23 }
 0x404   : > { %v5116_v5 = vsel %vm10209_vm12, %v5111_v44, %v5115_v26  ;;  %v5148_v56 = vor.u32 %v5147_v9, %v5144_v38  ;;  %v5185_v23 = vshll.u32 %v11330_v42, 16  ;;  %v11363_v38 = vld [vmem:[#allocation2 + $0x70] sm:$0xf] }
 0x405   : > { %v5158_v22 = vor.u32 %v5157_v20, %v11326_v62 }
 0x407   : > { %7880 = vmatmul.mubr.msk.bf16.vlgmr.msra.gmra.mrb[12].mxu1 %vm1486_vm11, %v7277_v7  ;;  %7908 = vmatmul.mubr.msk.bf16.gmra.mrb[8].mxu0 %vm1486_vm11, %v8614_v4  ;;  %v5166_v7 = vshrl.u32 %v5036_v33, 16  ;;  %v5169_v4 = vshll.u32 %v5036_v33, 16  ;;  %v5133_v33 = vrot.slane %v5131_v0, 4  ;;  %v5159_v9 = vrot.slane %v5158_v22, 4 }
 0x408   : > { %7916 = vmatpush3.bf16.msra.mxu1 %v11103_v47  ;;  %7883 = vmatprep.mubr.msk.bf16.mxu1 %vm1486_vm11, %v7278_v11  ;;  %v5123_v47 = vrot.slane %v5121_v50, 5  ;;  %v5092_v11 = vsel %vm10209_vm12, %v11273_v17, %v11267_v45  ;;  %v11322_v50 = vld [vmem:[#allocation2 + $0x64] sm:$0xf]  ;;  %v5137_v17 = vshll.u32 %v11312_v35, 16 }
 0x409   : > { %7911 = vmatprep.mubr.msk.bf16.mxu0 %vm1486_vm11, %v8615_v30  ;;  %7917 = vmatprep.subr.bf16.mxu1 %v8618_v43  ;;  %v5039_v30 = vld [vmem:[#allocation2 + $0x60] sm:$0xf]  ;;  %v5168_v2 = vrot.slane %v5166_v7, 4  ;;  %v5171_v25 = vrot.slane %v5169_v4, 5  ;;  %v5203_v48 = vshrl.u32 %v11322_v50, 16  ;;  %v5134_v1 = vor.u32 %v5133_v33, %v11320_v58 }
 0x40a   : > { %v5124_v45 = vor.u32 %v5123_v47, %v5120_v24  ;;  %v5190_v39 = vshrl.u32 %v5039_v30, 16  ;;  %v5193_v0 = vshll.u32 %v5039_v30, 16  ;;  %v5161_v7 = vshll.u32 %v11324_v3, 16  ;;  %v11356_v24 = vld [vmem:[#allocation2 + $0x68] sm:$0x1] }
 0x40b   : > { %v12231_v4 = vcombine.low %v11212_v15, %v11217_v52  ;;  %v12232_v47 = vrot.slane %v11069_v59, 5  ;;  %v5182_v15 = vor.u32 %v5181_v46, %v11332_v60  ;;  %v5042_v52 = vld [vmem:[#allocation2 + $0x6c] sm:$0xf]  ;;  %v7332_v59 = vcombine.low %v5106_v61, %v5116_v5 }
 0x40c   : > { %7918 = vmatpush3.bf16.msra.mxu1 %v8618_v43  ;;  %v5199_v43 = vshll.u32 %v11322_v50, 16  ;;  %v5125_v18 = vrot.slane %v5124_v45, 4  ;;  %v5192_v27 = vrot.slane %v5190_v39, 4  ;;  %v5195_v26 = vrot.slane %v5193_v0, 5 }
 0x40d   : > { %7955 = vmatprep.subr.bf16.mxu1 %v11307_v6  ;;  %v4418_v54 = vrot.slane %v12232_v47, 4  ;;  %v5135_v20 = vrot.slane %v5134_v1, 4  ;;  %v5163_v44 = vrot.slane %v5161_v7, 5  ;;  %v5149_v33 = vrot.slane %v5148_v56, 4 }
 0x40e   : > { %v11361_v30 = vrot.slane %v5199_v43, 5  ;;  %v5183_v46 = vrot.slane %v5182_v15, 4  ;;  %v5209_v39 = vshll.u32 %v11356_v24, 16  ;;  %v5214_v0 = vshrl.u32 %v5042_v52, 16 }
 0x40f   : > { %7884 = vmatmul.mubr.msk.bf16.gmra.mrb[16].mxu1 %vm1486_vm11, %v7279_v14  ;;  %7912 = vmatmul.mubr.msk.bf16.gmra.mrb[12].mxu0 %vm1486_vm11, %v8616_v8  ;;  %v5172_v14 = vor.u32 %v5171_v25, %v5168_v2  ;;  %v5139_v8 = vrot.slane %v5137_v17, 5  ;;  %v12233_v25 = vsel %vm10209_vm12, %v11251_v12, %v11219_v41  ;;  %v5187_v17 = vrot.slane %v5185_v23, 5  ;;  %v8629_v12 = vld [vmem:[#allocation10 + $0x88] sm:$0xff]  }
 0x410   : > { %7887 = vmatprep.mubr.msk.bf16.mxu1 %vm1486_vm11, %v12231_v4  ;;  %7939 = vmatprep.mubr.msk.bf16.mxu0 %vm1486_vm11, %v11271_v16  ;;  %v5205_v16 = vrot.slane %v5203_v48, 4  ;;  %v7331_v2 = vcombine.low %v12233_v25, %v5092_v11  ;;  %v5217_v43 = vshll.u32 %v5042_v52, 16  ;;  %v5196_v48 = vor.u32 %v5195_v26, %v5192_v27  ;;  %v8620_v26 = vld [vmem:[#allocation3 + $0x18] sm:$0xff]   ;;  %v5809_v25 = vld [vmem:[#allocation2 + $0x18] sm:$0xe] }
 0x411   : > { %v5173_v45 = vrot.slane %v5172_v14, 4  ;;  %v5223_v47 = vshll.u32 %v11363_v38, 16  ;;  %v5227_v41 = vshrl.u32 %v11363_v38, 16  ;;  %v12234_v11 = vcombine.low %v11229_v63, %v11243_v19 }
 0x412   : > { %v5206_v4 = vor.u32 %v5205_v16, %v11361_v30  ;;  %v12235_v61 = vrot.slane %v11090_v21, 5  ;;  %v5130_v1 = vsel %vm10209_vm12, %v5125_v18, %v11320_v58  ;;  %v5140_v7 = vsel %vm10209_vm12, %v5135_v20, %v5139_v8  ;;  %v11401_v58 = vld [vmem:[#allocation2 + $0x74] sm:$0x1] }
 0x413   : > { %v12236_v56 = vcombine.low %v11257_v57, %v11261_v31  ;;  %v5154_v21 = vsel %vm10209_vm12, %v5149_v33, %v11326_v62  ;;  %v5164_v63 = vsel %vm10209_vm12, %v5159_v9, %v5163_v44  ;;  %v5178_v19 = vsel %vm10209_vm12, %v5173_v45, %v11332_v60  ;;  %v5415_v44 = vld [vmem:[#allocation3 + $0x18] sm:$0xf]  ;;  %v11417_v33 = vld [vmem:[#allocation3 + $0x1c] sm:$0xf] }
 0x414   : > { %v4420_v5 = vsel %vm10431_vm15, %v4418_v54, %v12235_v61  ;;  %v5188_v57 = vsel %vm10209_vm12, %v5183_v46, %v5187_v17  ;;  %v5211_v31 = vrot.slane %v5209_v39, 5  ;;  %v5216_v22 = vrot.slane %v5214_v0, 4  ;;  %v5810_v46 = vld [vmem:[#allocation2 + $0x24] sm:$0xe] }
 0x415   : > { %v5219_v14 = vrot.slane %v5217_v43, 5  ;;  %v5197_v23 = vrot.slane %v5196_v48, 4  ;;  %v5207_v54 = vrot.slane %v5206_v4, 4  ;;  %v11406_v62 = vrot.slane %v5223_v47, 5  ;;  %v5811_v48 = vld [vmem:[#allocation2 + $0x30] sm:$0xe] }
 0x416   : > { %v5229_v18 = vrot.slane %v5227_v41, 4  ;;  %v7283_v8 = vcombine.low %v11289_v32, %v4420_v5  ;;  %v7333_v60 = vcombine.low %v5130_v1, %v5140_v7  ;;  %v5233_v52 = vshll.u32 %v11401_v58, 16 }
 0x417   : > { %7888 = vmatmul.mubr.msk.bf16.gmra.mrb[20].mxu1 %vm1486_vm11, %v12234_v11  ;;  %7940 = vmatmul.mubr.msk.bf16.vlgmr.msra.gmra.mrb[0].mxu0 %vm1486_vm11, %v7331_v2  ;;  %v7334_v16 = vcombine.low %v5154_v21, %v5164_v63  ;;  %v5843_v20 = vrot.slane %v11132_v13, 5  ;;  %v5202_v9 = vsel %vm10209_vm12, %v5197_v23, %v11361_v30  ;;  %v5212_v45 = vsel %vm10209_vm12, %v5207_v54, %v5211_v31  ;;  %v8622_v11 = vld [vmem:[#allocation3 + $0x24] sm:$0xff]   ;;  %v8623_v23 = vld [vmem:[#allocation3 + $0x30] sm:$0xff]  }
 0x418   : > { %7891 = vmatprep.mubr.msk.bf16.mxu1 %vm1486_vm11, %v12236_v56  ;;  %7943 = vmatprep.mubr.msk.bf16.mxu0 %vm1486_vm11, %v7332_v59  ;;  %v5220_v59 = vor.u32 %v5219_v14, %v5216_v22  ;;  %v5230_v17 = vor.u32 %v5229_v18, %v11406_v62  ;;  %v5850_v39 = vrot.slane %v11168_v34, 5  ;;  %v5235_v13 = vrot.slane %v5233_v52, 5 }
 0x419   : > { %7976 = vmatpush3.bf16.msra.mxu0 %v11197_v49  ;;  %v7335_v49 = vcombine.low %v5178_v19, %v5188_v57  ;;  %v7366_v0 = vrot.slane %v5809_v25, 9  ;;  %v5846_v43 = vrot.slane %v11161_v53, 5  ;;  %v5857_v4 = vrot.slane %v11221_v28, 5  ;;  %v11438_v57 = vld [vmem:[#allocation3 + $0x28] sm:$0xf] }
 0x41a   : > { %7977 = vmatprep.subr.bf16.mxu0 %v8629_v12  ;;  %v5440_v30 = vshrl.u32 %v5415_v44, 16  ;;  %v5443_v47 = vshll.u32 %v5415_v44, 16  ;;  %v5449_v41 = vshll.u32 %v11417_v33, 16  ;;  %v5453_v34 = vshrl.u32 %v11417_v33, 16 }
 0x41b   : > { %v11409_v15 = vpop.f32.mrb[0].mxu1  ;;  %v7336_v61 = vcombine.low %v5202_v9, %v5212_v45  ;;  %v5221_v5 = vrot.slane %v5220_v59, 4  ;;  %v5845_v1 = vrot.slane %v5843_v20, 4  ;;  %v7367_v7 = vrot.slane %v5810_v46, 9  ;;  %v11461_v59 = vld [vmem:[#allocation3 + $0x20] sm:$0x1] }
 0x41c   : > { %v11412_v27 = vpop.f32.mrb[1].mxu1  ;;  %v5231_v53 = vrot.slane %v5230_v17, 4  ;;  %v5852_v56 = vrot.slane %v5850_v39, 4  ;;  %v5853_v28 = vrot.slane %v11205_v36, 5  ;;  %v7368_v21 = vrot.slane %v5811_v48, 9 }
 0x41d   : > { %v11414_v2 = vpop.f32.mrb[2].mxu1  ;;  %7978 = vmatpush3.bf16.msra.mxu0 %v8629_v12  ;;  %v5418_v12 = vld [vmem:[#allocation3 + $0x24] sm:$0xf]  ;;  %v5859_v63 = vrot.slane %v5857_v4, 4  ;;  %v5860_v19 = vrot.slane %v11253_v40, 5  ;;  %v5442_v54 = vrot.slane %v5440_v30, 4  ;;  %v5226_v36 = vsel %vm10209_vm12, %v5221_v5, %v11406_v62 }
 0x41e   : > { %v11419_v32 = vpop.f32.mrb[3].mxu1  ;;  %v5464_v31 = vshrl.u32 %v5418_v12, 16  ;;  %v5467_v22 = vshll.u32 %v5418_v12, 16  ;;  %v5445_v18 = vrot.slane %v5443_v47, 5  ;;  %v11451_v40 = vsel %vm10431_vm15, %v7366_v0, %v5843_v20  ;;  %v5812_v9 = vld [vmem:[#allocation2 + $0x3c] sm:$0xe] }
 0x41f   : > { %7892 = vmatmul.mubr.msk.bf16.gmra.mrb[24].mxu1 %vm1486_vm11, %v7283_v8  ;;  %7944 = vmatmul.mubr.msk.bf16.gmra.mrb[4].mxu0 %vm1486_vm11, %v7333_v60  ;;  %v11442_v8 = vrot.slane %v5449_v41, 5  ;;  %v5455_v60 = vrot.slane %v5453_v34, 4  ;;  %v11459_v25 = vsel %vm10431_vm15, %v7367_v7, %v5850_v39  ;;  %v5236_v62 = vsel %vm10209_vm12, %v5231_v53, %v5235_v13  ;;  %v11490_v47 = vld [vmem:[#allocation3 + $0x2c] sm:$0x1]  ;;  %v5421_v12 = vld [vmem:[#allocation3 + $0x30] sm:$0xf] }
 0x420   : > { %7919 = vmatprep.mubr.msk.bf16.mxu1 %vm1486_vm11, %v8620_v26  ;;  %7947 = vmatprep.mubr.msk.bf16.mxu0 %vm1486_vm11, %v7334_v16  ;;  %v8627_v26 = vld [vmem:[#allocation13 + $0x78] sm:$0xff]   ;;  %v11455_v16 = vsel %vm10431_vm15, %v5845_v1, %v5846_v43  ;;  %v5864_v45 = vrot.slane %v11263_v29, 5  ;;  %v5473_v20 = vshll.u32 %v11438_v57, 16  ;;  %v5477_v17 = vshrl.u32 %v11438_v57, 16  ;;  %v11495_v34 = vld [vmem:[#allocation13 + $0x80] sm:$0xff]  }
 0x421   : > { %v11476_v39 = vsel %vm10431_vm15, %v5852_v56, %v5853_v28  ;;  %v11480_v13 = vsel %vm10431_vm15, %v7368_v21, %v5857_v4  ;;  %v5466_v0 = vrot.slane %v5464_v31, 4  ;;  %v5469_v29 = vrot.slane %v5467_v22, 5  ;;  %v11500_v53 = vld [vmem:[#allocation3 + $0x34] sm:$0xf]  ;;  %v8624_v56 = vld [vmem:[#allocation3 + $0x3c] sm:$0xff]  }
 0x422   : > { %v11486_v43 = vsel %vm10431_vm15, %v5859_v63, %v5860_v19  ;;  %v5456_v48 = vor.u32 %v5455_v60, %v11442_v8  ;;  %v5459_v30 = vshll.u32 %v11461_v59, 16  ;;  %v7337_v4 = vcombine.low %v5226_v36, %v5236_v62  ;;  %v5813_v19 = vld [vmem:[#allocation2 + $0x48] sm:$0xe]  ;;  %v5814_v31 = vld [vmem:[#allocation2 + $0x54] sm:$0xe] }
 0x423   : > { %v11440_v14 = vpop.f32.mrb[4].mxu1  ;;  %v7369_v41 = vrot.slane %v5812_v9, 9  ;;  %v5867_v5 = vrot.slane %v11312_v35, 5  ;;  %v11498_v1 = vrot.slane %v5473_v20, 5  ;;  %v5479_v7 = vrot.slane %v5477_v17, 4  ;;  %v8626_v35 = vld [vmem:[#allocation3 + $0x48] sm:$0xff]  }
 0x424   : > { %v11444_v52 = vpop.f32.mrb[5].mxu1  ;;  %v5470_v21 = vor.u32 %v5469_v29, %v5466_v0  ;;  %v5483_v63 = vshll.u32 %v11490_v47, 16  ;;  %v5871_v60 = vrot.slane %v11277_v51, 5  ;;  %v5497_v62 = vshll.u32 %v11500_v53, 16  ;;  %v5424_v29 = vld [vmem:[#allocation3 + $0x3c] sm:$0xf] }
 0x425   : > { %v11463_v44 = vpop.f32.mrb[6].mxu1  ;;  %v5501_v9 = vshrl.u32 %v11500_v53, 16  ;;  %v5480_v51 = vor.u32 %v5479_v7, %v11498_v1  ;;  %v5878_v0 = vrot.slane %v11293_v37, 5  ;;  %v5512_v28 = vshrl.u32 %v5424_v29, 16 }
 0x426   : > { %12237 = vst [vmem:[#allocation41_spill] sm:$0xff] %v11463_v44  ;;  %v11472_v46 = vpop.f32.mrb[7].mxu1 }
 0x427   : > { %7920 = vmatmul.mubr.msk.bf16.vlgmr.msra.gmra.mrb[12].mxu1 %vm1486_vm11, %v8622_v11  ;;  %7948 = vmatmul.mubr.msk.bf16.gmra.mrb[8].mxu0 %vm1486_vm11, %v7335_v49  ;;  %12238 = vst [vmem:[#allocation42_spill] sm:$0xff] %v11472_v46  ;;  %v5446_v49 = vor.u32 %v5445_v18, %v5442_v54  ;;  %v5866_v11 = vrot.slane %v5864_v45, 4  ;;  %v5457_v54 = vrot.slane %v5456_v48, 4  ;;  %v5461_v18 = vrot.slane %v5459_v30, 5 }
 0x428   : > { %7956 = vmatpush3.bf16.msra.mxu1 %v11307_v6  ;;  %7923 = vmatprep.mubr.msk.bf16.mxu1 %vm1486_vm11, %v8623_v23  ;;  %v7374_v6 = vcombine.low %v11451_v40, %v11455_v16  ;;  %v5488_v40 = vshrl.u32 %v5421_v12, 16  ;;  %v5491_v16 = vshll.u32 %v5421_v12, 16  ;;  %v5471_v48 = vrot.slane %v5470_v21, 4 }
 0x429   : > { %7951 = vmatprep.mubr.msk.bf16.mxu0 %vm1486_vm11, %v7336_v61  ;;  %7957 = vmatprep.subr.bf16.mxu1 %v8627_v26  ;;  %v5447_v23 = vrot.slane %v5446_v49, 4  ;;  %v11523_v17 = vsel %vm10431_vm15, %v5866_v11, %v5867_v5  ;;  %v5485_v30 = vrot.slane %v5483_v63, 5  ;;  %v7370_v12 = vrot.slane %v5813_v19, 9  ;;  %v11541_v63 = vld [vmem:[#allocation3 + $0x40] sm:$0xf] }
 0x42a   : > { %v5873_v11 = vrot.slane %v5871_v60, 4  ;;  %v5490_v5 = vrot.slane %v5488_v40, 4  ;;  %v5493_v7 = vrot.slane %v5491_v16, 5  ;;  %v5503_v21 = vrot.slane %v5501_v9, 4  ;;  %v11557_v40 = vld [vmem:[#allocation3 + $0x44] sm:$0x1] }
 0x42b   : > { %v11507_v22 = vpop.f32.mrb[8].mxu1  ;;  %v5452_v37 = vsel %vm10209_vm12, %v5447_v23, %v11442_v8  ;;  %v5880_v19 = vrot.slane %v5878_v0, 4  ;;  %v8628_v8 = vld [vmem:[#allocation3 + $0x54] sm:$0xff]   ;;  %v8630_v16 = vld [vmem:[#allocation3 + $0x60] sm:$0xff]   ;;  %v5515_v9 = vshll.u32 %v5424_v29, 16  ;;  %v5531_v23 = vshll.u32 %v11557_v40, 16 }
 0x42c   : > { %12239 = vst [vmem:[#allocation43_spill] sm:$0xff] %v11507_v22  ;;  %7958 = vmatpush3.bf16.msra.mxu1 %v8627_v26  ;;  %v11510_v36 = vpop.f32.mrb[9].mxu1  ;;  %v11519_v26 = vsel %vm10431_vm15, %v7369_v41, %v5864_v45  ;;  %v5874_v45 = vrot.slane %v11324_v3, 5  ;;  %v5462_v41 = vsel %vm10209_vm12, %v5457_v54, %v5461_v18  ;;  %v5481_v3 = vrot.slane %v5480_v51, 4  ;;  %v5815_v61 = vld [vmem:[#allocation2 + $0x60] sm:$0xe] }
 0x42d   : > { %12240 = vst [vmem:[#allocation44_spill] sm:$0xff] %v11510_v36  ;;  %7995 = vmatprep.subr.bf16.mxu1 %v11495_v34  ;;  %v11515_v20 = vpop.f32.mrb[10].mxu1  ;;  %v11548_v54 = vcombine.low %v5452_v37, %v5462_v41  ;;  %v11555_v18 = vsel %vm10431_vm15, %v7370_v12, %v5871_v60  ;;  %v5521_v51 = vshll.u32 %v11541_v63, 16  ;;  %v5525_v37 = vshrl.u32 %v11541_v63, 16  ;;  %v11565_v41 = vld [vmem:[#allocation3 + $0x4c] sm:$0xf] }
 0x42e   : > { %12241 = vst [vmem:[#allocation45_spill] sm:$0xff] %v11515_v20  ;;  %v11529_v49 = vpop.f32.mrb[11].mxu1  ;;  %v5494_v60 = vor.u32 %v5493_v7, %v5490_v5  ;;  %v5545_v7 = vshll.u32 %v11565_v41, 16 }
 0x42f   : > { %7924 = vmatmul.mubr.msk.bf16.gmra.mrb[16].mxu1 %vm1486_vm11, %v8624_v56  ;;  %7952 = vmatmul.mubr.msk.bf16.gmra.mrb[12].mxu0 %vm1486_vm11, %v7337_v4  ;;  %12242 = vst [vmem:[#allocation46_spill] sm:$0xff] %v11529_v49  ;;  %v7371_v4 = vrot.slane %v5814_v31, 9  ;;  %v11539_v56 = vrot.slane %v5497_v62, 5  ;;  %v5476_v31 = vsel %vm10209_vm12, %v5471_v48, %v11498_v1  ;;  %v11561_v62 = vsel %vm10431_vm15, %v5873_v11, %v5874_v45 }
 0x430   : > { %7927 = vmatprep.mubr.msk.bf16.mxu1 %vm1486_vm11, %v8626_v35  ;;  %7979 = vmatprep.mubr.msk.bf16.mxu0 %vm1486_vm11, %v7374_v6  ;;  %v5881_v6 = vrot.slane %v11330_v42, 5  ;;  %v11544_v35 = vld [vmem:[#allocation3 + $0x38] sm:$0x1]  ;;  %v5427_v42 = vld [vmem:[#allocation3 + $0x48] sm:$0xf]  ;;  %v5486_v45 = vsel %vm10209_vm12, %v5481_v3, %v5485_v30  ;;  %v5514_v11 = vrot.slane %v5512_v28, 4  ;;  %v12244_v28 = vcombine.low %v11480_v13, %v11486_v43 }
 0x431   : > { %v11569_v1 = vsel %vm10431_vm15, %v7371_v4, %v5878_v0  ;;  %v5504_v48 = vor.u32 %v5503_v21, %v11539_v56  ;;  %v5507_v12 = vshll.u32 %v11544_v35, 16  ;;  %v12243_v0 = vcombine.low %v11459_v25, %v11476_v39 }
 0x432   : > { %v11577_v29 = vsel %vm10431_vm15, %v5880_v19, %v5881_v6  ;;  %v5536_v4 = vshrl.u32 %v5427_v42, 16  ;;  %v5539_v5 = vshll.u32 %v5427_v42, 16  ;;  %v5549_v30 = vshrl.u32 %v11565_v41, 16 }
 0x433   : > { %v5517_v21 = vrot.slane %v5515_v9, 5  ;;  %v11592_v3 = vrot.slane %v5521_v51, 5  ;;  %v5527_v19 = vrot.slane %v5525_v37, 4  ;;  %v5885_v25 = vrot.slane %v11322_v50, 5  ;;  %v5816_v9 = vld [vmem:[#allocation2 + $0x6c] sm:$0xe] }
 0x434   : > { %v5495_v39 = vrot.slane %v5494_v60, 4  ;;  %v5505_v6 = vrot.slane %v5504_v48, 4  ;;  %v7372_v42 = vrot.slane %v5815_v61, 9  ;;  %v11595_v49 = vcombine.low %v5476_v31, %v5486_v45  ;;  %v11603_v51 = vld [vmem:[#allocation3 + $0x50] sm:$0x1] }
 0x435   : > { %v11601_v43 = vrot.slane %v5531_v23, 5  ;;  %v5538_v37 = vrot.slane %v5536_v4, 4  ;;  %v5541_v50 = vrot.slane %v5539_v5, 5  ;;  %v11605_v60 = vrot.slane %v5545_v7, 5  ;;  %v5430_v61 = vld [vmem:[#allocation3 + $0x54] sm:$0xf] }
 0x436   : > { %v5551_v48 = vrot.slane %v5549_v30, 4  ;;  %v5528_v31 = vor.u32 %v5527_v19, %v11592_v3  ;;  %v5887_v45 = vrot.slane %v5885_v25, 4  ;;  %v5500_v23 = vsel %vm10209_vm12, %v5495_v39, %v11539_v56  ;;  %v5433_v30 = vld [vmem:[#allocation3 + $0x60] sm:$0xf]  ;;  %v11620_v19 = vld [vmem:[#allocation3 + $0x64] sm:$0xf] }
 0x437   : > { %7928 = vmatmul.mubr.msk.bf16.gmra.mrb[20].mxu1 %vm1486_vm11, %v8628_v8  ;;  %7980 = vmatmul.mubr.msk.bf16.vlgmr.msra.gmra.mrb[0].mxu0 %vm1486_vm11, %v12243_v0  ;;  %v5509_v8 = vrot.slane %v5507_v12, 5  ;;  %v8631_v0 = vld [vmem:[#allocation3 + $0x6c] sm:$0xff]   ;;  %v5518_v12 = vor.u32 %v5517_v21, %v5514_v11  ;;  %v5886_v5 = vsel %vm10431_vm15, %v7372_v42, %v5885_v25  ;;  %v7373_v7 = vrot.slane %v5816_v9, 9 }
 0x438   : > { %7931 = vmatprep.mubr.msk.bf16.mxu1 %vm1486_vm11, %v8630_v16  ;;  %7983 = vmatprep.mubr.msk.bf16.mxu0 %vm1486_vm11, %v12244_v28  ;;  %v7378_v16 = vcombine.low %v11555_v18, %v11561_v62  ;;  %v5888_v18 = vrot.slane %v11356_v24, 5  ;;  %v11609_v62 = vld [vmem:[#allocation3 + $0x58] sm:$0xf]  ;;  %v5892_v11 = vrot.slane %v11363_v38, 5  ;;  %v5555_v28 = vshll.u32 %v11603_v51, 16 }
 0x439   : > { %v5510_v4 = vsel %vm10209_vm12, %v5505_v6, %v5509_v8  ;;  %v5560_v21 = vshrl.u32 %v5430_v61, 16  ;;  %v5563_v24 = vshll.u32 %v5430_v61, 16  ;;  %v12245_v56 = vcombine.low %v11519_v26, %v11523_v17 }
 0x43a   : > { %v5542_v39 = vor.u32 %v5541_v50, %v5538_v37  ;;  %v5552_v25 = vor.u32 %v5551_v48, %v11605_v60  ;;  %v5569_v6 = vshll.u32 %v11609_v62, 16  ;;  %v5573_v38 = vshrl.u32 %v11609_v62, 16 }
 0x43b   : > { %v5519_v8 = vrot.slane %v5518_v12, 4  ;;  %v5529_v42 = vrot.slane %v5528_v31, 4  ;;  %v5895_v26 = vrot.slane %v11401_v58, 5  ;;  %v5584_v17 = vshrl.u32 %v5433_v30, 16 }
 0x43c   : > { %v5587_v9 = vshll.u32 %v5433_v30, 16  ;;  %v5593_v37 = vshll.u32 %v11620_v19, 16  ;;  %v5597_v50 = vshrl.u32 %v11620_v19, 16  ;;  %v5894_v48 = vrot.slane %v5892_v11, 4  ;;  %v5436_v30 = vld [vmem:[#allocation3 + $0x6c] sm:$0xf] }
 0x43d   : > { %v5557_v61 = vrot.slane %v5555_v28, 5  ;;  %v5565_v13 = vrot.slane %v5563_v24, 5  ;;  %v5553_v20 = vrot.slane %v5552_v25, 4  ;;  %v5575_v12 = vrot.slane %v5573_v38, 4 }
 0x43e   : > { %v7350_v31 = vcombine.low %v5500_v23, %v5510_v4  ;;  %v5893_v58 = vsel %vm10431_vm15, %v7373_v7, %v5892_v11  ;;  %v5586_v22 = vrot.slane %v5584_v17, 4  ;;  %v5589_v46 = vrot.slane %v5587_v9, 5  ;;  %v11654_v7 = vld [vmem:[#allocation3 + $0x68] sm:$0x1] }
 0x43f   : > { %7932 = vmatmul.mubr.msk.bf16.gmra.mrb[24].mxu1 %vm1486_vm11, %v8631_v0  ;;  %7984 = vmatmul.mubr.msk.bf16.gmra.mrb[4].mxu0 %vm1486_vm11, %v12245_v56  ;;  %v5889_v0 = vsel %vm10431_vm15, %v5887_v45, %v5888_v18  ;;  %v5562_v56 = vrot.slane %v5560_v21, 4  ;;  %v8633_v45 = vld [vmem:[#allocation13 + $0x88] sm:$0xff]   ;;  %v11642_v18 = vld [vmem:[#allocation3 + $0x5c] sm:$0x1]  ;;  %v5595_v44 = vrot.slane %v5593_v37, 5  ;;  %v5599_v28 = vrot.slane %v5597_v50, 4 }
 0x440   : > { %7959 = vmatprep.mubr.msk.bf16.mxu1 %vm1486_vm11, %v11548_v54  ;;  %7987 = vmatprep.mubr.msk.bf16.mxu0 %vm1486_vm11, %v7378_v16  ;;  %v5543_v54 = vrot.slane %v5542_v39, 4  ;;  %v11638_v16 = vrot.slane %v5569_v6, 5  ;;  %v7380_v36 = vcombine.low %v5886_v5, %v5889_v0  ;;  %v11644_v21 = vld [vmem:[#allocation3 + $0x70] sm:$0xf]  ;;  %v5524_v24 = vsel %vm10209_vm12, %v5519_v8, %v11592_v3 }
 0x441   : > { %v5534_v23 = vsel %vm10209_vm12, %v5529_v42, %v11601_v43  ;;  %v5896_v4 = vsel %vm10431_vm15, %v5894_v48, %v5895_v26  ;;  %v5566_v5 = vor.u32 %v5565_v13, %v5562_v56  ;;  %v12246_v11 = vcombine.low %v11569_v1, %v11577_v29 }
 0x442   : > { %v5548_v3 = vsel %vm10209_vm12, %v5543_v54, %v11605_v60  ;;  %v5558_v43 = vsel %vm10209_vm12, %v5553_v20, %v5557_v61  ;;  %v5576_v39 = vor.u32 %v5575_v12, %v11638_v16  ;;  %v5579_v13 = vshll.u32 %v11642_v18, 16 }
 0x443   : > { %v5611_v25 = vshll.u32 %v5436_v30, 16  ;;  %v5617_v1 = vshll.u32 %v11644_v21, 16  ;;  %v5621_v29 = vshrl.u32 %v11644_v21, 16  ;;  %v5590_v60 = vor.u32 %v5589_v46, %v5586_v22 }
 0x444   : > { %v5600_v6 = vor.u32 %v5599_v28, %v5595_v44  ;;  %v5603_v20 = vshll.u32 %v11654_v7, 16  ;;  %v7351_v38 = vcombine.low %v5524_v24, %v5534_v23  ;;  %v7381_v8 = vcombine.low %v5893_v58, %v5896_v4  ;;  %v6075_v28 = vld [vmem:[#allocation3 + $0x18] sm:$0xe] }
 0x445   : > { %v7352_v42 = vcombine.low %v5548_v3, %v5558_v43  ;;  %v5567_v0 = vrot.slane %v5566_v5, 4  ;;  %v5581_v26 = vrot.slane %v5579_v13, 5  ;;  %v5613_v9 = vrot.slane %v5611_v25, 5  ;;  %v6076_v25 = vld [vmem:[#allocation3 + $0x24] sm:$0xe] }
 0x446   : > { %v5619_v37 = vrot.slane %v5617_v1, 5  ;;  %v5623_v50 = vrot.slane %v5621_v29, 4  ;;  %v5591_v48 = vrot.slane %v5590_v60, 4  ;;  %v5601_v61 = vrot.slane %v5600_v6, 4  ;;  %v6077_v1 = vld [vmem:[#allocation3 + $0x30] sm:$0xe] }
 0x447   : > { %7960 = vmatmul.mubr.msk.bf16.vlgmr.msra.gmra.mrb[12].mxu1 %vm1486_vm11, %v11595_v49  ;;  %7988 = vmatmul.mubr.msk.bf16.gmra.mrb[8].mxu0 %vm1486_vm11, %v12246_v11  ;;  %v5608_v49 = vshrl.u32 %v5436_v30, 16  ;;  %v5605_v56 = vrot.slane %v5603_v20, 5  ;;  %v5572_v46 = vsel %vm10209_vm12, %v5567_v0, %v11638_v16  ;;  %v6109_v30 = vrot.slane %v11417_v33, 5 }
 0x448   : > { %7996 = vmatpush3.bf16.msra.mxu1 %v11495_v34  ;;  %7963 = vmatprep.mubr.msk.bf16.mxu1 %vm1486_vm11, %v7350_v31  ;;  %v5577_v34 = vrot.slane %v5576_v39, 4  ;;  %v5624_v12 = vor.u32 %v5623_v50, %v5619_v37  ;;  %v5596_v58 = vsel %vm10209_vm12, %v5591_v48, %v5595_v44  ;;  %v7392_v11 = vrot.slane %v6075_v28, 9 }
 0x449   : > { %7991 = vmatprep.mubr.msk.bf16.mxu0 %vm1486_vm11, %v7380_v36  ;;  %7997 = vmatprep.subr.bf16.mxu1 %v8633_v45  ;;  %v5610_v17 = vrot.slane %v5608_v49, 4  ;;  %v11675_v36 = vld [vmem:[#allocation3 + $0x74] sm:$0x1]  ;;  %v6111_v3 = vrot.slane %v6109_v30, 4  ;;  %v6112_v43 = vrot.slane %v11461_v59, 5  ;;  %v6116_v39 = vrot.slane %v11438_v57, 5 }
 0x44a   : > { %v5582_v22 = vsel %vm10209_vm12, %v5577_v34, %v5581_v26  ;;  %v5627_v31 = vshll.u32 %v11675_v36, 16  ;;  %v5625_v4 = vrot.slane %v5624_v12, 4  ;;  %v6110_v13 = vsel %vm10431_vm15, %v7392_v11, %v6109_v30  ;;  %v6078_v26 = vld [vmem:[#allocation3 + $0x3c] sm:$0xe] }
 0x44b   : > { %v5614_v54 = vor.u32 %v5613_v9, %v5610_v17  ;;  %v7353_v24 = vcombine.low %v5572_v46, %v5582_v22  ;;  %v6113_v49 = vsel %vm10431_vm15, %v6111_v3, %v6112_v43  ;;  %v6123_v59 = vrot.slane %v11500_v53, 5  ;;  %v6079_v17 = vld [vmem:[#allocation3 + $0x48] sm:$0xe]  ;;  %v6082_v43 = vld [vmem:[#allocation3 + $0x6c] sm:$0xe] }
 0x44c   : > { %7998 = vmatpush3.bf16.msra.mxu1 %v8633_v45  ;;  %v5606_v45 = vsel %vm10209_vm12, %v5601_v61, %v5605_v56  ;;  %v5629_v5 = vrot.slane %v5627_v31, 5  ;;  %v7400_v60 = vcombine.low %v6110_v13, %v6113_v49  ;;  %v7393_v6 = vrot.slane %v6076_v25, 9  ;;  %v6080_v31 = vld [vmem:[#allocation3 + $0x54] sm:$0xe] }
 0x44d   : > { %v7354_v16 = vcombine.low %v5596_v58, %v5606_v45  ;;  %v5615_v23 = vrot.slane %v5614_v54, 4  ;;  %v6118_v20 = vrot.slane %v6116_v39, 4  ;;  %v7394_v10 = vrot.slane %v6077_v1, 9  ;;  %v6081_v58 = vld [vmem:[#allocation3 + $0x60] sm:$0xe] }
 0x44e   : > { %v5630_v33 = vsel %vm10209_vm12, %v5625_v4, %v5629_v5  ;;  %v6126_v57 = vrot.slane %v11544_v35, 5  ;;  %v6130_v0 = vrot.slane %v11541_v63, 5  ;;  %v6137_v35 = vrot.slane %v11565_v41, 5 }
 0x44f   : > { %7964 = vmatmul.mubr.msk.bf16.gmra.mrb[16].mxu1 %vm1486_vm11, %v7351_v38  ;;  %7992 = vmatmul.mubr.msk.bf16.gmra.mrb[12].mxu0 %vm1486_vm11, %v7381_v8  ;;  %v5620_v44 = vsel %vm10209_vm12, %v5615_v23, %v5619_v37  ;;  %v6119_v38 = vrot.slane %v11490_v47, 5  ;;  %v6125_v8 = vrot.slane %v6123_v59, 4  ;;  %v6124_v34 = vsel %vm10431_vm15, %v7394_v10, %v6123_v59 }
 0x450   : > { %7967 = vmatprep.mubr.msk.bf16.mxu1 %vm1486_vm11, %v7352_v42  ;;  %v7355_v29 = vcombine.low %v5620_v44, %v5630_v33  ;;  %v6117_v42 = vsel %vm10431_vm15, %v7393_v6, %v6116_v39  ;;  %v7395_v50 = vrot.slane %v6078_v26, 9  ;;  %v6132_v48 = vrot.slane %v6130_v0, 4 }
 0x451   : > { %v6120_v53 = vsel %vm10431_vm15, %v6118_v20, %v6119_v38  ;;  %v6127_v47 = vsel %vm10431_vm15, %v6125_v8, %v6126_v57  ;;  %v6133_v61 = vrot.slane %v11557_v40, 5  ;;  %v7396_v56 = vrot.slane %v6079_v17, 9 }
 0x452   : > { %v7401_v9 = vcombine.low %v6117_v42, %v6120_v53  ;;  %v7402_v37 = vcombine.low %v6124_v34, %v6127_v47  ;;  %v6139_v46 = vrot.slane %v6137_v35, 4  ;;  %v6140_v63 = vrot.slane %v11603_v51, 5  ;;  %v12247_v47 = vld [vmem:[#allocation41_spill] sm:$0xff] }
 0x453   : > { %v6131_v22 = vsel %vm10431_vm15, %v7395_v50, %v6130_v0  ;;  %v6134_v41 = vsel %vm10431_vm15, %v6132_v48, %v6133_v61  ;;  %v6144_v54 = vrot.slane %v11609_v62, 5  ;;  %v6138_v12 = vsel %vm10431_vm15, %v7396_v56, %v6137_v35  ;;  %v12248_v35 = vld [vmem:[#allocation42_spill] sm:$0xff]  ;;  %v12250_v50 = vld [vmem:[#allocation44_spill] sm:$0xff]  ;;  %v12251_v61 = vld [vmem:[#allocation45_spill] sm:$0xff] }
 0x454   : > { %v6141_v40 = vsel %vm10431_vm15, %v6139_v46, %v6140_v63  ;;  %v6151_v51 = vrot.slane %v11620_v19, 5  ;;  %v7403_v45 = vcombine.low %v6131_v22, %v6134_v41  ;;  %v7397_v28 = vrot.slane %v6080_v31, 9  ;;  %v12252_v46 = vld [vmem:[#allocation46_spill] sm:$0xff]  ;;  %v11797_v22 = vld [vmem:[#allocation15] ss:$0 sm:$0xff] }
 0x455   : > { %v7404_v30 = vcombine.low %v6138_v12, %v6141_v40  ;;  %v7398_v23 = vrot.slane %v6081_v58, 9  ;;  %v6154_v62 = vrot.slane %v11654_v7, 5  ;;  %v6158_v11 = vrot.slane %v11644_v21, 5 }
 0x456   : > { %v6153_v4 = vrot.slane %v6151_v51, 4  ;;  %v6145_v5 = vsel %vm10431_vm15, %v7397_v28, %v6144_v54  ;;  %v7399_v33 = vrot.slane %v6082_v43, 9  ;;  %v6161_v13 = vrot.slane %v11675_v36, 5 }
 0x457   : > { %7968 = vmatmul.mubr.msk.bf16.gmra.mrb[20].mxu1 %vm1486_vm11, %v7353_v24  ;;  %v6146_v24 = vrot.slane %v6144_v54, 4  ;;  %v6152_v3 = vsel %vm10431_vm15, %v7398_v23, %v6151_v51  ;;  %v6160_v39 = vrot.slane %v6158_v11, 4 }
 0x458   : > { %7971 = vmatprep.mubr.msk.bf16.mxu1 %vm1486_vm11, %v7354_v16  ;;  %v6147_v16 = vrot.slane %v11642_v18, 5  ;;  %v6155_v18 = vsel %vm10431_vm15, %v6153_v4, %v6154_v62  ;;  %v6159_v21 = vsel %vm10431_vm15, %v7399_v33, %v6158_v11 }
 0x459   : > { %v7406_v44 = vcombine.low %v6152_v3, %v6155_v18  ;;  %v6162_v49 = vsel %vm10431_vm15, %v6160_v39, %v6161_v13 }
 0x45a   : > { %v6148_v19 = vsel %vm10431_vm15, %v6146_v24, %v6147_v16  ;;  %v7407_v25 = vcombine.low %v6159_v21, %v6162_v49 }
 0x45b   : > { %v7405_v7 = vcombine.low %v6145_v5, %v6148_v19 }
 0x45f   : > { %7972 = vmatmul.mubr.msk.bf16.gmra.mrb[24].mxu1 %vm1486_vm11, %v7355_v29 }
 0x460   : > { %7999 = vmatprep.mubr.msk.bf16.mxu1 %vm1486_vm11, %v7400_v60 }
 0x467   : > { %8000 = vmatmul.mubr.msk.bf16.vlgmr.msra.gmra.mrb[12].mxu1 %vm1486_vm11, %v7401_v9  ;;  %v12249_v9 = vld [vmem:[#allocation43_spill] sm:$0xff] }
 0x468   : > { %8003 = vmatprep.mubr.msk.bf16.mxu1 %vm1486_vm11, %v7402_v37 }
 0x46f   : > { %8004 = vmatmul.mubr.msk.bf16.gmra.mrb[16].mxu1 %vm1486_vm11, %v7403_v45 }
 0x470   : > { %8007 = vmatprep.mubr.msk.bf16.mxu1 %vm1486_vm11, %v7404_v30 }
 0x477   : > { %8008 = vmatmul.mubr.msk.bf16.gmra.mrb[20].mxu1 %vm1486_vm11, %v7405_v7 }
 0x478   : > { %8011 = vmatprep.mubr.msk.bf16.mxu1 %vm1486_vm11, %v7406_v44 }
 0x47f   : > { %8012 = vmatmul.mubr.msk.bf16.gmra.mrb[24].mxu1 %vm1486_vm11, %v7407_v25 }
 0x50a   : > { %v11753_v59 = vpop.f32.mrb[0].mxu0 }
 0x50b   : > { %v11755_v1 = vpop.f32.mrb[1].mxu0 }
 0x50c   : > { %v11757_v29 = vpop.f32.mrb[2].mxu0 }
 0x50d   : > { %v11759_v36 = vpop.f32.mrb[3].mxu0 }
 0x512   : > { %v7985_v60 = vpop.f32.mrb[4].mxu0 }
 0x513   : > { %v11762_v6 = vadd.f32 %v7985_v60, %v11409_v15  ;;  %v6012_v20 = vpop.f32.mrb[5].mxu0 }
 0x514   : > { %v11765_v38 = vadd.f32 %v6012_v20, %v11412_v27  ;;  %v7986_v55 = vpop.f32.mrb[6].mxu0 }
 0x515   : > { %v11768_v10 = vadd.f32 %v7986_v55, %v11414_v2  ;;  %v6015_v8 = vpop.f32.mrb[7].mxu0 }
 0x516   : > { %v11771_v57 = vadd.f32 %v6015_v8, %v11419_v32 }
 0x51a   : > { %v7989_v42 = vpop.f32.mrb[8].mxu0 }
 0x51b   : > { %v11774_v53 = vadd.f32 %v7989_v42, %v11440_v14  ;;  %v6028_v0 = vpop.f32.mrb[9].mxu0 }
 0x51c   : > { %v11777_v15 = vadd.f32 %v6028_v0, %v11444_v52  ;;  %v7990_v34 = vpop.f32.mrb[10].mxu0 }
 0x51d   : > { %v11780_v27 = vadd.f32 %v7990_v34, %v12247_v47  ;;  %v6031_v26 = vpop.f32.mrb[11].mxu0 }
 0x51e   : > { %v11783_v2 = vadd.f32 %v6031_v26, %v12248_v35 }
 0x522   : > { %v7993_v17 = vpop.f32.mrb[12].mxu0 }
 0x523   : > { %v11786_v32 = vadd.f32 %v7993_v17, %v12249_v9  ;;  %v6044_v37 = vpop.f32.mrb[13].mxu0 }
 0x524   : > { %v11789_v14 = vadd.f32 %v6044_v37, %v12250_v50  ;;  %v7994_v48 = vpop.f32.mrb[14].mxu0 }
 0x525   : > { %v11792_v52 = vadd.f32 %v7994_v48, %v12251_v61  ;;  %v6047_v56 = vpop.f32.mrb[15].mxu0 }
 0x526   : > { %v11795_v63 = vadd.f32 %v6047_v56, %v12252_v46 }
 0x53a   : > { %v8001_v41 = vpop.f32.mrb[12].mxu1 }
 0x53b   : > { %v11800_v54 = vadd.f32 %v8001_v41, %v11797_v22  ;;  %v6262_v12 = vpop.f32.mrb[13].mxu1 }
 0x53c   : > { %v11803_v40 = vadd.f32 %v11797_v22, %v6262_v12  ;;  %v8002_v31 = vpop.f32.mrb[14].mxu1 }
 0x53d   : > { %v7438_v51 = vmul.f32 -1.442695, %v11800_v54  ;;  %v11807_v58 = vadd.f32 %v8002_v31, %v11797_v22  ;;  %v6265_v45 = vpop.f32.mrb[15].mxu1 }
 0x53e   : > { %v7436_v30 = vmul.f32 -1.442695, %v11803_v40  ;;  %v11811_v28 = vadd.f32 %v11797_v22, %v6265_v45 }
 0x53f   : > { %8635 = vpow2.f32 %v7438_v51  ;;  %v7439_v24 = vmul.f32 -1.442695, %v11807_v58 }
 0x540   : > { %8637 = vpow2.f32 %v7436_v30  ;;  %v7437_v16 = vmul.f32 -1.442695, %v11811_v28 }
 0x541   : > { %8639 = vpow2.f32 %v7439_v24 }
 0x542   : > { %8641 = vpow2.f32 %v7437_v16  ;;  %v8005_v23 = vpop.f32.mrb[16].mxu1 }
 0x543   : > { %v11816_v4 = vadd.f32 %v8005_v23, %v11797_v22  ;;  %v6278_v62 = vpop.f32.mrb[17].mxu1 }
 0x544   : > { %v11819_v5 = vadd.f32 %v11797_v22, %v6278_v62  ;;  %v8006_v19 = vpop.f32.mrb[18].mxu1 }
 0x545   : > { %v7442_v11 = vmul.f32 -1.442695, %v11816_v4  ;;  %v11823_v3 = vadd.f32 %v8006_v19, %v11797_v22  ;;  %v6281_v18 = vpop.f32.mrb[19].mxu1 }
 0x546   : > { %v7440_v43 = vmul.f32 -1.442695, %v11819_v5  ;;  %v11827_v7 = vadd.f32 %v11797_v22, %v6281_v18 }
 0x547   : > { %8643 = vpow2.f32 %v7442_v11  ;;  %v7443_v44 = vmul.f32 -1.442695, %v11823_v3 }
 0x548   : > { %8645 = vpow2.f32 %v7440_v43  ;;  %v7441_v33 = vmul.f32 -1.442695, %v11827_v7 }
 0x549   : > { %v8636_v39 = vpop.eup %8635  ;;  %8647 = vpow2.f32 %v7443_v44 }
 0x54a   : > { %v8638_v13 = vpop.eup %8637  ;;  %v6549_v21 = vadd.f32 1.0, %v8636_v39  ;;  %8649 = vpow2.f32 %v7441_v33  ;;  %v8009_v49 = vpop.f32.mrb[20].mxu1 }
 0x54b   : > { %v8640_v25 = vpop.eup %8639  ;;  %v6547_v60 = vadd.f32 1.0, %v8638_v13  ;;  %v11832_v20 = vadd.f32 %v8009_v49, %v11797_v22  ;;  %v6294_v55 = vpop.f32.mrb[21].mxu1 }
 0x54c   : > { %v8642_v8 = vpop.eup %8641  ;;  %8651 = vrcp.f32 %v6549_v21  ;;  %v6550_v42 = vadd.f32 1.0, %v8640_v25  ;;  %v11835_v0 = vadd.f32 %v11797_v22, %v6294_v55  ;;  %v8010_v34 = vpop.f32.mrb[22].mxu1  ;;  %v9207_v21 = vmov 0.0  }
 0x54d   : > { %8653 = vrcp.f32 %v6547_v60  ;;  %v6548_v47 = vadd.f32 1.0, %v8642_v8  ;;  %v7446_v26 = vmul.f32 -1.442695, %v11832_v20  ;;  %v11839_v35 = vadd.f32 %v8010_v34, %v11797_v22  ;;  %v6297_v17 = vpop.f32.mrb[23].mxu1  ;;  %8015 = vmatprep.subr.bf16.mxu0 %v9207_v21  ;;  %8031 = vmatprep.mubr.msk.bf16.mxu0 %vm9209_vm0, %v9207_v21 }
 0x54e   : > { %8655 = vrcp.f32 %v6550_v42  ;;  %v7444_v9 = vmul.f32 -1.442695, %v11835_v0  ;;  %v11843_v37 = vadd.f32 %v11797_v22, %v6297_v17 }
 0x54f   : > { %8657 = vrcp.f32 %v6548_v47  ;;  %v7447_v50 = vmul.f32 -1.442695, %v11839_v35 }
 0x550   : > { %8659 = vpow2.f32 %v7446_v26  ;;  %v7445_v48 = vmul.f32 -1.442695, %v11843_v37 }
 0x551   : > { %v8644_v61 = vpop.eup %8643  ;;  %8661 = vpow2.f32 %v7444_v9 }
 0x552   : > { %v8646_v56 = vpop.eup %8645  ;;  %v6553_v46 = vadd.f32 1.0, %v8644_v61  ;;  %8663 = vpow2.f32 %v7447_v50  ;;  %v8013_v41 = vpop.f32.mrb[24].mxu1 }
 0x553   : > { %v8648_v12 = vpop.eup %8647  ;;  %v6551_v31 = vadd.f32 1.0, %v8646_v56  ;;  %8665 = vpow2.f32 %v7445_v48  ;;  %v11848_v51 = vadd.f32 %v8013_v41, %v11797_v22  ;;  %v6310_v45 = vpop.f32.mrb[25].mxu1 }
 0x554   : > { %v8650_v30 = vpop.eup %8649  ;;  %8667 = vrcp.f32 %v6553_v46  ;;  %v6554_v24 = vadd.f32 1.0, %v8648_v12  ;;  %v11851_v16 = vadd.f32 %v11797_v22, %v6310_v45  ;;  %v8014_v23 = vpop.f32.mrb[26].mxu1 }
 0x555   : > { %8669 = vrcp.f32 %v6551_v31  ;;  %v6552_v62 = vadd.f32 1.0, %v8650_v30  ;;  %v7450_v19 = vmul.f32 -1.442695, %v11848_v51  ;;  %v11855_v11 = vadd.f32 %v8014_v23, %v11797_v22  ;;  %v6313_v18 = vpop.f32.mrb[27].mxu1 }
 0x556   : > { %v8652_v43 = vpop.eup %8651  ;;  %8671 = vrcp.f32 %v6554_v24  ;;  %v7448_v44 = vmul.f32 -1.442695, %v11851_v16  ;;  %v11859_v33 = vadd.f32 %v11797_v22, %v6313_v18 }
 0x557   : > { %v8654_v39 = vpop.eup %8653  ;;  %8673 = vrcp.f32 %v6552_v62  ;;  %v7451_v13 = vmul.f32 -1.442695, %v11855_v11  ;;  %v6597_v55 = vmul.f32 %v8652_v43, %v11800_v54 }
 0x558   : > { %v8656_v49 = vpop.eup %8655  ;;  %8675 = vpow2.f32 %v7450_v19  ;;  %v7449_v25 = vmul.f32 -1.442695, %v11859_v33  ;;  %v6595_v22 = vmul.f32 %v8654_v39, %v11803_v40 }
 0x559   : > { %v8658_v60 = vpop.eup %8657  ;;  %v6598_v8 = vmul.f32 %v8656_v49, %v11807_v58  ;;  %8677 = vpow2.f32 %v7448_v44 }
 0x55a   : > { %v8660_v42 = vpop.eup %8659  ;;  %v6596_v34 = vmul.f32 %v8658_v60, %v11811_v28  ;;  %8679 = vpow2.f32 %v7451_v13 }
 0x55b   : > { %v8662_v47 = vpop.eup %8661  ;;  %v6557_v26 = vadd.f32 1.0, %v8660_v42  ;;  %8681 = vpow2.f32 %v7449_v25  ;;  %v8513_v17 = vpack.i.bf16 %v6598_v8, %v6597_v55 }
 0x55c   : > { %v8664_v9 = vpop.eup %8663  ;;  %v6555_v50 = vadd.f32 1.0, %v8662_v47  ;;  %v8508_v48 = vpack.i.bf16 %v6596_v34, %v6595_v22 }
 0x55d   : > { %v8666_v61 = vpop.eup %8665  ;;  %8683 = vrcp.f32 %v6557_v26  ;;  %v6558_v56 = vadd.f32 1.0, %v8664_v9 }
 0x55e   : > { %v8668_v54 = vpop.eup %8667  ;;  %8685 = vrcp.f32 %v6555_v50  ;;  %v6556_v58 = vadd.f32 1.0, %v8666_v61  ;;  %8509 = vrot.lane.b32.xlu0 %v8508_v48, %s9208_s21  ;;  %v6701_v50 = vld [vmem:[#allocation18] sm:$0xff]  ;;  %v6702_v48 = vld [vmem:[#allocation18 + $0x8] sm:$0x1f]  ;;  %v9210_v61 = vmov 0  }
 0x55f   : > { %v8670_v40 = vpop.eup %8669  ;;  %8687 = vrcp.f32 %v6558_v56  ;;  %v6601_v41 = vmul.f32 %v8668_v54, %v11816_v4  ;;  %8548 = vset.pattern.permute.xlu0 %v9210_v61  ;;  %8549 = vset.pattern.permute.xlu1 %v9210_v61 }
 0x560   : > { %v8672_v28 = vpop.eup %8671  ;;  %8689 = vrcp.f32 %v6556_v58  ;;  %v6599_v45 = vmul.f32 %v8670_v40, %v11819_v5 }
 0x561   : > { %v8674_v46 = vpop.eup %8673  ;;  %v6602_v12 = vmul.f32 %v8672_v28, %v11823_v3 }
 0x562   : > { %v8676_v31 = vpop.eup %8675  ;;  %v6600_v30 = vmul.f32 %v8674_v46, %v11827_v7  ;;  %8514 = vrot.lane.b32.xlu0 %v8513_v17, %s9208_s21 }
 0x563   : > { %v8678_v24 = vpop.eup %8677  ;;  %v6561_v23 = vadd.f32 1.0, %v8676_v31  ;;  %v8523_v62 = vpack.i.bf16 %v6602_v12, %v6601_v41 }
 0x564   : > { %v8680_v19 = vpop.eup %8679  ;;  %v6559_v18 = vadd.f32 1.0, %v8678_v24  ;;  %v8518_v43 = vpack.i.bf16 %v6600_v30, %v6599_v45 }
 0x565   : > { %v8682_v44 = vpop.eup %8681  ;;  %8691 = vrcp.f32 %v6561_v23  ;;  %v6562_v39 = vadd.f32 1.0, %v8680_v19 }
 0x566   : > { %8693 = vrcp.f32 %v6559_v18  ;;  %v6560_v4 = vadd.f32 1.0, %v8682_v44  ;;  %8519 = vrot.lane.b32.xlu1 %v8518_v43, %s9208_s21 }
 0x567   : > { %v8684_v3 = vpop.eup %8683  ;;  %8695 = vrcp.f32 %v6562_v39 }
 0x568   : > { %v8686_v5 = vpop.eup %8685  ;;  %8697 = vrcp.f32 %v6560_v4  ;;  %v6605_v49 = vmul.f32 %v8684_v3, %v11832_v20 }
 0x569   : > { %v8688_v7 = vpop.eup %8687  ;;  %v6603_v60 = vmul.f32 %v8686_v5, %v11835_v0 }
 0x56a   : > { %v8690_v13 = vpop.eup %8689  ;;  %v6606_v25 = vmul.f32 %v8688_v7, %v11839_v35  ;;  %8524 = vrot.lane.b32.xlu1 %v8523_v62, %s9208_s21 }
 0x56b   : > { %v6604_v55 = vmul.f32 %v8690_v13, %v11843_v37 }
 0x56c   : > { %v8533_v8 = vpack.i.bf16 %v6606_v25, %v6605_v49 }
 0x56d   : > { %v8528_v42 = vpack.i.bf16 %v6604_v55, %v6603_v60 }
 0x56e   : > { %8534 = vrot.lane.b32.xlu1 %v8533_v8, %s9208_s21 }
 0x56f   : > { %v8692_v22 = vpop.eup %8691  ;;  %8529 = vrot.lane.b32.xlu0 %v8528_v42, %s9208_s21 }
 0x570   : > { %v8694_v34 = vpop.eup %8693  ;;  %v6609_v20 = vmul.f32 %v8692_v22, %v11848_v51  ;;  %v7418_v51 = vld [vmem:[#allocation12] ss:$0 sm:$0xff] }
 0x571   : > { %v8696_v47 = vpop.eup %8695  ;;  %v6607_v17 = vmul.f32 %v8694_v34, %v11851_v16  ;;  %v11890_v16 = vadd.f32 %v7418_v51, %v11755_v1  ;;  %v11898_v54 = vadd.f32 %v11753_v59, %v7418_v51  ;;  %v11901_v58 = vadd.f32 %v11757_v29, %v7418_v51 }
 0x572   : > { %v8698_v26 = vpop.eup %8697  ;;  %v6610_v35 = vmul.f32 %v8696_v47, %v11855_v11  ;;  %v11893_v11 = vadd.f32 %v7418_v51, %v11759_v36  ;;  %v11904_v40 = vadd.f32 %v11765_v38, %v7418_v51  ;;  %v11910_v46 = vadd.f32 %v11771_v57, %v7418_v51 }
 0x573   : > { %v6608_v0 = vmul.f32 %v8698_v26, %v11859_v33  ;;  %v7419_v33 = vmul.f32 -1.442695, %v11890_v16  ;;  %v7421_v1 = vmul.f32 -1.442695, %v11898_v54  ;;  %v7422_v36 = vmul.f32 -1.442695, %v11901_v58 }
 0x574   : > { %v8543_v9 = vpack.i.bf16 %v6610_v35, %v6609_v20  ;;  %v7420_v56 = vmul.f32 -1.442695, %v11893_v11  ;;  %v7423_v28 = vmul.f32 -1.442695, %v11904_v40  ;;  %v11913_v59 = vadd.f32 %v11762_v6, %v7418_v51 }
 0x575   : > { %v8538_v37 = vpack.i.bf16 %v6608_v0, %v6607_v17  ;;  %8699 = vpow2.f32 %v7419_v33  ;;  %v11916_v29 = vadd.f32 %v11768_v10, %v7418_v51  ;;  %v7424_v38 = vmul.f32 -1.442695, %v11910_v46 }
 0x576   : > { %8544 = vrot.lane.b32.xlu1 %v8543_v9, %s9208_s21  ;;  %8701 = vpow2.f32 %v7420_v56  ;;  %v7425_v31 = vmul.f32 -1.442695, %v11913_v59  ;;  %v11921_v45 = vadd.f32 %v11774_v53, %v7418_v51  ;;  %v11925_v30 = vadd.f32 %v11777_v15, %v7418_v51 }
 0x577   : > { %8539 = vrot.lane.b32.xlu0 %v8538_v37, %s9208_s21  ;;  %8703 = vpow2.f32 %v7421_v1  ;;  %v7426_v57 = vmul.f32 -1.442695, %v11916_v29  ;;  %v11928_v24 = vadd.f32 %v11780_v27, %v7418_v51  ;;  %v11931_v23 = vadd.f32 %v11783_v2, %v7418_v51 }
 0x578   : > { %8705 = vpow2.f32 %v7422_v36  ;;  %v7429_v62 = vmul.f32 -1.442695, %v11921_v45  ;;  %v7427_v53 = vmul.f32 -1.442695, %v11925_v30  ;;  %v11938_v44 = vadd.f32 %v11786_v32, %v7418_v51 }
 0x579   : > { %8707 = vpow2.f32 %v7423_v28  ;;  %v7430_v15 = vmul.f32 -1.442695, %v11928_v24  ;;  %v7428_v27 = vmul.f32 -1.442695, %v11931_v23  ;;  %v11941_v39 = vadd.f32 %v11789_v14, %v7418_v51 }
 0x57a   : > { %6710 = vperm.xlu1 %8549, %v6702_v48   ;;  %8709 = vpow2.f32 %v7424_v38  ;;  %v11944_v3 = vadd.f32 %v11792_v52, %v7418_v51  ;;  %v11947_v7 = vadd.f32 %v11795_v63, %v7418_v51  ;;  %v7433_v13 = vmul.f32 -1.442695, %v11938_v44 }
 0x57b   : > { %6705 = vperm.xlu0 %8548, %v6701_v50   ;;  %8711 = vpow2.f32 %v7425_v31  ;;  %v7431_v49 = vmul.f32 -1.442695, %v11941_v39 }
 0x57c   : > { %8713 = vpow2.f32 %v7426_v57  ;;  %v7434_v14 = vmul.f32 -1.442695, %v11944_v3  ;;  %v7432_v52 = vmul.f32 -1.442695, %v11947_v7 }
 0x57f   : > { %v8700_v41 = vpop.eup %8699 }
 0x580   : > { %v8702_v12 = vpop.eup %8701  ;;  %v6412_v6 = vadd.f32 1.0, %v8700_v41 }
 0x581   : > { %v6413_v10 = vadd.f32 1.0, %v8702_v12  ;;  %v8704_v19 = vpop.eup %8703 }
 0x582   : > { %v8706_v18 = vpop.eup %8705  ;;  %8715 = vrcp.f32 %v6412_v6  ;;  %v6414_v2 = vadd.f32 1.0, %v8704_v19 }
 0x583   : > { %v8708_v43 = vpop.eup %8707  ;;  %8717 = vrcp.f32 %v6413_v10  ;;  %v6415_v4 = vadd.f32 1.0, %v8706_v18 }
 0x584   : > { %8719 = vpow2.f32 %v7429_v62  ;;  %v6416_v5 = vadd.f32 1.0, %v8708_v43  ;;  %v8710_v32 = vpop.eup %8709 }
 0x585   : > { %8721 = vpow2.f32 %v7427_v53  ;;  %v8712_v25 = vpop.eup %8711  ;;  %v6417_v55 = vadd.f32 1.0, %v8710_v32 }
 0x586   : > { %8723 = vpow2.f32 %v7430_v15  ;;  %v8714_v60 = vpop.eup %8713  ;;  %v6418_v22 = vadd.f32 1.0, %v8712_v25 }
 0x587   : > { %8725 = vpow2.f32 %v7428_v27  ;;  %v6419_v47 = vadd.f32 1.0, %v8714_v60 }
 0x588   : > { %8727 = vrcp.f32 %v6414_v2 }
 0x589   : > { %8729 = vrcp.f32 %v6415_v4 }
 0x58a   : > { %8731 = vrcp.f32 %v6416_v5 }
 0x58b   : > { %8733 = vpow2.f32 %v7433_v13 }
 0x58c   : > { %v8716_v8 = vpop.eup %8715  ;;  %8735 = vpow2.f32 %v7431_v49 }
 0x58d   : > { %v8718_v63 = vpop.eup %8717  ;;  %8737 = vpow2.f32 %v7434_v14  ;;  %v6460_v37 = vmul.f32 %v8716_v8, %v11890_v16 }
 0x58e   : > { %v8720_v42 = vpop.eup %8719  ;;  %8739 = vpow2.f32 %v7432_v52  ;;  %v6461_v51 = vmul.f32 %v8718_v63, %v11893_v11 }
 0x58f   : > { %v8722_v34 = vpop.eup %8721  ;;  %8741 = vrcp.f32 %v6417_v55  ;;  %v6422_v35 = vadd.f32 1.0, %v8720_v42 }
 0x590   : > { %v8724_v26 = vpop.eup %8723  ;;  %8743 = vrcp.f32 %v6418_v22  ;;  %v6420_v0 = vadd.f32 1.0, %v8722_v34 }
 0x591   : > { %v8726_v20 = vpop.eup %8725  ;;  %8745 = vrcp.f32 %v6419_v47  ;;  %v6423_v50 = vadd.f32 1.0, %v8724_v26 }
 0x592   : > { %v8728_v17 = vpop.eup %8727  ;;  %v6421_v33 = vadd.f32 1.0, %v8726_v20  ;;  %8747 = vrcp.f32 %v6422_v35 }
 0x593   : > { %v8730_v9 = vpop.eup %8729  ;;  %8749 = vrcp.f32 %v6420_v0  ;;  %v6462_v16 = vmul.f32 %v8728_v17, %v11898_v54 }
 0x594   : > { %v8732_v61 = vpop.eup %8731  ;;  %8751 = vrcp.f32 %v6423_v50  ;;  %v6463_v11 = vmul.f32 %v8730_v9, %v11901_v58 }
 0x595   : > { %v8734_v36 = vpop.eup %8733  ;;  %8753 = vrcp.f32 %v6421_v33  ;;  %v6464_v54 = vmul.f32 %v8732_v61, %v11904_v40 }
 0x596   : > { %v8736_v28 = vpop.eup %8735  ;;  %v6426_v53 = vadd.f32 1.0, %v8734_v36 }
 0x597   : > { %v8738_v12 = vpop.eup %8737  ;;  %v6424_v15 = vadd.f32 1.0, %v8736_v28 }
 0x598   : > { %v8740_v6 = vpop.eup %8739  ;;  %v6427_v2 = vadd.f32 1.0, %v8738_v12  ;;  %8755 = vrcp.f32 %v6426_v53 }
 0x599   : > { %v8742_v19 = vpop.eup %8741  ;;  %v6425_v32 = vadd.f32 1.0, %v8740_v6  ;;  %8757 = vrcp.f32 %v6424_v15 }
 0x59a   : > { %v8744_v5 = vpop.eup %8743  ;;  %v6465_v13 = vmul.f32 %v8742_v19, %v11910_v46  ;;  %8759 = vrcp.f32 %v6427_v2 }
 0x59b   : > { %v8746_v25 = vpop.eup %8745  ;;  %v6466_v40 = vmul.f32 %v8744_v5, %v11913_v59  ;;  %8761 = vrcp.f32 %v6425_v32 }
 0x59c   : > { %v8748_v55 = vpop.eup %8747  ;;  %v6467_v22 = vmul.f32 %v8746_v25, %v11916_v29 }
 0x59d   : > { %v8750_v42 = vpop.eup %8749  ;;  %v6470_v9 = vmul.f32 %v8748_v55, %v11921_v45 }
 0x59e   : > { %v8752_v47 = vpop.eup %8751  ;;  %v6468_v61 = vmul.f32 %v8750_v42, %v11925_v30 }
 0x59f   : > { %v8754_v20 = vpop.eup %8753  ;;  %v6471_v29 = vmul.f32 %v8752_v47, %v11928_v24 }
 0x5a2   : > { %v8756_v28 = vpop.eup %8755 }
 0x5a3   : > { %v8758_v24 = vpop.eup %8757 }
 0x5a4   : > { %v6472_v19 = vmul.f32 %v8758_v24, %v11941_v39 }
 0x5d0   : > { %v8510_v48 = vpop.permute.xlu0 %8509 }
 0x5d1   : > { %v8512_v56 = vunpack.i.h.bf16 %v8510_v48  ;;  %v8511_v1 = vunpack.i.l.bf16 %v8510_v48 }
 0x5d3   : > { %v6675_v38 = vsel %vm1486_vm11, %v6460_v37, %v8511_v1  ;;  %v6676_v41 = vsel %vm1486_vm11, %v6461_v51, %v8512_v56  ;;  %v6469_v51 = vmul.f32 %v8754_v20, %v11931_v23 }
 0x5d4   : > { %v8515_v31 = vpop.permute.xlu0 %8514  ;;  %v6691_v57 = vpack.c.bf16 %v6676_v41, %v6675_v38 }
 0x5d5   : > { %v8517_v10 = vunpack.i.h.bf16 %v8515_v31  ;;  %v8516_v62 = vunpack.i.l.bf16 %v8515_v31 }
 0x5d6   : > { %v6723_v18 = vsel %vm6718_vm1, %v6691_v57, 0  ;;  %v6474_v57 = vmul.f32 %v8756_v28, %v11938_v44 }
 0x5d7   : > { %v6677_v43 = vsel %vm1486_vm11, %v6462_v16, %v8516_v62  ;;  %v6678_v27 = vsel %vm1486_vm11, %v6463_v11, %v8517_v10  ;;  %8016 = vmatpush3.bf16.xpose.msra.mxu0 %v6723_v18  ;;  %v8760_v16 = vpop.eup %8759 }
 0x5d8   : > { %v8520_v4 = vpop.permute.xlu1 %8519  ;;  %8017 = vmatprep.subr.bf16.mxu0 %v9207_v21  ;;  %v6692_v58 = vpack.c.bf16 %v6678_v27, %v6677_v43  ;;  %v8762_v30 = vpop.eup %8761  ;;  %v6475_v6 = vmul.f32 %v8760_v16, %v11944_v3 }
 0x5d9   : > { %v8522_v49 = vunpack.i.h.bf16 %v8520_v4  ;;  %v8521_v14 = vunpack.i.l.bf16 %v8520_v4  ;;  %v6473_v53 = vmul.f32 %v8762_v30, %v11947_v7 }
 0x5da   : > { %v6726_v26 = vsel %vm6718_vm1, %v6692_v58, 0 }
 0x5db   : > { %v6679_v52 = vsel %vm1486_vm11, %v6464_v54, %v8521_v14  ;;  %v6680_v60 = vsel %vm1486_vm11, %v6465_v13, %v8522_v49  ;;  %v8634_v13 = vld [vmem:[#allocation16] sm:$0x7f]  }
 0x5dc   : > { %v8525_v8 = vpop.permute.xlu1 %8524  ;;  %v6693_v63 = vpack.c.bf16 %v6680_v60, %v6679_v52 }
 0x5dd   : > { %v8527_v46 = vunpack.i.h.bf16 %v8525_v8  ;;  %v8526_v34 = vunpack.i.l.bf16 %v8525_v8 }
 0x5de   : > { %v6729_v31 = vsel %vm6718_vm1, %v6693_v63, 0 }
 0x5df   : > { %v6681_v35 = vsel %vm1486_vm11, %v6466_v40, %v8526_v34  ;;  %v6682_v17 = vsel %vm1486_vm11, %v6467_v22, %v8527_v46  ;;  %8018 = vmatpush3.bf16.xpose.msra.mxu0 %v6726_v26 }
 0x5e0   : > { %v8535_v0 = vpop.permute.xlu1 %8534  ;;  %8019 = vmatprep.subr.bf16.mxu0 %v9207_v21  ;;  %v6694_v59 = vpack.c.bf16 %v6682_v17, %v6681_v35 }
 0x5e1   : > { %v8537_v37 = vunpack.i.h.bf16 %v8535_v0  ;;  %v8536_v50 = vunpack.i.l.bf16 %v8535_v0  ;;  %v8530_v48 = vpop.permute.xlu0 %8529 }
 0x5e2   : > { %v8532_v33 = vunpack.i.h.bf16 %v8530_v48  ;;  %v8531_v56 = vunpack.i.l.bf16 %v8530_v48  ;;  %v6732_v3 = vsel %vm6718_vm1, %v6694_v59, 0 }
 0x5e3   : > { %v6685_v1 = vsel %vm1486_vm11, %v6470_v9, %v8536_v50  ;;  %v6686_v36 = vsel %vm1486_vm11, %v6471_v29, %v8537_v37 }
 0x5e4   : > { %v6683_v38 = vsel %vm1486_vm11, %v6468_v61, %v8531_v56  ;;  %v6684_v45 = vsel %vm1486_vm11, %v6469_v51, %v8532_v33  ;;  %v6696_v41 = vpack.c.bf16 %v6686_v36, %v6685_v1 }
 0x5e5   : > { %v6695_v12 = vpack.c.bf16 %v6684_v45, %v6683_v38 }
 0x5e6   : > { %v6738_v7 = vsel %vm6718_vm1, %v6696_v41, 0 }
 0x5e7   : > { %8020 = vmatpush3.bf16.xpose.msra.mxu0 %v6729_v31  ;;  %v6735_v39 = vsel %vm6718_vm1, %v6695_v12, 0 }
 0x5e8   : > { %v8545_v23 = vpop.permute.xlu1 %8544  ;;  %8021 = vmatprep.subr.bf16.mxu0 %v9207_v21 }
 0x5e9   : > { %v8547_v11 = vunpack.i.h.bf16 %v8545_v23  ;;  %v8546_v10 = vunpack.i.l.bf16 %v8545_v23  ;;  %v8540_v62 = vpop.permute.xlu0 %8539 }
 0x5ea   : > { %v8542_v18 = vunpack.i.h.bf16 %v8540_v62  ;;  %v8541_v15 = vunpack.i.l.bf16 %v8540_v62 }
 0x5eb   : > { %v6689_v43 = vsel %vm1486_vm11, %v6474_v57, %v8546_v10  ;;  %v6690_v27 = vsel %vm1486_vm11, %v6475_v6, %v8547_v11 }
 0x5ec   : > { %v6687_v54 = vsel %vm1486_vm11, %v6472_v19, %v8541_v15  ;;  %v6688_v2 = vsel %vm1486_vm11, %v6473_v53, %v8542_v18  ;;  %v6698_v44 = vpack.c.bf16 %v6690_v27, %v6689_v43 }
 0x5ed   : > { %v6697_v4 = vpack.c.bf16 %v6688_v2, %v6687_v54 }
 0x5ee   : > { %v6744_v5 = vsel %vm6718_vm1, %v6698_v44, 0 }
 0x5ef   : > { %8022 = vmatpush3.bf16.xpose.msra.mxu0 %v6732_v3  ;;  %v6741_v58 = vsel %vm6718_vm1, %v6697_v4, 0 }
 0x5f0   : > { %8023 = vmatprep.subr.bf16.mxu0 %v9207_v21 }
 0x5f7   : > { %8024 = vmatpush3.bf16.xpose.msra.mxu0 %v6735_v39 }
 0x5f8   : > { %8025 = vmatprep.subr.bf16.mxu0 %v9207_v21 }
 0x5f9   : > { %v6711_v14 = vpop.permute.xlu1 %6710 }
 0x5fa   : > { %v6706_v32 = vpop.permute.xlu0 %6705 }
 0x5ff   : > { %8026 = vmatpush3.bf16.xpose.msra.mxu0 %v6738_v7 }
 0x600   : > { %8027 = vmatprep.subr.bf16.mxu0 %v9207_v21 }
 0x607   : > { %8028 = vmatpush3.bf16.xpose.msra.mxu0 %v6741_v58 }
 0x608   : > { %8029 = vmatprep.subr.bf16.mxu0 %v9207_v21 }
 0x60f   : > { %8030 = vmatpush3.bf16.xpose.msra.mxu0 %v6744_v5 }
 0x616   : > { %8032 = vmatmul.mubr.msk.bf16.vlgmr.msra.gmra.mrb[16].mxu0 %vm6718_vm1, %v8634_v13 }
 0x6e9   : > { %v6780_v49 = vpop.f32.mrb[16].mxu0 }
 0x6ea   : > { %v6781_v25 = vadd.f32 %v6780_v49, %v6706_v32  ;;  %v8033_v52 = vpop.f32.mrb[17].mxu0 }
 0x6eb   : > { %v6783_v21 = vpop.f32.mrb[18].mxu0 }
 0x6ec   : > { %6787 = vst [vmem:[%s10123_s10] sm:$0xff] %v6781_v25  ;;  %v6784_v60 = vadd.f32 %v6783_v21, %v6711_v14  ;;  %v8034_v55 = vpop.f32.mrb[19].mxu0 }
 0x6ee   : > { %6788 = vst [vmem:[%s10123_s10 + $0x8] sm:$0x1f] %v6784_v60 }
 0x6ef   : > { %9034 = shalt.err (!%p9031_p8)
}
 0x6f0   : > { %s9035_s10 = scalar_lea.hbm %s12007_s24, 256  ;;  %s9039_s2 = scalar_lea.hbm %s12255_s27, 1024 }
 0x6f1   : > { %p9036_p4 = scmp.ne.s32.totalorder %s12007_s24, %s9035_s10  ;;  %p9040_p1 = scmp.lt.u32.totalorder %s12007_s24, %s12255_s27 }
 0x6f2   : > { %p9041_p7 = scmp.lt.u32.totalorder %s9039_s2, %s9035_s10  ;;  %p9043_p13 = scmp.lt.u32.totalorder %s9035_s10, %s12007_s24 }
 0x6f3   : > { %p9037_p12 = pnand %p9036_p4, %p12256_p11 }
 0x6f4   : > { %p9042_p3 = por %p9041_p7, %p9040_p1 }
 0x6f5   : > { %p9038_p9 = pneg %p9037_p12 }
 0x6f6   : > { %p9044_p5 = por %p9043_p13, %p9042_p3 }
 0x6f8   : > { %p9045_p10 = pnand %p9044_p5, %p9038_p9 }
 0x6fa   : > { %9048 = shalt.err (!%p9045_p10)
}
 0x6fb   : > { %s9212_s13 = smov 128   ;;  %s9213_s25 = smov 256  }
 0x6fc   : > { %s9214_s28 = smov 8  }
 0x6fd   : > { %8325 = dma.vmem_to_hbm [thread:$0]  (%p12256_p11), %s12009_s0, 256, %s12007_s24, %s6790_s23, %s9212_s13, %s9213_s25, %s9214_s28  }
 0x6fe PF: > { %s12257_s30 = sld [smem:[#allocation31_spill]]  ;;  %p8373_p0 = scmp.ge.s32.totalorder %s9187_s22, 2 }
 0x6ff   : > { %p12258_p2 = scmp.ne.s32.totalorder %s12177_s19, 0 }
 0x701   : > { %p8357_p6 = pnand %p8373_p0, %p12258_p2 }
 0x704   : > { %s6819_s3 = sand.u32 1, %s12257_s30  }
 0x705   : > { %s6820_s1 = scalar_lea.sflag [#allocation6], %s6819_s3 }
 0x706   : > { %9130 = dma.done.wait (!%p8357_p6), %s6820_s1, 256  }
 0x707   : > { %9132 = vsyncadd (!%p8357_p6), %s6820_s1, 4294967040  ;;  %s31_s22 = sadd.s32 1, %s9187_s22   ;;  %s12260_s30 = sld [smem:[#allocation28_spill]] }
 0x708   : > { %p12042_p8 = scmp.ge.s32.totalorder %s31_s22, 6   ;;  %s12261_s10 = sld [smem:[#allocation29_spill]] }
 0x709   : > { %s12262_s12 = sld [smem:[#allocation30_spill]]  ;;  %s12263_s15 = sld [smem:[#allocation32_spill]] }
 0x70a   : > { %s12264_s19 = sld [smem:[#allocation35_spill]]  ;;  %s12265_s26 = sld [smem:[#allocation37_spill]] }
 0x70b   : > { %s12266_s21 = sld [smem:[#allocation38_spill]]  ;;  %s12267_s11 = smov %s12289_s29 }
 0x70c   : > { %s12268_s13 = smov %s9155_s14  ;;  %s12269_s14 = smov %s9484_s5 }
 0x70d   : > { %s12270_s16 = smov %s9167_s17  ;;  %s12271_s17 = smov %s9601_s9 }
 0x70e   : > { %s12272_s18 = smov %s9179_s20  ;;  %30 = sbr.rel (!%p12042_p8) target bundleno = 26 (0x1a), region = 189 }
 0x710   : > { %s12273_s20 = smov %s12265_s26 }
 0x715   :  { %6825 = vsyncpa [#allocation5], 1 }
 0x716   :  { %6827 = vsyncpa [#allocation5 + $0x1], 1 }
 0x717   :  { %6828 = vsyncpa [#allocation8], 1 }
 0x718   :  { %6830 = vsyncpa [#allocation8 + $0x1], 1 }
 0x719   :  { %6831 = vsyncpa [#allocation11], 1 }
 0x71a   :  { %6832 = vsyncpa [#allocation14], 1 }
 0x71b   :  { %6833 = vsyncpa [#allocation17], 1 }
 0x71c   :  { %6834 = vsyncpa [#allocation6], 1 }
 0x71d   :  { %6836 = vsyncpa [#allocation6 + $0x1], 1 }

</bundles_post_ra>
